<compile_context>
chip_gen: v7x
topology: tpu7x:2x2x1
jax: 0.10.0
libtpu: 0.0.40
codegen_flags: <defaults>
</compile_context>

<pallas_src>
import numpy as np

import jax
import jax.numpy as jnp
from jax.experimental import pallas as pl
from jax.experimental.pallas import tpu as pltpu

# ----------------------------------------------------------------------------
# architecture / geometry constants
# ----------------------------------------------------------------------------
IMG = 28                      # input spatial size
C_IN = 3
C1, C2, C3, C4 = 32, 32, 64, 64
NUM_CLASSES = 10
FC_PAD = 128                  # lane-dense logits
BN_EPS = 1e-5

CIN_PAD = 4                   # input channels zero-padded 3 -> 4
PIECE_LANES = 32              # lanes per ki-piece: [kj(5) x c(4)] = 20 used, pad to 32
K1 = 5 * PIECE_LANES          # 160 : conv1 im2col contraction size

# conv1 flat geometry: input padded to 33 rows x 32 cols (top/left 2, right 2,
# bottom 3 -- the extra bottom row absorbs shifted reads of junk output columns).
G1_W = IMG + 4                # 32 : padded grid width (= conv1 output row stride)
G1_ROWS = IMG + 5             # 33
X_FLAT = G1_ROWS * G1_W       # 1056
N1 = IMG * G1_W               # 896 : conv1 outputs laid out on the 28x32 grid

H2 = IMG // 2                 # 14 : after maxpool (k=3, s=2, p=1)
N2 = H2 * H2                  # 196
H3 = H2 // 2                  # 7  : after conv3 (s=2)
N3 = H3 * H3                  # 49


# ----------------------------------------------------------------------------
# constant one-hot selection matrices:
#   sel[k, oi*out_w+oj, ii*row_stride+jj] = 1  with  ii = oi*stride + ki - pad,
#   jj = oj*stride + kj - pad, k = ki*ksize + kj;  out-of-bounds rows stay all-zero
#   (== zero padding of the conv input).
# ----------------------------------------------------------------------------
def _make_selectors(valid_h, valid_w, row_stride, in_flat, out_h, out_w,
                    ksize, stride, pad):
    sel = np.zeros((ksize * ksize, out_h * out_w, in_flat), np.float32)
    for ki in range(ksize):
        for kj in range(ksize):
            k = ki * ksize + kj
            for oi in range(out_h):
                ii = oi * stride + ki - pad
                if not 0 <= ii < valid_h:
                    continue
                for oj in range(out_w):
                    jj = oj * stride + kj - pad
                    if 0 <= jj < valid_w:
                        sel[k, oi * out_w + oj, ii * row_stride + jj] = 1.0
    return sel


# ----------------------------------------------------------------------------
# the fused Pallas kernel: one grid step == one image, entire network
# ----------------------------------------------------------------------------
def convnet_kernel(x_ref, w1_ref, b1_ref, mask_ref, selsub_ref,
                   sel2_ref, w2_ref, b2_ref,
                   sel3_ref, w3_ref, b3_ref,
                   sel4_ref, w4_ref, b4_ref,
                   fcw_ref, fcb_ref,
                   feat_ref, ylow_ref):
    f32, bf16 = jnp.float32, jnp.bfloat16

    # ---- conv1 (5x5, s=1, p=2) + ReLU as ONE im2col matmul.
    # (kj, c) already live on the lane dim (wrapper); fold ki with 5 aligned
    # sublane-shifted slices of the padded flat input -> (896, 160) @ (160, 32).
    xcat = jnp.concatenate(
        [x_ref[0, ki * G1_W: ki * G1_W + N1, :] for ki in range(5)], axis=-1)
    y1 = jnp.dot(xcat, w1_ref[...], preferred_element_type=f32) + b1_ref[...]
    y1 = jnp.maximum(y1, 0.0)                                    # (896, 32) f32

    # ---- maxpool 3x3, s=2, p=1 -> dense 14x14, separable on the 28x32 grid.
    # Zero the junk columns (28..31), then column max via +-1 flat shifts and
    # row max via +-32 flat shifts (zero padding is correct post-ReLU), then one
    # stride-2 subsample selector matmul.
    y1m = y1 * mask_ref[...]                                     # (896, 32)
    zr = jnp.zeros((1, C1), f32)
    cm = jnp.maximum(
        jnp.maximum(jnp.concatenate([zr, y1m[:-1, :]], axis=0), y1m),
        jnp.concatenate([y1m[1:, :], zr], axis=0))
    zb = jnp.zeros((G1_W, C1), f32)
    rm = jnp.maximum(
        jnp.maximum(jnp.concatenate([zb, cm[:-G1_W, :]], axis=0), cm),
        jnp.concatenate([cm[G1_W:, :], zb], axis=0))
    p1 = jnp.dot(selsub_ref[...], rm.astype(bf16),
                 preferred_element_type=f32).astype(bf16)        # (196, 32)

    # ---- conv2 3x3, s=1, p=1 + ReLU  == feat_out   (im2col: 9 gathers + 1 matmul)
    g2 = [jnp.dot(sel2_ref[k], p1, preferred_element_type=f32).astype(bf16)
          for k in range(9)]
    x2 = jnp.concatenate(g2, axis=-1)                            # (196, 288)
    feat = jnp.maximum(
        jnp.dot(x2, w2_ref[...], preferred_element_type=f32) + b2_ref[...], 0.0)
    feat_ref[0] = feat                                           # (196, 32) f32
    featb = feat.astype(bf16)

    # ---- conv3 3x3, s=2, p=1 + ReLU
    g3 = [jnp.dot(sel3_ref[k], featb, preferred_element_type=f32).astype(bf16)
          for k in range(9)]
    x3 = jnp.concatenate(g3, axis=-1)                            # (49, 288)
    y3 = jnp.maximum(
        jnp.dot(x3, w3_ref[...], preferred_element_type=f32) + b3_ref[...], 0.0
    ).astype(bf16)                                               # (49, 64)

    # ---- conv4 3x3, s=1, p=1 + ReLU
    g4 = [jnp.dot(sel4_ref[k], y3, preferred_element_type=f32).astype(bf16)
          for k in range(9)]
    x4 = jnp.concatenate(g4, axis=-1)                            # (49, 576)
    y4 = jnp.maximum(
        jnp.dot(x4, w4_ref[...], preferred_element_type=f32) + b4_ref[...], 0.0)

    # ---- global 7x7 average pool + fc (logits kept lane-dense, 128 wide)
    pooled = jnp.mean(y4, axis=0, keepdims=True).astype(bf16)    # (1, 64)
    ylow_ref[0] = (jnp.dot(pooled, fcw_ref[...], preferred_element_type=f32)
                   + fcb_ref[...])                               # (1, 128)


# ----------------------------------------------------------------------------
# parameter preparation (BN fold to affine, weight re-layout, bf16 casts,
# constant selection matrices).  Runs once, outside jit.
# ----------------------------------------------------------------------------
def prepare_operands(params):
    bf16, f32 = jnp.bfloat16, jnp.float32

    # conv1 weights -> im2col layout (160, 32): row = ki*32 + kj*4 + c
    w1 = jnp.transpose(params["w1"], (2, 3, 1, 0))                    # (5,5,3,32)
    w1 = jnp.pad(w1, ((0, 0), (0, 0), (0, CIN_PAD - C_IN), (0, 0)))   # (5,5,4,32)
    w1 = w1.reshape(5, 5 * CIN_PAD, C1)                               # (5,20,32)
    w1 = jnp.pad(w1, ((0, 0), (0, PIECE_LANES - 5 * CIN_PAD), (0, 0)))
    w1 = w1.reshape(K1, C1)                                           # (160,32)

    def conv_w_stacked(w):   # (O, C, 3, 3) -> (9*C, O), row = k*C + c, k = ki*3+kj
        o, c, kh, kw = w.shape
        return jnp.transpose(w, (2, 3, 1, 0)).reshape(kh * kw * c, o)

    fc_w = jnp.zeros((C4, FC_PAD), f32).at[:, :NUM_CLASSES].set(params["fc_w"].T)
    fc_b = jnp.zeros((1, FC_PAD), f32).at[0, :NUM_CLASSES].set(params["fc_b"])

    # eval-mode BatchNorm -> per-channel affine (applied to the input in the
    # wrapper; folding the shift into the conv bias would be wrong at the
    # zero-padded borders).
    scale = params["bn_gamma"] / jnp.sqrt(params["bn_var"] + BN_EPS)
    shift = params["bn_beta"] - params["bn_mean"] * scale

    # junk-column mask for the 28x32 conv1 output grid (cols 28..31 are junk)
    colmask = (np.arange(N1) % G1_W < IMG).astype(np.float32).reshape(N1, 1)

    return {
        "bn_scale": scale.astype(f32), "bn_shift": shift.astype(f32),
        "w1": w1.astype(bf16), "b1": params["b1"].reshape(1, C1).astype(f32),
        "w2": conv_w_stacked(params["w2"]).astype(bf16),
        "b2": params["b2"].reshape(1, C2).astype(f32),
        "w3": conv_w_stacked(params["w3"]).astype(bf16),
        "b3": params["b3"].reshape(1, C3).astype(f32),
        "w4": conv_w_stacked(params["w4"]).astype(bf16),
        "b4": params["b4"].reshape(1, C4).astype(f32),
        "fc_w": fc_w.astype(bf16), "fc_b": fc_b,
        "colmask": jnp.asarray(colmask),
        # one-hot selection matrices (exact in bf16: single 1 per row)
        "sel_sub": jnp.asarray(
            _make_selectors(IMG, IMG, G1_W, N1, H2, H2, 1, 2, 0)[0]).astype(bf16),
        "sel2": jnp.asarray(
            _make_selectors(H2, H2, H2, N2, H2, H2, 3, 1, 1)).astype(bf16),
        "sel3": jnp.asarray(
            _make_selectors(H2, H2, H2, N2, H3, H3, 3, 2, 1)).astype(bf16),
        "sel4": jnp.asarray(
            _make_selectors(H3, H3, H3, N3, H3, H3, 3, 1, 1)).astype(bf16),
    }


# ----------------------------------------------------------------------------
# forward wrapper: input layout prep + ONE pallas_call + output re-layout
# ----------------------------------------------------------------------------
def convnet_forward(ops, x):
    B = x.shape[0]

    # bn0 (eval mode) as a per-channel affine, NCHW -> NHWC, spatial zero padding
    # for conv1, then fold (kj, channel) into the lane dim:
    #   xk[b, t, kj*4 + c] = padded_flat[b, t + kj, c]   (lanes 20..31 are zero)
    xb = x * ops["bn_scale"][None, :, None, None] + ops["bn_shift"][None, :, None, None]
    xh = jnp.transpose(xb, (0, 2, 3, 1))                               # (B,28,28,3)
    xh = jnp.pad(xh, ((0, 0), (2, 3), (2, 2), (0, CIN_PAD - C_IN)))    # (B,33,32,4)
    xf = xh.reshape(B, X_FLAT, CIN_PAD)
    xf = jnp.pad(xf, ((0, 0), (0, 4), (0, 0)))                         # (B,1060,4)
    xk = jnp.concatenate([xf[:, kj:kj + X_FLAT, :] for kj in range(5)], axis=-1)
    xk = jnp.pad(xk, ((0, 0), (0, 0), (0, PIECE_LANES - 5 * CIN_PAD)))  # (B,1056,32)
    xk = xk.astype(jnp.bfloat16)    # pre-cast: half the input DMA, no in-kernel casts

    operands = (xk, ops["w1"], ops["b1"], ops["colmask"], ops["sel_sub"],
                ops["sel2"], ops["w2"], ops["b2"],
                ops["sel3"], ops["w3"], ops["b3"],
                ops["sel4"], ops["w4"], ops["b4"],
                ops["fc_w"], ops["fc_b"])

    def batched(shape):     # blocked along the leading batch dim only
        n = len(shape)
        return pl.BlockSpec((1,) + tuple(shape[1:]), lambda b: (b,) + (0,) * (n - 1))

    def const(shape):       # full-array resident block (weights / constants)
        n = len(shape)
        return pl.BlockSpec(tuple(shape), lambda b: (0,) * n)

    feat_flat, ylow = pl.pallas_call(
        convnet_kernel,
        out_shape=(jax.ShapeDtypeStruct((B, N2, C2), jnp.float32),
                   jax.ShapeDtypeStruct((B, 1, FC_PAD), jnp.float32)),
        grid=(B,),
        in_specs=[batched(xk.shape)] + [const(a.shape) for a in operands[1:]],
        out_specs=(batched((B, N2, C2)), batched((B, 1, FC_PAD))),
        compiler_params=pltpu.CompilerParams(
            dimension_semantics=("parallel",)),      # v7x: one image per TensorCore
    )(*operands)

    feat_out = feat_flat.reshape(B, H2, H2, C2).transpose(0, 3, 1, 2)   # NCHW
    y_low = ylow[:, 0, :NUM_CLASSES]
    return feat_out, y_low


# ----------------------------------------------------------------------------
# pure-JAX (XLA) reference of the same module, for a numerical self-check
# ----------------------------------------------------------------------------
def reference_forward(params, x):
    s = params["bn_gamma"] / jnp.sqrt(params["bn_var"] + BN_EPS)
    t = params["bn_beta"] - params["bn_mean"] * s
    y = x * s[None, :, None, None] + t[None, :, None, None]

    def conv(z, w, b, stride, pad):
        out = jax.lax.conv_general_dilated(
            z, w, window_strides=(stride, stride),
            padding=((pad, pad), (pad, pad)),
            dimension_numbers=("NCHW", "OIHW", "NCHW"),
            precision=jax.lax.Precision.HIGHEST)
        return out + b[None, :, None, None]

    y = jax.nn.relu(conv(y, params["w1"], params["b1"], 1, 2))
    y = jax.lax.reduce_window(y, -jnp.inf, jax.lax.max,
                              (1, 1, 3, 3), (1, 1, 2, 2),
                              ((0, 0), (0, 0), (1, 1), (1, 1)))
    feat = jax.nn.relu(conv(y, params["w2"], params["b2"], 1, 1))
    y = jax.nn.relu(conv(feat, params["w3"], params["b3"], 2, 1))
    y = jax.nn.relu(conv(y, params["w4"], params["b4"], 1, 1))
    y = jax.lax.reduce_window(y, 0.0, jax.lax.add,
                              (1, 1, 7, 7), (1, 1, 1, 1), "VALID") / 49.0
    y = y.reshape(y.shape[0], -1)
    y_low = y @ params["fc_w"].T + params["fc_b"]
    return feat, y_low


# ----------------------------------------------------------------------------
# deterministic PyTorch-like parameter init
# ----------------------------------------------------------------------------
def init_params(key, num_classes=NUM_CLASSES):
    ks = jax.random.split(key, 14)

    def nrm(k, shape, scale=0.05):
        return (scale * jax.random.normal(k, shape)).astype(jnp.float32)

    return {
        "bn_gamma": 1.0 + nrm(ks[0], (C_IN,), 0.1),
        "bn_beta": nrm(ks[1], (C_IN,), 0.1),
        "bn_mean": nrm(ks[2], (C_IN,), 0.1),
        "bn_var": jax.random.uniform(ks[3], (C_IN,), minval=0.5, maxval=1.5).astype(jnp.float32),
        "w1": nrm(ks[4], (C1, C_IN, 5, 5)), "b1": nrm(ks[5], (C1,)),
        "w2": nrm(ks[6], (C2, C1, 3, 3)),   "b2": nrm(ks[7], (C2,)),
        "w3": nrm(ks[8], (C3, C2, 3, 3)),   "b3": nrm(ks[9], (C3,)),
        "w4": nrm(ks[10], (C4, C3, 3, 3)),  "b4": nrm(ks[11], (C4,)),
        "fc_w": nrm(ks[12], (NUM_CLASSES, C4)), "fc_b": nrm(ks[13], (NUM_CLASSES,)),
    }


# ----------------------------------------------------------------------------
if __name__ == "__main__":
    key = jax.random.PRNGKey(0)
    kp, kx = jax.random.split(key)
    params = init_params(kp)
    x = jax.random.normal(kx, (2, C_IN, IMG, IMG), dtype=jnp.float32)

    ops = prepare_operands(params)
    fwd = jax.jit(convnet_forward)
    feat_out, y_low = fwd(ops, x)
    feat_out, y_low = jax.block_until_ready((feat_out, y_low))

    assert feat_out.shape == (2, C2, H2, H2), feat_out.shape
    assert y_low.shape == (2, NUM_CLASSES), y_low.shape
    assert bool(jnp.all(jnp.isfinite(feat_out)))
    assert bool(jnp.all(jnp.isfinite(y_low)))

    # numerical self-check against a pure-JAX f32 reference (kernel uses bf16
    # matmul operands with f32 accumulation).
    feat_ref, ylow_ref = reference_forward(params, x)

    def close(a, b):
        return float(jnp.max(jnp.abs(a - b))) <= 0.05 * float(jnp.max(jnp.abs(b))) + 2e-3

    assert close(feat_out, feat_ref)
    assert close(y_low, ylow_ref)

    print("KERNEL_OK")
</pallas_src>

<mosaic_0001>
module attributes {stable_mosaic.version = 11 : i64} {
  func.func @convnet_kernel(%arg0: i32, %arg1: memref<1x1056x32xbf16, #tpu.memory_space<vmem>>, %arg2: memref<160x32xbf16, #tpu.memory_space<vmem>>, %arg3: memref<1x32xf32, #tpu.memory_space<vmem>>, %arg4: memref<896x1xf32, #tpu.memory_space<vmem>>, %arg5: memref<196x896xbf16, #tpu.memory_space<vmem>>, %arg6: memref<9x196x196xbf16, #tpu.memory_space<vmem>>, %arg7: memref<288x32xbf16, #tpu.memory_space<vmem>>, %arg8: memref<1x32xf32, #tpu.memory_space<vmem>>, %arg9: memref<9x49x196xbf16, #tpu.memory_space<vmem>>, %arg10: memref<288x64xbf16, #tpu.memory_space<vmem>>, %arg11: memref<1x64xf32, #tpu.memory_space<vmem>>, %arg12: memref<9x49x49xbf16, #tpu.memory_space<vmem>>, %arg13: memref<576x64xbf16, #tpu.memory_space<vmem>>, %arg14: memref<1x64xf32, #tpu.memory_space<vmem>>, %arg15: memref<64x128xbf16, #tpu.memory_space<vmem>>, %arg16: memref<1x128xf32, #tpu.memory_space<vmem>>, %arg17: memref<1x196x32xf32, #tpu.memory_space<vmem>>, %arg18: memref<1x1x128xf32, #tpu.memory_space<vmem>>) attributes {dimension_semantics = [#tpu.dimension_semantics<parallel>], iteration_bounds = array<i64: 2>, scalar_prefetch = 0 : i64, scratch_operands = 0 : i64, tpu.core_type = #tpu.core_type<tc>, window_params = [{transform_indices = @transform_0, window_bounds = array<i64: 1, 1056, 32>}, {pipeline_mode = #tpu.pipeline_mode<synchronous>, transform_indices = @transform_1, window_bounds = array<i64: 160, 32>}, {pipeline_mode = #tpu.pipeline_mode<synchronous>, transform_indices = @transform_2, window_bounds = array<i64: 1, 32>}, {pipeline_mode = #tpu.pipeline_mode<synchronous>, transform_indices = @transform_3, window_bounds = array<i64: 896, 1>}, {pipeline_mode = #tpu.pipeline_mode<synchronous>, transform_indices = @transform_4, window_bounds = array<i64: 196, 896>}, {pipeline_mode = #tpu.pipeline_mode<synchronous>, transform_indices = @transform_5, window_bounds = array<i64: 9, 196, 196>}, {pipeline_mode = #tpu.pipeline_mode<synchronous>, transform_indices = @transform_6, window_bounds = array<i64: 288, 32>}, {pipeline_mode = #tpu.pipeline_mode<synchronous>, transform_indices = @transform_7, window_bounds = array<i64: 1, 32>}, {pipeline_mode = #tpu.pipeline_mode<synchronous>, transform_indices = @transform_8, window_bounds = array<i64: 9, 49, 196>}, {pipeline_mode = #tpu.pipeline_mode<synchronous>, transform_indices = @transform_9, window_bounds = array<i64: 288, 64>}, {pipeline_mode = #tpu.pipeline_mode<synchronous>, transform_indices = @transform_10, window_bounds = array<i64: 1, 64>}, {pipeline_mode = #tpu.pipeline_mode<synchronous>, transform_indices = @transform_11, window_bounds = array<i64: 9, 49, 49>}, {pipeline_mode = #tpu.pipeline_mode<synchronous>, transform_indices = @transform_12, window_bounds = array<i64: 576, 64>}, {pipeline_mode = #tpu.pipeline_mode<synchronous>, transform_indices = @transform_13, window_bounds = array<i64: 1, 64>}, {pipeline_mode = #tpu.pipeline_mode<synchronous>, transform_indices = @transform_14, window_bounds = array<i64: 64, 128>}, {pipeline_mode = #tpu.pipeline_mode<synchronous>, transform_indices = @transform_15, window_bounds = array<i64: 1, 128>}, {transform_indices = @transform_16, window_bounds = array<i64: 1, 196, 32>}, {transform_indices = @transform_17, window_bounds = array<i64: 1, 1, 128>}]} {
    %c0 = arith.constant 0 : index
    %c0_0 = arith.constant 0 : index
    %c0_1 = arith.constant 0 : index
    %0 = vector.load %arg1[%c0, %c0_0, %c0_1] : memref<1x1056x32xbf16, #tpu.memory_space<vmem>>, vector<1x896x32xbf16>
    %1 = vector.shape_cast %0 : vector<1x896x32xbf16> to vector<896x32xbf16>
    %c0_2 = arith.constant 0 : index
    %c32 = arith.constant 32 : index
    %c0_3 = arith.constant 0 : index
    %2 = vector.load %arg1[%c0_2, %c32, %c0_3] : memref<1x1056x32xbf16, #tpu.memory_space<vmem>>, vector<1x896x32xbf16>
    %3 = vector.shape_cast %2 : vector<1x896x32xbf16> to vector<896x32xbf16>
    %c0_4 = arith.constant 0 : index
    %c64 = arith.constant 64 : index
    %c0_5 = arith.constant 0 : index
    %4 = vector.load %arg1[%c0_4, %c64, %c0_5] : memref<1x1056x32xbf16, #tpu.memory_space<vmem>>, vector<1x896x32xbf16>
    %5 = vector.shape_cast %4 : vector<1x896x32xbf16> to vector<896x32xbf16>
    %c0_6 = arith.constant 0 : index
    %c96 = arith.constant 96 : index
    %c0_7 = arith.constant 0 : index
    %6 = vector.load %arg1[%c0_6, %c96, %c0_7] : memref<1x1056x32xbf16, #tpu.memory_space<vmem>>, vector<1x896x32xbf16>
    %7 = vector.shape_cast %6 : vector<1x896x32xbf16> to vector<896x32xbf16>
    %c0_8 = arith.constant 0 : index
    %c128 = arith.constant 128 : index
    %c0_9 = arith.constant 0 : index
    %8 = vector.load %arg1[%c0_8, %c128, %c0_9] : memref<1x1056x32xbf16, #tpu.memory_space<vmem>>, vector<1x896x32xbf16>
    %9 = vector.shape_cast %8 : vector<1x896x32xbf16> to vector<896x32xbf16>
    %10 = tpu.concatenate %1, %3, %5, %7, %9 in 1 : vector<896x32xbf16>, vector<896x32xbf16>, vector<896x32xbf16>, vector<896x32xbf16>, vector<896x32xbf16> -> vector<896x160xbf16>
    %c0_10 = arith.constant 0 : index
    %c0_11 = arith.constant 0 : index
    %11 = vector.load %arg2[%c0_10, %c0_11] : memref<160x32xbf16, #tpu.memory_space<vmem>>, vector<160x32xbf16>
    %cst = arith.constant dense<0.000000e+00> : vector<896x32xf32>
    %12 = tpu.matmul %10, %11, %cst {dimension_numbers = #tpu.dot_dimension_numbers<[1], [0], [0], [1], [0, 0, 1, 1], [], []>} : vector<896x160xbf16>, vector<160x32xbf16>, vector<896x32xf32> -> vector<896x32xf32>
    %c0_12 = arith.constant 0 : index
    %c0_13 = arith.constant 0 : index
    %13 = vector.load %arg3[%c0_12, %c0_13] : memref<1x32xf32, #tpu.memory_space<vmem>>, vector<1x32xf32>
    %14 = vector.broadcast %13 : vector<1x32xf32> to vector<896x32xf32>
    %15 = arith.addf %12, %14 : vector<896x32xf32>
    %cst_14 = arith.constant 0.000000e+00 : f32
    %16 = vector.broadcast %cst_14 : f32 to vector<896x32xf32>
    %17 = arith.maximumf %15, %16 : vector<896x32xf32>
    %c0_15 = arith.constant 0 : index
    %c0_16 = arith.constant 0 : index
    %18 = vector.load %arg4[%c0_15, %c0_16] : memref<896x1xf32, #tpu.memory_space<vmem>>, vector<896x1xf32>
    %19 = vector.broadcast %18 : vector<896x1xf32> to vector<896x32xf32>
    %20 = arith.mulf %17, %19 : vector<896x32xf32>
    %cst_17 = arith.constant 0.000000e+00 : f32
    %21 = vector.broadcast %cst_17 : f32 to vector<1x32xf32>
    %22 = vector.extract_strided_slice %20 {offsets = [0, 0], sizes = [895, 32], strides = [1, 1]} : vector<896x32xf32> to vector<895x32xf32>
    %23 = tpu.concatenate %21, %22 in 0 : vector<1x32xf32>, vector<895x32xf32> -> vector<896x32xf32>
    %24 = arith.maximumf %23, %20 : vector<896x32xf32>
    %25 = vector.extract_strided_slice %20 {offsets = [1, 0], sizes = [895, 32], strides = [1, 1]} : vector<896x32xf32> to vector<895x32xf32>
    %26 = tpu.concatenate %25, %21 in 0 : vector<895x32xf32>, vector<1x32xf32> -> vector<896x32xf32>
    %27 = arith.maximumf %24, %26 : vector<896x32xf32>
    %cst_18 = arith.constant 0.000000e+00 : f32
    %28 = vector.broadcast %cst_18 : f32 to vector<32x32xf32>
    %29 = vector.extract_strided_slice %27 {offsets = [0, 0], sizes = [864, 32], strides = [1, 1]} : vector<896x32xf32> to vector<864x32xf32>
    %30 = tpu.concatenate %28, %29 in 0 : vector<32x32xf32>, vector<864x32xf32> -> vector<896x32xf32>
    %31 = arith.maximumf %30, %27 : vector<896x32xf32>
    %32 = vector.extract_strided_slice %27 {offsets = [32, 0], sizes = [864, 32], strides = [1, 1]} : vector<896x32xf32> to vector<864x32xf32>
    %33 = tpu.concatenate %32, %28 in 0 : vector<864x32xf32>, vector<32x32xf32> -> vector<896x32xf32>
    %34 = arith.maximumf %31, %33 : vector<896x32xf32>
    %c0_19 = arith.constant 0 : index
    %c0_20 = arith.constant 0 : index
    %35 = vector.load %arg5[%c0_19, %c0_20] : memref<196x896xbf16, #tpu.memory_space<vmem>>, vector<196x896xbf16>
    %36 = arith.truncf %34 : vector<896x32xf32> to vector<896x32xbf16>
    %cst_21 = arith.constant dense<0.000000e+00> : vector<196x32xf32>
    %37 = tpu.matmul %35, %36, %cst_21 {dimension_numbers = #tpu.dot_dimension_numbers<[1], [0], [0], [1], [0, 0, 1, 1], [], []>} : vector<196x896xbf16>, vector<896x32xbf16>, vector<196x32xf32> -> vector<196x32xf32>
    %38 = arith.truncf %37 : vector<196x32xf32> to vector<196x32xbf16>
    %c0_22 = arith.constant 0 : index
    %c0_23 = arith.constant 0 : index
    %c0_24 = arith.constant 0 : index
    %39 = vector.load %arg6[%c0_22, %c0_23, %c0_24] : memref<9x196x196xbf16, #tpu.memory_space<vmem>>, vector<1x196x196xbf16>
    %40 = vector.shape_cast %39 : vector<1x196x196xbf16> to vector<196x196xbf16>
    %cst_25 = arith.constant dense<0.000000e+00> : vector<196x32xf32>
    %41 = tpu.matmul %40, %38, %cst_25 {dimension_numbers = #tpu.dot_dimension_numbers<[1], [0], [0], [1], [0, 0, 1, 1], [], []>} : vector<196x196xbf16>, vector<196x32xbf16>, vector<196x32xf32> -> vector<196x32xf32>
    %42 = arith.truncf %41 : vector<196x32xf32> to vector<196x32xbf16>
    %c1 = arith.constant 1 : index
    %c0_26 = arith.constant 0 : index
    %c0_27 = arith.constant 0 : index
    %43 = vector.load %arg6[%c1, %c0_26, %c0_27] : memref<9x196x196xbf16, #tpu.memory_space<vmem>>, vector<1x196x196xbf16>
    %44 = vector.shape_cast %43 : vector<1x196x196xbf16> to vector<196x196xbf16>
    %cst_28 = arith.constant dense<0.000000e+00> : vector<196x32xf32>
    %45 = tpu.matmul %44, %38, %cst_28 {dimension_numbers = #tpu.dot_dimension_numbers<[1], [0], [0], [1], [0, 0, 1, 1], [], []>} : vector<196x196xbf16>, vector<196x32xbf16>, vector<196x32xf32> -> vector<196x32xf32>
    %46 = arith.truncf %45 : vector<196x32xf32> to vector<196x32xbf16>
    %c2 = arith.constant 2 : index
    %c0_29 = arith.constant 0 : index
    %c0_30 = arith.constant 0 : index
    %47 = vector.load %arg6[%c2, %c0_29, %c0_30] : memref<9x196x196xbf16, #tpu.memory_space<vmem>>, vector<1x196x196xbf16>
    %48 = vector.shape_cast %47 : vector<1x196x196xbf16> to vector<196x196xbf16>
    %cst_31 = arith.constant dense<0.000000e+00> : vector<196x32xf32>
    %49 = tpu.matmul %48, %38, %cst_31 {dimension_numbers = #tpu.dot_dimension_numbers<[1], [0], [0], [1], [0, 0, 1, 1], [], []>} : vector<196x196xbf16>, vector<196x32xbf16>, vector<196x32xf32> -> vector<196x32xf32>
    %50 = arith.truncf %49 : vector<196x32xf32> to vector<196x32xbf16>
    %c3 = arith.constant 3 : index
    %c0_32 = arith.constant 0 : index
    %c0_33 = arith.constant 0 : index
    %51 = vector.load %arg6[%c3, %c0_32, %c0_33] : memref<9x196x196xbf16, #tpu.memory_space<vmem>>, vector<1x196x196xbf16>
    %52 = vector.shape_cast %51 : vector<1x196x196xbf16> to vector<196x196xbf16>
    %cst_34 = arith.constant dense<0.000000e+00> : vector<196x32xf32>
    %53 = tpu.matmul %52, %38, %cst_34 {dimension_numbers = #tpu.dot_dimension_numbers<[1], [0], [0], [1], [0, 0, 1, 1], [], []>} : vector<196x196xbf16>, vector<196x32xbf16>, vector<196x32xf32> -> vector<196x32xf32>
    %54 = arith.truncf %53 : vector<196x32xf32> to vector<196x32xbf16>
    %c4 = arith.constant 4 : index
    %c0_35 = arith.constant 0 : index
    %c0_36 = arith.constant 0 : index
    %55 = vector.load %arg6[%c4, %c0_35, %c0_36] : memref<9x196x196xbf16, #tpu.memory_space<vmem>>, vector<1x196x196xbf16>
    %56 = vector.shape_cast %55 : vector<1x196x196xbf16> to vector<196x196xbf16>
    %cst_37 = arith.constant dense<0.000000e+00> : vector<196x32xf32>
    %57 = tpu.matmul %56, %38, %cst_37 {dimension_numbers = #tpu.dot_dimension_numbers<[1], [0], [0], [1], [0, 0, 1, 1], [], []>} : vector<196x196xbf16>, vector<196x32xbf16>, vector<196x32xf32> -> vector<196x32xf32>
    %58 = arith.truncf %57 : vector<196x32xf32> to vector<196x32xbf16>
    %c5 = arith.constant 5 : index
    %c0_38 = arith.constant 0 : index
    %c0_39 = arith.constant 0 : index
    %59 = vector.load %arg6[%c5, %c0_38, %c0_39] : memref<9x196x196xbf16, #tpu.memory_space<vmem>>, vector<1x196x196xbf16>
    %60 = vector.shape_cast %59 : vector<1x196x196xbf16> to vector<196x196xbf16>
    %cst_40 = arith.constant dense<0.000000e+00> : vector<196x32xf32>
    %61 = tpu.matmul %60, %38, %cst_40 {dimension_numbers = #tpu.dot_dimension_numbers<[1], [0], [0], [1], [0, 0, 1, 1], [], []>} : vector<196x196xbf16>, vector<196x32xbf16>, vector<196x32xf32> -> vector<196x32xf32>
    %62 = arith.truncf %61 : vector<196x32xf32> to vector<196x32xbf16>
    %c6 = arith.constant 6 : index
    %c0_41 = arith.constant 0 : index
    %c0_42 = arith.constant 0 : index
    %63 = vector.load %arg6[%c6, %c0_41, %c0_42] : memref<9x196x196xbf16, #tpu.memory_space<vmem>>, vector<1x196x196xbf16>
    %64 = vector.shape_cast %63 : vector<1x196x196xbf16> to vector<196x196xbf16>
    %cst_43 = arith.constant dense<0.000000e+00> : vector<196x32xf32>
    %65 = tpu.matmul %64, %38, %cst_43 {dimension_numbers = #tpu.dot_dimension_numbers<[1], [0], [0], [1], [0, 0, 1, 1], [], []>} : vector<196x196xbf16>, vector<196x32xbf16>, vector<196x32xf32> -> vector<196x32xf32>
    %66 = arith.truncf %65 : vector<196x32xf32> to vector<196x32xbf16>
    %c7 = arith.constant 7 : index
    %c0_44 = arith.constant 0 : index
    %c0_45 = arith.constant 0 : index
    %67 = vector.load %arg6[%c7, %c0_44, %c0_45] : memref<9x196x196xbf16, #tpu.memory_space<vmem>>, vector<1x196x196xbf16>
    %68 = vector.shape_cast %67 : vector<1x196x196xbf16> to vector<196x196xbf16>
    %cst_46 = arith.constant dense<0.000000e+00> : vector<196x32xf32>
    %69 = tpu.matmul %68, %38, %cst_46 {dimension_numbers = #tpu.dot_dimension_numbers<[1], [0], [0], [1], [0, 0, 1, 1], [], []>} : vector<196x196xbf16>, vector<196x32xbf16>, vector<196x32xf32> -> vector<196x32xf32>
    %70 = arith.truncf %69 : vector<196x32xf32> to vector<196x32xbf16>
    %c8 = arith.constant 8 : index
    %c0_47 = arith.constant 0 : index
    %c0_48 = arith.constant 0 : index
    %71 = vector.load %arg6[%c8, %c0_47, %c0_48] : memref<9x196x196xbf16, #tpu.memory_space<vmem>>, vector<1x196x196xbf16>
    %72 = vector.shape_cast %71 : vector<1x196x196xbf16> to vector<196x196xbf16>
    %cst_49 = arith.constant dense<0.000000e+00> : vector<196x32xf32>
    %73 = tpu.matmul %72, %38, %cst_49 {dimension_numbers = #tpu.dot_dimension_numbers<[1], [0], [0], [1], [0, 0, 1, 1], [], []>} : vector<196x196xbf16>, vector<196x32xbf16>, vector<196x32xf32> -> vector<196x32xf32>
    %74 = arith.truncf %73 : vector<196x32xf32> to vector<196x32xbf16>
    %75 = tpu.concatenate %42, %46, %50, %54, %58, %62, %66, %70, %74 in 1 : vector<196x32xbf16>, vector<196x32xbf16>, vector<196x32xbf16>, vector<196x32xbf16>, vector<196x32xbf16>, vector<196x32xbf16>, vector<196x32xbf16>, vector<196x32xbf16>, vector<196x32xbf16> -> vector<196x288xbf16>
    %c0_50 = arith.constant 0 : index
    %c0_51 = arith.constant 0 : index
    %76 = vector.load %arg7[%c0_50, %c0_51] : memref<288x32xbf16, #tpu.memory_space<vmem>>, vector<288x32xbf16>
    %cst_52 = arith.constant dense<0.000000e+00> : vector<196x32xf32>
    %77 = tpu.matmul %75, %76, %cst_52 {dimension_numbers = #tpu.dot_dimension_numbers<[1], [0], [0], [1], [0, 0, 1, 1], [], []>} : vector<196x288xbf16>, vector<288x32xbf16>, vector<196x32xf32> -> vector<196x32xf32>
    %c0_53 = arith.constant 0 : index
    %c0_54 = arith.constant 0 : index
    %78 = vector.load %arg8[%c0_53, %c0_54] : memref<1x32xf32, #tpu.memory_space<vmem>>, vector<1x32xf32>
    %79 = vector.broadcast %78 : vector<1x32xf32> to vector<196x32xf32>
    %80 = arith.addf %77, %79 : vector<196x32xf32>
    %cst_55 = arith.constant 0.000000e+00 : f32
    %81 = vector.broadcast %cst_55 : f32 to vector<196x32xf32>
    %82 = arith.maximumf %80, %81 : vector<196x32xf32>
    %c0_56 = arith.constant 0 : index
    %c0_57 = arith.constant 0 : index
    %c0_58 = arith.constant 0 : index
    %83 = vector.load %arg17[%c0_56, %c0_57, %c0_58] : memref<1x196x32xf32, #tpu.memory_space<vmem>>, vector<1x196x32xf32>
    %84 = vector.shape_cast %83 : vector<1x196x32xf32> to vector<196x32xf32>
    %85 = vector.shape_cast %82 : vector<196x32xf32> to vector<1x196x32xf32>
    tpu.vector_store %arg17[%c0_56, %c0_57, %c0_58], %85 {strides = array<i32>} : memref<1x196x32xf32, #tpu.memory_space<vmem>>, vector<1x196x32xf32>,
    %86 = arith.truncf %82 : vector<196x32xf32> to vector<196x32xbf16>
    %c0_59 = arith.constant 0 : index
    %c0_60 = arith.constant 0 : index
    %c0_61 = arith.constant 0 : index
    %87 = vector.load %arg9[%c0_59, %c0_60, %c0_61] : memref<9x49x196xbf16, #tpu.memory_space<vmem>>, vector<1x49x196xbf16>
    %88 = vector.shape_cast %87 : vector<1x49x196xbf16> to vector<49x196xbf16>
    %cst_62 = arith.constant dense<0.000000e+00> : vector<49x32xf32>
    %89 = tpu.matmul %88, %86, %cst_62 {dimension_numbers = #tpu.dot_dimension_numbers<[1], [0], [0], [1], [0, 0, 1, 1], [], []>} : vector<49x196xbf16>, vector<196x32xbf16>, vector<49x32xf32> -> vector<49x32xf32>
    %90 = arith.truncf %89 : vector<49x32xf32> to vector<49x32xbf16>
    %c1_63 = arith.constant 1 : index
    %c0_64 = arith.constant 0 : index
    %c0_65 = arith.constant 0 : index
    %91 = vector.load %arg9[%c1_63, %c0_64, %c0_65] : memref<9x49x196xbf16, #tpu.memory_space<vmem>>, vector<1x49x196xbf16>
    %92 = vector.shape_cast %91 : vector<1x49x196xbf16> to vector<49x196xbf16>
    %cst_66 = arith.constant dense<0.000000e+00> : vector<49x32xf32>
    %93 = tpu.matmul %92, %86, %cst_66 {dimension_numbers = #tpu.dot_dimension_numbers<[1], [0], [0], [1], [0, 0, 1, 1], [], []>} : vector<49x196xbf16>, vector<196x32xbf16>, vector<49x32xf32> -> vector<49x32xf32>
    %94 = arith.truncf %93 : vector<49x32xf32> to vector<49x32xbf16>
    %c2_67 = arith.constant 2 : index
    %c0_68 = arith.constant 0 : index
    %c0_69 = arith.constant 0 : index
    %95 = vector.load %arg9[%c2_67, %c0_68, %c0_69] : memref<9x49x196xbf16, #tpu.memory_space<vmem>>, vector<1x49x196xbf16>
    %96 = vector.shape_cast %95 : vector<1x49x196xbf16> to vector<49x196xbf16>
    %cst_70 = arith.constant dense<0.000000e+00> : vector<49x32xf32>
    %97 = tpu.matmul %96, %86, %cst_70 {dimension_numbers = #tpu.dot_dimension_numbers<[1], [0], [0], [1], [0, 0, 1, 1], [], []>} : vector<49x196xbf16>, vector<196x32xbf16>, vector<49x32xf32> -> vector<49x32xf32>
    %98 = arith.truncf %97 : vector<49x32xf32> to vector<49x32xbf16>
    %c3_71 = arith.constant 3 : index
    %c0_72 = arith.constant 0 : index
    %c0_73 = arith.constant 0 : index
    %99 = vector.load %arg9[%c3_71, %c0_72, %c0_73] : memref<9x49x196xbf16, #tpu.memory_space<vmem>>, vector<1x49x196xbf16>
    %100 = vector.shape_cast %99 : vector<1x49x196xbf16> to vector<49x196xbf16>
    %cst_74 = arith.constant dense<0.000000e+00> : vector<49x32xf32>
    %101 = tpu.matmul %100, %86, %cst_74 {dimension_numbers = #tpu.dot_dimension_numbers<[1], [0], [0], [1], [0, 0, 1, 1], [], []>} : vector<49x196xbf16>, vector<196x32xbf16>, vector<49x32xf32> -> vector<49x32xf32>
    %102 = arith.truncf %101 : vector<49x32xf32> to vector<49x32xbf16>
    %c4_75 = arith.constant 4 : index
    %c0_76 = arith.constant 0 : index
    %c0_77 = arith.constant 0 : index
    %103 = vector.load %arg9[%c4_75, %c0_76, %c0_77] : memref<9x49x196xbf16, #tpu.memory_space<vmem>>, vector<1x49x196xbf16>
    %104 = vector.shape_cast %103 : vector<1x49x196xbf16> to vector<49x196xbf16>
    %cst_78 = arith.constant dense<0.000000e+00> : vector<49x32xf32>
    %105 = tpu.matmul %104, %86, %cst_78 {dimension_numbers = #tpu.dot_dimension_numbers<[1], [0], [0], [1], [0, 0, 1, 1], [], []>} : vector<49x196xbf16>, vector<196x32xbf16>, vector<49x32xf32> -> vector<49x32xf32>
    %106 = arith.truncf %105 : vector<49x32xf32> to vector<49x32xbf16>
    %c5_79 = arith.constant 5 : index
    %c0_80 = arith.constant 0 : index
    %c0_81 = arith.constant 0 : index
    %107 = vector.load %arg9[%c5_79, %c0_80, %c0_81] : memref<9x49x196xbf16, #tpu.memory_space<vmem>>, vector<1x49x196xbf16>
    %108 = vector.shape_cast %107 : vector<1x49x196xbf16> to vector<49x196xbf16>
    %cst_82 = arith.constant dense<0.000000e+00> : vector<49x32xf32>
    %109 = tpu.matmul %108, %86, %cst_82 {dimension_numbers = #tpu.dot_dimension_numbers<[1], [0], [0], [1], [0, 0, 1, 1], [], []>} : vector<49x196xbf16>, vector<196x32xbf16>, vector<49x32xf32> -> vector<49x32xf32>
    %110 = arith.truncf %109 : vector<49x32xf32> to vector<49x32xbf16>
    %c6_83 = arith.constant 6 : index
    %c0_84 = arith.constant 0 : index
    %c0_85 = arith.constant 0 : index
    %111 = vector.load %arg9[%c6_83, %c0_84, %c0_85] : memref<9x49x196xbf16, #tpu.memory_space<vmem>>, vector<1x49x196xbf16>
    %112 = vector.shape_cast %111 : vector<1x49x196xbf16> to vector<49x196xbf16>
    %cst_86 = arith.constant dense<0.000000e+00> : vector<49x32xf32>
    %113 = tpu.matmul %112, %86, %cst_86 {dimension_numbers = #tpu.dot_dimension_numbers<[1], [0], [0], [1], [0, 0, 1, 1], [], []>} : vector<49x196xbf16>, vector<196x32xbf16>, vector<49x32xf32> -> vector<49x32xf32>
    %114 = arith.truncf %113 : vector<49x32xf32> to vector<49x32xbf16>
    %c7_87 = arith.constant 7 : index
    %c0_88 = arith.constant 0 : index
    %c0_89 = arith.constant 0 : index
    %115 = vector.load %arg9[%c7_87, %c0_88, %c0_89] : memref<9x49x196xbf16, #tpu.memory_space<vmem>>, vector<1x49x196xbf16>
    %116 = vector.shape_cast %115 : vector<1x49x196xbf16> to vector<49x196xbf16>
    %cst_90 = arith.constant dense<0.000000e+00> : vector<49x32xf32>
    %117 = tpu.matmul %116, %86, %cst_90 {dimension_numbers = #tpu.dot_dimension_numbers<[1], [0], [0], [1], [0, 0, 1, 1], [], []>} : vector<49x196xbf16>, vector<196x32xbf16>, vector<49x32xf32> -> vector<49x32xf32>
    %118 = arith.truncf %117 : vector<49x32xf32> to vector<49x32xbf16>
    %c8_91 = arith.constant 8 : index
    %c0_92 = arith.constant 0 : index
    %c0_93 = arith.constant 0 : index
    %119 = vector.load %arg9[%c8_91, %c0_92, %c0_93] : memref<9x49x196xbf16, #tpu.memory_space<vmem>>, vector<1x49x196xbf16>
    %120 = vector.shape_cast %119 : vector<1x49x196xbf16> to vector<49x196xbf16>
    %cst_94 = arith.constant dense<0.000000e+00> : vector<49x32xf32>
    %121 = tpu.matmul %120, %86, %cst_94 {dimension_numbers = #tpu.dot_dimension_numbers<[1], [0], [0], [1], [0, 0, 1, 1], [], []>} : vector<49x196xbf16>, vector<196x32xbf16>, vector<49x32xf32> -> vector<49x32xf32>
    %122 = arith.truncf %121 : vector<49x32xf32> to vector<49x32xbf16>
    %123 = tpu.concatenate %90, %94, %98, %102, %106, %110, %114, %118, %122 in 1 : vector<49x32xbf16>, vector<49x32xbf16>, vector<49x32xbf16>, vector<49x32xbf16>, vector<49x32xbf16>, vector<49x32xbf16>, vector<49x32xbf16>, vector<49x32xbf16>, vector<49x32xbf16> -> vector<49x288xbf16>
    %c0_95 = arith.constant 0 : index
    %c0_96 = arith.constant 0 : index
    %124 = vector.load %arg10[%c0_95, %c0_96] : memref<288x64xbf16, #tpu.memory_space<vmem>>, vector<288x64xbf16>
    %cst_97 = arith.constant dense<0.000000e+00> : vector<49x64xf32>
    %125 = tpu.matmul %123, %124, %cst_97 {dimension_numbers = #tpu.dot_dimension_numbers<[1], [0], [0], [1], [0, 0, 1, 1], [], []>} : vector<49x288xbf16>, vector<288x64xbf16>, vector<49x64xf32> -> vector<49x64xf32>
    %c0_98 = arith.constant 0 : index
    %c0_99 = arith.constant 0 : index
    %126 = vector.load %arg11[%c0_98, %c0_99] : memref<1x64xf32, #tpu.memory_space<vmem>>, vector<1x64xf32>
    %127 = vector.broadcast %126 : vector<1x64xf32> to vector<49x64xf32>
    %128 = arith.addf %125, %127 : vector<49x64xf32>
    %cst_100 = arith.constant 0.000000e+00 : f32
    %129 = vector.broadcast %cst_100 : f32 to vector<49x64xf32>
    %130 = arith.maximumf %128, %129 : vector<49x64xf32>
    %131 = arith.truncf %130 : vector<49x64xf32> to vector<49x64xbf16>
    %c0_101 = arith.constant 0 : index
    %c0_102 = arith.constant 0 : index
    %c0_103 = arith.constant 0 : index
    %132 = vector.load %arg12[%c0_101, %c0_102, %c0_103] : memref<9x49x49xbf16, #tpu.memory_space<vmem>>, vector<1x49x49xbf16>
    %133 = vector.shape_cast %132 : vector<1x49x49xbf16> to vector<49x49xbf16>
    %cst_104 = arith.constant dense<0.000000e+00> : vector<49x64xf32>
    %134 = tpu.matmul %133, %131, %cst_104 {dimension_numbers = #tpu.dot_dimension_numbers<[1], [0], [0], [1], [0, 0, 1, 1], [], []>} : vector<49x49xbf16>, vector<49x64xbf16>, vector<49x64xf32> -> vector<49x64xf32>
    %135 = arith.truncf %134 : vector<49x64xf32> to vector<49x64xbf16>
    %c1_105 = arith.constant 1 : index
    %c0_106 = arith.constant 0 : index
    %c0_107 = arith.constant 0 : index
    %136 = vector.load %arg12[%c1_105, %c0_106, %c0_107] : memref<9x49x49xbf16, #tpu.memory_space<vmem>>, vector<1x49x49xbf16>
    %137 = vector.shape_cast %136 : vector<1x49x49xbf16> to vector<49x49xbf16>
    %cst_108 = arith.constant dense<0.000000e+00> : vector<49x64xf32>
    %138 = tpu.matmul %137, %131, %cst_108 {dimension_numbers = #tpu.dot_dimension_numbers<[1], [0], [0], [1], [0, 0, 1, 1], [], []>} : vector<49x49xbf16>, vector<49x64xbf16>, vector<49x64xf32> -> vector<49x64xf32>
    %139 = arith.truncf %138 : vector<49x64xf32> to vector<49x64xbf16>
    %c2_109 = arith.constant 2 : index
    %c0_110 = arith.constant 0 : index
    %c0_111 = arith.constant 0 : index
    %140 = vector.load %arg12[%c2_109, %c0_110, %c0_111] : memref<9x49x49xbf16, #tpu.memory_space<vmem>>, vector<1x49x49xbf16>
    %141 = vector.shape_cast %140 : vector<1x49x49xbf16> to vector<49x49xbf16>
    %cst_112 = arith.constant dense<0.000000e+00> : vector<49x64xf32>
    %142 = tpu.matmul %141, %131, %cst_112 {dimension_numbers = #tpu.dot_dimension_numbers<[1], [0], [0], [1], [0, 0, 1, 1], [], []>} : vector<49x49xbf16>, vector<49x64xbf16>, vector<49x64xf32> -> vector<49x64xf32>
    %143 = arith.truncf %142 : vector<49x64xf32> to vector<49x64xbf16>
    %c3_113 = arith.constant 3 : index
    %c0_114 = arith.constant 0 : index
    %c0_115 = arith.constant 0 : index
    %144 = vector.load %arg12[%c3_113, %c0_114, %c0_115] : memref<9x49x49xbf16, #tpu.memory_space<vmem>>, vector<1x49x49xbf16>
    %145 = vector.shape_cast %144 : vector<1x49x49xbf16> to vector<49x49xbf16>
    %cst_116 = arith.constant dense<0.000000e+00> : vector<49x64xf32>
    %146 = tpu.matmul %145, %131, %cst_116 {dimension_numbers = #tpu.dot_dimension_numbers<[1], [0], [0], [1], [0, 0, 1, 1], [], []>} : vector<49x49xbf16>, vector<49x64xbf16>, vector<49x64xf32> -> vector<49x64xf32>
    %147 = arith.truncf %146 : vector<49x64xf32> to vector<49x64xbf16>
    %c4_117 = arith.constant 4 : index
    %c0_118 = arith.constant 0 : index
    %c0_119 = arith.constant 0 : index
    %148 = vector.load %arg12[%c4_117, %c0_118, %c0_119] : memref<9x49x49xbf16, #tpu.memory_space<vmem>>, vector<1x49x49xbf16>
    %149 = vector.shape_cast %148 : vector<1x49x49xbf16> to vector<49x49xbf16>
    %cst_120 = arith.constant dense<0.000000e+00> : vector<49x64xf32>
    %150 = tpu.matmul %149, %131, %cst_120 {dimension_numbers = #tpu.dot_dimension_numbers<[1], [0], [0], [1], [0, 0, 1, 1], [], []>} : vector<49x49xbf16>, vector<49x64xbf16>, vector<49x64xf32> -> vector<49x64xf32>
    %151 = arith.truncf %150 : vector<49x64xf32> to vector<49x64xbf16>
    %c5_121 = arith.constant 5 : index
    %c0_122 = arith.constant 0 : index
    %c0_123 = arith.constant 0 : index
    %152 = vector.load %arg12[%c5_121, %c0_122, %c0_123] : memref<9x49x49xbf16, #tpu.memory_space<vmem>>, vector<1x49x49xbf16>
    %153 = vector.shape_cast %152 : vector<1x49x49xbf16> to vector<49x49xbf16>
    %cst_124 = arith.constant dense<0.000000e+00> : vector<49x64xf32>
    %154 = tpu.matmul %153, %131, %cst_124 {dimension_numbers = #tpu.dot_dimension_numbers<[1], [0], [0], [1], [0, 0, 1, 1], [], []>} : vector<49x49xbf16>, vector<49x64xbf16>, vector<49x64xf32> -> vector<49x64xf32>
    %155 = arith.truncf %154 : vector<49x64xf32> to vector<49x64xbf16>
    %c6_125 = arith.constant 6 : index
    %c0_126 = arith.constant 0 : index
    %c0_127 = arith.constant 0 : index
    %156 = vector.load %arg12[%c6_125, %c0_126, %c0_127] : memref<9x49x49xbf16, #tpu.memory_space<vmem>>, vector<1x49x49xbf16>
    %157 = vector.shape_cast %156 : vector<1x49x49xbf16> to vector<49x49xbf16>
    %cst_128 = arith.constant dense<0.000000e+00> : vector<49x64xf32>
    %158 = tpu.matmul %157, %131, %cst_128 {dimension_numbers = #tpu.dot_dimension_numbers<[1], [0], [0], [1], [0, 0, 1, 1], [], []>} : vector<49x49xbf16>, vector<49x64xbf16>, vector<49x64xf32> -> vector<49x64xf32>
    %159 = arith.truncf %158 : vector<49x64xf32> to vector<49x64xbf16>
    %c7_129 = arith.constant 7 : index
    %c0_130 = arith.constant 0 : index
    %c0_131 = arith.constant 0 : index
    %160 = vector.load %arg12[%c7_129, %c0_130, %c0_131] : memref<9x49x49xbf16, #tpu.memory_space<vmem>>, vector<1x49x49xbf16>
    %161 = vector.shape_cast %160 : vector<1x49x49xbf16> to vector<49x49xbf16>
    %cst_132 = arith.constant dense<0.000000e+00> : vector<49x64xf32>
    %162 = tpu.matmul %161, %131, %cst_132 {dimension_numbers = #tpu.dot_dimension_numbers<[1], [0], [0], [1], [0, 0, 1, 1], [], []>} : vector<49x49xbf16>, vector<49x64xbf16>, vector<49x64xf32> -> vector<49x64xf32>
    %163 = arith.truncf %162 : vector<49x64xf32> to vector<49x64xbf16>
    %c8_133 = arith.constant 8 : index
    %c0_134 = arith.constant 0 : index
    %c0_135 = arith.constant 0 : index
    %164 = vector.load %arg12[%c8_133, %c0_134, %c0_135] : memref<9x49x49xbf16, #tpu.memory_space<vmem>>, vector<1x49x49xbf16>
    %165 = vector.shape_cast %164 : vector<1x49x49xbf16> to vector<49x49xbf16>
    %cst_136 = arith.constant dense<0.000000e+00> : vector<49x64xf32>
    %166 = tpu.matmul %165, %131, %cst_136 {dimension_numbers = #tpu.dot_dimension_numbers<[1], [0], [0], [1], [0, 0, 1, 1], [], []>} : vector<49x49xbf16>, vector<49x64xbf16>, vector<49x64xf32> -> vector<49x64xf32>
    %167 = arith.truncf %166 : vector<49x64xf32> to vector<49x64xbf16>
    %168 = tpu.concatenate %135, %139, %143, %147, %151, %155, %159, %163, %167 in 1 : vector<49x64xbf16>, vector<49x64xbf16>, vector<49x64xbf16>, vector<49x64xbf16>, vector<49x64xbf16>, vector<49x64xbf16>, vector<49x64xbf16>, vector<49x64xbf16>, vector<49x64xbf16> -> vector<49x576xbf16>
    %c0_137 = arith.constant 0 : index
    %c0_138 = arith.constant 0 : index
    %169 = vector.load %arg13[%c0_137, %c0_138] : memref<576x64xbf16, #tpu.memory_space<vmem>>, vector<576x64xbf16>
    %cst_139 = arith.constant dense<0.000000e+00> : vector<49x64xf32>
    %170 = tpu.matmul %168, %169, %cst_139 {dimension_numbers = #tpu.dot_dimension_numbers<[1], [0], [0], [1], [0, 0, 1, 1], [], []>} : vector<49x576xbf16>, vector<576x64xbf16>, vector<49x64xf32> -> vector<49x64xf32>
    %c0_140 = arith.constant 0 : index
    %c0_141 = arith.constant 0 : index
    %171 = vector.load %arg14[%c0_140, %c0_141] : memref<1x64xf32, #tpu.memory_space<vmem>>, vector<1x64xf32>
    %172 = vector.broadcast %171 : vector<1x64xf32> to vector<49x64xf32>
    %173 = arith.addf %170, %172 : vector<49x64xf32>
    %cst_142 = arith.constant 0.000000e+00 : f32
    %174 = vector.broadcast %cst_142 : f32 to vector<49x64xf32>
    %175 = arith.maximumf %173, %174 : vector<49x64xf32>
    %cst_143 = arith.constant dense<0.000000e+00> : vector<64xf32>
    %176 = vector.multi_reduction <add>, %175, %cst_143 [0] : vector<49x64xf32> to vector<64xf32>
    %177 = vector.shape_cast %176 : vector<64xf32> to vector<1x64xf32>
    %cst_144 = arith.constant 4.900000e+01 : f32
    %178 = vector.broadcast %cst_144 : f32 to vector<1x64xf32>
    %179 = arith.divf %177, %178 : vector<1x64xf32>
    %180 = arith.truncf %179 : vector<1x64xf32> to vector<1x64xbf16>
    %c0_145 = arith.constant 0 : index
    %c0_146 = arith.constant 0 : index
    %181 = vector.load %arg15[%c0_145, %c0_146] : memref<64x128xbf16, #tpu.memory_space<vmem>>, vector<64x128xbf16>
    %cst_147 = arith.constant dense<0.000000e+00> : vector<1x128xf32>
    %182 = tpu.matmul %180, %181, %cst_147 {dimension_numbers = #tpu.dot_dimension_numbers<[1], [0], [0], [1], [0, 0, 1, 1], [], []>} : vector<1x64xbf16>, vector<64x128xbf16>, vector<1x128xf32> -> vector<1x128xf32>
    %c0_148 = arith.constant 0 : index
    %c0_149 = arith.constant 0 : index
    %183 = vector.load %arg16[%c0_148, %c0_149] : memref<1x128xf32, #tpu.memory_space<vmem>>, vector<1x128xf32>
    %184 = arith.addf %182, %183 : vector<1x128xf32>
    %c0_150 = arith.constant 0 : index
    %c0_151 = arith.constant 0 : index
    %c0_152 = arith.constant 0 : index
    %185 = vector.load %arg18[%c0_150, %c0_151, %c0_152] : memref<1x1x128xf32, #tpu.memory_space<vmem>>, vector<1x1x128xf32>
    %186 = vector.shape_cast %185 : vector<1x1x128xf32> to vector<1x128xf32>
    %187 = vector.shape_cast %184 : vector<1x128xf32> to vector<1x1x128xf32>
    tpu.vector_store %arg18[%c0_150, %c0_151, %c0_152], %187 {strides = array<i32>} : memref<1x1x128xf32, #tpu.memory_space<vmem>>, vector<1x1x128xf32>,
    return
  }
  func.func @transform_0(%arg0: i32) -> (i32, i32, i32) {
    %c0_i32 = arith.constant 0 : i32
    %c0_i32_0 = arith.constant 0 : i32
    %c0_i32_1 = arith.constant 0 : i32
    return %arg0, %c0_i32, %c0_i32_0 : i32, i32, i32
  }
  func.func @transform_1(%arg0: i32) -> (i32, i32) {
    %c0_i32 = arith.constant 0 : i32
    %c0_i32_0 = arith.constant 0 : i32
    %c0_i32_1 = arith.constant 0 : i32
    return %c0_i32, %c0_i32_0 : i32, i32
  }
  func.func @transform_2(%arg0: i32) -> (i32, i32) {
    %c0_i32 = arith.constant 0 : i32
    %c0_i32_0 = arith.constant 0 : i32
    %c0_i32_1 = arith.constant 0 : i32
    return %c0_i32, %c0_i32_0 : i32, i32
  }
  func.func @transform_3(%arg0: i32) -> (i32, i32) {
    %c0_i32 = arith.constant 0 : i32
    %c0_i32_0 = arith.constant 0 : i32
    %c0_i32_1 = arith.constant 0 : i32
    return %c0_i32, %c0_i32_0 : i32, i32
  }
  func.func @transform_4(%arg0: i32) -> (i32, i32) {
    %c0_i32 = arith.constant 0 : i32
    %c0_i32_0 = arith.constant 0 : i32
    %c0_i32_1 = arith.constant 0 : i32
    return %c0_i32, %c0_i32_0 : i32, i32
  }
  func.func @transform_5(%arg0: i32) -> (i32, i32, i32) {
    %c0_i32 = arith.constant 0 : i32
    %c0_i32_0 = arith.constant 0 : i32
    %c0_i32_1 = arith.constant 0 : i32
    %c0_i32_2 = arith.constant 0 : i32
    return %c0_i32, %c0_i32_0, %c0_i32_1 : i32, i32, i32
  }
  func.func @transform_6(%arg0: i32) -> (i32, i32) {
    %c0_i32 = arith.constant 0 : i32
    %c0_i32_0 = arith.constant 0 : i32
    %c0_i32_1 = arith.constant 0 : i32
    return %c0_i32, %c0_i32_0 : i32, i32
  }
  func.func @transform_7(%arg0: i32) -> (i32, i32) {
    %c0_i32 = arith.constant 0 : i32
    %c0_i32_0 = arith.constant 0 : i32
    %c0_i32_1 = arith.constant 0 : i32
    return %c0_i32, %c0_i32_0 : i32, i32
  }
  func.func @transform_8(%arg0: i32) -> (i32, i32, i32) {
    %c0_i32 = arith.constant 0 : i32
    %c0_i32_0 = arith.constant 0 : i32
    %c0_i32_1 = arith.constant 0 : i32
    %c0_i32_2 = arith.constant 0 : i32
    return %c0_i32, %c0_i32_0, %c0_i32_1 : i32, i32, i32
  }
  func.func @transform_9(%arg0: i32) -> (i32, i32) {
    %c0_i32 = arith.constant 0 : i32
    %c0_i32_0 = arith.constant 0 : i32
    %c0_i32_1 = arith.constant 0 : i32
    return %c0_i32, %c0_i32_0 : i32, i32
  }
  func.func @transform_10(%arg0: i32) -> (i32, i32) {
    %c0_i32 = arith.constant 0 : i32
    %c0_i32_0 = arith.constant 0 : i32
    %c0_i32_1 = arith.constant 0 : i32
    return %c0_i32, %c0_i32_0 : i32, i32
  }
  func.func @transform_11(%arg0: i32) -> (i32, i32, i32) {
    %c0_i32 = arith.constant 0 : i32
    %c0_i32_0 = arith.constant 0 : i32
    %c0_i32_1 = arith.constant 0 : i32
    %c0_i32_2 = arith.constant 0 : i32
    return %c0_i32, %c0_i32_0, %c0_i32_1 : i32, i32, i32
  }
  func.func @transform_12(%arg0: i32) -> (i32, i32) {
    %c0_i32 = arith.constant 0 : i32
    %c0_i32_0 = arith.constant 0 : i32
    %c0_i32_1 = arith.constant 0 : i32
    return %c0_i32, %c0_i32_0 : i32, i32
  }
  func.func @transform_13(%arg0: i32) -> (i32, i32) {
    %c0_i32 = arith.constant 0 : i32
    %c0_i32_0 = arith.constant 0 : i32
    %c0_i32_1 = arith.constant 0 : i32
    return %c0_i32, %c0_i32_0 : i32, i32
  }
  func.func @transform_14(%arg0: i32) -> (i32, i32) {
    %c0_i32 = arith.constant 0 : i32
    %c0_i32_0 = arith.constant 0 : i32
    %c0_i32_1 = arith.constant 0 : i32
    return %c0_i32, %c0_i32_0 : i32, i32
  }
  func.func @transform_15(%arg0: i32) -> (i32, i32) {
    %c0_i32 = arith.constant 0 : i32
    %c0_i32_0 = arith.constant 0 : i32
    %c0_i32_1 = arith.constant 0 : i32
    return %c0_i32, %c0_i32_0 : i32, i32
  }
  func.func @transform_16(%arg0: i32) -> (i32, i32, i32) {
    %c0_i32 = arith.constant 0 : i32
    %c0_i32_0 = arith.constant 0 : i32
    %c0_i32_1 = arith.constant 0 : i32
    return %arg0, %c0_i32, %c0_i32_0 : i32, i32, i32
  }
  func.func @transform_17(%arg0: i32) -> (i32, i32, i32) {
    %c0_i32 = arith.constant 0 : i32
    %c0_i32_0 = arith.constant 0 : i32
    %c0_i32_1 = arith.constant 0 : i32
    return %arg0, %c0_i32, %c0_i32_0 : i32, i32, i32
  }
}

</mosaic_0001>

<bundles_post_ra>
// kernel: convnet_forward.1
= control target key start
LH: loop header
LB: loop body
LE: loop exit
PB: predicated region body
PF: predicated region fallthrough
CT: control target
= control target key end

     0   :  { %s23251_s0 = inlined_call_operand.vmem [shape: bf16[2,1056,32], index: 0, kind: input, shape index: {}]   ;;  %s23252_s1 = inlined_call_operand.vmem [shape: bf16[160,32], index: 1, kind: input, shape index: {}]   ;;  %s23253_s2 = inlined_call_operand.vmem [shape: f32[1,32], index: 2, kind: input, shape index: {}]   ;;  %s23254_s3 = inlined_call_operand.vmem [shape: f32[896,1], index: 3, kind: input, shape index: {}]   ;;  %s23255_s4 = inlined_call_operand.vmem [shape: bf16[196,896], index: 4, kind: input, shape index: {}]   ;;  %s23256_s5 = inlined_call_operand.vmem [shape: bf16[9,196,196], index: 5, kind: input, shape index: {}]   ;;  %s23257_s6 = inlined_call_operand.vmem [shape: bf16[288,32], index: 6, kind: input, shape index: {}]   ;;  %s23258_s7 = inlined_call_operand.vmem [shape: f32[1,32], index: 7, kind: input, shape index: {}]   ;;  %s23259_s8 = inlined_call_operand.vmem [shape: bf16[9,49,196], index: 8, kind: input, shape index: {}]   ;;  %s23260_s9 = inlined_call_operand.vmem [shape: bf16[288,64], index: 9, kind: input, shape index: {}]   ;;  %s23261_s10 = inlined_call_operand.vmem [shape: f32[1,64], index: 10, kind: input, shape index: {}]   ;;  %s23262_s11 = inlined_call_operand.vmem [shape: bf16[9,49,49], index: 11, kind: input, shape index: {}]   ;;  %s23263_s12 = inlined_call_operand.vmem [shape: bf16[576,64], index: 12, kind: input, shape index: {}]   ;;  %s23264_s13 = inlined_call_operand.vmem [shape: f32[1,64], index: 13, kind: input, shape index: {}]   ;;  %s23265_s14 = inlined_call_operand.vmem [shape: bf16[64,128], index: 14, kind: input, shape index: {}]   ;;  %s23266_s15 = inlined_call_operand.vmem [shape: f32[1,128], index: 15, kind: input, shape index: {}]   ;;  %s23267_s16 = inlined_call_operand.vmem [shape: f32[2,196,32], index: 16, kind: output, shape index: {0}]   ;;  %s23268_s17 = inlined_call_operand.hbm [shape: f32[2,1,128], index: 17, kind: output, shape index: {1}]  }
   0x1   :  { %23326 = sst [smem:[#allocation37_spill]] %s23251_s0 }
   0x2   :  { %23327 = sst [smem:[#allocation38_spill]] %s23252_s1 }
   0x3   :  { %23328 = sst [smem:[#allocation39_spill]] %s23253_s2 }
   0x4   :  { %23 = vsyncpa [#allocation3], 0 }
   0x5   :  { %25 = vsyncpa [#allocation3 + $0x1], 0  ;;  %s16148_s24 = smov 0   ;;  %s16150_s25 = smov 0  }
   0x6   :  { %s16152_s26 = smov 0   ;;  %s16154_s27 = smov 0  }
   0x7 LB: > { %23329 = sst [smem:[#allocation5_spill]] %s16037_s24  ;;  %s16169_s28 = sadd.s32 4294967295, %s16049_s27   ;;  %s16049_s27 = sphi %s16154_s27, %s23524_s27   ;;  %s16045_s26 = sphi %s16152_s26, %s23526_s26   ;;  %s16041_s25 = sphi %s16150_s25, %s23528_s25   ;;  %s16037_s24 = sphi %s16148_s24, %s23527_s24  }
   0x8   : > { %23330 = sst [smem:[#allocation6_spill]] %s16045_s26  ;;  %s13014_s29 = sadd.s32 4294967294, %s16049_s27  }
   0x9   : > { %s16173_s0 = sadd.s32 1, %s16049_s27   ;;  %s405_s30 = sadd.s32 1, %s16045_s26 }
   0xa   : > { %23331 = sst [smem:[#allocation7_spill]] %s16173_s0  ;;  %s402_s18 = ssub.s32 %s16049_s27, %s16173_s0 }
   0xb   : > { %p415_p0 = scmp.ne.s32.totalorder %s16045_s26, %s16041_s25  ;;  %p403_p1 = scmp.eq.s32.totalorder %s402_s18, 0 }
   0xc   : > { %p416_p2 = scmp.eq.s32.totalorder %s16169_s28, 1  ;;  %p421_p3 = scmp.ne.s32.totalorder %s16041_s25, %s16037_s24 }
   0xd   : > { %p422_p4 = scmp.eq.s32.totalorder %s13014_s29, 1  ;;  %p13017_p7 = scmp.ge.s32.totalorder %s16049_s27, 1 }
   0xe   : > { %s16184_s19 = scalar_select %p403_p1, %s16045_s26, %s405_s30  }
   0xf   : > { %p16186_p5 = por %p416_p2, %p415_p0  ;;  %p16190_p6 = por %p422_p4, %p421_p3 }
  0x10   : > { %23332 = sst [smem:[#allocation8_spill]] %s16184_s19  ;;  %p493_p8 = scmp.lt.s32.totalorder %s16049_s27, 3 }
  0x11   : > { %s23334_s20 = scalar_select %p16190_p6, 1, 0 }
  0x12   : > { %p494_p9 = pnand %p13017_p7, %p493_p8 }
  0x13   : > { %23335 = sst [smem:[#allocation9_spill]] %s23334_s20 }
  0x14   : > { %497 = sbr.rel (%p494_p9) target bundleno = 3863 (0xf17), region = 84 }
  0x1b   : > { %p549_p10 = scmp.lt.s32.totalorder %s16169_s28, 1  ;;  %s23336_s23 = sld [smem:[#allocation38_spill]]  ;;  %v23279_v1 = vmov 0   ;;  %vm1344_vm0 = vcmask 261120   ;;  %vm1513_vm1 = vcmask 523264   ;;  %vm1626_vm2 = vcmask 785408  }
  0x1c   : > { %2002 = vmatprep.subr.bf16.mxu0 %v23279_v1  ;;  %15167 = vset.pattern.permute.xlu1 %v23279_v1  ;;  %s23337_s26 = sld [smem:[#allocation37_spill]]  ;;  %s23277_s21 = smov 64   ;;  %vm3491_vm3 = vcmask 1040384   ;;  %vm3940_vm4 = vcmask 1046528   ;;  %vm16056_vm5 = vmmov 0   ;;  %vm5922_vm6 = vcmask 556032  }
  0x1d   : > { %s16203_s29 = scalar_select %p549_p10, %s16169_s28, 1  ;;  %15168 = vset.pattern.permute.xlu0 %v23279_v1  ;;  %vm5962_vm7 = vcmask 1041408   ;;  %vm9692_vm8 = vcmask 257024   ;;  %vm11261_vm9 = vcmask 400384   ;;  %vm12824_vm10 = vcmask 516096  }
  0x1e   : > { %s23338_s20 = smov 96   ;;  %s23339_s22 = smov 64  }
  0x1f   : > { %s15120_s19 = smul.u32 528, %s16203_s29  ;;  %s23346_s2 = sld [smem:[#allocation39_spill]] }
  0x20   : > { %s14186_s18 = sshll.u32 %s16169_s28, 4 }
  0x21   : > { %v15187_v0 = vld [vmem:[%s23336_s23] sm:$0xff]   ;;  %v15188_v2 = vld [vmem:[%s23336_s23 + $0x8] sm:$0xff]   ;;  %v15190_v3 = vld [vmem:[%s23336_s23 + $0x10] sm:$0xff]   ;;  %s23209_s24 = scalar_lea.hbm %s23268_s17, %s14186_s18 }
  0x22   : > { %2003 = vmatpush1.bf16.msra.mxu0 %v15187_v0  ;;  %s16214_s0 = scalar_lea.vmem %s23337_s26, %s15120_s19  ;;  %v15192_v6 = vld [vmem:[%s23336_s23 + $0x18] sm:$0xff]   ;;  %s23275_s26 = smov 96   ;;  %v15193_v10 = vld [vmem:[%s23336_s23 + $0x20] sm:$0xff]   ;;  %v15195_v13 = vld [vmem:[%s23336_s23 + $0x28] sm:$0xff]  }
  0x23   : > { %2004 = vmatprep.subr.bf16.mxu0 %v23279_v1  ;;  %v15169_v4 = vld [vmem:[%s16214_s0 + $0x30] sm:$0xff]   ;;  %v15171_v7 = vld [vmem:[%s16214_s0 + $0x18] sm:$0xff]   ;;  %s23281_s19 = smov 32   ;;  %v15172_v8 = vld [vmem:[%s16214_s0 + $0x20] sm:$0xff]  }
  0x24   : > { %v16222_v5 = vld [vmem:[%s16214_s0 + $0x10] sm:$0xff]   ;;  %1222 = vrot.lane.b32.xlu1 %v15169_v4, %s23275_s26  ;;  %v15173_v9 = vld [vmem:[%s16214_s0 + $0x38] sm:$0xff]   ;;  %v15175_v11 = vld [vmem:[%s16214_s0 + $0x40] sm:$0xff]  }
  0x25   : > { %978 = vrot.lane.b32.xlu0 %v16222_v5, %s23281_s19  ;;  %v15174_v12 = vld [vmem:[%s16214_s0 + $0x28] sm:$0xff]   ;;  %13095 = vmatprep.mubr.msk.bf16.mxu0 %vm1344_vm0, %v15175_v11  ;;  %v15197_v15 = vld [vmem:[%s23336_s23 + $0x30] sm:$0xff]   ;;  %v15198_v16 = vld [vmem:[%s23336_s23 + $0x38] sm:$0xff]  }
  0x26   : > { %2005 = vmatpush1.bf16.msra.mxu0 %v15188_v2  ;;  %v16254_v14 = vld [vmem:[%s16214_s0 + $0x48] sm:$0xff]   ;;  %v16270_v17 = vld [vmem:[%s16214_s0 + $0x50] sm:$0xff]   ;;  %v15200_v18 = vld [vmem:[%s23336_s23 + $0x40] sm:$0xff]  }
  0x27   : > { %2006 = vmatprep.subr.bf16.mxu0 %v23279_v1  ;;  %v16278_v19 = vld [vmem:[%s16214_s0 + $0x58] sm:$0xff]   ;;  %v15203_v20 = vld [vmem:[%s23336_s23 + $0x48] sm:$0xff]   ;;  %v16291_v21 = vld [vmem:[%s16214_s0 + $0x60] sm:$0xff]  }
  0x28   : > { %980 = vrot.lane.b32.xlu1 %v15171_v7, %s23281_s19  ;;  %v16298_v22 = vld [vmem:[%s16214_s0 + $0x68] sm:$0xff]   ;;  %v16309_v23 = vld [vmem:[%s16214_s0 + $0x70] sm:$0xff]   ;;  %v16316_v24 = vld [vmem:[%s16214_s0 + $0x78] sm:$0xff]  }
  0x29   : > { %1100 = vrot.lane.b32.xlu0 %v15172_v8, %s23277_s21  ;;  %v16327_v25 = vld [vmem:[%s16214_s0 + $0x80] sm:$0xff]   ;;  %v15184_v26 = vld [vmem:[%s16214_s0 + $0x88] sm:$0xff]   ;;  %v15185_v27 = vld [vmem:[%s16214_s0 + $0x90] sm:$0xff]  }
  0x2a   : > { %2007 = vmatpush1.bf16.msra.mxu0 %v15190_v3  ;;  %v15186_v28 = vld [vmem:[%s16214_s0 + $0x98] sm:$0xff]   ;;  %v15189_v29 = vld [vmem:[%s16214_s0 + $0xa0] sm:$0xff]   ;;  %v15191_v30 = vld [vmem:[%s16214_s0 + $0xa8] sm:$0xff]  }
  0x2b   : > { %2008 = vmatprep.subr.bf16.mxu0 %v23279_v1  ;;  %v15194_v31 = vld [vmem:[%s16214_s0 + $0xb0] sm:$0xff]   ;;  %v15196_v32 = vld [vmem:[%s16214_s0 + $0xb8] sm:$0xff]   ;;  %v15199_v33 = vld [vmem:[%s16214_s0 + $0xc0] sm:$0xff]  }
  0x2c   : > { %1224 = vrot.lane.b32.xlu1 %v15173_v9, %s23275_s26  ;;  %v15202_v34 = vld [vmem:[%s16214_s0 + $0xc8] sm:$0xff]   ;;  %v15201_v37 = vld [vmem:[%s16214_s0] sm:$0xff]   ;;  %v15205_v42 = vld [vmem:[%s16214_s0 + $0xd0] sm:$0xff]  }
  0x2d   : > { %1102 = vrot.lane.b32.xlu0 %v15174_v12, %s23277_s21  ;;  %v15204_v38 = vld [vmem:[%s16214_s0 + $0x8] sm:$0xff]   ;;  %v15206_v46 = vld [vmem:[%s16214_s0 + $0xd8] sm:$0xff]   ;;  %v15207_v56 = vld [vmem:[%s16214_s0 + $0xe0] sm:$0xff]  }
  0x2e   : > { %2009 = vmatpush1.bf16.msra.mxu0 %v15192_v6  ;;  %v15208_v58 = vld [vmem:[%s16214_s0 + $0xe8] sm:$0xff]   ;;  %v15923_v63 = vld [vmem:[%s16214_s0 + $0x18] sm:$0xff]  }
  0x2f   : > { %2010 = vmatprep.subr.bf16.mxu0 %v23279_v1 }
  0x30   : > { %1104 = vrot.lane.b32.xlu1 %v15169_v4, %s23277_s21 }
  0x31   : > { %982 = vrot.lane.b32.xlu0 %v15172_v8, %s23281_s19  ;;  %v15210_v8 = vld [vmem:[%s16214_s0 + $0xf8] sm:$0xff]  }
  0x32   : > { %2011 = vmatpush1.bf16.msra.mxu0 %v15193_v10  ;;  %v15924_v10 = vld [vmem:[%s16214_s0 + $0x20] sm:$0xff]  }
  0x33   : > { %2012 = vmatprep.subr.bf16.mxu0 %v23279_v1 }
  0x34   : > { %984 = vrot.lane.b32.xlu1 %v15174_v12, %s23281_s19 }
  0x35   : > { %1226 = vrot.lane.b32.xlu0 %v15175_v11, %s23275_s26 }
  0x36   : > { %2013 = vmatpush1.bf16.msra.mxu0 %v15195_v13 }
  0x37   : > { %2014 = vmatprep.subr.bf16.mxu0 %v23279_v1 }
  0x38   : > { %1228 = vrot.lane.b32.xlu1 %v16254_v14, %s23275_s26 }
  0x39   : > { %1106 = vrot.lane.b32.xlu0 %v15173_v9, %s23277_s21 }
  0x3a   : > { %2015 = vmatpush1.bf16.msra.mxu0 %v15197_v15 }
  0x3b   : > { %2016 = vmatprep.subr.bf16.mxu0 %v23279_v1 }
  0x3c   : > { %1108 = vrot.lane.b32.xlu1 %v15175_v11, %s23277_s21 }
  0x3d   : > { %986 = vrot.lane.b32.xlu0 %v15169_v4, %s23281_s19 }
  0x3e   : > { %2017 = vmatpush1.bf16.msra.mxu0 %v15198_v16 }
  0x3f   : > { %2018 = vmatprep.subr.bf16.mxu0 %v23279_v1 }
  0x40   : > { %988 = vrot.lane.b32.xlu1 %v15173_v9, %s23281_s19 }
  0x41   : > { %1230 = vrot.lane.b32.xlu0 %v16270_v17, %s23275_s26 }
  0x42   : > { %2019 = vmatpush1.bf16.msra.mxu0 %v15200_v18  ;;  %v15925_v18 = vld [vmem:[%s16214_s0 + $0x28] sm:$0xff]  }
  0x43   : > { %2020 = vmatprep.subr.bf16.mxu0 %v23279_v1 }
  0x44   : > { %1232 = vrot.lane.b32.xlu1 %v16278_v19, %s23275_s26 }
  0x45   : > { %1110 = vrot.lane.b32.xlu0 %v16254_v14, %s23277_s21 }
  0x46   : > { %2021 = vmatpush1.bf16.msra.mxu0 %v15203_v20 }
  0x47   : > { %6294 = vmatprep.subr.bf16.mxu0 %v23279_v1 }
  0x48   : > { %1112 = vrot.lane.b32.xlu1 %v16270_v17, %s23277_s21 }
  0x49   : > { %990 = vrot.lane.b32.xlu0 %v15175_v11, %s23281_s19 }
  0x4c   : > { %992 = vrot.lane.b32.xlu1 %v16254_v14, %s23281_s19 }
  0x4d   : > { %1234 = vrot.lane.b32.xlu0 %v16291_v21, %s23275_s26 }
  0x50   : > { %1236 = vrot.lane.b32.xlu1 %v16298_v22, %s23275_s26 }
  0x51   : > { %1114 = vrot.lane.b32.xlu0 %v16278_v19, %s23277_s21 }
  0x54   : > { %1116 = vrot.lane.b32.xlu1 %v16291_v21, %s23277_s21 }
  0x55   : > { %994 = vrot.lane.b32.xlu0 %v16270_v17, %s23281_s19 }
  0x58   : > { %996 = vrot.lane.b32.xlu1 %v16278_v19, %s23281_s19 }
  0x59   : > { %1238 = vrot.lane.b32.xlu0 %v16309_v23, %s23275_s26 }
  0x5c   : > { %1240 = vrot.lane.b32.xlu1 %v16316_v24, %s23275_s26 }
  0x5d   : > { %1118 = vrot.lane.b32.xlu0 %v16298_v22, %s23277_s21 }
  0x60   : > { %1120 = vrot.lane.b32.xlu1 %v16309_v23, %s23277_s21 }
  0x61   : > { %998 = vrot.lane.b32.xlu0 %v16291_v21, %s23281_s19 }
  0x64   : > { %1000 = vrot.lane.b32.xlu1 %v16298_v22, %s23281_s19 }
  0x65   : > { %1242 = vrot.lane.b32.xlu0 %v16327_v25, %s23275_s26 }
  0x68   : > { %1244 = vrot.lane.b32.xlu1 %v15184_v26, %s23275_s26 }
  0x69   : > { %1122 = vrot.lane.b32.xlu0 %v16316_v24, %s23277_s21 }
  0x6c   : > { %1124 = vrot.lane.b32.xlu1 %v16327_v25, %s23277_s21 }
  0x6d   : > { %1002 = vrot.lane.b32.xlu0 %v16309_v23, %s23281_s19 }
  0x70   : > { %1004 = vrot.lane.b32.xlu1 %v16316_v24, %s23281_s19 }
  0x71   : > { %1246 = vrot.lane.b32.xlu0 %v15185_v27, %s23275_s26 }
  0x74   : > { %1248 = vrot.lane.b32.xlu1 %v15186_v28, %s23275_s26 }
  0x75   : > { %1126 = vrot.lane.b32.xlu0 %v15184_v26, %s23277_s21 }
  0x78   : > { %1128 = vrot.lane.b32.xlu1 %v15185_v27, %s23277_s21 }
  0x79   : > { %1006 = vrot.lane.b32.xlu0 %v16327_v25, %s23281_s19 }
  0x7c   : > { %1008 = vrot.lane.b32.xlu1 %v15184_v26, %s23281_s19 }
  0x7d   : > { %1250 = vrot.lane.b32.xlu0 %v15189_v29, %s23275_s26 }
  0x80   : > { %1252 = vrot.lane.b32.xlu1 %v15191_v30, %s23275_s26 }
  0x81   : > { %1130 = vrot.lane.b32.xlu0 %v15186_v28, %s23277_s21 }
  0x84   : > { %1132 = vrot.lane.b32.xlu1 %v15189_v29, %s23277_s21 }
  0x85   : > { %1010 = vrot.lane.b32.xlu0 %v15185_v27, %s23281_s19 }
  0x88   : > { %1012 = vrot.lane.b32.xlu1 %v15186_v28, %s23281_s19 }
  0x89   : > { %1254 = vrot.lane.b32.xlu0 %v15194_v31, %s23275_s26 }
  0x8c   : > { %1256 = vrot.lane.b32.xlu1 %v15196_v32, %s23275_s26 }
  0x8d   : > { %1134 = vrot.lane.b32.xlu0 %v15191_v30, %s23277_s21 }
  0x90   : > { %1136 = vrot.lane.b32.xlu1 %v15194_v31, %s23277_s21 }
  0x91   : > { %1014 = vrot.lane.b32.xlu0 %v15189_v29, %s23281_s19  ;;  %v15212_v29 = vld [vmem:[%s16214_s0 + $0x108] sm:$0xff]  }
  0x94   : > { %1016 = vrot.lane.b32.xlu1 %v15191_v30, %s23281_s19 }
  0x95   : > { %1258 = vrot.lane.b32.xlu0 %v15199_v33, %s23275_s26 }
  0x96   : > { %v1223_v35 = vpop.permute.xlu1 %1222 }
  0x97   : > { %v979_v36 = vpop.permute.xlu0 %978 }
  0x98   : > { %1260 = vrot.lane.b32.xlu1 %v15202_v34, %s23275_s26  ;;  %v1347_v40 = vsel %vm1344_vm0, %v15201_v37, %v979_v36  ;;  %v15213_v37 = vld [vmem:[%s16214_s0 + $0x110] sm:$0xff]  }
  0x99   : > { %1138 = vrot.lane.b32.xlu0 %v15196_v32, %s23277_s21 }
  0x9a   : > { %v981_v39 = vpop.permute.xlu1 %980 }
  0x9b   : > { %v1101_v41 = vpop.permute.xlu0 %1100  ;;  %v1350_v47 = vsel %vm1344_vm0, %v15204_v38, %v981_v39 }
  0x9c   : > { %v1515_v43 = vsel %vm1513_vm1, %v1347_v40, %v1101_v41  ;;  %1140 = vrot.lane.b32.xlu1 %v15199_v33, %s23277_s21 }
  0x9d   : > { %1018 = vrot.lane.b32.xlu0 %v15194_v31, %s23281_s19  ;;  %v1628_v44 = vsel %vm1626_vm2, %v1515_v43, %v1223_v35  ;;  %v15926_v31 = vld [vmem:[%s16214_s0 + $0x30] sm:$0xff]  }
  0x9e   : > { %2035 = vmatmul.mubr.bf16.vlgmr.msra.gmra.mrb[0].mxu0 %v1628_v44  ;;  %v1225_v45 = vpop.permute.xlu1 %1224 }
  0x9f   : > { %v1103_v48 = vpop.permute.xlu0 %1102  ;;  %13096 = vmatprep.mubr.msk.bf16.mxu0 %vm1344_vm0, %v16254_v14 }
  0xa0   : > { %1020 = vrot.lane.b32.xlu1 %v15196_v32, %s23281_s19  ;;  %v1517_v49 = vsel %vm1513_vm1, %v1350_v47, %v1103_v48  ;;  %v15928_v47 = vld [vmem:[%s16214_s0 + $0x40] sm:$0xff]  }
  0xa1   : > { %1262 = vrot.lane.b32.xlu0 %v15205_v42, %s23275_s26  ;;  %v1631_v52 = vsel %vm1626_vm2, %v1517_v49, %v1225_v45 }
  0xa2   : > { %v1105_v50 = vpop.permute.xlu1 %1104 }
  0xa3   : > { %v983_v51 = vpop.permute.xlu0 %982 }
  0xa4   : > { %1264 = vrot.lane.b32.xlu1 %v15206_v46, %s23275_s26  ;;  %v1353_v54 = vsel %vm1344_vm0, %v16222_v5, %v983_v51  ;;  %v15209_v5 = vld [vmem:[%s16214_s0 + $0xf0] sm:$0xff]  }
  0xa5   : > { %1142 = vrot.lane.b32.xlu0 %v15202_v34, %s23277_s21  ;;  %v1519_v57 = vsel %vm1513_vm1, %v1353_v54, %v1105_v50  ;;  %v15215_v50 = vld [vmem:[%s16214_s0 + $0x120] sm:$0xff]   ;;  %v15216_v54 = vld [vmem:[%s16214_s0 + $0x128] sm:$0xff]  }
  0xa6   : > { %2043 = vmatmul.mubr.bf16.gmra.mrb[4].mxu0 %v1631_v52  ;;  %v985_v53 = vpop.permute.xlu1 %984 }
  0xa7   : > { %v1227_v55 = vpop.permute.xlu0 %1226  ;;  %13097 = vmatprep.mubr.msk.bf16.mxu0 %vm1344_vm0, %v16270_v17  ;;  %v1356_v0 = vsel %vm1344_vm0, %v15923_v63, %v985_v53  ;;  %v15217_v63 = vld [vmem:[%s16214_s0 + $0x130] sm:$0xff]  }
  0xa8   : > { %1144 = vrot.lane.b32.xlu1 %v15205_v42, %s23277_s21  ;;  %v1634_v61 = vsel %vm1626_vm2, %v1519_v57, %v1227_v55 }
  0xa9   : > { %1022 = vrot.lane.b32.xlu0 %v15199_v33, %s23281_s19 }
  0xaa   : > { %v1229_v59 = vpop.permute.xlu1 %1228 }
  0xab   : > { %v1107_v60 = vpop.permute.xlu0 %1106 }
  0xac   : > { %1024 = vrot.lane.b32.xlu1 %v15202_v34, %s23281_s19  ;;  %v1521_v3 = vsel %vm1513_vm1, %v1356_v0, %v1107_v60 }
  0xad   : > { %1266 = vrot.lane.b32.xlu0 %v15207_v56, %s23275_s26  ;;  %v1637_v7 = vsel %vm1626_vm2, %v1521_v3, %v1229_v59  ;;  %v15931_v3 = vld [vmem:[%s16214_s0 + $0x50] sm:$0xff]  }
  0xae   : > { %2051 = vmatmul.mubr.bf16.gmra.mrb[8].mxu0 %v1634_v61  ;;  %v1109_v62 = vpop.permute.xlu1 %1108 }
  0xaf   : > { %13098 = vmatprep.mubr.msk.bf16.mxu0 %vm1344_vm0, %v16278_v19  ;;  %v987_v2 = vpop.permute.xlu0 %986 }
  0xb0   : > { %1268 = vrot.lane.b32.xlu1 %v15208_v58, %s23275_s26  ;;  %v1359_v11 = vsel %vm1344_vm0, %v15924_v10, %v987_v2 }
  0xb1   : > { %1146 = vrot.lane.b32.xlu0 %v15206_v46, %s23277_s21  ;;  %v1523_v13 = vsel %vm1513_vm1, %v1359_v11, %v1109_v62 }
  0xb2   : > { %v989_v4 = vpop.permute.xlu1 %988 }
  0xb3   : > { %v1231_v6 = vpop.permute.xlu0 %1230  ;;  %v1362_v19 = vsel %vm1344_vm0, %v15925_v18, %v989_v4 }
  0xb4   : > { %1148 = vrot.lane.b32.xlu1 %v15207_v56, %s23277_s21  ;;  %v1640_v16 = vsel %vm1626_vm2, %v1523_v13, %v1231_v6  ;;  %v15933_v13 = vld [vmem:[%s16214_s0 + $0x58] sm:$0xff]  }
  0xb5   : > { %1026 = vrot.lane.b32.xlu0 %v15205_v42, %s23281_s19  ;;  %v15214_v42 = vld [vmem:[%s16214_s0 + $0x118] sm:$0xff]  }
  0xb6   : > { %2059 = vmatmul.mubr.bf16.gmra.mrb[12].mxu0 %v1637_v7  ;;  %v1233_v9 = vpop.permute.xlu1 %1232  ;;  %v15218_v7 = vld [vmem:[%s16214_s0 + $0x138] sm:$0xff]  }
  0xb7   : > { %13099 = vmatprep.mubr.msk.bf16.mxu0 %vm1344_vm0, %v16291_v21  ;;  %v1111_v12 = vpop.permute.xlu0 %1110  ;;  %v15211_v21 = vld [vmem:[%s16214_s0 + $0x100] sm:$0xff]  }
  0xb8   : > { %1028 = vrot.lane.b32.xlu1 %v15206_v46, %s23281_s19  ;;  %v1525_v26 = vsel %vm1513_vm1, %v1362_v19, %v1111_v12 }
  0xb9   : > { %1270 = vrot.lane.b32.xlu0 %v15209_v5, %s23275_s26  ;;  %v1643_v30 = vsel %vm1626_vm2, %v1525_v26, %v1233_v9 }
  0xba   : > { %v1113_v14 = vpop.permute.xlu1 %1112 }
  0xbb   : > { %v991_v15 = vpop.permute.xlu0 %990 }
  0xbc   : > { %1272 = vrot.lane.b32.xlu1 %v15210_v8, %s23275_s26  ;;  %v1365_v32 = vsel %vm1344_vm0, %v15926_v31, %v991_v15  ;;  %v16512_v15 = vld [vmem:[%s16214_s0 + $0x98] sm:$0xff]  }
  0xbd   : > { %1150 = vrot.lane.b32.xlu0 %v15208_v58, %s23277_s21  ;;  %v1527_v34 = vsel %vm1513_vm1, %v1365_v32, %v1113_v14 }
  0xbe   : > { %2067 = vmatmul.mubr.bf16.gmra.mrb[16].mxu0 %v1640_v16  ;;  %v993_v17 = vpop.permute.xlu1 %992 }
  0xbf   : > { %13100 = vmatprep.mubr.msk.bf16.mxu0 %vm1344_vm0, %v16298_v22  ;;  %v1235_v20 = vpop.permute.xlu0 %1234 }
  0xc0   : > { %1152 = vrot.lane.b32.xlu1 %v15209_v5, %s23277_s21  ;;  %v1646_v38 = vsel %vm1626_vm2, %v1527_v34, %v1235_v20  ;;  %v16548_v34 = vld [vmem:[%s16214_s0 + $0x150] sm:$0xff]  }
  0xc1   : > { %1030 = vrot.lane.b32.xlu0 %v15207_v56, %s23281_s19  ;;  %v15929_v56 = vld [vmem:[%s16214_s0 + $0x48] sm:$0xff]  }
  0xc2   : > { %v1237_v27 = vpop.permute.xlu1 %1236 }
  0xc3   : > { %v1115_v28 = vpop.permute.xlu0 %1114 }
  0xc4   : > { %1032 = vrot.lane.b32.xlu1 %v15208_v58, %s23281_s19  ;;  %v16478_v58 = vld [vmem:[%s16214_s0 + $0x88] sm:$0xff]  }
  0xc5   : > { %1274 = vrot.lane.b32.xlu0 %v15211_v21, %s23275_s26 }
  0xc6   : > { %2075 = vmatmul.mubr.bf16.gmra.mrb[20].mxu0 %v1643_v30  ;;  %v1117_v22 = vpop.permute.xlu1 %1116  ;;  %v16533_v30 = vld [vmem:[%s16214_s0 + $0xa0] sm:$0xff]  }
  0xc7   : > { %13101 = vmatprep.mubr.msk.bf16.mxu0 %vm1344_vm0, %v16309_v23  ;;  %v995_v33 = vpop.permute.xlu0 %994  ;;  %v15927_v23 = vld [vmem:[%s16214_s0 + $0x38] sm:$0xff]  }
  0xc8   : > { %1276 = vrot.lane.b32.xlu1 %v15212_v29, %s23275_s26  ;;  %v1368_v40 = vsel %vm1344_vm0, %v15927_v23, %v993_v17  ;;  %v1371_v48 = vsel %vm1344_vm0, %v15928_v47, %v995_v33  ;;  %v15219_v17 = vld [vmem:[%s16214_s0 + $0x140] sm:$0xff]  }
  0xc9   : > { %1154 = vrot.lane.b32.xlu0 %v15210_v8, %s23277_s21  ;;  %v1529_v43 = vsel %vm1513_vm1, %v1368_v40, %v1115_v28  ;;  %v1531_v51 = vsel %vm1513_vm1, %v1371_v48, %v1117_v22  ;;  %v15935_v28 = vld [vmem:[%s16214_s0 + $0x60] sm:$0xff]   ;;  %v16565_v40 = vld [vmem:[%s16214_s0 + $0x158] sm:$0xff]   ;;  %v16585_v48 = vld [vmem:[%s16214_s0 + $0xb0] sm:$0xff]  }
  0xca   : > { %v997_v35 = vpop.permute.xlu1 %996  ;;  %v1649_v46 = vsel %vm1626_vm2, %v1529_v43, %v1237_v27  ;;  %v15223_v47 = vld [vmem:[%s16214_s0 + $0x160] sm:$0xff]  }
  0xcb   : > { %v1239_v36 = vpop.permute.xlu0 %1238  ;;  %v1374_v57 = vsel %vm1344_vm0, %v15929_v56, %v997_v35 }
  0xcc   : > { %1156 = vrot.lane.b32.xlu1 %v15211_v21, %s23277_s21  ;;  %v1652_v55 = vsel %vm1626_vm2, %v1531_v51, %v1239_v36 }
  0xcd   : > { %1034 = vrot.lane.b32.xlu0 %v15209_v5, %s23281_s19  ;;  %v16494_v5 = vld [vmem:[%s16214_s0 + $0x90] sm:$0xff]  }
  0xce   : > { %2083 = vmatmul.mubr.bf16.gmra.mrb[24].mxu0 %v1646_v38  ;;  %v1241_v39 = vpop.permute.xlu1 %1240 }
  0xcf   : > { %13102 = vmatprep.mubr.msk.bf16.mxu0 %vm1344_vm0, %v16316_v24  ;;  %v1119_v41 = vpop.permute.xlu0 %1118 }
  0xd0   : > { %1036 = vrot.lane.b32.xlu1 %v15210_v8, %s23281_s19  ;;  %v1533_v60 = vsel %vm1513_vm1, %v1374_v57, %v1119_v41  ;;  %v16610_v57 = vld [vmem:[%s16214_s0 + $0xb8] sm:$0xff]  }
  0xd1   : > { %1278 = vrot.lane.b32.xlu0 %v15213_v37, %s23275_s26  ;;  %v1655_v0 = vsel %vm1626_vm2, %v1533_v60, %v1241_v39  ;;  %v16557_v39 = vld [vmem:[%s16214_s0 + $0xa8] sm:$0xff]  }
  0xd2   : > { %v1121_v44 = vpop.permute.xlu1 %1120 }
  0xd3   : > { %v999_v45 = vpop.permute.xlu0 %998 }
  0xd4   : > { %1280 = vrot.lane.b32.xlu1 %v15214_v42, %s23275_s26  ;;  %v1377_v4 = vsel %vm1344_vm0, %v15931_v3, %v999_v45  ;;  %v15943_v3 = vld [vmem:[%s16214_s0 + $0x80] sm:$0xff]  }
  0xd5   : > { %1158 = vrot.lane.b32.xlu0 %v15212_v29, %s23277_s21  ;;  %v1535_v8 = vsel %vm1513_vm1, %v1377_v4, %v1121_v44 }
  0xd6   : > { %2091 = vmatmul.mubr.bf16.gmra.mrb[28].mxu0 %v1649_v46  ;;  %v1001_v24 = vpop.permute.xlu1 %1000  ;;  %v15939_v46 = vld [vmem:[%s16214_s0 + $0x70] sm:$0xff]  }
  0xd7   : > { %13103 = vmatprep.mubr.msk.bf16.mxu0 %vm1344_vm0, %v16327_v25  ;;  %v1243_v49 = vpop.permute.xlu0 %1242  ;;  %v1380_v14 = vsel %vm1344_vm0, %v15933_v13, %v1001_v24 }
  0xd8   : > { %1160 = vrot.lane.b32.xlu1 %v15213_v37, %s23277_s21  ;;  %v1658_v11 = vsel %vm1626_vm2, %v1535_v8, %v1243_v49 }
  0xd9   : > { %1038 = vrot.lane.b32.xlu0 %v15211_v21, %s23281_s19  ;;  %v15220_v21 = vld [vmem:[%s16214_s0 + $0x148] sm:$0xff]  }
  0xda   : > { %v1245_v52 = vpop.permute.xlu1 %1244 }
  0xdb   : > { %v1123_v53 = vpop.permute.xlu0 %1122 }
  0xdc   : > { %1040 = vrot.lane.b32.xlu1 %v15212_v29, %s23281_s19  ;;  %v1537_v18 = vsel %vm1513_vm1, %v1380_v14, %v1123_v53  ;;  %v15224_v53 = vld [vmem:[%s16214_s0 + $0x168] sm:$0xff]  }
  0xdd   : > { %1282 = vrot.lane.b32.xlu0 %v15215_v50, %s23275_s26  ;;  %v1661_v26 = vsel %vm1626_vm2, %v1537_v18, %v1245_v52 }
  0xde   : > { %2099 = vmatmul.mubr.bf16.gmra.mrb[32].mxu0 %v1652_v55  ;;  %v1125_v25 = vpop.permute.xlu1 %1124 }
  0xdf   : > { %13104 = vmatprep.mubr.msk.bf16.mxu0 %vm1344_vm0, %v16478_v58  ;;  %v1003_v59 = vpop.permute.xlu0 %1002 }
  0xe0   : > { %1284 = vrot.lane.b32.xlu1 %v15216_v54, %s23275_s26  ;;  %v1383_v29 = vsel %vm1344_vm0, %v15935_v28, %v1003_v59 }
  0xe1   : > { %1162 = vrot.lane.b32.xlu0 %v15214_v42, %s23277_s21  ;;  %v1539_v31 = vsel %vm1513_vm1, %v1383_v29, %v1125_v25  ;;  %v15941_v25 = vld [vmem:[%s16214_s0 + $0x78] sm:$0xff]   ;;  %v16691_v29 = vld [vmem:[%s16214_s0 + $0xd0] sm:$0xff]  }
  0xe2   : > { %v1005_v61 = vpop.permute.xlu1 %1004 }
  0xe3   : > { %v1247_v62 = vpop.permute.xlu0 %1246 }
  0xe4   : > { %1164 = vrot.lane.b32.xlu1 %v15215_v50, %s23277_s21  ;;  %v1664_v35 = vsel %vm1626_vm2, %v1539_v31, %v1247_v62 }
  0xe5   : > { %1042 = vrot.lane.b32.xlu0 %v15213_v37, %s23281_s19  ;;  %v15937_v37 = vld [vmem:[%s16214_s0 + $0x68] sm:$0xff]  }
  0xe6   : > { %2107 = vmatmul.mubr.bf16.gmra.mrb[36].mxu0 %v1655_v0  ;;  %v16489_v2 = vpop.permute.xlu1 %1248  ;;  %v1386_v38 = vsel %vm1344_vm0, %v15937_v37, %v1005_v61 }
  0xe7   : > { %13105 = vmatprep.mubr.msk.bf16.mxu0 %vm1344_vm0, %v16494_v5  ;;  %v1127_v6 = vpop.permute.xlu0 %1126 }
  0xe8   : > { %1044 = vrot.lane.b32.xlu1 %v15214_v42, %s23281_s19  ;;  %v1541_v41 = vsel %vm1513_vm1, %v1386_v38, %v1127_v6  ;;  %v15226_v6 = vld [vmem:[%s16214_s0 + $0x178] sm:$0xff]  }
  0xe9   : > { %1286 = vrot.lane.b32.xlu0 %v15217_v63, %s23275_s26  ;;  %v1667_v44 = vsel %vm1626_vm2, %v1541_v41, %v16489_v2  ;;  %v16719_v38 = vld [vmem:[%s16214_s0 + $0xd8] sm:$0xff]  }
  0xea   : > { %v16502_v9 = vpop.permute.xlu1 %1128  ;;  %v16727_v41 = vld [vmem:[%s16214_s0 + $0x198] sm:$0xff]  }
  0xeb   : > { %v1007_v10 = vpop.permute.xlu0 %1006 }
  0xec   : > { %1288 = vrot.lane.b32.xlu1 %v15218_v7, %s23275_s26  ;;  %v1389_v24 = vsel %vm1344_vm0, %v15939_v46, %v1007_v10 }
  0xed   : > { %1166 = vrot.lane.b32.xlu0 %v15216_v54, %s23277_s21 }
  0xee   : > { %2115 = vmatmul.mubr.bf16.gmra.mrb[40].mxu0 %v1658_v11  ;;  %v16507_v12 = vpop.permute.xlu1 %1008 }
  0xef   : > { %13106 = vmatprep.mubr.msk.bf16.mxu0 %vm1344_vm0, %v16512_v15  ;;  %v1251_v16 = vpop.permute.xlu0 %1250  ;;  %v1392_v56 = vsel %vm1344_vm0, %v15941_v25, %v16507_v12 }
  0xf0   : > { %1168 = vrot.lane.b32.xlu1 %v15217_v63, %s23277_s21 }
  0xf1   : > { %1046 = vrot.lane.b32.xlu0 %v15215_v50, %s23281_s19  ;;  %v1543_v50 = vsel %vm1513_vm1, %v1389_v24, %v16502_v9  ;;  %v16749_v24 = vld [vmem:[%s16214_s0 + $0xe0] sm:$0xff]  }
  0xf2   : > { %v16520_v19 = vpop.permute.xlu1 %1252 }
  0xf3   : > { %v16522_v20 = vpop.permute.xlu0 %1130 }
  0xf4   : > { %1048 = vrot.lane.b32.xlu1 %v15216_v54, %s23281_s19  ;;  %v1670_v54 = vsel %vm1626_vm2, %v1543_v50, %v1251_v16  ;;  %v1545_v60 = vsel %vm1513_vm1, %v1392_v56, %v16522_v20  ;;  %v15227_v16 = vld [vmem:[%s16214_s0 + $0x180] sm:$0xff]  }
  0xf5   : > { %1290 = vrot.lane.b32.xlu0 %v15219_v17, %s23275_s26  ;;  %v1673_v0 = vsel %vm1626_vm2, %v1545_v60, %v16520_v19  ;;  %v16762_v50 = vld [vmem:[%s16214_s0 + $0x1a0] sm:$0xff]  }
  0xf6   : > { %2123 = vmatmul.mubr.bf16.gmra.mrb[44].mxu0 %v1661_v26  ;;  %v16528_v27 = vpop.permute.xlu1 %1132 }
  0xf7   : > { %13107 = vmatprep.mubr.msk.bf16.mxu0 %vm1344_vm0, %v16533_v30  ;;  %v16537_v22 = vpop.permute.xlu0 %1010 }
  0xf8   : > { %1292 = vrot.lane.b32.xlu1 %v15220_v21, %s23275_s26  ;;  %v1395_v4 = vsel %vm1344_vm0, %v15943_v3, %v16537_v22 }
  0xf9   : > { %1170 = vrot.lane.b32.xlu0 %v15218_v7, %s23277_s21  ;;  %v1547_v9 = vsel %vm1513_vm1, %v1395_v4, %v16528_v27  ;;  %v2612_v4 = vld [vmem:[%s23254_s3 + $0x88] sm:$0xff] }
  0xfa   : > { %v16542_v32 = vpop.permute.xlu1 %1012 }
  0xfb   : > { %v16544_v33 = vpop.permute.xlu0 %1254  ;;  %v1398_v14 = vsel %vm1344_vm0, %v16478_v58, %v16542_v32 }
  0xfc   : > { %1172 = vrot.lane.b32.xlu1 %v15219_v17, %s23277_s21  ;;  %v1676_v12 = vsel %vm1626_vm2, %v1547_v9, %v16544_v33  ;;  %v16708_v33 = vld [vmem:[%s16214_s0 + $0x190] sm:$0xff]  }
  0xfd   : > { %1050 = vrot.lane.b32.xlu0 %v15217_v63, %s23281_s19  ;;  %v15225_v63 = vld [vmem:[%s16214_s0 + $0x170] sm:$0xff]  }
  0xfe   : > { %2131 = vmatmul.mubr.bf16.gmra.mrb[48].mxu0 %v1664_v35  ;;  %v16552_v36 = vpop.permute.xlu1 %1256 }
  0xff   : > { %13108 = vmatprep.mubr.msk.bf16.mxu0 %vm1344_vm0, %v16557_v39  ;;  %v16561_v23 = vpop.permute.xlu0 %1134 }
 0x100   : > { %1052 = vrot.lane.b32.xlu1 %v15218_v7, %s23281_s19  ;;  %v16638_v7 = vld [vmem:[%s16214_s0 + $0xc0] sm:$0xff]   ;;  %v1549_v19 = vsel %vm1513_vm1, %v1398_v14, %v16561_v23  ;;  %v2596_v14 = vld [vmem:[%s23254_s3 + $0x8] sm:$0xff] }
 0x101   : > { %1294 = vrot.lane.b32.xlu0 %v16548_v34, %s23275_s26  ;;  %v1679_v26 = vsel %vm1626_vm2, %v1549_v19, %v16552_v36 }
 0x102   : > { %v16570_v42 = vpop.permute.xlu1 %1136 }
 0x103   : > { %v16572_v43 = vpop.permute.xlu0 %1014 }
 0x104   : > { %1296 = vrot.lane.b32.xlu1 %v16565_v40, %s23275_s26  ;;  %v1401_v28 = vsel %vm1344_vm0, %v16494_v5, %v16572_v43 }
 0x105   : > { %1174 = vrot.lane.b32.xlu0 %v15220_v21, %s23277_s21  ;;  %v1551_v31 = vsel %vm1513_vm1, %v1401_v28, %v16570_v42  ;;  %v2613_v28 = vld [vmem:[%s23254_s3 + $0x90] sm:$0xff] }
 0x106   : > { %2139 = vmatmul.mubr.bf16.gmra.mrb[52].mxu0 %v1667_v44  ;;  %v16579_v45 = vpop.permute.xlu1 %1016 }
 0x107   : > { %13109 = vmatprep.mubr.msk.bf16.mxu0 %vm1344_vm0, %v16585_v48  ;;  %v16589_v49 = vpop.permute.xlu0 %1258  ;;  %v1404_v37 = vsel %vm1344_vm0, %v16512_v15, %v16579_v45 }
 0x108   : > { %1176 = vrot.lane.b32.xlu1 %v16548_v34, %s23277_s21  ;;  %v1682_v35 = vsel %vm1626_vm2, %v1551_v31, %v16589_v49  ;;  %v2606_v49 = vld [vmem:[%s23254_s3 + $0x58] sm:$0xff] }
 0x109   : > { %1054 = vrot.lane.b32.xlu0 %v15219_v17, %s23281_s19  ;;  %v16664_v17 = vld [vmem:[%s16214_s0 + $0xc8] sm:$0xff]   ;;  %v2614_v31 = vld [vmem:[%s23254_s3 + $0x98] sm:$0xff] }
 0x10a   : > { %v16596_v51 = vpop.permute.xlu1 %1260 }
 0x10b   : > { %v16598_v52 = vpop.permute.xlu0 %1138 }
 0x10c   : > { %1056 = vrot.lane.b32.xlu1 %v15220_v21, %s23281_s19  ;;  %v16677_v21 = vld [vmem:[%s16214_s0 + $0x188] sm:$0xff]   ;;  %v1553_v42 = vsel %vm1513_vm1, %v1404_v37, %v16598_v52  ;;  %v16850_v37 = vld [vmem:[%s16214_s0 + $0xf8] sm:$0xff]  }
 0x10d   : > { %1298 = vrot.lane.b32.xlu0 %v15223_v47, %s23275_s26  ;;  %v1685_v44 = vsel %vm1626_vm2, %v1553_v42, %v16596_v51  ;;  %v2615_v42 = vld [vmem:[%s23254_s3 + $0xa0] sm:$0xff] }
 0x10e   : > { %2147 = vmatmul.mubr.bf16.gmra.mrb[56].mxu0 %v1670_v54  ;;  %v16604_v55 = vpop.permute.xlu1 %1140  ;;  %v2608_v54 = vld [vmem:[%s23254_s3 + $0x68] sm:$0xff] }
 0x10f   : > { %13110 = vmatprep.mubr.msk.bf16.mxu0 %vm1344_vm0, %v16610_v57  ;;  %v16614_v59 = vpop.permute.xlu0 %1018 }
 0x110   : > { %1300 = vrot.lane.b32.xlu1 %v15224_v53, %s23275_s26  ;;  %v1407_v46 = vsel %vm1344_vm0, %v16533_v30, %v16614_v59  ;;  %v16786_v59 = vld [vmem:[%s16214_s0 + $0xe8] sm:$0xff]  }
 0x111   : > { %1178 = vrot.lane.b32.xlu0 %v16565_v40, %s23277_s21  ;;  %v1555_v30 = vsel %vm1513_vm1, %v1407_v46, %v16604_v55  ;;  %v2607_v55 = vld [vmem:[%s23254_s3 + $0x60] sm:$0xff] }
 0x112   : > { %v16621_v61 = vpop.permute.xlu1 %1020 }
 0x113   : > { %v16623_v62 = vpop.permute.xlu0 %1262  ;;  %v1410_v56 = vsel %vm1344_vm0, %v16557_v39, %v16621_v61  ;;  %v2611_v39 = vld [vmem:[%s23254_s3 + $0x80] sm:$0xff] }
 0x114   : > { %1180 = vrot.lane.b32.xlu1 %v15223_v47, %s23277_s21 }
 0x115   : > { %1058 = vrot.lane.b32.xlu0 %v16548_v34, %s23281_s19 }
 0x116   : > { %2155 = vmatmul.mubr.bf16.gmra.mrb[60].mxu0 %v1673_v0  ;;  %v16631_v2 = vpop.permute.xlu1 %1264 }
 0x117   : > { %13111 = vmatprep.mubr.msk.bf16.mxu0 %vm1344_vm0, %v16638_v7  ;;  %v16642_v8 = vpop.permute.xlu0 %1142 }
 0x118   : > { %1060 = vrot.lane.b32.xlu1 %v16565_v40, %s23281_s19 }
 0x119   : > { %1302 = vrot.lane.b32.xlu0 %v15225_v63, %s23275_s26 }
 0x11a   : > { %v16649_v10 = vpop.permute.xlu1 %1144 }
 0x11b   : > { %v16651_v11 = vpop.permute.xlu0 %1022 }
 0x11c   : > { %1304 = vrot.lane.b32.xlu1 %v15226_v6, %s23275_s26  ;;  %v1413_v9 = vsel %vm1344_vm0, %v16585_v48, %v16651_v11 }
 0x11d   : > { %1182 = vrot.lane.b32.xlu0 %v15224_v53, %s23277_s21  ;;  %v1559_v48 = vsel %vm1513_vm1, %v1413_v9, %v16649_v10 }
 0x11e   : > { %2163 = vmatmul.mubr.bf16.gmra.mrb[64].mxu0 %v1676_v12  ;;  %v16657_v13 = vpop.permute.xlu1 %1024  ;;  %v16818_v12 = vld [vmem:[%s16214_s0 + $0xf0] sm:$0xff]  }
 0x11f   : > { %13112 = vmatprep.mubr.msk.bf16.mxu0 %vm1344_vm0, %v16664_v17  ;;  %v16668_v18 = vpop.permute.xlu0 %1266  ;;  %v1416_v10 = vsel %vm1344_vm0, %v16610_v57, %v16657_v13  ;;  %v2616_v57 = vld [vmem:[%s23254_s3 + $0xa8] sm:$0xff] }
 0x120   : > { %1184 = vrot.lane.b32.xlu1 %v15225_v63, %s23277_s21 }
 0x121   : > { %1062 = vrot.lane.b32.xlu0 %v15223_v47, %s23281_s19 }
 0x122   : > { %v16674_v20 = vpop.permute.xlu1 %1268 }
 0x123   : > { %v16679_v58 = vpop.permute.xlu0 %1146 }
 0x124   : > { %1064 = vrot.lane.b32.xlu1 %v15224_v53, %s23281_s19  ;;  %v1688_v53 = vsel %vm1626_vm2, %v1555_v30, %v16623_v62  ;;  %v2610_v62 = vld [vmem:[%s23254_s3 + $0x78] sm:$0xff]  ;;  %v2597_v30 = vld [vmem:[%s23254_s3 + $0x10] sm:$0xff] }
 0x125   : > { %1306 = vrot.lane.b32.xlu0 %v15227_v16, %s23275_s26 }
 0x126   : > { %2171 = vmatmul.mubr.bf16.gmra.mrb[68].mxu0 %v1679_v26  ;;  %v16685_v27 = vpop.permute.xlu1 %1148  ;;  %v1694_v26 = vsel %vm1626_vm2, %v1559_v48, %v16668_v18 }
 0x127   : > { %13113 = vmatprep.mubr.msk.bf16.mxu0 %vm1344_vm0, %v16691_v29  ;;  %v16695_v22 = vpop.permute.xlu0 %1026 }
 0x128   : > { %1308 = vrot.lane.b32.xlu1 %v16677_v21, %s23275_s26 }
 0x129   : > { %1186 = vrot.lane.b32.xlu0 %v15226_v6, %s23277_s21 }
 0x12a   : > { %v16702_v32 = vpop.permute.xlu1 %1028 }
 0x12b   : > { %v16704_v5 = vpop.permute.xlu0 %1270 }
 0x12c   : > { %1188 = vrot.lane.b32.xlu1 %v15227_v16, %s23277_s21 }
 0x12d   : > { %1066 = vrot.lane.b32.xlu0 %v15225_v63, %s23281_s19  ;;  %v1557_v63 = vsel %vm1513_vm1, %v1410_v56, %v16642_v8  ;;  %v2599_v56 = vld [vmem:[%s23254_s3 + $0x20] sm:$0xff] }
 0x12e   : > { %2179 = vmatmul.mubr.bf16.gmra.mrb[72].mxu0 %v1682_v35  ;;  %v16713_v36 = vpop.permute.xlu1 %1272  ;;  %v1691_v3 = vsel %vm1626_vm2, %v1557_v63, %v16631_v2 }
 0x12f   : > { %13114 = vmatprep.mubr.msk.bf16.mxu0 %vm1344_vm0, %v16719_v38  ;;  %v16723_v23 = vpop.permute.xlu0 %1150 }
 0x130   : > { %1068 = vrot.lane.b32.xlu1 %v15226_v6, %s23281_s19  ;;  %v2595_v6 = vld [vmem:[%s23254_s3] sm:$0xff] }
 0x131   : > { %1310 = vrot.lane.b32.xlu0 %v16708_v33, %s23275_s26 }
 0x132   : > { %v16733_v15 = vpop.permute.xlu1 %1152 }
 0x133   : > { %v16735_v43 = vpop.permute.xlu0 %1030 }
 0x134   : > { %1312 = vrot.lane.b32.xlu1 %v16727_v41, %s23275_s26 }
 0x135   : > { %1190 = vrot.lane.b32.xlu0 %v16677_v21, %s23277_s21 }
 0x136   : > { %2187 = vmatmul.mubr.bf16.gmra.mrb[76].mxu0 %v1685_v44  ;;  %v16743_v45 = vpop.permute.xlu1 %1032  ;;  %v1561_v44 = vsel %vm1513_vm1, %v1416_v10, %v16679_v58  ;;  %v2598_v58 = vld [vmem:[%s23254_s3 + $0x18] sm:$0xff] }
 0x137   : > { %13115 = vmatprep.mubr.msk.bf16.mxu0 %vm1344_vm0, %v16749_v24  ;;  %v16753_v47 = vpop.permute.xlu0 %1274 }
 0x138   : > { %1192 = vrot.lane.b32.xlu1 %v16708_v33, %s23277_s21 }
 0x139   : > { %1070 = vrot.lane.b32.xlu0 %v15227_v16, %s23281_s19  ;;  %v2609_v16 = vld [vmem:[%s23254_s3 + $0x70] sm:$0xff] }
 0x13a   : > { %v16766_v51 = vpop.permute.xlu1 %1276 }
 0x13b   : > { %v16768_v52 = vpop.permute.xlu0 %1154 }
 0x13c   : > { %2764 = vperm.xlu1 %15167, %v2606_v49   ;;  %v1697_v49 = vsel %vm1626_vm2, %v1561_v44, %v16674_v20 }
 0x13d   : > { %1314 = vrot.lane.b32.xlu0 %v16762_v50, %s23275_s26 }
 0x13e   : > { %2195 = vmatmul.mubr.bf16.gmra.mrb[80].mxu0 %v1688_v53  ;;  %v16780_v25 = vpop.permute.xlu1 %1156 }
 0x13f   : > { %13116 = vmatprep.mubr.msk.bf16.mxu0 %vm1344_vm0, %v16786_v59  ;;  %v16790_v60 = vpop.permute.xlu0 %1034 }
 0x140   : > { %2774 = vperm.xlu1 %15167, %v2608_v54   ;;  %v1419_v54 = vsel %vm1344_vm0, %v16638_v7, %v16695_v22 }
 0x141   : > { %2769 = vperm.xlu0 %15168, %v2607_v55   ;;  %v16882_v55 = vld [vmem:[%s16214_s0 + $0x100] sm:$0xff]   ;;  %v1563_v7 = vsel %vm1513_vm1, %v1419_v54, %v16685_v27  ;;  %v1422_v27 = vsel %vm1344_vm0, %v16664_v17, %v16702_v32 }
 0x142   : > { %v16800_v61 = vpop.permute.xlu1 %1036 }
 0x143   : > { %v16802_v0 = vpop.permute.xlu0 %1278 }
 0x144   : > { %2784 = vperm.xlu1 %15167, %v2610_v62   ;;  %v2600_v62 = vld [vmem:[%s23254_s3 + $0x28] sm:$0xff] }
 0x145   : > { %2789 = vperm.xlu0 %15168, %v2611_v39   ;;  %v1700_v39 = vsel %vm1626_vm2, %v1563_v7, %v16704_v5  ;;  %v1565_v5 = vsel %vm1513_vm1, %v1422_v27, %v16723_v23  ;;  %v2618_v23 = vld [vmem:[%s23254_s3 + $0xb8] sm:$0xff] }
 0x146   : > { %2203 = vmatmul.mubr.bf16.gmra.mrb[84].mxu0 %v1691_v3  ;;  %v16812_v8 = vpop.permute.xlu1 %1280  ;;  %v2617_v3 = vld [vmem:[%s23254_s3 + $0xb0] sm:$0xff] }
 0x147   : > { %13117 = vmatprep.mubr.msk.bf16.mxu0 %vm1344_vm0, %v16818_v12  ;;  %v16822_v2 = vpop.permute.xlu0 %1158 }
 0x148   : > { %2794 = vperm.xlu1 %15167, %v2612_v4  }
 0x149   : > { %2709 = vperm.xlu0 %15168, %v2595_v6   ;;  %v16911_v6 = vld [vmem:[%s16214_s0 + $0x108] sm:$0xff]  }
 0x14a   : > { %v16832_v11 = vpop.permute.xlu1 %1160 }
 0x14b   : > { %v16834_v19 = vpop.permute.xlu0 %1038 }
 0x14c   : > { %2714 = vperm.xlu1 %15167, %v2596_v14   ;;  %v2601_v14 = vld [vmem:[%s23254_s3 + $0x30] sm:$0xff] }
 0x14d   : > { %2779 = vperm.xlu0 %15168, %v2609_v16   ;;  %v16931_v16 = vld [vmem:[%s16214_s0 + $0x1a8] sm:$0xff]  }
 0x14e   : > { %2211 = vmatmul.mubr.bf16.gmra.mrb[88].mxu0 %v1694_v26  ;;  %v16844_v35 = vpop.permute.xlu1 %1040  ;;  %v1425_v26 = vsel %vm1344_vm0, %v16691_v29, %v16735_v43  ;;  %v2619_v29 = vld [vmem:[%s23254_s3 + $0xc0] sm:$0xff] }
 0x14f   : > { %13118 = vmatprep.mubr.msk.bf16.mxu0 %vm1344_vm0, %v16850_v37  ;;  %v16854_v18 = vpop.permute.xlu0 %1282  ;;  %v1567_v43 = vsel %vm1513_vm1, %v1425_v26, %v16733_v15  ;;  %v1428_v15 = vsel %vm1344_vm0, %v16719_v38, %v16743_v45  ;;  %v17024_v26 = vld [vmem:[%s16214_s0 + $0x1b0] sm:$0xff]  }
 0x150   : > { %2799 = vperm.xlu1 %15167, %v2613_v28   ;;  %v16944_v28 = vld [vmem:[%s16214_s0 + $0x110] sm:$0xff]   ;;  %v1706_v44 = vsel %vm1626_vm2, %v1567_v43, %v16753_v47 }
 0x151   : > { %2804 = vperm.xlu0 %15168, %v2614_v31  }
 0x152   : > { %v16864_v13 = vpop.permute.xlu1 %1284 }
 0x153   : > { %v16866_v46 = vpop.permute.xlu0 %1162 }
 0x154   : > { %2809 = vperm.xlu1 %15167, %v2615_v42  }
 0x155   : > { %2814 = vperm.xlu0 %15168, %v2616_v57   ;;  %v2603_v57 = vld [vmem:[%s23254_s3 + $0x40] sm:$0xff] }
 0x156   : > { %2219 = vmatmul.mubr.bf16.gmra.mrb[92].mxu0 %v1697_v49  ;;  %v16876_v53 = vpop.permute.xlu1 %1164  ;;  %v2620_v49 = vld [vmem:[%s23254_s3 + $0xc8] sm:$0xff] }
 0x157   : > { %13119 = vmatprep.mubr.msk.bf16.mxu0 %vm1344_vm0, %v16882_v55  ;;  %v16886_v20 = vpop.permute.xlu0 %1042 }
 0x158   : > { %2719 = vperm.xlu1 %15167, %v2597_v30  }
 0x159   : > { %2724 = vperm.xlu0 %15168, %v2598_v58   ;;  %v16978_v58 = vld [vmem:[%s16214_s0 + $0x118] sm:$0xff]  }
 0x15a   : > { %v16896_v22 = vpop.permute.xlu1 %1044 }
 0x15b   : > { %v16898_v63 = vpop.permute.xlu0 %1286 }
 0x15c   : > { %2729 = vperm.xlu1 %15167, %v2599_v56   ;;  %v2604_v56 = vld [vmem:[%s23254_s3 + $0x48] sm:$0xff] }
 0x15d   : > { %2734 = vperm.xlu0 %15168, %v2600_v62   ;;  %v1569_v62 = vsel %vm1513_vm1, %v1428_v15, %v16768_v52  ;;  %v2621_v52 = vld [vmem:[%s23254_s3 + $0xd0] sm:$0xff] }
 0x15e   : > { %2227 = vmatmul.mubr.bf16.gmra.mrb[96].mxu0 %v1700_v39  ;;  %v16905_v4 = vpop.permute.xlu1 %1288  ;;  %v1709_v27 = vsel %vm1626_vm2, %v1569_v62, %v16766_v51  ;;  %v17050_v62 = vld [vmem:[%s16214_s0 + $0x128] sm:$0xff]  }
 0x15f   : > { %13120 = vmatprep.mubr.msk.bf16.mxu0 %vm1344_vm0, %v16911_v6  ;;  %v16915_v9 = vpop.permute.xlu0 %1166 }
 0x160   : > { %1072 = vrot.lane.b32.xlu1 %v16677_v21, %s23281_s19  ;;  %v1703_v21 = vsel %vm1626_vm2, %v1565_v5, %v16713_v36  ;;  %v2602_v36 = vld [vmem:[%s23254_s3 + $0x38] sm:$0xff] }
 0x161   : > { %2819 = vperm.xlu0 %15168, %v2617_v3  }
 0x162   : > { %v16924_v17 = vpop.permute.xlu1 %1168 }
 0x163   : > { %v16926_v32 = vpop.permute.xlu0 %1046 }
 0x164   : > { %1194 = vrot.lane.b32.xlu1 %v16727_v41, %s23277_s21  ;;  %s15121_s21 = smul.u32 200, %s16203_s29 }
 0x165   : > { %2739 = vperm.xlu0 %15168, %v2601_v14   ;;  %v1431_v14 = vsel %vm1344_vm0, %v16749_v24, %v16790_v60 }
 0x166   : > { %2235 = vmatmul.mubr.bf16.gmra.mrb[100].mxu0 %v1703_v21  ;;  %v16938_v48 = vpop.permute.xlu1 %1048  ;;  %v17010_v21 = vld [vmem:[%s16214_s0 + $0x120] sm:$0xff]   ;;  %v1571_v60 = vsel %vm1513_vm1, %v1431_v14, %v16780_v25  ;;  %s21870_s23 = scalar_lea.vmem %s23267_s16, %s15121_s21 }
 0x167   : > { %13121 = vmatprep.mubr.msk.bf16.mxu0 %vm1344_vm0, %v16944_v28  ;;  %v16948_v31 = vpop.permute.xlu0 %1290  ;;  %v2623_v25 = vld [vmem:[%s23254_s3 + $0xe0] sm:$0xff] }
 0x168   : > { %1316 = vrot.lane.b32.xlu1 %v16931_v16, %s23338_s20 }
 0x169   : > { %2824 = vperm.xlu0 %15168, %v2618_v23   ;;  %v2605_v23 = vld [vmem:[%s23254_s3 + $0x50] sm:$0xff] }
 0x16a   : > { %v16960_v10 = vpop.permute.xlu1 %1292 }
 0x16b   : > { %v16962_v42 = vpop.permute.xlu0 %1170 }
 0x16c   : > { %2744 = vperm.xlu1 %15167, %v2602_v36  }
 0x16d   : > { %2829 = vperm.xlu0 %15168, %v2619_v29  }
 0x16e   : > { %2243 = vmatmul.mubr.bf16.gmra.mrb[104].mxu0 %v1706_v44  ;;  %v16972_v30 = vpop.permute.xlu1 %1172 }
 0x16f   : > { %13122 = vmatprep.mubr.msk.bf16.mxu0 %vm1344_vm0, %v16978_v58  ;;  %v16982_v47 = vpop.permute.xlu0 %1050 }
 0x170   : > { %2749 = vperm.xlu1 %15167, %v2603_v57   ;;  %v1712_v57 = vsel %vm1626_vm2, %v1571_v60, %v16802_v0 }
 0x171   : > { %2834 = vperm.xlu0 %15168, %v2620_v49   ;;  %v16984_v54 = vpop.f32.mrb[0].mxu0  ;;  %v2622_v49 = vld [vmem:[%s23254_s3 + $0xd8] sm:$0xff] }
 0x172   : > { %v2038_v38 = vpop.f32.mrb[1].mxu0  ;;  %v16991_v45 = vpop.permute.xlu1 %1052 }
 0x173   : > { %v16993_v7 = vpop.f32.mrb[2].mxu0  ;;  %v16995_v39 = vpop.permute.xlu0 %1294 }
 0x174   : > { %v2041_v3 = vpop.f32.mrb[3].mxu0  ;;  %2754 = vperm.xlu1 %15167, %v2604_v56   ;;  %v1434_v56 = vsel %vm1344_vm0, %v16786_v59, %v16800_v61 }
 0x175   : > { %1074 = vrot.lane.b32.xlu0 %v16708_v33, %s23281_s19  ;;  %v2624_v3 = vld [vmem:[%s23254_s3 + $0xe8] sm:$0xff] }
 0x176   : > { %2251 = vmatmul.mubr.bf16.gmra.mrb[108].mxu0 %v1709_v27  ;;  %v17004_v5 = vpop.permute.xlu1 %1296  ;;  %v1573_v27 = vsel %vm1513_vm1, %v1434_v56, %v16822_v2  ;;  %v2625_v2 = vld [vmem:[%s23254_s3 + $0xf0] sm:$0xff] }
 0x177   : > { %13123 = vmatprep.mubr.msk.bf16.mxu0 %vm1344_vm0, %v17010_v21  ;;  %v17014_v33 = vpop.permute.xlu0 %1174 }
 0x178   : > { %2839 = vperm.xlu1 %15167, %v2621_v52  }
 0x179   : > { %1196 = vrot.lane.b32.xlu0 %v16762_v50, %s23339_s22  ;;  %v17018_v51 = vpop.f32.mrb[4].mxu0 }
 0x17a   : > { %v2046_v24 = vpop.f32.mrb[5].mxu0  ;;  %v17028_v36 = vpop.permute.xlu1 %1176 }
 0x17b   : > { %v17030_v29 = vpop.f32.mrb[6].mxu0  ;;  %v17032_v43 = vpop.permute.xlu0 %1054  ;;  %v1715_v24 = vsel %vm1626_vm2, %v1573_v27, %v16812_v8  ;;  %v17089_v8 = vld [vmem:[%s16214_s0 + $0x1b8] sm:$0xff]  }
 0x17c   : > { %v2049_v44 = vpop.f32.mrb[7].mxu0  ;;  %2759 = vperm.xlu1 %15167, %v2605_v23  }
 0x17d   : > { %1318 = vrot.lane.b32.xlu0 %v17024_v26, %s23338_s20  ;;  %v1437_v44 = vsel %vm1344_vm0, %v16818_v12, %v16834_v19  ;;  %v2626_v12 = vld [vmem:[%s23254_s3 + $0xf8] sm:$0xff] }
 0x17e   : > { %2259 = vmatmul.mubr.bf16.gmra.mrb[112].mxu0 %v1712_v57  ;;  %v17044_v15 = vpop.permute.xlu1 %1056  ;;  %v17082_v57 = vld [vmem:[%s16214_s0 + $0x130] sm:$0xff]   ;;  %v1575_v19 = vsel %vm1513_vm1, %v1437_v44, %v16832_v11  ;;  %v2628_v11 = vld [vmem:[%s23254_s3 + $0x108] sm:$0xff]  ;;  %v1440_v44 = vsel %vm1344_vm0, %v16850_v37, %v16844_v35 }
 0x17f   : > { %13124 = vmatprep.mubr.msk.bf16.mxu0 %vm1344_vm0, %v17050_v62  ;;  %v17054_v0 = vpop.permute.xlu0 %1298  ;;  %v2629_v35 = vld [vmem:[%s23254_s3 + $0x110] sm:$0xff] }
 0x180   : > { %2844 = vperm.xlu1 %15167, %v2622_v49  }
 0x181   : > { %2849 = vperm.xlu0 %15168, %v2623_v25   ;;  %v17056_v38 = vpop.f32.mrb[8].mxu0 }
 0x182   : > { %v2054_v59 = vpop.f32.mrb[9].mxu0  ;;  %v17063_v61 = vpop.permute.xlu1 %1300 }
 0x183   : > { %v17065_v52 = vpop.f32.mrb[10].mxu0  ;;  %v17067_v14 = vpop.permute.xlu0 %1178 }
 0x184   : > { %v2057_v23 = vpop.f32.mrb[11].mxu0  ;;  %2854 = vperm.xlu1 %15167, %v2624_v3  }
 0x185   : > { %1076 = vrot.lane.b32.xlu0 %v16727_v41, %s23281_s19  ;;  %v1718_v23 = vsel %vm1626_vm2, %v1575_v19, %v16854_v18  ;;  %v1577_v19 = vsel %vm1513_vm1, %v1440_v44, %v16866_v46  ;;  %v17146_v46 = vld [vmem:[%s16214_s0 + $0x1c0] sm:$0xff]  }
 0x186   : > { %2267 = vmatmul.mubr.bf16.gmra.mrb[116].mxu0 %v1715_v24  ;;  %v17076_v60 = vpop.permute.xlu1 %1180  ;;  %v2627_v24 = vld [vmem:[%s23254_s3 + $0x100] sm:$0xff] }
 0x187   : > { %13125 = vmatprep.mubr.msk.bf16.mxu0 %vm1344_vm0, %v17082_v57  ;;  %v17086_v41 = vpop.permute.xlu0 %1058  ;;  %v17152_v44 = vld [vmem:[%s16214_s0 + $0x140] sm:$0xff]  }
 0x188   : > { %2859 = vperm.xlu1 %15167, %v2625_v2  }
 0x189   : > { %1198 = vrot.lane.b32.xlu0 %v16931_v16, %s23339_s22  ;;  %v17093_v49 = vpop.f32.mrb[12].mxu0 }
 0x18a   : > { %v2062_v25 = vpop.f32.mrb[13].mxu0  ;;  %v17100_v56 = vpop.permute.xlu1 %1060 }
 0x18b   : > { %v17102_v3 = vpop.f32.mrb[14].mxu0  ;;  %v17104_v27 = vpop.permute.xlu0 %1302  ;;  %v17122_v25 = vld [vmem:[%s16214_s0 + $0x138] sm:$0xff]  }
 0x18c   : > { %23340 = vst [vmem:[#allocation10_spill] sm:$0xff] %v17104_v27  ;;  %v2065_v59 = vpop.f32.mrb[15].mxu0  ;;  %1320 = vrot.lane.b32.xlu1 %v17089_v8, %s23338_s20  ;;  %v17186_v27 = vld [vmem:[%s16214_s0 + $0x148] sm:$0xff]  }
 0x18d   : > { %2864 = vperm.xlu0 %15168, %v2626_v12  }
 0x18e   : > { %2275 = vmatmul.mubr.bf16.gmra.mrb[120].mxu0 %v1718_v23  ;;  %v17116_v2 = vpop.permute.xlu1 %1304 }
 0x18f   : > { %23341 = vst [vmem:[#allocation11_spill] sm:$0xff] %v17116_v2  ;;  %13126 = vmatprep.mubr.msk.bf16.mxu0 %vm1344_vm0, %v17122_v25  ;;  %v17126_v18 = vpop.permute.xlu0 %1182 }
 0x190   : > { %2869 = vperm.xlu1 %15167, %v2627_v24   ;;  %v1721_v24 = vsel %vm1626_vm2, %v1577_v19, %v16864_v13  ;;  %v2630_v13 = vld [vmem:[%s23254_s3 + $0x118] sm:$0xff] }
 0x191   : > { %2874 = vperm.xlu0 %15168, %v2628_v11   ;;  %v17128_v12 = vpop.f32.mrb[16].mxu0  ;;  %v1443_v11 = vsel %vm1344_vm0, %v16882_v55, %v16886_v20  ;;  %v2631_v20 = vld [vmem:[%s23254_s3 + $0x120] sm:$0xff] }
 0x192   : > { %v2070_v59 = vpop.f32.mrb[17].mxu0  ;;  %v17135_v37 = vpop.permute.xlu1 %1184  ;;  %v1579_v19 = vsel %vm1513_vm1, %v1443_v11, %v16876_v53  ;;  %v17193_v53 = vld [vmem:[%s16214_s0 + $0x1c8] sm:$0xff]  }
 0x193   : > { %23342 = vst [vmem:[#allocation12_spill] sm:$0xff] %v17135_v37  ;;  %v17137_v23 = vpop.f32.mrb[18].mxu0  ;;  %v17139_v1 = vpop.permute.xlu0 %1062 }
 0x194   : > { %v2073_v2 = vpop.f32.mrb[19].mxu0  ;;  %1078 = vrot.lane.b32.xlu1 %v16762_v50, %s23281_s19 }
 0x195   : > { %2879 = vperm.xlu0 %15168, %v2629_v35  }
 0x196   : > { %2283 = vmatmul.mubr.bf16.gmra.mrb[124].mxu0 %v1721_v24  ;;  %v17156_v2 = vpop.permute.xlu1 %1064 }
 0x197   : > { %13127 = vmatprep.mubr.msk.bf16.mxu0 %vm1344_vm0, %v17152_v44  ;;  %v17158_v59 = vpop.permute.xlu0 %1306 }
 0x198   : > { %23343 = vst [vmem:[#allocation13_spill] sm:$0xff] %v17158_v59  ;;  %1200 = vrot.lane.b32.xlu1 %v17024_v26, %s23339_s22 }
 0x199   : > { %1322 = vrot.lane.b32.xlu0 %v17146_v46, %s23338_s20  ;;  %v17164_v50 = vpop.f32.mrb[20].mxu0 }
 0x19a   : > { %23344 = vst [vmem:[#allocation14_spill] sm:$0xff] %v17164_v50  ;;  %v2078_v55 = vpop.f32.mrb[21].mxu0  ;;  %v1724_v50 = vsel %vm1626_vm2, %v1579_v19, %v16898_v63  ;;  %v17180_v37 = vpop.permute.xlu1 %1308  ;;  %v17214_v19 = vld [vmem:[%s16214_s0 + $0x1d0] sm:$0xff]  }
 0x19b   : > { %v17174_v35 = vpop.f32.mrb[22].mxu0  ;;  %v17176_v59 = vpop.permute.xlu0 %1186  ;;  %v1446_v55 = vsel %vm1344_vm0, %v16911_v6, %v16896_v22  ;;  %23345 = vst [vmem:[#allocation15_spill] sm:$0xff] %v17214_v19 }
 0x19c   : > { %v2081_v24 = vpop.f32.mrb[23].mxu0  ;;  %2884 = vperm.xlu1 %15167, %v2630_v13   ;;  %v1581_v11 = vsel %vm1513_vm1, %v1446_v55, %v16915_v9  ;;  %v1449_v9 = vsel %vm1344_vm0, %v16944_v28, %v16926_v32 }
 0x19d   : > { %2889 = vperm.xlu0 %15168, %v2631_v20   ;;  %v1583_v28 = vsel %vm1513_vm1, %v1449_v9, %v16924_v17  ;;  %v17254_v17 = vld [vmem:[%s23346_s2] ss:$0 sm:$0xff] }
 0x19e   : > { %2291 = vmatmul.mubr.bf16.gmra.mrb[128].mxu0 %v1724_v50  ;;  %v17205_v13 = vpop.permute.xlu1 %1188 }
 0x19f   : > { %13128 = vmatprep.mubr.msk.bf16.mxu0 %vm1344_vm0, %v17186_v27  ;;  %v17201_v6 = vpop.permute.xlu0 %1066 }
 0x1a0   : > { %1080 = vrot.lane.b32.xlu1 %v16931_v16, %s23281_s19  ;;  %v1727_v16 = vsel %vm1626_vm2, %v1581_v11, %v16905_v4  ;;  %v2638_v4 = vld [vmem:[%s23254_s3 + $0x158] sm:$0xff] }
 0x1a1   : > { %1202 = vrot.lane.b32.xlu0 %v17089_v8, %s23339_s22  ;;  %v17197_v63 = vpop.f32.mrb[24].mxu0 }
 0x1a2   : > { %v2086_v22 = vpop.f32.mrb[25].mxu0  ;;  %v17232_v55 = vpop.permute.xlu1 %1068 }
 0x1a3   : > { %v17203_v50 = vpop.f32.mrb[26].mxu0  ;;  %v17223_v24 = vpop.permute.xlu0 %1310 }
 0x1a4   : > { %v2089_v20 = vpop.f32.mrb[27].mxu0  ;;  %1324 = vrot.lane.b32.xlu1 %v17193_v53, %s23338_s20 }
 0x1a5   : > { %1082 = vrot.lane.b32.xlu0 %v17024_v26, %s23281_s19  ;;  %v1730_v20 = vsel %vm1626_vm2, %v1583_v28, %v16948_v31  ;;  %v1452_v31 = vsel %vm1344_vm0, %v16978_v58, %v16938_v48  ;;  %v2643_v48 = vld [vmem:[%s23254_s3 + $0x180] sm:$0xff]  ;;  %v17276_v58 = vadd.f32 %v17254_v17, %v16984_v54  ;;  %s23347_s19 = smov 32  }
 0x1a6   : > { %2299 = vmatmul.mubr.bf16.gmra.mrb[132].mxu0 %v1727_v16  ;;  %v2640_v16 = vld [vmem:[%s23254_s3 + $0x168] sm:$0xff]  ;;  %v17259_v9 = vpop.permute.xlu1 %1312 }
 0x1a7   : > { %13129 = vmatprep.mubr.msk.bf16.mxu0 %vm1344_vm0, %v16548_v34  ;;  %v2639_v34 = vld [vmem:[%s23254_s3 + $0x160] sm:$0xff] }
 0x1a8   : > { %1204 = vrot.lane.b32.xlu1 %v17146_v46, %s23339_s22 }
 0x1a9   : > { %1326 = vrot.lane.b32.xlu0 %v17214_v19, %s23338_s20  ;;  %v17227_v26 = vpop.f32.mrb[28].mxu0  ;;  %v17249_v19 = vpop.permute.xlu0 %1190 }
 0x1aa   : > { %v2094_v32 = vpop.f32.mrb[29].mxu0 }
 0x1ab   : > { %v17239_v11 = vpop.f32.mrb[30].mxu0  ;;  %v2642_v32 = vld [vmem:[%s23254_s3 + $0x178] sm:$0xff] }
 0x1ac   : > { %v2097_v22 = vpop.f32.mrb[31].mxu0  ;;  %2924 = vperm.xlu1 %15167, %v2638_v4   ;;  %v1455_v4 = vsel %vm1344_vm0, %v17010_v21, %v16982_v47  ;;  %v15243_v21 = vld [vmem:[%s23255_s4 + $0x4] ss:$28 sps:$4 sm:$0xff]  }
 0x1ad   : > { %2929 = vperm.xlu0 %15168, %v2639_v34   ;;  %v1458_v34 = vsel %vm1344_vm0, %v17050_v62, %v16991_v45  ;;  %v2644_v45 = vld [vmem:[%s23254_s3 + $0x188] sm:$0xff]  ;;  %v17288_v62 = vadd.f32 %v17254_v17, %v16993_v7  ;;  %v1461_v7 = vsel %vm1344_vm0, %v17082_v57, %v17032_v43  ;;  %5258 = vmatprep.mubr.bf16.mxu1 %v15243_v21 }
 0x1ae   : > { %2307 = vmatmul.mubr.bf16.gmra.mrb[136].mxu0 %v1730_v20  ;;  %v1589_v54 = vsel %vm1513_vm1, %v1458_v34, %v17014_v33  ;;  %v17298_v20 = vadd.f32 %v17254_v17, %v17018_v51  ;;  %v17307_v33 = vpop.permute.xlu0 %1070  ;;  %v1467_v43 = vsel %vm1344_vm0, %v17152_v44, %v17086_v41  ;;  %v1591_v41 = vsel %vm1513_vm1, %v1461_v7, %v17028_v36 }
 0x1af   : > { %13130 = vmatprep.mubr.msk.bf16.mxu0 %vm1344_vm0, %v16565_v40  ;;  %v1585_v40 = vsel %vm1513_vm1, %v1452_v31, %v16962_v42  ;;  %v1587_v42 = vsel %vm1513_vm1, %v1455_v4, %v16972_v30  ;;  %v1464_v30 = vsel %vm1344_vm0, %v17122_v25, %v17044_v15  ;;  %v17318_v31 = vadd.f32 %v17254_v17, %v17056_v38  ;;  %v15962_v25 = vld [vmem:[%s16214_s0 + $0x160] sm:$0xff]  }
 0x1b0   : > { %2934 = vperm.xlu1 %15167, %v2640_v16   ;;  %v17302_v16 = vadd.f32 %v17254_v17, %v17030_v29  ;;  %v1733_v51 = vsel %vm1626_vm2, %v1585_v40, %v16960_v10  ;;  %v17314_v29 = vpop.permute.xlu1 %1192  ;;  %v1736_v57 = vsel %vm1626_vm2, %v1587_v42, %v16995_v39  ;;  %v2483_v15 = vmax.f32 %v17276_v58, 0.0  ;;  %v2645_v40 = vld [vmem:[%s23254_s3 + $0x190] sm:$0xff] }
 0x1b1   : > { %2944 = vperm.xlu0 %15168, %v2642_v32   ;;  %v17269_v28 = vpop.f32.mrb[32].mxu0  ;;  %v1470_v10 = vsel %vm1344_vm0, %v17186_v27, %v17100_v56  ;;  %v17333_v38 = vsel %vm1626_vm2, %v1589_v54, %v17004_v5  ;;  %v2484_v4 = vmax.f32 %v17288_v62, 0.0  ;;  %v17340_v39 = vadd.f32 %v17254_v17, %v17065_v52  ;;  %v15964_v54 = vld [vmem:[%s16214_s0 + $0x158] sm:$0xff]  }
 0x1b2   : > { %v2102_v47 = vpop.f32.mrb[33].mxu0  ;;  %v1593_v44 = vsel %vm1513_vm1, %v1464_v30, %v17067_v14  ;;  %v17350_v27 = vadd.f32 %v17254_v17, %v17093_v49  ;;  %v17354_v36 = vadd.f32 %v17254_v17, %v17102_v3  ;;  %v2080_v52 = vadd.f32 %v17254_v17, %v17174_v35  ;;  %v2634_v62 = vld [vmem:[%s23254_s3 + $0x138] sm:$0xff] }
 0x1b3   : > { %v17292_v22 = vpop.f32.mrb[34].mxu0  ;;  %v1595_v49 = vsel %vm1513_vm1, %v1467_v43, %v17076_v60  ;;  %v1597_v3 = vsel %vm1513_vm1, %v1470_v10, %v17126_v18  ;;  %v2088_v34 = vadd.f32 %v17254_v17, %v17203_v50  ;;  %v17378_v47 = vsel %vm1626_vm2, %v1591_v41, %v17054_v0  ;;  %v15963_v50 = vld [vmem:[%s16214_s0 + $0x150] sm:$0xff]  }
 0x1b4   : > { %v2105_v32 = vpop.f32.mrb[35].mxu0  ;;  %2949 = vperm.xlu1 %15167, %v2643_v48   ;;  %v17371_v48 = vpop.permute.xlu0 %1314  ;;  %v17383_v18 = vadd.f32 %v17254_v17, %v17128_v12  ;;  %v2085_v21 = vadd.f32 %v17254_v17, %v17197_v63  ;;  %v1476_v42 = vsel %vm1344_vm0, %v15964_v54, %v17156_v2  ;;  %v17401_v30 = vsel %vm1626_vm2, %v1593_v44, %v17063_v61  ;;  %v23348_v63 = vld [vmem:[#allocation10_spill] sm:$0xff]  ;;  %v23349_v10 = vld [vmem:[#allocation11_spill] sm:$0xff] }
 0x1b5   : > { %2954 = vperm.xlu0 %15168, %v2644_v45   ;;  %v1473_v45 = vsel %vm1344_vm0, %v15963_v50, %v17139_v1  ;;  %v17397_v32 = vadd.f32 %v17254_v17, %v17137_v23  ;;  %v2494_v2 = vmax.f32 %v2080_v52, 0.0  ;;  %v2646_v23 = vld [vmem:[%s23254_s3 + $0x198] sm:$0xff]  ;;  %v17414_v41 = vsel %vm1626_vm2, %v1597_v3, %v23349_v10 }
 0x1b6   : > { %2315 = vmatmul.mubr.bf16.gmra.mrb[140].mxu0 %v1733_v51  ;;  %v17406_v51 = vsel %vm1626_vm2, %v1595_v49, %v23348_v63  ;;  %v1601_v44 = vsel %vm1513_vm1, %v1476_v42, %v17176_v59  ;;  %v2096_v52 = vadd.f32 %v17254_v17, %v17239_v11  ;;  %v2647_v49 = vld [vmem:[%s23254_s3 + $0x1a0] sm:$0xff]  ;;  %v1479_v3 = vsel %vm1344_vm0, %v15962_v25, %v17201_v6  ;;  %v15965_v42 = vld [vmem:[%s16214_s0 + $0x168] sm:$0xff]  }
 0x1b7   : > { %13131 = vmatprep.mubr.msk.bf16.mxu0 %vm1344_vm0, %v15962_v25  ;;  %v2495_v59 = vmax.f32 %v2085_v21, 0.0  ;;  %v23352_v25 = vld [vmem:[#allocation14_spill] sm:$0xff] }
 0x1b8   : > { %1084 = vrot.lane.b32.xlu1 %v17089_v8, %s23347_s19  ;;  %v2641_v8 = vld [vmem:[%s23254_s3 + $0x170] sm:$0xff]  ;;  %v17442_v21 = vadd.f32 %v17254_v17, %v23352_v25 }
 0x1b9   : > { %1206 = vrot.lane.b32.xlu0 %v17193_v53, %s23339_s22  ;;  %v17360_v14 = vpop.f32.mrb[36].mxu0 }
 0x1ba   : > { %v2110_v35 = vpop.f32.mrb[37].mxu0 }
 0x1bb   : > { %v17393_v7 = vpop.f32.mrb[38].mxu0  ;;  %v2765_v0 = vpop.permute.xlu1 %2764  ;;  %v23350_v35 = vld [vmem:[#allocation12_spill] sm:$0xff] }
 0x1bc   : > { %v2113_v12 = vpop.f32.mrb[39].mxu0  ;;  %2939 = vperm.xlu1 %15167, %v2641_v8   ;;  %v2496_v8 = vmax.f32 %v2088_v34, 0.0  ;;  %v17428_v50 = vmul.f32 %v2765_v0, %v2494_v2  ;;  %v2104_v34 = vadd.f32 %v17254_v17, %v17292_v22  ;;  %v17450_v2 = vld [vmem:[%s16214_s0 + $0x1d8] sm:$0xff]  }
 0x1bd   : > { %2959 = vperm.xlu0 %15168, %v2645_v40   ;;  %v1599_v40 = vsel %vm1513_vm1, %v1473_v45, %v23350_v35  ;;  %v23353_v22 = vld [vmem:[#allocation13_spill] sm:$0xff] }
 0x1be   : > { %2323 = vmatmul.mubr.bf16.gmra.mrb[144].mxu0 %v1736_v57  ;;  %23351 = vst [vmem:[#allocation10_spill] sm:$0xff] %v17428_v50  ;;  %v2101_v57 = vadd.f32 %v17254_v17, %v17269_v28  ;;  %v2648_v28 = vld [vmem:[%s23254_s3 + $0x1a8] sm:$0xff]  ;;  %v17454_v10 = vsel %vm1626_vm2, %v1599_v40, %v23353_v22  ;;  %v23284_v25 = vrot.slane %v17428_v50, 1 }
 0x1bf   : > { %v2775_v54 = vpop.permute.xlu1 %2774  ;;  %13132 = vmatprep.mubr.msk.bf16.mxu0 %vm1344_vm0, %v15965_v42 }
 0x1c0   : > { %v17437_v45 = vmul.f32 %v2775_v54, %v2496_v8  ;;  %v2770_v12 = vpop.permute.xlu0 %2769  ;;  %2964 = vperm.xlu1 %15167, %v2646_v23   ;;  %v17458_v23 = vsel %vm1626_vm2, %v1601_v44, %v17180_v37  ;;  %v2498_v54 = vmax.f32 %v2096_v52, 0.0  ;;  %v1482_v37 = vsel %vm1344_vm0, %v15965_v42, %v17232_v55 }
 0x1c1   : > { %v3279_v0 = vmul.f32 %v2770_v12, %v2495_v59  ;;  %2969 = vperm.xlu0 %15168, %v2647_v49   ;;  %v17444_v63 = vpop.f32.mrb[40].mxu0  ;;  %23354 = vst [vmem:[#allocation11_spill] sm:$0xff] %v17458_v23  ;;  %v1603_v59 = vsel %vm1513_vm1, %v1479_v3, %v17205_v13  ;;  %v23285_v12 = vrot.slane %v17428_v50, 7  ;;  %v2500_v13 = vmax.f32 %v2104_v34, 0.0 }
 0x1c2   : > { %v3517_v8 = vrot.slane %v17437_v45, 7  ;;  %v3966_v49 = vrot.slane %v17437_v45, 1  ;;  %v2118_v35 = vpop.f32.mrb[41].mxu0 }
 0x1c3   : > { %v3515_v6 = vrot.slane %v3279_v0, 7  ;;  %v3964_v40 = vrot.slane %v3279_v0, 1  ;;  %v17466_v22 = vpop.f32.mrb[42].mxu0  ;;  %v2785_v11 = vpop.permute.xlu1 %2784  ;;  %v2499_v35 = vmax.f32 %v2101_v57, 0.0 }
 0x1c4   : > { %v17470_v44 = vmul.f32 %v2785_v11, %v2498_v54  ;;  %v2790_v61 = vpop.permute.xlu0 %2789  ;;  %v2121_v52 = vpop.f32.mrb[43].mxu0  ;;  %2974 = vperm.xlu1 %15167, %v2648_v28   ;;  %v2632_v11 = vld [vmem:[%s23254_s3 + $0x128] sm:$0xff]  ;;  %v2649_v54 = vld [vmem:[%s23254_s3 + $0x1b0] sm:$0xff] }
 0x1c5   : > { %v3516_v3 = vsel %vm3491_vm3, %v23285_v12, %v3515_v6  ;;  %v17478_v43 = vsel %vm3491_vm3, %v3515_v6, %v3517_v8  ;;  %v17483_v55 = vsel %vm3940_vm4, %v23284_v25, %v3964_v40  ;;  %v3967_v42 = vsel %vm3940_vm4, %v3964_v40, %v3966_v49  ;;  %1328 = vrot.lane.b32.xlu0 %v17450_v2, %s23338_s20  ;;  %v15966_v25 = vld [vmem:[%s16214_s0 + $0x170] sm:$0xff]  }
 0x1c6   : > { %23355 = vst [vmem:[#allocation12_spill] sm:$0xff] %v17483_v55  ;;  %v3840_v57 = vmax.f32 %v3516_v3, %v3279_v0  ;;  %v3521_v34 = vrot.slane %v17470_v44, 7  ;;  %v3970_v6 = vrot.slane %v17470_v44, 1  ;;  %v3283_v28 = vmul.f32 %v2790_v61, %v2499_v35  ;;  %2331 = vmatmul.mubr.bf16.gmra.mrb[148].mxu0 %v17333_v38 }
 0x1c7   : > { %v2093_v40 = vadd.f32 %v17254_v17, %v17227_v26  ;;  %v1605_v52 = vsel %vm1513_vm1, %v1482_v37, %v17249_v19  ;;  %v1485_v0 = vsel %vm1344_vm0, %v15966_v25, %v17307_v33  ;;  %v2795_v3 = vpop.permute.xlu1 %2794  ;;  %13133 = vmatprep.mubr.msk.bf16.mxu0 %vm1344_vm0, %v15966_v25  ;;  %v2109_v19 = vadd.f32 %v17254_v17, %v17360_v14 }
 0x1c8   : > { %v17509_v61 = vmax.f32 %v3840_v57, %v3967_v42  ;;  %v3523_v35 = vrot.slane %v3283_v28, 7  ;;  %v3972_v12 = vrot.slane %v3283_v28, 1  ;;  %v17511_v1 = vmul.f32 %v2795_v3, %v2500_v13  ;;  %v2710_v26 = vpop.permute.xlu0 %2709  ;;  %2894 = vperm.xlu1 %15167, %v2632_v11   ;;  %v2633_v13 = vld [vmem:[%s23254_s3 + $0x130] sm:$0xff]  ;;  %v2650_v57 = vld [vmem:[%s23254_s3 + $0x1b8] sm:$0xff] }
 0x1c9   : > { %v17517_v33 = vadd.f32 %v17254_v17, %v17393_v7  ;;  %v17521_v25 = vmul.f32 %v2710_v26, %v2483_v15  ;;  %2979 = vperm.xlu0 %15168, %v2649_v54   ;;  %v17523_v37 = vpop.f32.mrb[44].mxu0  ;;  %v17530_v42 = vsel %vm1626_vm2, %v1603_v59, %v17223_v24  ;;  %v2497_v3 = vmax.f32 %v2093_v40, 0.0 }
 0x1ca   : > { %23356 = vst [vmem:[#allocation14_spill] sm:$0xff] %v17530_v42  ;;  %v3524_v14 = vsel %vm3491_vm3, %v3521_v34, %v3523_v35  ;;  %v17538_v58 = vsel %vm3940_vm4, %v3970_v6, %v3972_v12  ;;  %v3525_v15 = vrot.slane %v17511_v1, 7  ;;  %v23289_v7 = vrot.slane %v17511_v1, 1  ;;  %v2126_v11 = vpop.f32.mrb[45].mxu0 }
 0x1cb   : > { %v3844_v24 = vmax.f32 %v3524_v14, %v3283_v28  ;;  %v17545_v59 = vpop.f32.mrb[46].mxu0  ;;  %v2715_v54 = vpop.permute.xlu1 %2714  ;;  %v17549_v26 = vsel %vm1626_vm2, %v1605_v52, %v17259_v9  ;;  %v17553_v38 = vsel %vm1513_vm1, %v1485_v0, %v17314_v29  ;;  %v2117_v11 = vadd.f32 %v17254_v17, %v17444_v63 }
 0x1cc   : > { %23357 = vst [vmem:[#allocation13_spill] sm:$0xff] %v17549_v26  ;;  %v17560_v60 = vsel %vm3491_vm3, %v3523_v35, %v3525_v15  ;;  %v17564_v28 = vmul.f32 %v2715_v54, %v2484_v4  ;;  %v2780_v40 = vpop.permute.xlu0 %2779  ;;  %v2129_v14 = vpop.f32.mrb[47].mxu0  ;;  %2899 = vperm.xlu1 %15167, %v2633_v13   ;;  %v3975_v9 = vsel %vm3940_vm4, %v3972_v12, %v23289_v7  ;;  %v2501_v52 = vmax.f32 %v2109_v19, 0.0  ;;  %v2651_v19 = vld [vmem:[%s23254_s3 + $0x1c0] sm:$0xff] }
 0x1cd   : > { %v3281_v63 = vmul.f32 %v2780_v40, %v2497_v3  ;;  %2984 = vperm.xlu0 %15168, %v2650_v57   ;;  %v2502_v0 = vmax.f32 %v17517_v33, 0.0  ;;  %v23288_v4 = vrot.slane %v17521_v25, 7  ;;  %v3941_v35 = vrot.slane %v17521_v25, 1  ;;  %v17586_v40 = vld [vmem:[%s16214_s0 + $0x178] sm:$0xff]  }
 0x1ce   : > { %v23286_v13 = vrot.slane %v17564_v28, 7  ;;  %v23287_v12 = vrot.slane %v17564_v28, 1  ;;  %2339 = vmatmul.mubr.bf16.gmra.mrb[152].mxu0 %v17378_v47  ;;  %v2120_v33 = vadd.f32 %v17254_v17, %v17466_v22  ;;  %v17590_v14 = vmax.f32 %v3844_v24, %v3975_v9 }
 0x1cf   : > { %v3519_v57 = vrot.slane %v3281_v63, 7  ;;  %v3968_v54 = vrot.slane %v3281_v63, 1  ;;  %v2800_v3 = vpop.permute.xlu1 %2799  ;;  %13134 = vmatprep.mubr.msk.bf16.mxu0 %vm1344_vm0, %v17586_v40  ;;  %v2503_v22 = vmax.f32 %v2117_v11, 0.0  ;;  %v23369_v50 = vmax.f32 %v17560_v60, %v17511_v1  ;;  %v2653_v60 = vld [vmem:[%s23254_s3 + $0x1d0] sm:$0xff] }
 0x1d0   : > { %23358 = vst [vmem:[#allocation16_spill] sm:$0xff] %v17590_v14  ;;  %v17597_v47 = vsel %vm3491_vm3, %v23288_v4, %v23286_v13  ;;  %v3285_v29 = vmul.f32 %v2800_v3, %v2501_v52  ;;  %v2805_v5 = vpop.permute.xlu0 %2804  ;;  %2904 = vperm.xlu1 %15167, %v2634_v62   ;;  %v17602_v56 = vsel %vm3940_vm4, %v3941_v35, %v23287_v12  ;;  %v2504_v7 = vmax.f32 %v2120_v33, 0.0 }
 0x1d1   : > { %v3520_v9 = vsel %vm3491_vm3, %v3517_v8, %v3519_v57  ;;  %v17612_v13 = vsel %vm3491_vm3, %v3519_v57, %v3521_v34  ;;  %v3971_v11 = vsel %vm3940_vm4, %v3968_v54, %v3970_v6  ;;  %2989 = vperm.xlu0 %15168, %v2651_v19   ;;  %v17617_v52 = vpop.f32.mrb[48].mxu0  ;;  %v2635_v8 = vld [vmem:[%s23254_s3 + $0x140] sm:$0xff]  ;;  %v3286_v34 = vmul.f32 %v2805_v5, %v2502_v0 }
 0x1d2   : > { %v3842_v62 = vmax.f32 %v3520_v9, %v3281_v63  ;;  %v3527_v3 = vrot.slane %v3285_v29, 7  ;;  %v3976_v24 = vrot.slane %v3285_v29, 1  ;;  %v2134_v12 = vpop.f32.mrb[49].mxu0  ;;  %v3969_v6 = vsel %vm3940_vm4, %v3966_v49, %v3968_v54 }
 0x1d3   : > { %v17624_v57 = vpop.f32.mrb[50].mxu0  ;;  %v2810_v4 = vpop.permute.xlu1 %2809  ;;  %v17633_v19 = vadd.f32 %v17254_v17, %v17523_v37  ;;  %v3529_v54 = vrot.slane %v3286_v34, 7  ;;  %v3978_v35 = vrot.slane %v3286_v34, 1  ;;  %v17648_v37 = vadd.f32 %v17254_v17, %v17545_v59 }
 0x1d4   : > { %v17635_v12 = vmax.f32 %v3842_v62, %v3971_v11  ;;  %v3528_v5 = vsel %vm3491_vm3, %v3525_v15, %v3527_v3  ;;  %v17640_v0 = vmul.f32 %v2810_v4, %v2503_v22  ;;  %v2815_v33 = vpop.permute.xlu0 %2814  ;;  %v2137_v9 = vpop.f32.mrb[51].mxu0  ;;  %1086 = vrot.lane.b32.xlu1 %v17146_v46, %s23347_s19  ;;  %v2652_v46 = vld [vmem:[%s23254_s3 + $0x1c8] sm:$0xff]  ;;  %v15239_v11 = vld [vmem:[%s16214_s0 + $0x1e0] sm:$0xff]   ;;  %v23371_v23 = vrot.slane %v17564_v28, 7 }
 0x1d5   : > { %v3846_v49 = vmax.f32 %v3528_v5, %v3285_v29  ;;  %v17644_v63 = vmul.f32 %v2815_v33, %v2504_v7  ;;  %2909 = vperm.xlu0 %15168, %v2635_v8   ;;  %v23359_v29 = vrot.slane %v17511_v1, 1  ;;  %v3530_v22 = vsel %vm3491_vm3, %v3527_v3, %v3529_v54  ;;  %v17664_v5 = vld [vmem:[%s16214_s0 + $0x180] sm:$0xff]  }
 0x1d6   : > { %v3531_v15 = vrot.slane %v17640_v0, 7  ;;  %v3980_v4 = vrot.slane %v17640_v0, 1  ;;  %2347 = vmatmul.mubr.bf16.gmra.mrb[156].mxu0 %v17401_v30  ;;  %v3979_v59 = vsel %vm3940_vm4, %v3976_v24, %v3978_v35  ;;  %23360 = vst [vmem:[#allocation17_spill] sm:$0xff] %v17664_v5  ;;  %v3847_v30 = vmax.f32 %v3530_v22, %v3286_v34 }
 0x1d7   : > { %v3977_v7 = vsel %vm3940_vm4, %v23359_v29, %v3976_v24  ;;  %v2720_v8 = vpop.permute.xlu1 %2719  ;;  %13135 = vmatprep.mubr.msk.bf16.mxu0 %vm1344_vm0, %v17664_v5  ;;  %v17668_v33 = vmax.f32 %v3846_v49, %v3979_v59  ;;  %v23361_v24 = vld [vmem:[#allocation15_spill] sm:$0xff]  ;;  %v23362_v55 = vrot.slane %v17644_v63, 7  ;;  %v23363_v34 = vmax.f32 %v17298_v20, 0.0 }
 0x1d8   : > { %v3532_v9 = vsel %vm3491_vm3, %v3529_v54, %v3531_v15  ;;  %v3981_v29 = vsel %vm3940_vm4, %v3978_v35, %v3980_v4  ;;  %v2725_v3 = vpop.permute.xlu0 %2724  ;;  %1208 = vrot.lane.b32.xlu1 %v23361_v24, %s23339_s22  ;;  %v23364_v54 = vmax.f32 %v17302_v16, 0.0  ;;  %v23365_v59 = vrot.slane %v17521_v25, 7  ;;  %v2636_v20 = vld [vmem:[%s23254_s3 + $0x148] sm:$0xff] }
 0x1d9   : > { %v3848_v62 = vmax.f32 %v3532_v9, %v17640_v0  ;;  %v17679_v26 = vsel %vm3491_vm3, %v3531_v15, %v23362_v55  ;;  %v17683_v49 = vmul.f32 %v2720_v8, %v23363_v34  ;;  %2994 = vperm.xlu0 %15168, %v2652_v46   ;;  %v17689_v35 = vpop.f32.mrb[52].mxu0  ;;  %v17694_v9 = vmax.f32 %v3847_v30, %v3981_v29 }
 0x1da   : > { %v17687_v22 = vmul.f32 %v2725_v3, %v23364_v54  ;;  %v3827_v0 = vsel %vm3491_vm3, 0.0, %v23365_v59  ;;  %v2142_v15 = vpop.f32.mrb[53].mxu0  ;;  %v23366_v16 = vrot.slane %v17644_v63, 1  ;;  %v23367_v54 = vmax.f32 %v17318_v31, 0.0 }
 0x1db   : > { %v3495_v8 = vrot.slane %v17683_v49, 7  ;;  %v3944_v3 = vrot.slane %v17683_v49, 1  ;;  %v17708_v29 = vpop.f32.mrb[54].mxu0  ;;  %v2730_v34 = vpop.permute.xlu1 %2729  ;;  %v17722_v42 = vmax.f32 %v23369_v50, %v3977_v7 }
 0x1dc   : > { %v3983_v46 = vsel %vm3940_vm4, %v3980_v4, %v23366_v16  ;;  %v3497_v24 = vrot.slane %v17687_v22, 7  ;;  %v3946_v30 = vrot.slane %v17687_v22, 1  ;;  %v3271_v59 = vmul.f32 %v2730_v34, %v23367_v54  ;;  %v2735_v15 = vpop.permute.xlu0 %2734  ;;  %v2145_v55 = vpop.f32.mrb[55].mxu0  ;;  %1330 = vrot.lane.b32.xlu1 %v15239_v11, %s23338_s20 }
 0x1dd   : > { %v2505_v4 = vmax.f32 %v17633_v19, 0.0  ;;  %v23368_v16 = vmax.f32 %v17478_v43, %v17437_v45  ;;  %23370 = vst [vmem:[#allocation15_spill] sm:$0xff] %v17722_v42  ;;  %v17727_v31 = vsel %vm3491_vm3, %v23371_v23, %v3495_v8  ;;  %v23372_v43 = vmax.f32 %v17340_v39, 0.0  ;;  %2914 = vperm.xlu0 %15168, %v2636_v20   ;;  %v2637_v39 = vld [vmem:[%s23254_s3 + $0x150] sm:$0xff] }
 0x1de   : > { %v17730_v11 = vsel %vm3491_vm3, %v3495_v8, %v3497_v24  ;;  %v17733_v19 = vsel %vm3940_vm4, %v3944_v3, %v3946_v30  ;;  %v3499_v23 = vrot.slane %v3271_v59, 7  ;;  %2355 = vmatmul.mubr.bf16.gmra.mrb[160].mxu0 %v17406_v51  ;;  %v17753_v8 = vld [vmem:[%s16214_s0 + $0x188] sm:$0xff]   ;;  %v17757_v34 = vmax.f32 %v3848_v62, %v3983_v46 }
 0x1df   : > { %v17717_v5 = vmax.f32 %v23368_v16, %v3969_v6  ;;  %v17737_v45 = vmul.f32 %v2735_v15, %v23372_v43  ;;  %v3948_v6 = vrot.slane %v3271_v59, 1  ;;  %v1073_v20 = vpop.permute.xlu1 %1072  ;;  %13136 = vmatprep.mubr.msk.bf16.mxu0 %vm1344_vm0, %v17753_v8  ;;  %v3828_v51 = vmax.f32 %v3827_v0, %v17521_v25  ;;  %v2654_v25 = vld [vmem:[%s23254_s3 + $0x1d8] sm:$0xff] }
 0x1e0   : > { %v17764_v15 = vadd.f32 %v17254_v17, %v17617_v52  ;;  %v3500_v16 = vsel %vm3491_vm3, %v3497_v24, %v3499_v23  ;;  %v2820_v50 = vpop.permute.xlu0 %2819  ;;  %2999 = vperm.xlu1 %15167, %v2653_v60   ;;  %v23373_v52 = vmax.f32 %v17509_v61, %v17590_v14 }
 0x1e1   : > { %v23293_v7 = vrot.slane %v17737_v45, 7  ;;  %v4406_v54 = vmax.f32 %v17717_v5, %v17722_v42  ;;  %v3949_v43 = vsel %vm3940_vm4, %v3946_v30, %v3948_v6  ;;  %v3832_v1 = vmax.f32 %v3500_v16, %v3271_v59  ;;  %2919 = vperm.xlu0 %15168, %v2637_v39   ;;  %v2148_v55 = vpop.f32.mrb[56].mxu0  ;;  %v2655_v59 = vld [vmem:[%s23254_s3 + $0x1e0] sm:$0xff] }
 0x1e2   : > { %v17771_v46 = vmul.f32 %v2820_v50, %v2505_v4  ;;  %v17780_v0 = vmax.f32 %v23373_v52, %v17757_v34  ;;  %v2150_v30 = vpop.f32.mrb[57].mxu0  ;;  %v23374_v4 = vrot.slane %v17564_v28, 1  ;;  %v23375_v50 = vrot.slane %v17737_v45, 1 }
 0x1e3   : > { %v3502_v62 = vsel %vm3491_vm3, %v3499_v23, %v23293_v7  ;;  %v17795_v39 = vsel %vm1626_vm2, %v17553_v38, %v17371_v48  ;;  %v2151_v52 = vpop.f32.mrb[58].mxu0  ;;  %v1195_v30 = vpop.permute.xlu1 %1194  ;;  %v17800_v7 = vmax.f32 %v3828_v51, %v17602_v56 }
 0x1e4   : > { %v3833_v24 = vmax.f32 %v3502_v62, %v17737_v45  ;;  %v3945_v60 = vsel %vm3940_vm4, %v23374_v4, %v3944_v3  ;;  %v3951_v23 = vsel %vm3940_vm4, %v3948_v6, %v23375_v50  ;;  %v23376_v3 = vmax.f32 %v17597_v47, %v17564_v28  ;;  %v2740_v48 = vpop.permute.xlu0 %2739  ;;  %v2153_v38 = vpop.f32.mrb[59].mxu0  ;;  %3004 = vperm.xlu1 %15167, %v2654_v25  }
 0x1e5   : > { %v17809_v6 = vadd.f32 %v17254_v17, %v17624_v57  ;;  %v2506_v50 = vmax.f32 %v17648_v37, 0.0  ;;  %v2507_v62 = vmax.f32 %v17764_v15, 0.0  ;;  %v17813_v16 = vmax.f32 %v3832_v1, %v3951_v23  ;;  %3009 = vperm.xlu0 %15168, %v2655_v59  }
 0x1e6   : > { %v17805_v4 = vmax.f32 %v23376_v3, %v3945_v60  ;;  %v23377_v56 = vrot.slane %v17771_v46, 7  ;;  %v23378_v28 = vrot.slane %v17644_v63, 7  ;;  %v23379_v57 = vmax.f32 %v17350_v27, 0.0  ;;  %2363 = vmatmul.mubr.bf16.gmra.mrb[164].mxu0 %v17414_v41 }
 0x1e7   : > { %v23380_v25 = vrot.slane %v17771_v46, 1  ;;  %v23381_v37 = vrot.slane %v17644_v63, 1  ;;  %v4389_v1 = vmax.f32 %v17800_v7, 0.0  ;;  %v17834_v60 = vadd.f32 %v17254_v17, %v17689_v35 }
 0x1e8   : > { %v17820_v47 = vsel %vm3491_vm3, %v23378_v28, %v23377_v56  ;;  %v17824_v51 = vmul.f32 %v2740_v48, %v23379_v57  ;;  %v23382_v27 = vmax.f32 %v17679_v26, %v17644_v63  ;;  %v23383_v3 = vmax.f32 %v17612_v13, %v17470_v44  ;;  %v17852_v56 = vpop.permute.xlu1 %1316  ;;  %v17855_v28 = vld [vmem:[%s16214_s0 + $0x190] sm:$0xff]   ;;  %v2825_v44 = vpop.permute.xlu0 %2824  ;;  %1088 = vrot.lane.b32.xlu1 %v17193_v53, %s23347_s19 }
 0x1e9   : > { %v3985_v15 = vsel %vm3940_vm4, %v23381_v37, %v23380_v25  ;;  %v3850_v23 = vmax.f32 %v17820_v47, %v17771_v46  ;;  %23384 = vst [vmem:[#allocation18_spill] sm:$0xff] %v17855_v28  ;;  %13137 = vmatprep.mubr.msk.bf16.mxu0 %vm1344_vm0, %v17855_v28  ;;  %v4501_v41 = vmax.f32 %v4389_v1, %v17813_v16  ;;  %v23387_v53 = vrot.slane %v17737_v45, 7 }
 0x1ea   : > { %v17842_v59 = vmax.f32 %v23382_v27, %v3985_v15  ;;  %v17848_v48 = vmax.f32 %v23383_v3, %v17538_v58  ;;  %v3503_v38 = vrot.slane %v17824_v51, 7  ;;  %v3952_v35 = vrot.slane %v17824_v51, 1  ;;  %1210 = vrot.lane.b32.xlu0 %v17450_v2, %s23339_s22 }
 0x1eb   : > { %v4407_v26 = vmax.f32 %v17635_v12, %v17668_v33  ;;  %v23385_v63 = vmax.f32 %v17727_v31, %v17683_v49  ;;  %v23386_v57 = vmax.f32 %v17730_v11, %v17687_v22  ;;  %v1488_v37 = vsel %vm1344_vm0, %v17586_v40, %v1073_v20  ;;  %v17889_v49 = vpop.f32.mrb[60].mxu0  ;;  %v2656_v22 = vld [vmem:[%s23254_s3 + $0x1e8] sm:$0xff] }
 0x1ec   : > { %v4518_v58 = vmax.f32 %v4406_v54, %v17842_v59  ;;  %v17883_v54 = vsel %vm3491_vm3, %v23387_v53, %v3503_v38  ;;  %v17885_v15 = vmul.f32 %v2825_v44, %v2506_v50  ;;  %v15240_v31 = vld [vmem:[%s16214_s0 + $0x1e8] sm:$0xff]   ;;  %v23388_v11 = vrot.slane %v17737_v45, 1  ;;  %v2158_v20 = vpop.f32.mrb[61].mxu0  ;;  %3014 = vperm.xlu1 %15167, %v2656_v22  }
 0x1ed   : > { %v17871_v47 = vmax.f32 %v23385_v63, %v17733_v19  ;;  %v17876_v25 = vmax.f32 %v23386_v57, %v3949_v43  ;;  %v4390_v2 = vmax.f32 %v17805_v4, 0.0  ;;  %v17906_v1 = vadd.f32 %v17254_v17, %v17708_v29  ;;  %v17913_v44 = vpop.f32.mrb[62].mxu0  ;;  %v2745_v63 = vpop.permute.xlu1 %2744 }
 0x1ee   : > { %v3953_v40 = vsel %vm3940_vm4, %v23388_v11, %v3952_v35  ;;  %v4721_v43 = vpack.c.bf16 %v4518_v58, %v17780_v0  ;;  %v17909_v27 = vadd.f32 %v17254_v17, %v2148_v55  ;;  %v3537_v45 = vrot.slane %v17885_v15, 7  ;;  %v2830_v57 = vpop.permute.xlu0 %2829  ;;  %v2161_v29 = vpop.f32.mrb[63].mxu0  ;;  %1332 = vrot.lane.b32.xlu0 %v15240_v31, %s23338_s20  ;;  %2371 = vmatmul.mubr.bf16.gmra.mrb[168].mxu0 %v17454_v10 }
 0x1ef   : > { %v17901_v50 = vmax.f32 %v3833_v24, %v3953_v40  ;;  %v3986_v3 = vrot.slane %v17885_v15, 1  ;;  %v17916_v0 = vadd.f32 %v17254_v17, %v2151_v52  ;;  %v23389_v24 = vmax.f32 %v17354_v36, 0.0 }
 0x1f0   : > { %14189 = vmatprep.subr.bf16.mxu1 %v4721_v43  ;;  %v2508_v55 = vmax.f32 %v17809_v6, 0.0  ;;  %v17925_v11 = vsel %vm1513_vm1, %v1488_v37, %v1195_v30  ;;  %v23390_v40 = vrot.slane %v17771_v46, 7  ;;  %v23391_v36 = vrot.slane %v17771_v46, 1  ;;  %v2657_v6 = vld [vmem:[%s23254_s3 + $0x1f0] sm:$0xff]  ;;  %v2658_v46 = vld [vmem:[%s23254_s3 + $0x1f8] sm:$0xff] }
 0x1f1   : > { %v17920_v58 = vmul.f32 %v2745_v63, %v23389_v24  ;;  %v4502_v53 = vmax.f32 %v4390_v2, %v17901_v50  ;;  %v17933_v63 = vmul.f32 %v2830_v57, %v2507_v62  ;;  %v2750_v2 = vpop.permute.xlu1 %2749  ;;  %v17949_v24 = vld [vmem:[%s16214_s0 + $0x198] sm:$0xff]   ;;  %v23393_v29 = vmax.f32 %v17383_v18, 0.0  ;;  %3019 = vperm.xlu1 %15167, %v2657_v6   ;;  %v2659_v18 = vld [vmem:[%s23254_s3 + $0x200] sm:$0xff] }
 0x1f2   : > { %v3538_v52 = vsel %vm3491_vm3, %v23390_v40, %v3537_v45  ;;  %v3987_v20 = vsel %vm3940_vm4, %v23391_v36, %v3986_v3  ;;  %23392 = vst [vmem:[#allocation19_spill] sm:$0xff] %v17949_v24  ;;  %13138 = vmatprep.mubr.msk.bf16.mxu0 %vm1344_vm0, %v17949_v24  ;;  %v2835_v40 = vpop.permute.xlu0 %2834  ;;  %3024 = vperm.xlu0 %15168, %v2658_v46  }
 0x1f3   : > { %v3851_v22 = vmax.f32 %v3538_v52, %v17885_v15  ;;  %v3505_v30 = vrot.slane %v17920_v58, 7  ;;  %v3954_v37 = vrot.slane %v17920_v58, 1  ;;  %v4713_v43 = vpack.c.bf16 %v4502_v53, %v4501_v41 }
 0x1f4   : > { %v3539_v62 = vrot.slane %v17933_v63, 7  ;;  %v3988_v31 = vrot.slane %v17933_v63, 1  ;;  %v17953_v15 = vmax.f32 %v3850_v23, %v3987_v20  ;;  %v17961_v53 = vmul.f32 %v2750_v2, %v23393_v29 }
 0x1f5   : > { %v3506_v41 = vsel %vm3491_vm3, %v3503_v38, %v3505_v30  ;;  %v3955_v57 = vsel %vm3940_vm4, %v3952_v35, %v3954_v37  ;;  %14190 = vmatpush3.bf16.msra.mxu1 %v4713_v43  ;;  %v17967_v10 = vmul.f32 %v2835_v40, %v2508_v55  ;;  %v17969_v38 = vpop.f32.mrb[64].mxu0  ;;  %3029 = vperm.xlu1 %15167, %v2659_v18  }
 0x1f6   : > { %v3835_v36 = vmax.f32 %v3506_v41, %v17920_v58  ;;  %v3540_v23 = vsel %vm3491_vm3, %v3537_v45, %v3539_v62  ;;  %v3989_v20 = vsel %vm3940_vm4, %v3986_v3, %v3988_v31  ;;  %v3507_v6 = vrot.slane %v17961_v53, 7  ;;  %v2166_v58 = vpop.f32.mrb[65].mxu0  ;;  %v2660_v45 = vld [vmem:[%s23254_s3 + $0x208] sm:$0xff]  ;;  %v2755_v41 = vpop.permute.xlu1 %2754 }
 0x1f7   : > { %v3852_v35 = vmax.f32 %v3540_v23, %v17933_v63  ;;  %v3956_v43 = vrot.slane %v17961_v53, 1  ;;  %v2509_v3 = vmax.f32 %v17834_v60, 0.0  ;;  %v3541_v55 = vrot.slane %v17967_v10, 7  ;;  %v17983_v2 = vpop.f32.mrb[66].mxu0  ;;  %v17997_v52 = vpop.permute.xlu0 %1074  ;;  %3034 = vperm.xlu0 %15168, %v2660_v45  }
 0x1f8   : > { %v3990_v46 = vrot.slane %v17967_v10, 1  ;;  %v17985_v29 = vmax.f32 %v3851_v22, %v3989_v20  ;;  %v4519_v63 = vmax.f32 %v4407_v26, %v17953_v15  ;;  %v3508_v40 = vsel %vm3491_vm3, %v3505_v30, %v3507_v6  ;;  %v2169_v19 = vpop.f32.mrb[67].mxu0 }
 0x1f9   : > { %v3957_v23 = vsel %vm3940_vm4, %v3954_v37, %v3956_v43  ;;  %v23394_v60 = vmax.f32 %v17397_v32, 0.0  ;;  %v4391_v22 = vmax.f32 %v17871_v47, 0.0  ;;  %v3836_v20 = vmax.f32 %v3508_v40, %v17961_v53  ;;  %v2661_v32 = vld [vmem:[%s23254_s3 + $0x210] sm:$0xff]  ;;  %v2662_v53 = vld [vmem:[%s23254_s3 + $0x218] sm:$0xff] }
 0x1fa   : > { %v3542_v13 = vsel %vm3491_vm3, %v3539_v62, %v3541_v55  ;;  %v3991_v26 = vsel %vm3940_vm4, %v3988_v31, %v3990_v46  ;;  %v4392_v30 = vmax.f32 %v17876_v25, 0.0  ;;  %v23396_v62 = vmax.f32 %v17848_v48, %v17694_v9  ;;  %v2840_v45 = vpop.permute.xlu1 %2839  ;;  %3039 = vperm.xlu1 %15167, %v2661_v32  }
 0x1fb   : > { %v17995_v58 = vmul.f32 %v2755_v41, %v23394_v60  ;;  %v3853_v37 = vmax.f32 %v3542_v13, %v17967_v10  ;;  %v23395_v41 = vld [vmem:[#allocation11_spill] sm:$0xff]  ;;  %v23397_v40 = vmax.f32 %v17883_v54, %v17824_v51  ;;  %v18023_v10 = vmax.f32 %v3835_v36, %v3957_v23  ;;  %v18026_v60 = vld [vmem:[%s16214_s0 + $0x1a0] sm:$0xff]   ;;  %v18044_v36 = vpop.permute.xlu0 %1196  ;;  %3044 = vperm.xlu0 %15168, %v2662_v53  }
 0x1fc   : > { %2379 = vmatmul.mubr.bf16.gmra.mrb[172].mxu0 %v23395_v41  ;;  %v4520_v31 = vmax.f32 %v23396_v62, %v17985_v29  ;;  %23398 = vst [vmem:[#allocation11_spill] sm:$0xff] %v18026_v60  ;;  %v18030_v41 = vmax.f32 %v3852_v35, %v3991_v26  ;;  %v4410_v62 = vmax.f32 %v17722_v42, %v17842_v59  ;;  %v18048_v26 = vpop.f32.mrb[68].mxu0 }
 0x1fd   : > { %v23294_v19 = vrot.slane %v17995_v58, 7  ;;  %v18021_v13 = vmax.f32 %v23397_v40, %v3955_v57  ;;  %13139 = vmatprep.mubr.msk.bf16.mxu0 %vm1344_vm0, %v18026_v60  ;;  %v23399_v51 = vrot.slane %v17995_v58, 1  ;;  %v18042_v57 = vmul.f32 %v2840_v45, %v2509_v3  ;;  %v2174_v53 = vpop.f32.mrb[69].mxu0 }
 0x1fe   : > { %v4722_v23 = vpack.c.bf16 %v4520_v31, %v4519_v63  ;;  %v2510_v3 = vmax.f32 %v17906_v1, 0.0  ;;  %v18058_v63 = vadd.f32 %v17254_v17, %v17889_v49  ;;  %v18071_v1 = vpop.f32.mrb[70].mxu0  ;;  %v2760_v49 = vpop.permute.xlu1 %2759  ;;  %v4394_v53 = vmax.f32 %v17805_v4, %v17901_v50 }
 0x1ff   : > { %v18037_v18 = vsel %vm3491_vm3, %v3507_v6, %v23294_v19  ;;  %v3959_v54 = vsel %vm3940_vm4, %v3956_v43, %v23399_v51  ;;  %v4503_v40 = vmax.f32 %v4391_v22, %v18021_v13  ;;  %v4504_v6 = vmax.f32 %v4392_v30, %v18023_v10  ;;  %v2663_v43 = vld [vmem:[%s23254_s3 + $0x220] sm:$0xff]  ;;  %v2670_v22 = vld [vmem:[%s23254_s3 + $0x258] sm:$0xff] }
 0x200   : > { %v23296_v32 = vrot.slane %v18042_v57, 7  ;;  %v23295_v31 = vrot.slane %v18042_v57, 1  ;;  %14191 = vmatprep.subr.bf16.mxu1 %v4722_v23  ;;  %v23400_v30 = vmax.f32 %v17590_v14, %v17757_v34  ;;  %v18073_v35 = vmax.f32 %v3836_v20, %v3959_v54  ;;  %3049 = vperm.xlu1 %15167, %v2663_v43   ;;  %v23402_v43 = vld [vmem:[#allocation14_spill] sm:$0xff] }
 0x201   : > { %v4714_v51 = vpack.c.bf16 %v4504_v6, %v4503_v40  ;;  %v4393_v23 = vmax.f32 %v17800_v7, %v17813_v16  ;;  %v18081_v19 = vadd.f32 %v17254_v17, %v17913_v44  ;;  %v23401_v54 = vmax.f32 %v17442_v21, 0.0  ;;  %v18093_v7 = vpop.permute.xlu0 %1318  ;;  %v2177_v6 = vpop.f32.mrb[71].mxu0  ;;  %3084 = vperm.xlu0 %15168, %v2670_v22  }
 0x202   : > { %v18069_v45 = vmax.f32 %v23400_v30, %v18030_v41  ;;  %v18086_v30 = vsel %vm3491_vm3, %v3541_v55, %v23296_v32  ;;  %v3993_v20 = vsel %vm3940_vm4, %v3990_v46, %v23295_v31  ;;  %v2511_v44 = vmax.f32 %v17909_v27, 0.0  ;;  %v2671_v55 = vld [vmem:[%s23254_s3 + $0x260] sm:$0xff]  ;;  %v2845_v6 = vpop.permute.xlu1 %2844 }
 0x203   : > { %v3277_v40 = vmul.f32 %v2760_v49, %v23401_v54  ;;  %14192 = vmatpush3.bf16.msra.mxu1 %v4714_v51  ;;  %v18101_v46 = vmax.f32 %v3853_v37, %v3993_v20  ;;  %v18104_v21 = vmax.f32 %v4393_v23, %v18073_v35  ;;  %v2672_v51 = vld [vmem:[%s23254_s3 + $0x268] sm:$0xff]  ;;  %v2512_v37 = vmax.f32 %v17916_v0, 0.0 }
 0x204   : > { %2387 = vmatmul.mubr.bf16.gmra.mrb[176].mxu0 %v23402_v43  ;;  %v18117_v20 = vld [vmem:[%s16214_s0 + $0x1a8] sm:$0xff]   ;;  %v4395_v43 = vmax.f32 %v17871_v47, %v18021_v13  ;;  %v23404_v27 = vrot.slane %v17995_v58, 7  ;;  %3089 = vperm.xlu1 %15167, %v2671_v55   ;;  %v3294_v42 = vmul.f32 %v2845_v6, %v2510_v3  ;;  %v2675_v3 = vld [vmem:[%s23254_s3 + $0x280] sm:$0xff] }
 0x205   : > { %v3511_v49 = vrot.slane %v3277_v40, 7  ;;  %v3960_v54 = vrot.slane %v3277_v40, 1  ;;  %v4522_v23 = vmax.f32 %v4410_v62, %v18101_v46  ;;  %23403 = vst [vmem:[#allocation14_spill] sm:$0xff] %v18117_v20  ;;  %13140 = vmatprep.mubr.msk.bf16.mxu0 %vm1344_vm0, %v18117_v20  ;;  %v23405_v31 = vld [vmem:[#allocation10_spill] sm:$0xff]  ;;  %v23407_v62 = vrot.slane %v17995_v58, 1  ;;  %v2850_v47 = vpop.permute.xlu0 %2849  ;;  %3094 = vperm.xlu0 %15168, %v2672_v51  }
 0x206   : > { %v23406_v32 = vrot.slane %v23405_v31, 7  ;;  %v23408_v20 = vrot.slane %v23405_v31, 1  ;;  %v18138_v14 = vmul.f32 %v2850_v47, %v2511_v44  ;;  %v3994_v6 = vrot.slane %v3294_v42, 1 }
 0x207   : > { %v3512_v22 = vsel %vm3491_vm3, %v23404_v27, %v3511_v49  ;;  %v3961_v60 = vsel %vm3940_vm4, %v23407_v62, %v3960_v54  ;;  %v18140_v27 = vpop.f32.mrb[72].mxu0  ;;  %v4723_v55 = vpack.c.bf16 %v4522_v23, %v18069_v45  ;;  %v2855_v45 = vpop.permute.xlu1 %2854  ;;  %v18167_v23 = vld [vmem:[%s23346_s2] ss:$0 sm:$0xff] }
 0x208   : > { %v3514_v0 = vsel %vm3491_vm3, %v3511_v49, %v23406_v32  ;;  %v3963_v24 = vsel %vm3940_vm4, %v3960_v54, %v23408_v20  ;;  %v3838_v28 = vmax.f32 %v3512_v22, %v3277_v40  ;;  %v2674_v32 = vld [vmem:[%s23254_s3 + $0x278] sm:$0xff]  ;;  %v18147_v49 = vadd.f32 %v17254_v17, %v17969_v38  ;;  %v2182_v54 = vpop.f32.mrb[73].mxu0 }
 0x209   : > { %v3839_v4 = vmax.f32 %v3514_v0, %v23405_v31  ;;  %v2513_v31 = vmax.f32 %v18058_v63, 0.0  ;;  %v23409_v40 = vmax.f32 %v18037_v18, %v17995_v58  ;;  %v3545_v22 = vrot.slane %v3294_v42, 7  ;;  %v18162_v38 = vpop.f32.mrb[74].mxu0  ;;  %14193 = vmatprep.subr.bf16.mxu1 %v4723_v55  ;;  %3104 = vperm.xlu1 %15167, %v2674_v32   ;;  %v23410_v20 = vld [vmem:[#allocation17_spill] sm:$0xff] }
 0x20a   : > { %v18159_v51 = vmax.f32 %v3838_v28, %v3963_v24  ;;  %v3547_v17 = vrot.slane %v18138_v14, 7  ;;  %v18171_v63 = vadd.f32 %v18167_v23, %v17983_v2  ;;  %v3996_v58 = vrot.slane %v18138_v14, 1  ;;  %v18176_v24 = vpop.permute.xlu0 %1076  ;;  %v2185_v18 = vpop.f32.mrb[75].mxu0  ;;  %3109 = vperm.xlu0 %15168, %v2675_v3  }
 0x20b   : > { %v18157_v44 = vmax.f32 %v23409_v40, %v3961_v60  ;;  %v18174_v28 = vmul.f32 %v2855_v45, %v2512_v37  ;;  %v18182_v0 = vsel %vm1344_vm0, %v23410_v20, %v17997_v52  ;;  %v23411_v2 = vrot.slane %v18042_v57, 7  ;;  %v23413_v45 = vld [vmem:[#allocation13_spill] sm:$0xff]  ;;  %v2673_v18 = vld [vmem:[%s23254_s3 + $0x270] sm:$0xff]  ;;  %v2860_v3 = vpop.permute.xlu1 %2859 }
 0x20c   : > { %v23412_v37 = vrot.slane %v18042_v57, 1  ;;  %v3548_v54 = vsel %vm3491_vm3, %v3545_v22, %v3547_v17  ;;  %v3997_v52 = vsel %vm3940_vm4, %v3994_v6, %v3996_v58  ;;  %2395 = vmatmul.mubr.bf16.gmra.mrb[180].mxu0 %v23413_v45 }
 0x20d   : > { %v4506_v60 = vmax.f32 %v4394_v53, %v18157_v44  ;;  %v3546_v62 = vsel %vm3491_vm3, %v23411_v2, %v3545_v22  ;;  %v2676_v53 = vld [vmem:[%s23254_s3 + $0x288] sm:$0xff]  ;;  %v3856_v55 = vmax.f32 %v3548_v54, %v18138_v14  ;;  %v3549_v40 = vrot.slane %v18174_v28, 7  ;;  %v18204_v2 = vld [vmem:[%s16214_s0 + $0x1b0] sm:$0xff]  }
 0x20e   : > { %v3995_v47 = vsel %vm3940_vm4, %v23412_v37, %v3994_v6  ;;  %v3855_v32 = vmax.f32 %v3546_v62, %v3294_v42  ;;  %v3998_v22 = vrot.slane %v18174_v28, 1  ;;  %23414 = vst [vmem:[#allocation10_spill] sm:$0xff] %v18204_v2  ;;  %13141 = vmatprep.mubr.msk.bf16.mxu0 %vm1344_vm0, %v18204_v2  ;;  %v23415_v42 = vmax.f32 %v18086_v30, %v18042_v57  ;;  %v23416_v6 = vld [vmem:[#allocation12_spill] sm:$0xff]  ;;  %v18219_v45 = vpop.permute.xlu0 %1198 }
 0x20f   : > { %v4715_v20 = vpack.c.bf16 %v4506_v60, %v18104_v21  ;;  %v18214_v62 = vmax.f32 %v3839_v4, %v23416_v6  ;;  %v3550_v37 = vsel %vm3491_vm3, %v3547_v17, %v3549_v40  ;;  %v18217_v54 = vmul.f32 %v2860_v3, %v2513_v31  ;;  %3114 = vperm.xlu1 %15167, %v2676_v53   ;;  %v18230_v4 = vpop.f32.mrb[76].mxu0  ;;  %v2677_v31 = vld [vmem:[%s23254_s3 + $0x290] sm:$0xff] }
 0x210   : > { %v18211_v14 = vmax.f32 %v23415_v42, %v3995_v47  ;;  %v18221_v21 = vmax.f32 %v3855_v32, %v3997_v52  ;;  %v4507_v60 = vmax.f32 %v4395_v43, %v18159_v51  ;;  %v18226_v2 = vadd.f32 %v18167_v23, %v18048_v26  ;;  %3099 = vperm.xlu0 %15168, %v2673_v18   ;;  %v2190_v47 = vpop.f32.mrb[77].mxu0  ;;  %v18247_v52 = vpop.permute.xlu1 %1320 }
 0x211   : > { %v3857_v57 = vmax.f32 %v3550_v37, %v18174_v28  ;;  %v3999_v30 = vsel %vm3940_vm4, %v3996_v58, %v3998_v22  ;;  %14194 = vmatpush3.bf16.msra.mxu1 %v4715_v20  ;;  %23417 = vst [vmem:[#allocation17_spill] sm:$0xff] %v18230_v4  ;;  %v3551_v17 = vrot.slane %v18217_v54, 7  ;;  %v4000_v43 = vrot.slane %v18217_v54, 1  ;;  %v2678_v28 = vld [vmem:[%s23254_s3 + $0x298] sm:$0xff]  ;;  %v18245_v32 = vpop.f32.mrb[78].mxu0 }
 0x212   : > { %v2514_v26 = vmax.f32 %v18081_v19, 0.0  ;;  %v23418_v58 = vmax.f32 %v17668_v33, %v17953_v15  ;;  %23419 = vst [vmem:[#allocation13_spill] sm:$0xff] %v18245_v32  ;;  %v23420_v18 = vmax.f32 %v17694_v9, %v17985_v29  ;;  %v23421_v19 = vmax.f32 %v17876_v25, %v18023_v10  ;;  %v2193_v32 = vpop.f32.mrb[79].mxu0 }
 0x213   : > { %v18257_v42 = vmax.f32 %v3856_v55, %v3999_v30  ;;  %v4413_v6 = vmax.f32 %v17757_v34, %v18030_v41  ;;  %v18262_v37 = vsel %vm3491_vm3, %v3549_v40, %v3551_v17  ;;  %v4001_v47 = vsel %vm3940_vm4, %v3998_v22, %v4000_v43  ;;  %3119 = vperm.xlu1 %15167, %v2677_v31   ;;  %v2679_v40 = vld [vmem:[%s23254_s3 + $0x2a0] sm:$0xff] }
 0x214   : > { %v4523_v53 = vmax.f32 %v23418_v58, %v18211_v14  ;;  %v4524_v3 = vmax.f32 %v23420_v18, %v18221_v21  ;;  %v4508_v20 = vmax.f32 %v23421_v19, %v18214_v62  ;;  %v2865_v58 = vpop.permute.xlu0 %2864  ;;  %v2515_v18 = vmax.f32 %v18147_v49, 0.0  ;;  %3124 = vperm.xlu0 %15168, %v2678_v28   ;;  %2403 = vmatmul.mubr.bf16.gmra.mrb[184].mxu0 %v17795_v39  ;;  %v2680_v49 = vld [vmem:[%s23254_s3 + $0x2a8] sm:$0xff]  ;;  %v2870_v28 = vpop.permute.xlu1 %2869 }
 0x215   : > { %v4414_v4 = vmax.f32 %v17842_v59, %v18101_v46  ;;  %v3858_v25 = vmax.f32 %v18262_v37, %v18217_v54  ;;  %v3298_v55 = vmul.f32 %v2865_v58, %v2514_v26  ;;  %v18277_v22 = vmax.f32 %v3857_v57, %v4001_v47  ;;  %v15976_v57 = vld [vmem:[%s16214_s0 + $0x1b8] sm:$0xff]  }
 0x216   : > { %v4724_v34 = vpack.c.bf16 %v4524_v3, %v4523_v53  ;;  %v4716_v30 = vpack.c.bf16 %v4508_v20, %v4507_v60  ;;  %v4525_v59 = vmax.f32 %v4413_v6, %v18257_v42  ;;  %v4397_v54 = vmax.f32 %v17813_v16, %v18073_v35  ;;  %13142 = vmatprep.mubr.msk.bf16.mxu0 %vm1344_vm0, %v15976_v57  ;;  %v2664_v6 = vld [vmem:[%s23254_s3 + $0x228] sm:$0xff] }
 0x217   : > { %v4398_v60 = vmax.f32 %v17901_v50, %v18157_v44  ;;  %v18286_v31 = vadd.f32 %v18167_v23, %v18071_v1  ;;  %v3553_v26 = vrot.slane %v3298_v55, 7  ;;  %v4002_v39 = vrot.slane %v3298_v55, 1  ;;  %3129 = vperm.xlu1 %15167, %v2679_v40  }
 0x218   : > { %14195 = vmatprep.subr.bf16.mxu1 %v4724_v34  ;;  %v2516_v53 = vmax.f32 %v18171_v63, 0.0  ;;  %v18291_v32 = vmul.f32 %v2870_v28, %v2515_v18  ;;  %v2875_v16 = vpop.permute.xlu0 %2874  ;;  %v4526_v50 = vmax.f32 %v4414_v4, %v18277_v22  ;;  %v4509_v3 = vmax.f32 %v4397_v54, %v17509_v61  ;;  %3134 = vperm.xlu0 %15168, %v2680_v49   ;;  %v18299_v63 = vpop.f32.mrb[80].mxu0 }
 0x219   : > { %14196 = vmatpush3.bf16.msra.mxu1 %v4716_v30  ;;  %v3554_v1 = vsel %vm3491_vm3, %v3551_v17, %v3553_v26  ;;  %v4003_v19 = vsel %vm3940_vm4, %v4000_v43, %v4002_v39  ;;  %v4510_v37 = vmax.f32 %v4398_v60, %v17717_v5  ;;  %v2198_v18 = vpop.f32.mrb[81].mxu0  ;;  %v2517_v17 = vmax.f32 %v18226_v2, 0.0  ;;  %v18312_v40 = vpop.permute.xlu1 %1078 }
 0x21a   : > { %v18297_v20 = vmul.f32 %v2875_v16, %v2516_v53  ;;  %v3859_v47 = vmax.f32 %v3554_v1, %v3298_v55  ;;  %v3555_v4 = vrot.slane %v18291_v32, 7  ;;  %v4004_v58 = vrot.slane %v18291_v32, 1  ;;  %v18310_v30 = vpop.f32.mrb[82].mxu0  ;;  %v2681_v55 = vld [vmem:[%s23254_s3 + $0x2b0] sm:$0xff] }
 0x21b   : > { %v4725_v49 = vpack.c.bf16 %v4526_v50, %v4525_v59  ;;  %v4717_v54 = vpack.c.bf16 %v4510_v37, %v4509_v3  ;;  %v2181_v60 = vadd.f32 %v18167_v23, %v18140_v27  ;;  %v2201_v57 = vpop.f32.mrb[83].mxu0  ;;  %3054 = vperm.xlu1 %15167, %v2664_v6   ;;  %v1769_v16 = vsel %vm1626_vm2, %v17925_v11, %v17852_v56  ;;  %v2665_v27 = vld [vmem:[%s23254_s3 + $0x230] sm:$0xff]  ;;  %v2682_v37 = vld [vmem:[%s23254_s3 + $0x2b8] sm:$0xff] }
 0x21c   : > { %v3557_v43 = vrot.slane %v18297_v20, 7  ;;  %v4006_v34 = vrot.slane %v18297_v20, 1  ;;  %v3556_v28 = vsel %vm3491_vm3, %v3553_v26, %v3555_v4  ;;  %v4005_v2 = vsel %vm3940_vm4, %v4002_v39, %v4004_v58  ;;  %v2880_v53 = vpop.permute.xlu0 %2879  ;;  %3139 = vperm.xlu0 %15168, %v2681_v55   ;;  %2411 = vmatmul.mubr.bf16.gmra.mrb[188].mxu0 %v1769_v16  ;;  %v2683_v57 = vld [vmem:[%s23254_s3 + $0x2c0] sm:$0xff] }
 0x21d   : > { %v3860_v59 = vmax.f32 %v3556_v28, %v18291_v32  ;;  %v18327_v1 = vmul.f32 %v2880_v53, %v2517_v17  ;;  %14197 = vmatprep.subr.bf16.mxu1 %v4725_v49  ;;  %v18333_v39 = vmax.f32 %v3858_v25, %v4003_v19  ;;  %v18335_v56 = vmax.f32 %v3859_v47, %v4005_v2  ;;  %v18339_v6 = vpop.permute.xlu1 %1200  ;;  %v18363_v17 = vpop.f32.mrb[84].mxu0  ;;  %v2666_v49 = vld [vmem:[%s23254_s3 + $0x238] sm:$0xff] }
 0x21e   : > { %v3558_v50 = vsel %vm3491_vm3, %v3555_v4, %v3557_v43  ;;  %v4007_v3 = vsel %vm3940_vm4, %v4004_v58, %v4006_v34  ;;  %14198 = vmatpush3.bf16.msra.mxu1 %v4717_v54  ;;  %v4416_v25 = vmax.f32 %v17985_v29, %v18221_v21  ;;  %v1611_v19 = vsel %vm1513_vm1, %v18182_v0, %v18044_v36  ;;  %v15977_v4 = vld [vmem:[%s16214_s0 + $0x1c0] sm:$0xff]  }
 0x21f   : > { %v3861_v26 = vmax.f32 %v3558_v50, %v18297_v20  ;;  %v3559_v11 = vrot.slane %v18327_v1, 7  ;;  %v4008_v32 = vrot.slane %v18327_v1, 1  ;;  %v4415_v20 = vmax.f32 %v17953_v15, %v18211_v14  ;;  %3059 = vperm.xlu1 %15167, %v2665_v27   ;;  %13143 = vmatprep.mubr.msk.bf16.mxu0 %vm1344_vm0, %v15977_v4 }
 0x220   : > { %v18351_v47 = vpop.permute.xlu0 %1322  ;;  %v4399_v58 = vmax.f32 %v18021_v13, %v18159_v51  ;;  %v4400_v18 = vmax.f32 %v18023_v10, %v18214_v62  ;;  %v4528_v0 = vmax.f32 %v4416_v25, %v18335_v56  ;;  %3144 = vperm.xlu0 %15168, %v2682_v37   ;;  %v2206_v10 = vpop.f32.mrb[85].mxu0  ;;  %v2519_v2 = vmax.f32 %v2181_v60, 0.0 }
 0x221   : > { %v18360_v15 = vsel %vm3491_vm3, %v3557_v43, %v3559_v11  ;;  %v4009_v29 = vsel %vm3940_vm4, %v4006_v34, %v4008_v32  ;;  %v4527_v36 = vmax.f32 %v4415_v20, %v18333_v39  ;;  %v2518_v43 = vmax.f32 %v18286_v31, 0.0  ;;  %v18375_v54 = vpop.f32.mrb[86].mxu0  ;;  %v2885_v28 = vpop.permute.xlu1 %2884 }
 0x222   : > { %v3862_v13 = vmax.f32 %v18360_v15, %v18327_v1  ;;  %v4511_v55 = vmax.f32 %v4399_v58, %v17635_v12  ;;  %v4512_v34 = vmax.f32 %v4400_v18, %v17848_v48  ;;  %v18380_v16 = vmax.f32 %v3860_v59, %v4007_v3  ;;  %v2209_v37 = vpop.f32.mrb[87].mxu0  ;;  %v2667_v3 = vld [vmem:[%s23254_s3 + $0x240] sm:$0xff] }
 0x223   : > { %v4726_v53 = vpack.c.bf16 %v4528_v0, %v4527_v36  ;;  %v18382_v50 = vmax.f32 %v3861_v26, %v4009_v29  ;;  %v1494_v31 = vsel %vm1344_vm0, %v17753_v8, %v18176_v24  ;;  %v3302_v1 = vmul.f32 %v2885_v28, %v2518_v43  ;;  %3064 = vperm.xlu1 %15167, %v2666_v49   ;;  %v23423_v36 = vld [vmem:[#allocation15_spill] sm:$0xff] }
 0x224   : > { %v2890_v27 = vpop.permute.xlu0 %2889  ;;  %v4718_v20 = vpack.c.bf16 %v4512_v34, %v4511_v55  ;;  %v4417_v60 = vmax.f32 %v18030_v41, %v18257_v42  ;;  %v4418_v59 = vmax.f32 %v18101_v46, %v18277_v22  ;;  %v4401_v8 = vmax.f32 %v18073_v35, %v17509_v61  ;;  %3149 = vperm.xlu0 %15168, %v2683_v57   ;;  %v23422_v35 = vld [vmem:[#allocation16_spill] sm:$0xff]  ;;  %v2212_v55 = vpop.f32.mrb[88].mxu0 }
 0x225   : > { %v18389_v25 = vmul.f32 %v2890_v27, %v2519_v2  ;;  %14199 = vmatprep.subr.bf16.mxu1 %v4726_v53  ;;  %v4402_v24 = vmax.f32 %v18157_v44, %v17717_v5  ;;  %v3561_v26 = vrot.slane %v3302_v1, 7  ;;  %v4010_v4 = vrot.slane %v3302_v1, 1  ;;  %v18405_v15 = vpop.permute.xlu1 %1080  ;;  %v2684_v5 = vld [vmem:[%s23254_s3 + $0x2c8] sm:$0xff]  ;;  %v2214_v57 = vpop.f32.mrb[89].mxu0  ;;  %v2685_v37 = vld [vmem:[%s23254_s3 + $0x2d0] sm:$0xff] }
 0x226   : > { %14200 = vmatpush3.bf16.msra.mxu1 %v4718_v20  ;;  %v1772_v41 = vsel %vm1626_vm2, %v1611_v19, %v18093_v7  ;;  %v4529_v58 = vmax.f32 %v4417_v60, %v18380_v16  ;;  %v4530_v61 = vmax.f32 %v4418_v59, %v18382_v50  ;;  %v4513_v44 = vmax.f32 %v4401_v8, %v23422_v35 }
 0x227   : > { %v3563_v46 = vrot.slane %v18389_v25, 7  ;;  %v4012_v18 = vrot.slane %v18389_v25, 1  ;;  %2419 = vmatmul.mubr.bf16.gmra.mrb[192].mxu0 %v1772_v41  ;;  %v3562_v7 = vsel %vm3491_vm3, %v3559_v11, %v3561_v26  ;;  %v4011_v19 = vsel %vm3940_vm4, %v4008_v32, %v4010_v4  ;;  %3069 = vperm.xlu1 %15167, %v2667_v3   ;;  %v2668_v11 = vld [vmem:[%s23254_s3 + $0x248] sm:$0xff]  ;;  %v2686_v41 = vld [vmem:[%s23254_s3 + $0x2d8] sm:$0xff] }
 0x228   : > { %v18414_v29 = vpop.permute.xlu0 %1202  ;;  %v4514_v0 = vmax.f32 %v4402_v24, %v23423_v36  ;;  %v3863_v49 = vmax.f32 %v3562_v7, %v3302_v1  ;;  %v15978_v32 = vld [vmem:[%s16214_s0 + $0x1c8] sm:$0xff]   ;;  %v1613_v34 = vsel %vm1513_vm1, %v1494_v31, %v18219_v45  ;;  %v4727_v2 = vpack.c.bf16 %v4530_v61, %v4529_v58  ;;  %3154 = vperm.xlu0 %15168, %v2684_v5   ;;  %v2215_v1 = vpop.f32.mrb[90].mxu0  ;;  %v2669_v24 = vld [vmem:[%s23254_s3 + $0x250] sm:$0xff] }
 0x229   : > { %v18420_v10 = vsel %vm3491_vm3, %v3561_v26, %v3563_v46  ;;  %v4013_v43 = vsel %vm3940_vm4, %v4010_v4, %v4012_v18  ;;  %13144 = vmatprep.mubr.msk.bf16.mxu0 %vm1344_vm0, %v15978_v32  ;;  %v18434_v27 = vpop.permute.xlu1 %1324  ;;  %v18439_v20 = vmax.f32 %v3862_v13, %v4011_v19  ;;  %v4419_v45 = vmax.f32 %v18211_v14, %v18333_v39  ;;  %v2217_v3 = vpop.f32.mrb[91].mxu0  ;;  %v2688_v32 = vld [vmem:[%s23254_s3 + $0x2e8] sm:$0xff] }
 0x22a   : > { %v3864_v28 = vmax.f32 %v18420_v10, %v18389_v25  ;;  %v4719_v53 = vpack.c.bf16 %v4514_v0, %v4513_v44  ;;  %v18441_v60 = vmax.f32 %v3863_v49, %v4013_v43  ;;  %v4420_v31 = vmax.f32 %v18221_v21, %v18335_v56  ;;  %14201 = vmatprep.subr.bf16.mxu1 %v4727_v2  ;;  %v18479_v35 = vpop.f32.mrb[92].mxu0  ;;  %v15241_v44 = vld [vmem:[%s23255_s4] ss:$28 sps:$4 sm:$0xff]  }
 0x22b   : > { %3074 = vperm.xlu1 %15167, %v2668_v11   ;;  %v4403_v8 = vmax.f32 %v18159_v51, %v17635_v12  ;;  %v4404_v13 = vmax.f32 %v18214_v62, %v17848_v48  ;;  %v4531_v14 = vmax.f32 %v4419_v45, %v18439_v20  ;;  %v2208_v26 = vadd.f32 %v18167_v23, %v18375_v54  ;;  %v23424_v54 = vld [vmem:[#allocation18_spill] sm:$0xff]  ;;  %v2222_v19 = vpop.f32.mrb[93].mxu0  ;;  %v15244_v0 = vld [vmem:[%s23255_s4 + $0x3c] ss:$28 sps:$4 sm:$0xff]  }
 0x22c   : > { %v18447_v59 = vpop.permute.xlu0 %1082  ;;  %14202 = vmatpush3.bf16.msra.mxu1 %v4719_v53  ;;  %v4532_v21 = vmax.f32 %v4420_v31, %v18441_v60  ;;  %3159 = vperm.xlu0 %15168, %v2685_v37   ;;  %v1775_v12 = vsel %vm1626_vm2, %v1613_v34, %v18247_v52  ;;  %v2213_v62 = vadd.f32 %v18167_v23, %v2212_v55  ;;  %v15979_v52 = vld [vmem:[%s16214_s0 + $0x1d0] sm:$0xff]   ;;  %v2223_v43 = vpop.f32.mrb[94].mxu0  ;;  %v2706_v25 = vld [vmem:[%s23254_s3 + $0x378] sm:$0xff] }
 0x22d   : > { %v4515_v51 = vmax.f32 %v4403_v8, %v17668_v33  ;;  %v4516_v48 = vmax.f32 %v4404_v13, %v17694_v9  ;;  %v18465_v4 = vpop.permute.xlu1 %1204  ;;  %v1497_v61 = vsel %vm1344_vm0, %v23424_v54, %v18312_v40  ;;  %v4421_v9 = vmax.f32 %v18257_v42, %v18380_v16  ;;  %v2687_v40 = vld [vmem:[%s23254_s3 + $0x2e0] sm:$0xff]  ;;  %v2225_v57 = vpop.f32.mrb[95].mxu0  ;;  %v15246_v54 = vld [vmem:[%s23255_s4 + $0x38] ss:$28 sps:$4 sm:$0xff]  }
 0x22e   : > { %v4728_v58 = vpack.c.bf16 %v4532_v21, %v4531_v14  ;;  %v2216_v7 = vadd.f32 %v18167_v23, %v2215_v1  ;;  %v2526_v36 = vmax.f32 %v2208_v26, 0.0  ;;  %v1615_v49 = vsel %vm1513_vm1, %v1497_v61, %v18339_v6  ;;  %v2689_v6 = vld [vmem:[%s23254_s3 + $0x2f0] sm:$0xff]  ;;  %v2690_v21 = vld [vmem:[%s23254_s3 + $0x2f8] sm:$0xff] }
 0x22f   : > { %2427 = vmatmul.mubr.bf16.gmra.mrb[196].mxu0 %v1775_v12  ;;  %3079 = vperm.xlu1 %15167, %v2669_v24   ;;  %v4720_v33 = vpack.c.bf16 %v4516_v48, %v4515_v51  ;;  %v2527_v11 = vmax.f32 %v2213_v62, 0.0  ;;  %v2224_v34 = vadd.f32 %v18167_v23, %v2223_v43  ;;  %v1778_v31 = vsel %vm1626_vm2, %v1615_v49, %v18351_v47  ;;  %v23425_v26 = vld [vmem:[#allocation19_spill] sm:$0xff]  ;;  %v15980_v47 = vld [vmem:[%s16214_s0 + $0x1d8] sm:$0xff]  }
 0x230   : > { %v18473_v5 = vpop.permute.xlu0 %1326  ;;  %13145 = vmatprep.mubr.msk.bf16.mxu0 %vm1344_vm0, %v15979_v52  ;;  %14203 = vmatprep.subr.bf16.mxu1 %v4728_v58  ;;  %v2528_v3 = vmax.f32 %v2216_v7, 0.0  ;;  %v1500_v12 = vsel %vm1344_vm0, %v23425_v26, %v18405_v15  ;;  %v2691_v15 = vld [vmem:[%s23254_s3 + $0x300] sm:$0xff]  ;;  %v15247_v7 = vld [vmem:[%s23255_s4 + $0x74] ss:$28 sps:$4 sm:$0xff]   ;;  %v18538_v19 = vadd.f32 %v18167_v23, %v18162_v38  ;;  %v18577_v26 = vadd.f32 %v18167_v23, %v18299_v63 }
 0x231   : > { %3164 = vperm.xlu0 %15168, %v2686_v41   ;;  %14204 = vmatpush3.bf16.msra.mxu1 %v4720_v33  ;;  %v2925_v55 = vpop.permute.xlu1 %2924  ;;  %v2530_v14 = vmax.f32 %v2224_v34, 0.0  ;;  %v2228_v58 = vpop.f32.mrb[96].mxu0  ;;  %v23426_v57 = vld [vmem:[#allocation17_spill] sm:$0xff] }
 0x232   : > { %v18497_v2 = vmul.f32 %v2925_v55, %v2526_v36  ;;  %v1617_v36 = vsel %vm1513_vm1, %v1500_v12, %v18414_v29  ;;  %v2692_v55 = vld [vmem:[%s23254_s3 + $0x308] sm:$0xff] }
 0x233   : > { %3169 = vperm.xlu1 %15167, %v2687_v40   ;;  %v2230_v40 = vpop.f32.mrb[97].mxu0  ;;  %v23428_v12 = vld [vmem:[#allocation11_spill] sm:$0xff] }
 0x234   : > { %v2930_v53 = vpop.permute.xlu0 %2929  ;;  %5259 = vmatmul.mubr.bf16.vlgmr.msra.gmra.mrb[0].mxu1 %v15241_v44  ;;  %v23306_v37 = vrot.slane %v18497_v2, 7  ;;  %v23305_v45 = vrot.slane %v18497_v2, 1  ;;  %v2229_v44 = vadd.f32 %v18167_v23, %v2228_v58  ;;  %v2231_v49 = vpop.f32.mrb[98].mxu0  ;;  %v18598_v40 = vadd.f32 %v18167_v23, %v18310_v30 }
 0x235   : > { %v3311_v1 = vmul.f32 %v2930_v53, %v2527_v11  ;;  %3174 = vperm.xlu0 %15168, %v2688_v32   ;;  %5266 = vmatprep.mubr.bf16.mxu1 %v15244_v0  ;;  %v2935_v24 = vpop.permute.xlu1 %2934  ;;  %v2232_v32 = vadd.f32 %v18167_v23, %v2231_v49  ;;  %v2233_v53 = vpop.f32.mrb[99].mxu0  ;;  %v15249_v49 = vld [vmem:[%s23255_s4 + $0x70] ss:$28 sps:$4 sm:$0xff]  }
 0x236   : > { %v18512_v51 = vmul.f32 %v2935_v24, %v2528_v3  ;;  %v2531_v29 = vmax.f32 %v2229_v44, 0.0  ;;  %v15981_v44 = vld [vmem:[%s16214_s0 + $0x1e0] sm:$0xff]   ;;  %v15250_v53 = vld [vmem:[%s23255_s4 + $0xac] ss:$28 sps:$4 sm:$0xff]  }
 0x237   : > { %v3579_v8 = vrot.slane %v3311_v1, 7  ;;  %v4028_v13 = vrot.slane %v3311_v1, 1  ;;  %2435 = vmatmul.mubr.bf16.gmra.mrb[200].mxu0 %v1778_v31  ;;  %3179 = vperm.xlu1 %15167, %v2689_v6   ;;  %v2221_v6 = vadd.f32 %v18167_v23, %v18479_v35  ;;  %v2532_v24 = vmax.f32 %v2232_v32, 0.0 }
 0x238   : > { %v2945_v48 = vpop.permute.xlu0 %2944  ;;  %13146 = vmatprep.mubr.msk.bf16.mxu0 %vm1344_vm0, %v15980_v47  ;;  %v3581_v33 = vrot.slane %v18512_v51, 7  ;;  %v4030_v52 = vrot.slane %v18512_v51, 1 }
 0x239   : > { %v3580_v62 = vsel %vm3491_vm3, %v23306_v37, %v3579_v8  ;;  %v18522_v41 = vsel %vm3940_vm4, %v23305_v45, %v4028_v13  ;;  %3184 = vperm.xlu0 %15168, %v2690_v21   ;;  %v18542_v0 = vmul.f32 %v2945_v48, %v2530_v14  ;;  %v2950_v43 = vpop.permute.xlu1 %2949  ;;  %v1781_v14 = vsel %vm1626_vm2, %v1617_v36, %v18434_v27  ;;  %v23427_v21 = vld [vmem:[#allocation13_spill] sm:$0xff] }
 0x23a   : > { %v3872_v61 = vmax.f32 %v3580_v62, %v3311_v1  ;;  %v18550_v11 = vsel %vm3491_vm3, %v3579_v8, %v3581_v33  ;;  %v4031_v38 = vsel %vm3940_vm4, %v4028_v13, %v4030_v52  ;;  %v18558_v1 = vadd.f32 %v18167_v23, %v23426_v57  ;;  %v2693_v8 = vld [vmem:[%s23254_s3 + $0x310] sm:$0xff]  ;;  %v2694_v27 = vld [vmem:[%s23254_s3 + $0x318] sm:$0xff] }
 0x23b   : > { %3189 = vperm.xlu1 %15167, %v2691_v15   ;;  %v3873_v31 = vmax.f32 %v18550_v11, %v18512_v51  ;;  %v3315_v13 = vmul.f32 %v2950_v43, %v2531_v29  ;;  %v18573_v35 = vadd.f32 %v18167_v23, %v23427_v21  ;;  %v1503_v48 = vsel %vm1344_vm0, %v23428_v12, %v18447_v59  ;;  %v2695_v59 = vld [vmem:[%s23254_s3 + $0x320] sm:$0xff]  ;;  %v2696_v12 = vld [vmem:[%s23254_s3 + $0x328] sm:$0xff] }
 0x23c   : > { %v2955_v34 = vpop.permute.xlu0 %2954  ;;  %v18564_v3 = vmax.f32 %v3872_v61, %v4031_v38  ;;  %5267 = vmatmul.mubr.bf16.gmra.mrb[4].mxu1 %v15246_v54  ;;  %v3585_v47 = vrot.slane %v18542_v0, 7  ;;  %v4034_v58 = vrot.slane %v18542_v0, 1  ;;  %v2529_v36 = vmax.f32 %v2221_v6, 0.0 }
 0x23d   : > { %3194 = vperm.xlu0 %15168, %v2692_v55   ;;  %5274 = vmatprep.mubr.bf16.mxu1 %v15247_v7  ;;  %v1085_v62 = vpop.permute.xlu1 %1084  ;;  %v3587_v15 = vrot.slane %v3315_v13, 7  ;;  %v4036_v54 = vrot.slane %v3315_v13, 1  ;;  %v18587_v61 = vmul.f32 %v2955_v34, %v2532_v24  ;;  %v2236_v7 = vpop.f32.mrb[100].mxu0  ;;  %v2520_v43 = vmax.f32 %v18538_v19, 0.0  ;;  %v2703_v19 = vld [vmem:[%s23254_s3 + $0x360] sm:$0xff] }
 0x23e   : > { %v2521_v55 = vmax.f32 %v18558_v1, 0.0  ;;  %v2238_v34 = vpop.f32.mrb[101].mxu0  ;;  %v18616_v57 = vadd.f32 %v18167_v23, %v18363_v17  ;;  %v1619_v6 = vsel %vm1513_vm1, %v1503_v48, %v18465_v4  ;;  %v2237_v24 = vadd.f32 %v18167_v23, %v2236_v7 }
 0x23f   : > { %2443 = vmatmul.mubr.bf16.gmra.mrb[204].mxu0 %v1781_v14  ;;  %3199 = vperm.xlu1 %15167, %v2693_v8   ;;  %v3588_v38 = vsel %vm3491_vm3, %v3585_v47, %v3587_v15  ;;  %v18607_v32 = vsel %vm3940_vm4, %v4034_v58, %v4036_v54  ;;  %v3589_v29 = vrot.slane %v18587_v61, 7  ;;  %v4038_v30 = vrot.slane %v18587_v61, 1  ;;  %v2239_v14 = vpop.f32.mrb[102].mxu0 }
 0x240   : > { %v18589_v63 = vpop.permute.xlu0 %1206  ;;  %13147 = vmatprep.mubr.msk.bf16.mxu0 %vm1344_vm0, %v15981_v44  ;;  %v3876_v8 = vmax.f32 %v3588_v38, %v3315_v13  ;;  %v2240_v44 = vadd.f32 %v18167_v23, %v2239_v14  ;;  %v2241_v13 = vpop.f32.mrb[103].mxu0  ;;  %v2533_v38 = vmax.f32 %v2237_v24, 0.0  ;;  %v2522_v45 = vmax.f32 %v18573_v35, 0.0  ;;  %v23429_v14 = vld [vmem:[#allocation14_spill] sm:$0xff]  ;;  %v2698_v24 = vld [vmem:[%s23254_s3 + $0x338] sm:$0xff] }
 0x241   : > { %3204 = vperm.xlu0 %15168, %v2694_v27   ;;  %v2940_v21 = vpop.permute.xlu1 %2939  ;;  %v18625_v27 = vsel %vm3491_vm3, %v3587_v15, %v3589_v29  ;;  %v4039_v17 = vsel %vm3940_vm4, %v4036_v54, %v4038_v30  ;;  %v2697_v15 = vld [vmem:[%s23254_s3 + $0x330] sm:$0xff] }
 0x242   : > { %v3313_v34 = vmul.f32 %v2940_v21, %v2529_v36  ;;  %v3877_v48 = vmax.f32 %v18625_v27, %v18587_v61  ;;  %v18633_v7 = vmax.f32 %v3876_v8, %v4039_v17  ;;  %v1784_v36 = vsel %vm1626_vm2, %v1619_v6, %v18473_v5  ;;  %v2701_v61 = vld [vmem:[%s23254_s3 + $0x350] sm:$0xff] }
 0x243   : > { %3209 = vperm.xlu1 %15167, %v2695_v59   ;;  %v2534_v59 = vmax.f32 %v2240_v44, 0.0  ;;  %v1506_v8 = vsel %vm1344_vm0, %v23429_v14, %v1085_v62  ;;  %v2523_v27 = vmax.f32 %v18577_v26, 0.0 }
 0x244   : > { %v2960_v4 = vpop.permute.xlu0 %2959  ;;  %5275 = vmatmul.mubr.bf16.gmra.mrb[8].mxu1 %v15249_v49  ;;  %v3583_v54 = vrot.slane %v3313_v34, 7  ;;  %v4032_v37 = vrot.slane %v3313_v34, 1 }
 0x245   : > { %3214 = vperm.xlu0 %15168, %v2696_v12   ;;  %5282 = vmatprep.mubr.bf16.mxu1 %v15250_v53  ;;  %v3317_v21 = vmul.f32 %v2960_v4, %v2533_v38  ;;  %v2965_v49 = vpop.permute.xlu1 %2964  ;;  %v4437_v12 = vmax.f32 %v18564_v3, %v18633_v7 }
 0x246   : > { %v3584_v5 = vsel %vm3491_vm3, %v3581_v33, %v3583_v54  ;;  %v3586_v53 = vsel %vm3491_vm3, %v3583_v54, %v3585_v47  ;;  %v4033_v62 = vsel %vm3940_vm4, %v4030_v52, %v4032_v37  ;;  %v4035_v6 = vsel %vm3940_vm4, %v4032_v37, %v4034_v58  ;;  %v2244_v33 = vpop.f32.mrb[104].mxu0  ;;  %v2699_v47 = vld [vmem:[%s23254_s3 + $0x340] sm:$0xff]  ;;  %v15982_v54 = vld [vmem:[%s16214_s0 + $0x1e8] sm:$0xff]  }
 0x247   : > { %2451 = vmatmul.mubr.bf16.gmra.mrb[208].mxu0 %v1784_v36  ;;  %3219 = vperm.xlu1 %15167, %v2697_v15   ;;  %v3874_v44 = vmax.f32 %v3584_v5, %v3313_v34  ;;  %v3875_v4 = vmax.f32 %v3586_v53, %v18542_v0  ;;  %v18661_v13 = vmax.f32 %v3873_v31, %v4033_v62  ;;  %v3591_v38 = vrot.slane %v3317_v21, 7  ;;  %v15252_v37 = vld [vmem:[%s23255_s4 + $0xa8] ss:$28 sps:$4 sm:$0xff]   ;;  %v2246_v31 = vpop.f32.mrb[105].mxu0 }
 0x248   : > { %v2970_v17 = vpop.permute.xlu0 %2969  ;;  %13148 = vmatprep.mubr.msk.bf16.mxu0 %vm1344_vm0, %v15982_v54  ;;  %v1621_v52 = vsel %vm1513_vm1, %v1506_v8, %v18589_v63  ;;  %v4040_v0 = vrot.slane %v3317_v21, 1  ;;  %v18673_v51 = vmul.f32 %v2965_v49, %v2534_v59  ;;  %v2245_v11 = vadd.f32 %v18167_v23, %v2244_v33  ;;  %v15253_v58 = vld [vmem:[%s23255_s4 + $0xe4] ss:$28 sps:$4 sm:$0xff]   ;;  %v2247_v36 = vpop.f32.mrb[106].mxu0  ;;  %v2700_v63 = vld [vmem:[%s23254_s3 + $0x348] sm:$0xff] }
 0x249   : > { %3224 = vperm.xlu0 %15168, %v2698_v24   ;;  %v18679_v34 = vmax.f32 %v3874_v44, %v4035_v6  ;;  %v3592_v15 = vsel %vm3491_vm3, %v3589_v29, %v3591_v38  ;;  %v2975_v14 = vpop.permute.xlu1 %2974  ;;  %v4422_v59 = vmax.f32 %v18277_v22, %v18382_v50  ;;  %v18688_v8 = vmax.f32 %v3875_v4, %v18607_v32  ;;  %v2249_v62 = vpop.f32.mrb[107].mxu0  ;;  %v15259_v6 = vld [vmem:[%s16214_s0 + $0x1f0] sm:$0xff]  }
 0x24a   : > { %v3878_v49 = vmax.f32 %v3592_v15, %v3317_v21  ;;  %v4041_v24 = vsel %vm3940_vm4, %v4038_v30, %v4040_v0  ;;  %v3593_v5 = vrot.slane %v18673_v51, 7  ;;  %v4042_v29 = vrot.slane %v18673_v51, 1  ;;  %v2704_v62 = vld [vmem:[%s23254_s3 + $0x368] sm:$0xff] }
 0x24b   : > { %3229 = vperm.xlu1 %15167, %v2699_v47   ;;  %v18696_v44 = vmax.f32 %v3877_v48, %v4041_v24  ;;  %v2535_v33 = vmax.f32 %v2245_v11, 0.0  ;;  %v2248_v54 = vadd.f32 %v18167_v23, %v2247_v36 }
 0x24c   : > { %v1329_v53 = vpop.permute.xlu0 %1328  ;;  %5283 = vmatmul.mubr.bf16.gmra.mrb[12].mxu1 %v15252_v37  ;;  %v18704_v30 = vsel %vm3491_vm3, %v3591_v38, %v3593_v5  ;;  %v4043_v21 = vsel %vm3940_vm4, %v4040_v0, %v4042_v29  ;;  %v2702_v38 = vld [vmem:[%s23254_s3 + $0x358] sm:$0xff]  ;;  %v18720_v0 = vld [vmem:[%s23255_s4 + $0x2a0] sm:$0x33] }
 0x24d   : > { %v1787_v32 = vsel %vm1626_vm2, %v1621_v52, %v1329_v53  ;;  %3234 = vperm.xlu0 %15168, %v2700_v63   ;;  %5290 = vmatprep.mubr.bf16.mxu1 %v15253_v58  ;;  %v3879_v47 = vmax.f32 %v18704_v30, %v18673_v51  ;;  %v18712_v37 = vmax.f32 %v3878_v49, %v4043_v21  ;;  %v2536_v11 = vmax.f32 %v2248_v54, 0.0  ;;  %v2895_v31 = vpop.permute.xlu1 %2894  ;;  %v2252_v53 = vpop.f32.mrb[108].mxu0 }
 0x24e   : > { %v3319_v52 = vmul.f32 %v2970_v17, %v2535_v33  ;;  %v18724_v58 = vmul.f32 %v2895_v31, %v2520_v43  ;;  %v4438_v17 = vmax.f32 %v18661_v13, %v18696_v44  ;;  %v15255_v43 = vld [vmem:[%s23255_s4 + $0xe0] ss:$28 sps:$4 sm:$0xff]   ;;  %v2254_v54 = vpop.f32.mrb[109].mxu0 }
 0x24f   : > { %2459 = vmatmul.mubr.bf16.gmra.mrb[212].mxu0 %v1787_v32  ;;  %3239 = vperm.xlu1 %15167, %v2701_v61   ;;  %v18732_v24 = vmul.f32 %v2975_v14, %v2536_v11  ;;  %v2253_v14 = vadd.f32 %v18167_v23, %v2252_v53  ;;  %v2255_v11 = vpop.f32.mrb[110].mxu0 }
 0x250   : > { %v2980_v51 = vpop.permute.xlu0 %2979  ;;  %13149 = vmatprep.mubr.msk.bf16.mxu0 %vm1344_vm0, %v15259_v6  ;;  %v3595_v63 = vrot.slane %v3319_v52, 7  ;;  %v4044_v49 = vrot.slane %v3319_v52, 1  ;;  %v3565_v6 = vrot.slane %v18724_v58, 7  ;;  %v4014_v33 = vrot.slane %v18724_v58, 1  ;;  %v2257_v4 = vpop.f32.mrb[111].mxu0 }
 0x251   : > { %3244 = vperm.xlu0 %15168, %v2702_v38   ;;  %v3597_v30 = vrot.slane %v18732_v24, 7  ;;  %v4046_v21 = vrot.slane %v18732_v24, 1  ;;  %v2900_v31 = vpop.permute.xlu1 %2899  ;;  %v15256_v38 = vld [vmem:[%s23255_s4 + $0x11c] ss:$28 sps:$4 sm:$0xff]   ;;  %v2537_v15 = vmax.f32 %v2253_v14, 0.0  ;;  %v2260_v42 = vpop.f32.mrb[112].mxu0 }
 0x252   : > { %v3596_v61 = vsel %vm3491_vm3, %v3593_v5, %v3595_v63  ;;  %v4045_v53 = vsel %vm3940_vm4, %v4042_v29, %v4044_v49  ;;  %v3566_v5 = vsel %vm3491_vm3, %v3563_v46, %v3565_v6  ;;  %v4015_v32 = vsel %vm3940_vm4, %v4012_v18, %v4014_v33  ;;  %v2705_v18 = vld [vmem:[%s23254_s3 + $0x370] sm:$0xff] }
 0x253   : > { %v3880_v54 = vmax.f32 %v3596_v61, %v3319_v52  ;;  %3249 = vperm.xlu1 %15167, %v2703_v19   ;;  %v18764_v48 = vsel %vm3491_vm3, %v3595_v63, %v3597_v30  ;;  %v4047_v29 = vsel %vm3940_vm4, %v4044_v49, %v4046_v21  ;;  %v3865_v52 = vmax.f32 %v3566_v5, %v18724_v58 }
 0x254   : > { %v2985_v36 = vpop.permute.xlu0 %2984  ;;  %v18773_v46 = vmax.f32 %v3864_v28, %v4015_v32  ;;  %5291 = vmatmul.mubr.bf16.gmra.mrb[16].mxu1 %v15255_v43  ;;  %v3881_v4 = vmax.f32 %v18764_v48, %v18732_v24  ;;  %v18780_v63 = vmul.f32 %v2980_v51, %v2537_v15  ;;  %v2256_v19 = vadd.f32 %v18167_v23, %v2255_v11 }
 0x255   : > { %v3305_v58 = vmul.f32 %v2900_v31, %v2521_v55  ;;  %3254 = vperm.xlu0 %15168, %v2704_v62   ;;  %v2905_v49 = vpop.permute.xlu1 %2904  ;;  %5298 = vmatprep.mubr.bf16.mxu1 %v15256_v38  ;;  %v18788_v10 = vmax.f32 %v3880_v54, %v4047_v29  ;;  %v18796_v51 = vmax.f32 %v3879_v47, %v4045_v53  ;;  %v2262_v53 = vpop.f32.mrb[113].mxu0  ;;  %v15260_v54 = vld [vmem:[%s23255_s4 + $0x154] ss:$28 sps:$4 sm:$0xff]  }
 0x256   : > { %v18794_v28 = vmax.f32 %v4421_v9, %v18773_v46  ;;  %v3599_v55 = vrot.slane %v18780_v63, 7  ;;  %v4048_v15 = vrot.slane %v18780_v63, 1  ;;  %v2538_v32 = vmax.f32 %v2256_v19, 0.0  ;;  %v15258_v9 = vld [vmem:[%s23255_s4 + $0x118] ss:$28 sps:$4 sm:$0xff]  }
 0x257   : > { %v3567_v43 = vrot.slane %v3305_v58, 7  ;;  %v4016_v62 = vrot.slane %v3305_v58, 1  ;;  %3259 = vperm.xlu1 %15167, %v2705_v18   ;;  %v18804_v61 = vmul.f32 %v2905_v49, %v2522_v45  ;;  %v18813_v47 = vmax.f32 %v4437_v12, %v18788_v10  ;;  %v2263_v18 = vpop.f32.mrb[114].mxu0 }
 0x258   : > { %v2990_v14 = vpop.permute.xlu0 %2989  ;;  %v18818_v31 = vsel %vm3491_vm3, %v3597_v30, %v3599_v55  ;;  %v2261_v38 = vadd.f32 %v18167_v23, %v2260_v42  ;;  %v18830_v30 = vmul.f32 %v2985_v36, %v2538_v32  ;;  %v2265_v53 = vpop.f32.mrb[115].mxu0 }
 0x259   : > { %v3568_v45 = vsel %vm3491_vm3, %v3565_v6, %v3567_v43  ;;  %v4017_v35 = vsel %vm3940_vm4, %v4014_v33, %v4016_v62  ;;  %3264 = vperm.xlu0 %15168, %v2706_v25   ;;  %v1087_v6 = vpop.permute.xlu1 %1086  ;;  %v3569_v33 = vrot.slane %v18804_v61, 7  ;;  %v4018_v19 = vrot.slane %v18804_v61, 1 }
 0x25a   : > { %v3866_v5 = vmax.f32 %v3568_v45, %v3305_v58  ;;  %v18828_v29 = vmax.f32 %v3865_v52, %v4017_v35  ;;  %v2539_v49 = vmax.f32 %v2261_v38, 0.0  ;;  %v2264_v25 = vadd.f32 %v18167_v23, %v2263_v18  ;;  %v23430_v58 = vld [vmem:[#allocation10_spill] sm:$0xff] }
 0x25b   : > { %v3601_v1 = vrot.slane %v18830_v30, 7  ;;  %v4050_v11 = vrot.slane %v18830_v30, 1  ;;  %v1509_v52 = vsel %vm1344_vm0, %v23430_v58, %v1087_v6  ;;  %v3570_v32 = vsel %vm3491_vm3, %v3567_v43, %v3569_v33  ;;  %v18873_v58 = vld [vmem:[%s23346_s2] ss:$0 sm:$0xff] }
 0x25c   : > { %v2910_v42 = vpop.permute.xlu0 %2909  ;;  %5299 = vmatmul.mubr.bf16.gmra.mrb[20].mxu1 %v15258_v9  ;;  %v4019_v45 = vsel %vm3940_vm4, %v4016_v62, %v4018_v19  ;;  %v18845_v35 = vmul.f32 %v2990_v14, %v2539_v49  ;;  %v2540_v23 = vmax.f32 %v2264_v25, 0.0  ;;  %v3867_v53 = vmax.f32 %v3570_v32, %v18804_v61  ;;  %v2268_v25 = vpop.f32.mrb[116].mxu0 }
 0x25d   : > { %v18841_v36 = vmul.f32 %v2910_v42, %v2523_v27  ;;  %5306 = vmatprep.mubr.bf16.mxu1 %v15260_v54  ;;  %v3602_v38 = vsel %vm3491_vm3, %v3599_v55, %v3601_v1  ;;  %v4051_v18 = vsel %vm3940_vm4, %v4048_v15, %v4050_v11  ;;  %v18850_v6 = vmax.f32 %v3866_v5, %v4019_v45  ;;  %v1209_v26 = vpop.permute.xlu1 %1208  ;;  %v15262_v5 = vld [vmem:[%s23255_s4 + $0x150] ss:$28 sps:$4 sm:$0xff]  }
 0x25e   : > { %v3883_v27 = vmax.f32 %v3602_v38, %v18830_v30  ;;  %v3603_v9 = vrot.slane %v18845_v35, 7  ;;  %v4052_v43 = vrot.slane %v18845_v35, 1  ;;  %v1623_v55 = vsel %vm1513_vm1, %v1509_v52, %v1209_v26  ;;  %v15263_v26 = vld [vmem:[%s23255_s4 + $0x18c] ss:$28 sps:$4 sm:$0xff]  }
 0x25f   : > { %v3571_v62 = vrot.slane %v18841_v36, 7  ;;  %v4020_v54 = vrot.slane %v18841_v36, 1  ;;  %v4049_v61 = vsel %vm3940_vm4, %v4046_v21, %v4048_v15  ;;  %v2269_v52 = vadd.f32 %v18873_v58, %v2268_v25  ;;  %v2270_v15 = vpop.f32.mrb[117].mxu0 }
 0x260   : > { %v2995_v14 = vpop.permute.xlu0 %2994  ;;  %v18867_v30 = vsel %vm3491_vm3, %v3601_v1, %v3603_v9  ;;  %v18879_v21 = vmax.f32 %v3881_v4, %v4049_v61 }
 0x261   : > { %v18858_v49 = vmul.f32 %v2995_v14, %v2540_v23  ;;  %v3572_v42 = vsel %vm3491_vm3, %v3569_v33, %v3571_v62  ;;  %v4021_v33 = vsel %vm3940_vm4, %v4018_v19, %v4020_v54  ;;  %v2271_v23 = vpop.f32.mrb[118].mxu0  ;;  %v1331_v38 = vpop.permute.xlu1 %1330  ;;  %v15266_v14 = vld [vmem:[%s16214_s0 + $0x1f8] sm:$0xff]   ;;  %v4534_v19 = vmax.f32 %v4422_v59, %v18828_v29 }
 0x262   : > { %v3868_v1 = vmax.f32 %v3572_v42, %v18841_v36  ;;  %v18890_v48 = vmax.f32 %v3867_v53, %v4021_v33  ;;  %v4550_v4 = vmax.f32 %v4438_v17, %v18879_v21  ;;  %v2273_v25 = vpop.f32.mrb[119].mxu0  ;;  %v2272_v53 = vadd.f32 %v18873_v58, %v2271_v23 }
 0x263   : > { %v3605_v45 = vrot.slane %v18858_v49, 7  ;;  %v4054_v24 = vrot.slane %v18858_v49, 1  ;;  %v23431_v42 = vmax.f32 %v18598_v40, 0.0  ;;  %v1790_v33 = vsel %vm1626_vm2, %v1623_v55, %v1331_v38 }
 0x264   : > { %v2915_v36 = vpop.permute.xlu0 %2914  ;;  %5307 = vmatmul.mubr.bf16.gmra.mrb[24].mxu1 %v15262_v5  ;;  %v4737_v22 = vpack.c.bf16 %v4550_v4, %v18813_v47  ;;  %v4729_v59 = vpack.c.bf16 %v4534_v19, %v18794_v28  ;;  %2467 = vmatmul.mubr.bf16.gmra.mrb[216].mxu0 %v1790_v33  ;;  %v2541_v12 = vmax.f32 %v2269_v52, 0.0  ;;  %v4053_v40 = vsel %vm3940_vm4, %v4050_v11, %v4052_v43 }
 0x265   : > { %v18902_v61 = vsel %vm3491_vm3, %v3603_v9, %v3605_v45  ;;  %v3308_v15 = vmul.f32 %v2915_v36, %v23431_v42  ;;  %v18911_v32 = vsel %vm3940_vm4, %v4052_v43, %v4054_v24  ;;  %v3000_v23 = vpop.permute.xlu1 %2999  ;;  %5314 = vmatprep.mubr.bf16.mxu1 %v15263_v26  ;;  %13150 = vmatprep.mubr.msk.bf16.mxu0 %vm1344_vm0, %v15266_v14 }
 0x266   : > { %v3885_v17 = vmax.f32 %v18902_v61, %v18858_v49  ;;  %14283 = vmatprep.subr.bf16.mxu1 %v4737_v22  ;;  %v23432_v5 = vmax.f32 %v18818_v31, %v18780_v63  ;;  %v18922_v47 = vmax.f32 %v3883_v27, %v4053_v40  ;;  %v23433_v28 = vmax.f32 %v18333_v39, %v18439_v20  ;;  %v2276_v27 = vpop.f32.mrb[120].mxu0  ;;  %v15265_v39 = vld [vmem:[%s23255_s4 + $0x188] ss:$28 sps:$4 sm:$0xff]  }
 0x267   : > { %v3573_v9 = vrot.slane %v3308_v15, 7  ;;  %v4022_v25 = vrot.slane %v3308_v15, 1  ;;  %v23434_v11 = vmax.f32 %v18335_v56, %v18441_v60  ;;  %14284 = vmatpush3.bf16.msra.mxu1 %v4729_v59  ;;  %v18934_v63 = vmul.f32 %v3000_v23, %v2541_v12  ;;  %v2278_v12 = vpop.f32.mrb[121].mxu0 }
 0x268   : > { %v2920_v55 = vpop.permute.xlu0 %2919  ;;  %v18920_v38 = vmax.f32 %v23432_v5, %v4051_v18  ;;  %v4535_v4 = vmax.f32 %v23433_v28, %v18850_v6  ;;  %v23435_v31 = vmax.f32 %v18616_v57, 0.0  ;;  %v2277_v56 = vadd.f32 %v18873_v58, %v2276_v27  ;;  %v15267_v57 = vld [vmem:[%s23255_s4 + $0x1c4] ss:$28 sps:$4 sm:$0xff]  }
 0x269   : > { %v4536_v43 = vmax.f32 %v23434_v11, %v18890_v48  ;;  %v3574_v52 = vsel %vm3491_vm3, %v3571_v62, %v3573_v9  ;;  %v4023_v26 = vsel %vm3940_vm4, %v4020_v54, %v4022_v25  ;;  %v23436_v62 = vmax.f32 %v18679_v34, %v18712_v37  ;;  %v3005_v22 = vpop.permute.xlu1 %3004 }
 0x26a   : > { %v3309_v18 = vmul.f32 %v2920_v55, %v23435_v31  ;;  %v3869_v14 = vmax.f32 %v3574_v52, %v3308_v15  ;;  %v18941_v19 = vmax.f32 %v3868_v1, %v4023_v26  ;;  %v3607_v36 = vrot.slane %v18934_v63, 7  ;;  %v2279_v1 = vpop.f32.mrb[122].mxu0 }
 0x26b   : > { %v4551_v54 = vmax.f32 %v23436_v62, %v18920_v38  ;;  %v4056_v42 = vrot.slane %v18934_v63, 1  ;;  %v23437_v59 = vmax.f32 %v18688_v8, %v18796_v51  ;;  %v4730_v40 = vpack.c.bf16 %v4536_v43, %v4535_v4  ;;  %v2281_v11 = vpop.f32.mrb[123].mxu0 }
 0x26c   : > { %v3575_v33 = vrot.slane %v3309_v18, 7  ;;  %v4024_v15 = vrot.slane %v3309_v18, 1  ;;  %v2280_v55 = vadd.f32 %v18873_v58, %v2279_v1  ;;  %v2542_v5 = vmax.f32 %v2272_v53, 0.0  ;;  %v3010_v28 = vpop.permute.xlu0 %3009  ;;  %5315 = vmatmul.mubr.bf16.gmra.mrb[28].mxu1 %v15265_v39 }
 0x26d   : > { %v4552_v23 = vmax.f32 %v23437_v59, %v18922_v47  ;;  %v18959_v52 = vsel %vm3491_vm3, %v3605_v45, %v3607_v36  ;;  %v4057_v26 = vsel %vm3940_vm4, %v4054_v24, %v4056_v42  ;;  %v23438_v27 = vrot.slane %v18497_v2, 7  ;;  %5322 = vmatprep.mubr.bf16.mxu1 %v15267_v57  ;;  %v1089_v11 = vpop.permute.xlu1 %1088 }
 0x26e   : > { %v3576_v31 = vsel %vm3491_vm3, %v3573_v9, %v3575_v33  ;;  %v3886_v4 = vmax.f32 %v18959_v52, %v18934_v63  ;;  %v4025_v12 = vsel %vm3940_vm4, %v4022_v25, %v4024_v15  ;;  %v23439_v45 = vrot.slane %v18497_v2, 1 }
 0x26f   : > { %v3578_v62 = vsel %vm3491_vm3, %v3575_v33, %v23438_v27  ;;  %v3870_v43 = vmax.f32 %v3576_v31, %v3309_v18  ;;  %v18973_v9 = vmax.f32 %v3869_v14, %v4025_v12  ;;  %v4738_v1 = vpack.c.bf16 %v4552_v23, %v4551_v54  ;;  %v15984_v18 = vld [vmem:[%s16214_s0 + $0x1b8] sm:$0xff]   ;;  %v2284_v14 = vpop.f32.mrb[124].mxu0 }
 0x270   : > { %v3871_v53 = vmax.f32 %v3578_v62, %v18497_v2  ;;  %v4027_v24 = vsel %vm3940_vm4, %v4024_v15, %v23439_v45  ;;  %v3326_v59 = vmul.f32 %v3005_v22, %v2542_v5  ;;  %v2543_v63 = vmax.f32 %v2277_v56, 0.0  ;;  %v1211_v25 = vpop.permute.xlu0 %1210  ;;  %v15269_v54 = vld [vmem:[%s23255_s4 + $0x1c0] ss:$28 sps:$4 sm:$0xff]   ;;  %v2286_v56 = vpop.f32.mrb[125].mxu0 }
 0x271   : > { %v18975_v33 = vmax.f32 %v3870_v43, %v4027_v24  ;;  %v1512_v52 = vsel %vm1344_vm0, %v15984_v18, %v1089_v11  ;;  %14285 = vmatprep.subr.bf16.mxu1 %v4738_v1  ;;  %v2544_v31 = vmax.f32 %v2280_v55, 0.0  ;;  %v23440_v23 = vmax.f32 %v18867_v30, %v18845_v35  ;;  %v2287_v62 = vpop.f32.mrb[126].mxu0  ;;  %v3015_v43 = vpop.permute.xlu1 %3014 }
 0x272   : > { %v18978_v39 = vmax.f32 %v3871_v53, %v18522_v41  ;;  %v3609_v57 = vrot.slane %v3326_v59, 7  ;;  %v4058_v2 = vrot.slane %v3326_v59, 1  ;;  %v1625_v15 = vsel %vm1513_vm1, %v1512_v52, %v1211_v25  ;;  %14286 = vmatpush3.bf16.msra.mxu1 %v4730_v40  ;;  %v15270_v40 = vld [vmem:[%s23255_s4 + $0x1fc] ss:$28 sps:$4 sm:$0xff]   ;;  %v2289_v53 = vpop.f32.mrb[127].mxu0 }
 0x273   : > { %v18986_v22 = vmul.f32 %v3010_v28, %v2543_v63  ;;  %v2285_v41 = vadd.f32 %v18873_v58, %v2284_v14  ;;  %v18993_v5 = vmax.f32 %v23440_v23, %v18911_v32  ;;  %v18998_v55 = vmax.f32 %v3885_v17, %v4057_v26 }
 0x274   : > { %v3610_v28 = vsel %vm3491_vm3, %v3607_v36, %v3609_v57  ;;  %v4059_v27 = vsel %vm3940_vm4, %v4056_v42, %v4058_v2  ;;  %v4441_v35 = vmax.f32 %v18633_v7, %v18788_v10  ;;  %v4442_v30 = vmax.f32 %v18696_v44, %v18879_v21  ;;  %v1333_v26 = vpop.permute.xlu0 %1332  ;;  %5323 = vmatmul.mubr.bf16.gmra.mrb[32].mxu1 %v15269_v54 }
 0x275   : > { %v3887_v32 = vmax.f32 %v3610_v28, %v3326_v59  ;;  %v3611_v49 = vrot.slane %v18986_v22, 7  ;;  %v4060_v61 = vrot.slane %v18986_v22, 1  ;;  %v2288_v17 = vadd.f32 %v18873_v58, %v2287_v62  ;;  %5330 = vmatprep.mubr.bf16.mxu1 %v15270_v40  ;;  %v3020_v14 = vpop.permute.xlu1 %3019  ;;  %v15272_v28 = vld [vmem:[%s23255_s4 + $0x1f8] ss:$28 sps:$4 sm:$0xff]  }
 0x276   : > { %v19012_v36 = vmul.f32 %v3015_v43, %v2544_v31  ;;  %v4553_v42 = vmax.f32 %v4441_v35, %v18993_v5  ;;  %v4554_v12 = vmax.f32 %v4442_v30, %v18998_v55  ;;  %v4426_v45 = vmax.f32 %v18382_v50, %v18828_v29  ;;  %v15273_v35 = vld [vmem:[%s23255_s4 + $0x234] ss:$28 sps:$4 sm:$0xff]  }
 0x277   : > { %v3612_v24 = vsel %vm3491_vm3, %v3609_v57, %v3611_v49  ;;  %v4061_v1 = vsel %vm3940_vm4, %v4058_v2, %v4060_v61  ;;  %v23441_v59 = vmax.f32 %v18380_v16, %v18773_v46  ;;  %v1793_v63 = vsel %vm1626_vm2, %v1625_v15, %v1333_v26 }
 0x278   : > { %v3888_v18 = vmax.f32 %v3612_v24, %v18986_v22  ;;  %v3613_v52 = vrot.slane %v19012_v36, 7  ;;  %v4062_v25 = vrot.slane %v19012_v36, 1  ;;  %v4739_v50 = vpack.c.bf16 %v4554_v12, %v4553_v42  ;;  %2475 = vmatmul.mubr.bf16.gmra.mrb[220].mxu0 %v1793_v63  ;;  %v3025_v31 = vpop.permute.xlu0 %3024  ;;  %v2292_v22 = vpop.f32.mrb[128].mxu0 }
 0x279   : > { %v4537_v11 = vmax.f32 %v23441_v59, %v18941_v19  ;;  %v4538_v57 = vmax.f32 %v4426_v45, %v18973_v9  ;;  %v2545_v2 = vmax.f32 %v2285_v41, 0.0  ;;  %v2546_v54 = vmax.f32 %v2288_v17, 0.0  ;;  %v2294_v43 = vpop.f32.mrb[129].mxu0  ;;  %v3030_v26 = vpop.permute.xlu1 %3029 }
 0x27a   : > { %v19029_v56 = vmax.f32 %v3886_v4, %v4059_v27  ;;  %v3614_v16 = vsel %vm3491_vm3, %v3611_v49, %v3613_v52  ;;  %v4063_v15 = vsel %vm3940_vm4, %v4060_v61, %v4062_v25  ;;  %14287 = vmatprep.subr.bf16.mxu1 %v4739_v50  ;;  %v19033_v23 = vmax.f32 %v3887_v32, %v4061_v1  ;;  %v2295_v61 = vpop.f32.mrb[130].mxu0 }
 0x27b   : > { %v4443_v40 = vmax.f32 %v18712_v37, %v18920_v38  ;;  %v3889_v41 = vmax.f32 %v3614_v16, %v19012_v36  ;;  %v4731_v62 = vpack.c.bf16 %v4538_v57, %v4537_v11  ;;  %v3329_v4 = vmul.f32 %v3020_v14, %v2545_v2  ;;  %v2297_v45 = vpop.f32.mrb[131].mxu0 }
 0x27c   : > { %v19041_v27 = vmul.f32 %v3025_v31, %v2546_v54  ;;  %v2293_v30 = vadd.f32 %v18873_v58, %v2292_v22  ;;  %v4444_v32 = vmax.f32 %v18796_v51, %v18922_v47  ;;  %v4427_v17 = vmax.f32 %v18439_v20, %v18850_v6  ;;  %5331 = vmatmul.mubr.bf16.gmra.mrb[36].mxu1 %v15272_v28 }
 0x27d   : > { %v4555_v49 = vmax.f32 %v4443_v40, %v19029_v56  ;;  %14288 = vmatpush3.bf16.msra.mxu1 %v4731_v62  ;;  %v3615_v53 = vrot.slane %v3329_v4, 7  ;;  %v4064_v36 = vrot.slane %v3329_v4, 1  ;;  %v2296_v1 = vadd.f32 %v18873_v58, %v2295_v61  ;;  %5338 = vmatprep.mubr.bf16.mxu1 %v15273_v35  ;;  %v3040_v16 = vpop.permute.xlu1 %3039  ;;  %v2300_v62 = vpop.f32.mrb[132].mxu0 }
 0x27e   : > { %v3617_v42 = vrot.slane %v19041_v27, 7  ;;  %v4066_v12 = vrot.slane %v19041_v27, 1  ;;  %v4556_v24 = vmax.f32 %v4444_v32, %v19033_v23  ;;  %v4428_v59 = vmax.f32 %v18441_v60, %v18890_v48 }
 0x27f   : > { %v4539_v11 = vmax.f32 %v4427_v17, %v18975_v33  ;;  %v3616_v20 = vsel %vm3491_vm3, %v3613_v52, %v3615_v53  ;;  %v4065_v63 = vsel %vm3940_vm4, %v4062_v25, %v4064_v36  ;;  %v2547_v60 = vmax.f32 %v2293_v30, 0.0  ;;  %v3035_v25 = vpop.permute.xlu0 %3034  ;;  %v2302_v30 = vpop.f32.mrb[133].mxu0 }
 0x280   : > { %v3618_v50 = vsel %vm3491_vm3, %v3615_v53, %v3617_v42  ;;  %v4067_v14 = vsel %vm3940_vm4, %v4064_v36, %v4066_v12  ;;  %v3890_v57 = vmax.f32 %v3616_v20, %v3329_v4  ;;  %v4740_v31 = vpack.c.bf16 %v4556_v24, %v4555_v49 }
 0x281   : > { %v3891_v2 = vmax.f32 %v3618_v50, %v19041_v27  ;;  %v4540_v54 = vmax.f32 %v4428_v59, %v18978_v39  ;;  %v2548_v22 = vmax.f32 %v2296_v1, 0.0  ;;  %v19065_v40 = vmax.f32 %v3888_v18, %v4063_v15  ;;  %v15275_v18 = vld [vmem:[%s23255_s4 + $0x230] ss:$28 sps:$4 sm:$0xff]   ;;  %v3050_v32 = vpop.permute.xlu1 %3049 }
 0x282   : > { %v19067_v28 = vmax.f32 %v3889_v41, %v4065_v63  ;;  %14289 = vmatprep.subr.bf16.mxu1 %v4740_v31  ;;  %v4445_v43 = vmax.f32 %v18788_v10, %v18993_v5  ;;  %v4446_v4 = vmax.f32 %v18879_v21, %v18998_v55  ;;  %v4429_v27 = vmax.f32 %v18773_v46, %v18941_v19  ;;  %v15276_v21 = vld [vmem:[%s23255_s4 + $0x26c] ss:$28 sps:$4 sm:$0xff]   ;;  %v2303_v46 = vpop.f32.mrb[134].mxu0 }
 0x283   : > { %v4732_v52 = vpack.c.bf16 %v4540_v54, %v4539_v11  ;;  %v19078_v15 = vmul.f32 %v3030_v26, %v2547_v60  ;;  %v19080_v41 = vmul.f32 %v3035_v25, %v2548_v22  ;;  %v2301_v35 = vadd.f32 %v18873_v58, %v2300_v62  ;;  %v2305_v24 = vpop.f32.mrb[135].mxu0  ;;  %v3045_v25 = vpop.permute.xlu0 %3044 }
 0x284   : > { %v4430_v10 = vmax.f32 %v18828_v29, %v18973_v9  ;;  %v4557_v49 = vmax.f32 %v4445_v43, %v19065_v40  ;;  %v4558_v61 = vmax.f32 %v4446_v4, %v19067_v28  ;;  %v4541_v17 = vmax.f32 %v4429_v27, %v18564_v3  ;;  %5339 = vmatmul.mubr.bf16.gmra.mrb[40].mxu1 %v15275_v18 }
 0x285   : > { %14290 = vmatpush3.bf16.msra.mxu1 %v4732_v52  ;;  %v19091_v26 = vmax.f32 %v3890_v57, %v4067_v14  ;;  %v3619_v53 = vrot.slane %v19078_v15, 7  ;;  %v4068_v36 = vrot.slane %v19078_v15, 1  ;;  %v3621_v29 = vrot.slane %v19080_v41, 7  ;;  %5346 = vmatprep.mubr.bf16.mxu1 %v15276_v21  ;;  %v19105_v52 = vpop.permute.xlu1 %3089 }
 0x286   : > { %v4070_v45 = vrot.slane %v19080_v41, 1  ;;  %v2549_v1 = vmax.f32 %v2301_v35, 0.0  ;;  %v2304_v59 = vadd.f32 %v18873_v58, %v2303_v46  ;;  %v4741_v11 = vpack.c.bf16 %v4558_v61, %v4557_v49 }
 0x287   : > { %v4542_v20 = vmax.f32 %v4430_v10, %v18661_v13  ;;  %v3620_v63 = vsel %vm3491_vm3, %v3617_v42, %v3619_v53  ;;  %v4069_v50 = vsel %vm3940_vm4, %v4066_v12, %v4068_v36  ;;  %v3622_v14 = vsel %vm3491_vm3, %v3619_v53, %v3621_v29 }
 0x288   : > { %v4071_v57 = vsel %vm3940_vm4, %v4068_v36, %v4070_v45  ;;  %v3892_v31 = vmax.f32 %v3620_v63, %v19078_v15  ;;  %v3893_v54 = vmax.f32 %v3622_v14, %v19080_v41  ;;  %v3333_v60 = vmul.f32 %v3040_v16, %v2549_v1  ;;  %14291 = vmatprep.subr.bf16.mxu1 %v4741_v11  ;;  %v2308_v15 = vpop.f32.mrb[136].mxu0  ;;  %v15278_v41 = vld [vmem:[%s23255_s4 + $0x268] ss:$28 sps:$4 sm:$0xff]  }
 0x289   : > { %v2550_v22 = vmax.f32 %v2304_v59, 0.0  ;;  %v4733_v62 = vpack.c.bf16 %v4542_v20, %v4541_v17  ;;  %v19107_v43 = vmax.f32 %v3891_v2, %v4069_v50  ;;  %v4447_v42 = vmax.f32 %v18920_v38, %v19029_v56  ;;  %v2310_v30 = vpop.f32.mrb[137].mxu0  ;;  %v19125_v61 = vpop.permute.xlu1 %3104 }
 0x28a   : > { %v4448_v12 = vmax.f32 %v18922_v47, %v19033_v23  ;;  %v3623_v4 = vrot.slane %v3333_v60, 7  ;;  %v4072_v27 = vrot.slane %v3333_v60, 1  ;;  %v4431_v16 = vmax.f32 %v18850_v6, %v18975_v33  ;;  %v2311_v49 = vpop.f32.mrb[138].mxu0 }
 0x28b   : > { %v3334_v18 = vmul.f32 %v3045_v25, %v2550_v22  ;;  %14292 = vmatpush3.bf16.msra.mxu1 %v4733_v62  ;;  %v2309_v2 = vadd.f32 %v18873_v58, %v2308_v15  ;;  %v4559_v35 = vmax.f32 %v4447_v42, %v19091_v26  ;;  %v4432_v47 = vmax.f32 %v18890_v48, %v18978_v39  ;;  %v2313_v1 = vpop.f32.mrb[139].mxu0 }
 0x28c   : > { %v4560_v38 = vmax.f32 %v4448_v12, %v19107_v43  ;;  %v3624_v10 = vsel %vm3491_vm3, %v3621_v29, %v3623_v4  ;;  %v4543_v6 = vmax.f32 %v4431_v16, %v18679_v34  ;;  %5347 = vmatmul.mubr.bf16.gmra.mrb[44].mxu1 %v15278_v41  ;;  %v4073_v48 = vsel %vm3940_vm4, %v4070_v45, %v4072_v27  ;;  %v2316_v62 = vpop.f32.mrb[140].mxu0 }
 0x28d   : > { %v3625_v21 = vrot.slane %v3334_v18, 7  ;;  %v4074_v46 = vrot.slane %v3334_v18, 1  ;;  %v3894_v17 = vmax.f32 %v3624_v10, %v3333_v60  ;;  %v2551_v53 = vmax.f32 %v2309_v2, 0.0  ;;  %v2318_v42 = vpop.f32.mrb[141].mxu0 }
 0x28e   : > { %v4742_v36 = vpack.c.bf16 %v4560_v38, %v4559_v35  ;;  %v4544_v24 = vmax.f32 %v4432_v47, %v18688_v8  ;;  %v19130_v11 = vmax.f32 %v3892_v31, %v4071_v57  ;;  %v13235_v29 = vcombine.low %v18720_v0, %v18720_v0  ;;  %v19138_v60 = vpop.permute.xlu1 %3114  ;;  %v2319_v16 = vpop.f32.mrb[142].mxu0 }
 0x28f   : > { %v3626_v59 = vsel %vm3491_vm3, %v3623_v4, %v3625_v21  ;;  %v19134_v63 = vmul.f32 %v3050_v32, %v2551_v53  ;;  %v19136_v14 = vmax.f32 %v3893_v54, %v4073_v48  ;;  %v4449_v22 = vmax.f32 %v18993_v5, %v19065_v40 }
 0x290   : > { %v3895_v20 = vmax.f32 %v3626_v59, %v3334_v18  ;;  %14293 = vmatprep.subr.bf16.mxu1 %v4742_v36  ;;  %v4734_v50 = vpack.c.bf16 %v4544_v24, %v4543_v6  ;;  %v4450_v45 = vmax.f32 %v18998_v55, %v19067_v28  ;;  %v4433_v57 = vmax.f32 %v18941_v19, %v18564_v3  ;;  %v15284_v24 = vld [vmem:[%s23255_s4 + $0x44] ss:$28 sps:$4 sm:$0xff]  }
 0x291   : > { %v4434_v31 = vmax.f32 %v18973_v9, %v18661_v13  ;;  %v23442_v32 = vcombine.high %v18720_v0, %v18720_v0  ;;  %v3627_v54 = vrot.slane %v19134_v63, 7  ;;  %v4076_v25 = vrot.slane %v19134_v63, 1 }
 0x292   : > { %14294 = vmatpush3.bf16.msra.mxu1 %v4734_v50  ;;  %v4075_v5 = vsel %vm3940_vm4, %v4072_v27, %v4074_v46  ;;  %v4451_v55 = vmax.f32 %v19029_v56, %v19091_v26  ;;  %v4561_v3 = vmax.f32 %v4449_v22, %v19130_v11  ;;  %v4562_v19 = vmax.f32 %v4450_v45, %v19136_v14  ;;  %v15283_v56 = vld [vmem:[%s23255_s4 + $0xc] ss:$28 sps:$4 sm:$0xff]   ;;  %v19168_v41 = vpop.permute.xlu1 %3119 }
 0x293   : > { %5354 = vmatprep.mubr.bf16.mxu1 %v23442_v32  ;;  %v4545_v13 = vmax.f32 %v4433_v57, %v18633_v7  ;;  %v4546_v0 = vmax.f32 %v4434_v31, %v18696_v44  ;;  %v3628_v9 = vsel %vm3491_vm3, %v3625_v21, %v3627_v54  ;;  %v4077_v12 = vsel %vm3940_vm4, %v4074_v46, %v4076_v25  ;;  %v2321_v44 = vpop.f32.mrb[143].mxu0 }
 0x294   : > { %v19162_v4 = vmax.f32 %v3894_v17, %v4075_v5  ;;  %v3896_v27 = vmax.f32 %v3628_v9, %v19134_v63  ;;  %v4743_v18 = vpack.c.bf16 %v4562_v19, %v4561_v3  ;;  %v19170_v7 = vmax.f32 %v3895_v20, %v4077_v12  ;;  %5355 = vmatmul.mubr.bf16.gmra.mrb[48].mxu1 %v13235_v29 }
 0x295   : > { %v4735_v15 = vpack.c.bf16 %v4546_v0, %v4545_v13  ;;  %v4452_v2 = vmax.f32 %v19033_v23, %v19107_v43  ;;  %v4435_v38 = vmax.f32 %v18975_v33, %v18679_v34  ;;  %v2312_v30 = vadd.f32 %v18873_v58, %v2311_v49  ;;  %5394 = vmatprep.mubr.bf16.mxu1 %v15283_v56  ;;  %v15286_v0 = vld [vmem:[%s23255_s4 + $0x40] ss:$28 sps:$4 sm:$0xff]   ;;  %v3085_v56 = vpop.permute.xlu0 %3084 }
 0x296   : > { %v4563_v35 = vmax.f32 %v4451_v55, %v19162_v4  ;;  %14295 = vmatprep.subr.bf16.mxu1 %v4743_v18  ;;  %v4436_v47 = vmax.f32 %v18978_v39, %v18688_v8  ;;  %v4453_v10 = vmax.f32 %v19065_v40, %v19130_v11  ;;  %v4454_v46 = vmax.f32 %v19067_v28, %v19136_v14  ;;  %v19186_v34 = vpop.permute.xlu1 %3129  ;;  %v2324_v40 = vpop.f32.mrb[144].mxu0  ;;  %v15281_v28 = vld [vmem:[%s23255_s4 + $0x8] ss:$28 sps:$4 sm:$0xff]  }
 0x297   : > { %14296 = vmatpush3.bf16.msra.mxu1 %v4735_v15  ;;  %v4564_v21 = vmax.f32 %v4452_v2, %v19170_v7  ;;  %v4547_v23 = vmax.f32 %v4435_v38, %v18712_v37  ;;  %v4455_v6 = vmax.f32 %v19091_v26, %v19162_v4  ;;  %v4456_v8 = vmax.f32 %v19107_v43, %v19170_v7  ;;  %v2326_v37 = vpop.f32.mrb[145].mxu0 }
 0x298   : > { %v4548_v33 = vmax.f32 %v4436_v47, %v18796_v51  ;;  %v2317_v17 = vadd.f32 %v18873_v58, %v2316_v62  ;;  %v2552_v53 = vmax.f32 %v2312_v30, 0.0  ;;  %v2327_v51 = vpop.f32.mrb[146].mxu0  ;;  %v2320_v48 = vadd.f32 %v18873_v58, %v2319_v16 }
 0x299   : > { %v4744_v39 = vpack.c.bf16 %v4564_v21, %v4563_v35  ;;  %v2329_v59 = vpop.f32.mrb[147].mxu0  ;;  %v2325_v55 = vadd.f32 %v18873_v58, %v2324_v40  ;;  %v2328_v2 = vadd.f32 %v18873_v58, %v2327_v51 }
 0x29a   : > { %v4736_v49 = vpack.c.bf16 %v4548_v33, %v4547_v23  ;;  %v3055_v36 = vpop.permute.xlu1 %3054  ;;  %v2553_v63 = vmax.f32 %v2317_v17, 0.0  ;;  %v2332_v5 = vpop.f32.mrb[148].mxu0  ;;  %v2554_v13 = vmax.f32 %v2320_v48, 0.0 }
 0x29b   : > { %14297 = vmatprep.subr.bf16.mxu1 %v4744_v39  ;;  %v3336_v1 = vmul.f32 %v3055_v36, %v2552_v53  ;;  %v2334_v19 = vpop.f32.mrb[149].mxu0  ;;  %v2555_v21 = vmax.f32 %v2325_v55, 0.0  ;;  %v2333_v37 = vadd.f32 %v18873_v58, %v2332_v5 }
 0x29c   : > { %14298 = vmatpush3.bf16.msra.mxu1 %v4736_v49  ;;  %v2335_v9 = vpop.f32.mrb[150].mxu0 }
 0x29d   : > { %v3629_v29 = vrot.slane %v3336_v1, 7  ;;  %v4078_v20 = vrot.slane %v3336_v1, 1  ;;  %v2336_v15 = vadd.f32 %v18873_v58, %v2335_v9  ;;  %v2337_v44 = vpop.f32.mrb[151].mxu0 }
 0x29e   : > { %v3060_v50 = vpop.permute.xlu1 %3059 }
 0x29f   : > { %5395 = vmatmul.mubr.bf16.vlgmr.msra.gmra.mrb[52].mxu1 %v15281_v28  ;;  %v3630_v22 = vsel %vm3491_vm3, %v3627_v54, %v3629_v29  ;;  %v4079_v45 = vsel %vm3940_vm4, %v4076_v25, %v4078_v20  ;;  %v3337_v57 = vmul.f32 %v3060_v50, %v2553_v63  ;;  %v15287_v54 = vld [vmem:[%s23255_s4 + $0x7c] ss:$28 sps:$4 sm:$0xff]   ;;  %v2558_v30 = vmax.f32 %v2336_v15, 0.0 }
 0x2a0   : > { %5402 = vmatprep.mubr.bf16.mxu1 %v15284_v24  ;;  %v3897_v31 = vmax.f32 %v3630_v22, %v3336_v1  ;;  %v19203_v32 = vmax.f32 %v3896_v27, %v4079_v45  ;;  %v3095_v24 = vpop.permute.xlu0 %3094  ;;  %v15290_v45 = vld [vmem:[%s23255_s4 + $0xb4] ss:$28 sps:$4 sm:$0xff]  }
 0x2a1   : > { %v3631_v62 = vrot.slane %v3337_v57, 7  ;;  %v4080_v3 = vrot.slane %v3337_v57, 1  ;;  %v2340_v51 = vpop.f32.mrb[152].mxu0 }
 0x2a2   : > { %v3065_v42 = vpop.permute.xlu1 %3064  ;;  %v19213_v25 = vmax.f32 %v4453_v10, %v19203_v32  ;;  %v4457_v12 = vmax.f32 %v19130_v11, %v19203_v32  ;;  %v2342_v48 = vpop.f32.mrb[153].mxu0  ;;  %v2341_v63 = vadd.f32 %v18873_v58, %v2340_v51 }
 0x2a3   : > { %v3632_v27 = vsel %vm3491_vm3, %v3629_v29, %v3631_v62  ;;  %v4081_v18 = vsel %vm3940_vm4, %v4078_v20, %v4080_v3  ;;  %v3338_v16 = vmul.f32 %v3065_v42, %v2554_v13  ;;  %v2556_v29 = vmax.f32 %v2328_v2, 0.0  ;;  %v15289_v20 = vld [vmem:[%s23255_s4 + $0x78] ss:$28 sps:$4 sm:$0xff]   ;;  %v2343_v50 = vpop.f32.mrb[154].mxu0  ;;  %v15293_v48 = vld [vmem:[%s23255_s4 + $0xec] ss:$28 sps:$4 sm:$0xff]  }
 0x2a4   : > { %v3898_v35 = vmax.f32 %v3632_v27, %v3337_v57  ;;  %v19221_v38 = vmax.f32 %v3897_v31, %v4081_v18  ;;  %v2345_v19 = vpop.f32.mrb[155].mxu0  ;;  %v2559_v9 = vmax.f32 %v2341_v63, 0.0  ;;  %v2557_v42 = vmax.f32 %v2333_v37, 0.0 }
 0x2a5   : > { %v3633_v47 = vrot.slane %v3338_v16, 7  ;;  %v4082_v10 = vrot.slane %v3338_v16, 1 }
 0x2a6   : > { %v3070_v23 = vpop.permute.xlu1 %3069  ;;  %v19224_v33 = vmax.f32 %v4454_v46, %v19221_v38  ;;  %v4458_v39 = vmax.f32 %v19136_v14, %v19221_v38  ;;  %v19235_v46 = vmul.f32 %v3085_v56, %v2558_v30  ;;  %v3343_v18 = vmul.f32 %v19105_v52, %v2559_v9 }
 0x2a7   : > { %5403 = vmatmul.mubr.bf16.gmra.mrb[56].mxu1 %v15286_v0  ;;  %v3634_v40 = vsel %vm3491_vm3, %v3631_v62, %v3633_v47  ;;  %v4083_v49 = vsel %vm3940_vm4, %v4080_v3, %v4082_v10  ;;  %v3339_v17 = vmul.f32 %v3070_v23, %v2555_v21  ;;  %v2344_v62 = vadd.f32 %v18873_v58, %v2343_v50 }
 0x2a8   : > { %5410 = vmatprep.mubr.bf16.mxu1 %v15287_v54  ;;  %v3899_v53 = vmax.f32 %v3634_v40, %v3338_v16  ;;  %v19231_v28 = vmax.f32 %v3898_v35, %v4083_v49  ;;  %v4745_v36 = vpack.c.bf16 %v19224_v33, %v19213_v25  ;;  %v3641_v26 = vrot.slane %v19235_v46, 7 }
 0x2a9   : > { %v3635_v1 = vrot.slane %v3339_v17, 7  ;;  %v4084_v59 = vrot.slane %v3339_v17, 1  ;;  %v4090_v27 = vrot.slane %v19235_v46, 1  ;;  %v3643_v52 = vrot.slane %v3343_v18, 7  ;;  %v2348_v43 = vpop.f32.mrb[156].mxu0 }
 0x2aa   : > { %v3075_v22 = vpop.permute.xlu1 %3074  ;;  %v19248_v57 = vmax.f32 %v4455_v6, %v19231_v28  ;;  %v4459_v31 = vmax.f32 %v19162_v4, %v19231_v28  ;;  %v2560_v6 = vmax.f32 %v2344_v62, 0.0  ;;  %v4092_v21 = vrot.slane %v3343_v18, 1  ;;  %v15295_v4 = vld [vmem:[%s23255_s4 + $0xe8] ss:$28 sps:$4 sm:$0xff]  }
 0x2ab   : > { %v3636_v5 = vsel %vm3491_vm3, %v3633_v47, %v3635_v1  ;;  %v4085_v55 = vsel %vm3940_vm4, %v4082_v10, %v4084_v59  ;;  %v3340_v3 = vmul.f32 %v3075_v22, %v2556_v29  ;;  %v19272_v10 = vpop.permute.xlu0 %3109  ;;  %v3644_v51 = vsel %vm3491_vm3, %v3641_v26, %v3643_v52 }
 0x2ac   : > { %v3900_v13 = vmax.f32 %v3636_v5, %v3339_v17  ;;  %v19255_v0 = vmax.f32 %v3899_v53, %v4085_v55  ;;  %v19268_v2 = vmul.f32 %v3095_v24, %v2560_v6  ;;  %v2350_v53 = vpop.f32.mrb[157].mxu0  ;;  %v4093_v24 = vsel %vm3940_vm4, %v4090_v27, %v4092_v21 }
 0x2ad   : > { %v3637_v54 = vrot.slane %v3340_v3, 7  ;;  %v4086_v56 = vrot.slane %v3340_v3, 1 }
 0x2ae   : > { %v3080_v15 = vpop.permute.xlu1 %3079  ;;  %v19264_v16 = vmax.f32 %v4456_v8, %v19255_v0  ;;  %v4460_v44 = vmax.f32 %v19170_v7, %v19255_v0  ;;  %v15292_v8 = vld [vmem:[%s23255_s4 + $0xb0] ss:$28 sps:$4 sm:$0xff]   ;;  %v3645_v7 = vrot.slane %v19268_v2, 7  ;;  %v4094_v49 = vrot.slane %v19268_v2, 1 }
 0x2af   : > { %5411 = vmatmul.mubr.bf16.gmra.mrb[60].mxu1 %v15289_v20  ;;  %v3638_v35 = vsel %vm3491_vm3, %v3635_v1, %v3637_v54  ;;  %v4087_v30 = vsel %vm3940_vm4, %v4084_v59, %v4086_v56  ;;  %v3341_v47 = vmul.f32 %v3080_v15, %v2557_v42  ;;  %v2349_v1 = vadd.f32 %v18873_v58, %v2348_v43  ;;  %v2351_v59 = vpop.f32.mrb[158].mxu0  ;;  %v3100_v6 = vpop.permute.xlu0 %3099 }
 0x2b0   : > { %5418 = vmatprep.mubr.bf16.mxu1 %v15290_v45  ;;  %v3901_v23 = vmax.f32 %v3638_v35, %v3340_v3  ;;  %v19274_v40 = vmax.f32 %v3900_v13, %v4087_v30  ;;  %v4746_v29 = vpack.c.bf16 %v19264_v16, %v19248_v57  ;;  %v3904_v20 = vmax.f32 %v3644_v51, %v3343_v18  ;;  %v2353_v45 = vpop.f32.mrb[159].mxu0 }
 0x2b1   : > { %v3639_v17 = vrot.slane %v3341_v47, 7  ;;  %v4088_v37 = vrot.slane %v3341_v47, 1  ;;  %v3646_v63 = vsel %vm3491_vm3, %v3643_v52, %v3645_v7  ;;  %v2561_v9 = vmax.f32 %v2349_v1, 0.0  ;;  %v2356_v35 = vpop.f32.mrb[160].mxu0 }
 0x2b2   : > { %v3905_v5 = vmax.f32 %v3646_v63, %v19268_v2  ;;  %v2352_v42 = vadd.f32 %v18873_v58, %v2351_v59  ;;  %v4095_v18 = vsel %vm3940_vm4, %v4092_v21, %v4094_v49  ;;  %v2357_v21 = vadd.f32 %v18873_v58, %v2356_v35 }
 0x2b3   : > { %v3640_v50 = vsel %vm3491_vm3, %v3637_v54, %v3639_v17  ;;  %v3642_v22 = vsel %vm3491_vm3, %v3639_v17, %v3641_v26  ;;  %v4089_v3 = vsel %vm3940_vm4, %v4086_v56, %v4088_v37  ;;  %v4091_v19 = vsel %vm3940_vm4, %v4088_v37, %v4090_v27 }
 0x2b4   : > { %v3902_v55 = vmax.f32 %v3640_v50, %v3341_v47  ;;  %v3903_v62 = vmax.f32 %v3642_v22, %v19235_v46  ;;  %v19296_v13 = vmax.f32 %v3901_v23, %v4089_v3  ;;  %v19308_v46 = vmax.f32 %v4457_v12, %v19274_v40  ;;  %v2358_v23 = vpop.f32.mrb[161].mxu0 }
 0x2b5   : > { %v3345_v56 = vmul.f32 %v3100_v6, %v2561_v9  ;;  %v2562_v27 = vmax.f32 %v2352_v42, 0.0  ;;  %v19310_v15 = vmax.f32 %v3904_v20, %v4095_v18  ;;  %v4461_v12 = vmax.f32 %v19203_v32, %v19274_v40 }
 0x2b6   : > { %v19299_v54 = vmax.f32 %v3902_v55, %v4091_v19  ;;  %v19301_v26 = vmax.f32 %v3903_v62, %v4093_v24  ;;  %v19316_v2 = vmax.f32 %v4458_v39, %v19296_v13  ;;  %v4462_v47 = vmax.f32 %v19221_v38, %v19296_v13  ;;  %v3125_v24 = vpop.permute.xlu0 %3124 }
 0x2b7   : > { %5419 = vmatmul.mubr.bf16.gmra.mrb[64].mxu1 %v15292_v8  ;;  %v3647_v52 = vrot.slane %v3345_v56, 7  ;;  %v4096_v14 = vrot.slane %v3345_v56, 1  ;;  %v3346_v39 = vmul.f32 %v19125_v61, %v2562_v27  ;;  %v19344_v61 = vmax.f32 %v4461_v12, %v19310_v15 }
 0x2b8   : > { %5426 = vmatprep.mubr.bf16.mxu1 %v15293_v48  ;;  %v19322_v30 = vmax.f32 %v4459_v31, %v19299_v54  ;;  %v19325_v11 = vmax.f32 %v4460_v44, %v19301_v26  ;;  %v2359_v31 = vpop.f32.mrb[162].mxu0  ;;  %v15296_v44 = vld [vmem:[%s23255_s4 + $0x124] ss:$28 sps:$4 sm:$0xff]   ;;  %v4747_v32 = vpack.c.bf16 %v19316_v2, %v19308_v46  ;;  %v4463_v43 = vmax.f32 %v19231_v28, %v19299_v54 }
 0x2b9   : > { %v3648_v8 = vsel %vm3491_vm3, %v3645_v7, %v3647_v52  ;;  %v3649_v17 = vrot.slane %v3346_v39, 7  ;;  %v4098_v37 = vrot.slane %v3346_v39, 1  ;;  %v2563_v53 = vmax.f32 %v2357_v21, 0.0  ;;  %v2361_v51 = vpop.f32.mrb[163].mxu0 }
 0x2ba   : > { %v4748_v38 = vpack.c.bf16 %v19325_v11, %v19322_v30  ;;  %v3906_v1 = vmax.f32 %v3648_v8, %v3345_v56  ;;  %v2360_v59 = vadd.f32 %v18873_v58, %v2359_v31  ;;  %v4097_v48 = vsel %vm3940_vm4, %v4094_v49, %v4096_v14  ;;  %v2364_v19 = vpop.f32.mrb[164].mxu0  ;;  %v15298_v56 = vld [vmem:[%s23255_s4 + $0x120] ss:$28 sps:$4 sm:$0xff]   ;;  %v3135_v35 = vpop.permute.xlu0 %3134 }
 0x2bb   : > { %v4464_v20 = vmax.f32 %v19255_v0, %v19301_v26  ;;  %v3650_v63 = vsel %vm3491_vm3, %v3647_v52, %v3649_v17  ;;  %v3347_v50 = vmul.f32 %v19272_v10, %v2563_v53  ;;  %v19355_v28 = vmax.f32 %v3905_v5, %v4097_v48  ;;  %v2366_v18 = vpop.f32.mrb[165].mxu0 }
 0x2bc   : > { %v4099_v7 = vsel %vm3940_vm4, %v4096_v14, %v4098_v37  ;;  %v3907_v22 = vmax.f32 %v3650_v63, %v3346_v39  ;;  %v2564_v45 = vmax.f32 %v2360_v59, 0.0  ;;  %v4465_v49 = vmax.f32 %v19274_v40, %v19310_v15  ;;  %v2367_v14 = vpop.f32.mrb[166].mxu0  ;;  %v15299_v39 = vld [vmem:[%s23255_s4 + $0x15c] ss:$28 sps:$4 sm:$0xff]  }
 0x2bd   : > { %v19358_v55 = vmax.f32 %v3906_v1, %v4099_v7  ;;  %v3651_v62 = vrot.slane %v3347_v50, 7  ;;  %v4100_v3 = vrot.slane %v3347_v50, 1  ;;  %v19363_v0 = vmax.f32 %v4462_v47, %v19355_v28  ;;  %v2369_v31 = vpop.f32.mrb[167].mxu0 }
 0x2be   : > { %v4466_v10 = vmax.f32 %v19296_v13, %v19355_v28  ;;  %v3348_v5 = vmul.f32 %v19138_v60, %v2564_v45  ;;  %v2365_v40 = vadd.f32 %v18873_v58, %v2364_v19 }
 0x2bf   : > { %5427 = vmatmul.mubr.bf16.gmra.mrb[68].mxu1 %v15295_v4  ;;  %v19369_v9 = vmax.f32 %v4463_v43, %v19358_v55  ;;  %v4467_v42 = vmax.f32 %v19299_v54, %v19358_v55  ;;  %v3652_v6 = vsel %vm3491_vm3, %v3649_v17, %v3651_v62  ;;  %v4101_v27 = vsel %vm3940_vm4, %v4098_v37, %v4100_v3 }
 0x2c0   : > { %5434 = vmatprep.mubr.bf16.mxu1 %v15296_v44  ;;  %v4749_v60 = vpack.c.bf16 %v19363_v0, %v19344_v61  ;;  %v3908_v12 = vmax.f32 %v3652_v6, %v3347_v50  ;;  %v3653_v47 = vrot.slane %v3348_v5, 7  ;;  %v4102_v52 = vrot.slane %v3348_v5, 1  ;;  %v3140_v50 = vpop.permute.xlu0 %3139 }
 0x2c1   : > { %v19384_v21 = vmax.f32 %v3907_v22, %v4101_v27  ;;  %v2565_v23 = vmax.f32 %v2365_v40, 0.0  ;;  %v2368_v4 = vadd.f32 %v18873_v58, %v2367_v14  ;;  %v2372_v7 = vpop.f32.mrb[168].mxu0 }
 0x2c2   : > { %v3654_v44 = vsel %vm3491_vm3, %v3651_v62, %v3653_v47  ;;  %v4103_v43 = vsel %vm3940_vm4, %v4100_v3, %v4102_v52  ;;  %v19408_v3 = vld [vmem:[%s23346_s2] ss:$0 sm:$0xff] }
 0x2c3   : > { %v19390_v8 = vmax.f32 %v4464_v20, %v19384_v21  ;;  %v4468_v17 = vmax.f32 %v19301_v26, %v19384_v21  ;;  %v3909_v37 = vmax.f32 %v3654_v44, %v3348_v5  ;;  %v3349_v53 = vmul.f32 %v19168_v41, %v2565_v23  ;;  %v15307_v26 = vld [vmem:[%s23255_s4 + $0x1c8] ss:$28 sps:$4 sm:$0xff]  }
 0x2c4   : > { %v2566_v51 = vmax.f32 %v2368_v4, 0.0  ;;  %v19395_v1 = vmax.f32 %v3908_v12, %v4103_v43  ;;  %v2373_v5 = vadd.f32 %v19408_v3, %v2372_v7 }
 0x2c5   : > { %v4750_v58 = vpack.c.bf16 %v19390_v8, %v19369_v9  ;;  %v3655_v59 = vrot.slane %v3349_v53, 7  ;;  %v4104_v48 = vrot.slane %v3349_v53, 1 }
 0x2c6   : > { %v3350_v63 = vmul.f32 %v3125_v24, %v2566_v51  ;;  %v4469_v20 = vmax.f32 %v19310_v15, %v19395_v1  ;;  %v19402_v22 = vmax.f32 %v4465_v49, %v19395_v1  ;;  %v2374_v24 = vpop.f32.mrb[169].mxu0  ;;  %v15301_v15 = vld [vmem:[%s23255_s4 + $0x158] ss:$28 sps:$4 sm:$0xff]  }
 0x2c7   : > { %5435 = vmatmul.mubr.bf16.gmra.mrb[72].mxu1 %v15298_v56  ;;  %v3656_v41 = vsel %vm3491_vm3, %v3653_v47, %v3655_v59  ;;  %v2375_v6 = vpop.f32.mrb[170].mxu0  ;;  %v15302_v49 = vld [vmem:[%s23255_s4 + $0x194] ss:$28 sps:$4 sm:$0xff]   ;;  %v4105_v40 = vsel %vm3940_vm4, %v4102_v52, %v4104_v48  ;;  %v2567_v56 = vmax.f32 %v2373_v5, 0.0  ;;  %v3145_v52 = vpop.permute.xlu0 %3144 }
 0x2c8   : > { %5442 = vmatprep.mubr.bf16.mxu1 %v15299_v39  ;;  %v3657_v45 = vrot.slane %v3350_v63, 7  ;;  %v4106_v62 = vrot.slane %v3350_v63, 1  ;;  %v3910_v19 = vmax.f32 %v3656_v41, %v3349_v53  ;;  %v2376_v27 = vadd.f32 %v19408_v3, %v2375_v6  ;;  %v2377_v12 = vpop.f32.mrb[171].mxu0  ;;  %v15304_v5 = vld [vmem:[%s23255_s4 + $0x190] ss:$28 sps:$4 sm:$0xff]  }
 0x2c9   : > { %v19420_v47 = vmax.f32 %v3909_v37, %v4105_v40  ;;  %v3351_v23 = vmul.f32 %v19186_v34, %v2567_v56 }
 0x2ca   : > { %v3658_v18 = vsel %vm3491_vm3, %v3655_v59, %v3657_v45  ;;  %v4107_v39 = vsel %vm3940_vm4, %v4104_v48, %v4106_v62  ;;  %v2568_v4 = vmax.f32 %v2376_v27, 0.0 }
 0x2cb   : > { %v3911_v14 = vmax.f32 %v3658_v18, %v3350_v63  ;;  %v4470_v31 = vmax.f32 %v19355_v28, %v19420_v47  ;;  %v19426_v44 = vmax.f32 %v3910_v19, %v4107_v39  ;;  %v19432_v43 = vmax.f32 %v4466_v10, %v19420_v47  ;;  %v15305_v19 = vld [vmem:[%s23255_s4 + $0x1cc] ss:$28 sps:$4 sm:$0xff]   ;;  %v3150_v18 = vpop.permute.xlu0 %3149 }
 0x2cc   : > { %v3659_v37 = vrot.slane %v3351_v23, 7  ;;  %v4108_v53 = vrot.slane %v3351_v23, 1  ;;  %v3352_v51 = vmul.f32 %v3135_v35, %v2568_v4 }
 0x2cd   : > { %v4471_v34 = vmax.f32 %v19358_v55, %v19426_v44  ;;  %v4751_v48 = vpack.c.bf16 %v19432_v43, %v19402_v22  ;;  %v19442_v63 = vmax.f32 %v4467_v42, %v19426_v44 }
 0x2ce   : > { %v3660_v13 = vsel %vm3491_vm3, %v3657_v45, %v3659_v37  ;;  %v3661_v10 = vrot.slane %v3352_v51, 7  ;;  %v4110_v7 = vrot.slane %v3352_v51, 1  ;;  %v4109_v54 = vsel %vm3940_vm4, %v4106_v62, %v4108_v53 }
 0x2cf   : > { %5443 = vmatmul.mubr.bf16.gmra.mrb[76].mxu1 %v15301_v15  ;;  %v2380_v59 = vpop.f32.mrb[172].mxu0  ;;  %v3912_v24 = vmax.f32 %v3660_v13, %v3351_v23  ;;  %v19458_v12 = vmax.f32 %v3911_v14, %v4109_v54  ;;  %v15308_v54 = vld [vmem:[%s23255_s4 + $0x204] ss:$28 sps:$4 sm:$0xff]  }
 0x2d0   : > { %5450 = vmatprep.mubr.bf16.mxu1 %v15302_v49  ;;  %v2381_v41 = vadd.f32 %v19408_v3, %v2380_v59  ;;  %v2382_v35 = vpop.f32.mrb[173].mxu0  ;;  %v3662_v42 = vsel %vm3491_vm3, %v3659_v37, %v3661_v10  ;;  %v4111_v40 = vsel %vm3940_vm4, %v4108_v53, %v4110_v7 }
 0x2d1   : > { %v2383_v15 = vpop.f32.mrb[174].mxu0  ;;  %v3913_v56 = vmax.f32 %v3662_v42, %v3352_v51  ;;  %v19456_v27 = vmax.f32 %v3912_v24, %v4111_v40  ;;  %v4472_v4 = vmax.f32 %v19384_v21, %v19458_v12  ;;  %v19469_v53 = vmax.f32 %v4468_v17, %v19458_v12  ;;  %v3155_v17 = vpop.permute.xlu0 %3154 }
 0x2d2   : > { %v2569_v45 = vmax.f32 %v2381_v41, 0.0  ;;  %v2384_v6 = vadd.f32 %v19408_v3, %v2383_v15  ;;  %v2385_v49 = vpop.f32.mrb[175].mxu0 }
 0x2d3   : > { %v4581_v62 = vmax.f32 %v4469_v20, %v19456_v27  ;;  %v4473_v37 = vmax.f32 %v19395_v1, %v19456_v27  ;;  %v4752_v13 = vpack.c.bf16 %v19469_v53, %v19442_v63 }
 0x2d4   : > { %v3353_v39 = vmul.f32 %v3140_v50, %v2569_v45  ;;  %v2570_v23 = vmax.f32 %v2384_v6, 0.0 }
 0x2d6   : > { %v3663_v14 = vrot.slane %v3353_v39, 7  ;;  %v4112_v51 = vrot.slane %v3353_v39, 1  ;;  %v3354_v50 = vmul.f32 %v3145_v52, %v2570_v23 }
 0x2d7   : > { %5451 = vmatmul.mubr.bf16.gmra.mrb[80].mxu1 %v15304_v5  ;;  %v2388_v59 = vpop.f32.mrb[176].mxu0 }
 0x2d8   : > { %5458 = vmatprep.mubr.bf16.mxu1 %v15305_v19  ;;  %v3664_v20 = vsel %vm3491_vm3, %v3661_v10, %v3663_v14  ;;  %v3665_v41 = vrot.slane %v3354_v50, 7  ;;  %v4114_v35 = vrot.slane %v3354_v50, 1  ;;  %v2389_v5 = vadd.f32 %v19408_v3, %v2388_v59  ;;  %v2390_v24 = vpop.f32.mrb[177].mxu0 }
 0x2d9   : > { %v3914_v15 = vmax.f32 %v3664_v20, %v3353_v39  ;;  %v2391_v19 = vpop.f32.mrb[178].mxu0  ;;  %v4113_v52 = vsel %vm3940_vm4, %v4110_v7, %v4112_v51 }
 0x2da   : > { %v3666_v10 = vsel %vm3491_vm3, %v3663_v14, %v3665_v41  ;;  %v2571_v42 = vmax.f32 %v2389_v5, 0.0  ;;  %v2392_v45 = vadd.f32 %v19408_v3, %v2391_v19  ;;  %v2393_v6 = vpop.f32.mrb[179].mxu0  ;;  %v19484_v49 = vmax.f32 %v3913_v56, %v4113_v52  ;;  %v3160_v19 = vpop.permute.xlu0 %3159 }
 0x2db   : > { %v3915_v40 = vmax.f32 %v3666_v10, %v3354_v50  ;;  %v4115_v23 = vsel %vm3940_vm4, %v4112_v51, %v4114_v35 }
 0x2dc   : > { %v3355_v59 = vmul.f32 %v3150_v18, %v2571_v42  ;;  %v2572_v39 = vmax.f32 %v2392_v45, 0.0  ;;  %v4582_v7 = vmax.f32 %v4470_v31, %v19484_v49  ;;  %v19491_v20 = vmax.f32 %v3914_v15, %v4115_v23 }
 0x2dd   : > { %v4474_v14 = vmax.f32 %v19420_v47, %v19484_v49 }
 0x2de   : > { %v3667_v5 = vrot.slane %v3355_v59, 7  ;;  %v4116_v56 = vrot.slane %v3355_v59, 1  ;;  %v3356_v24 = vmul.f32 %v3155_v17, %v2572_v39  ;;  %v4753_v50 = vpack.c.bf16 %v4582_v7, %v4581_v62  ;;  %v15310_v62 = vld [vmem:[%s23255_s4 + $0x200] ss:$28 sps:$4 sm:$0xff]   ;;  %v3165_v7 = vpop.permute.xlu0 %3164 }
 0x2df   : > { %5459 = vmatmul.mubr.bf16.gmra.mrb[84].mxu1 %v15307_v26  ;;  %v2396_v51 = vpop.f32.mrb[180].mxu0  ;;  %v4583_v18 = vmax.f32 %v4471_v34, %v19491_v20  ;;  %v4475_v28 = vmax.f32 %v19426_v44, %v19491_v20 }
 0x2e0   : > { %5466 = vmatprep.mubr.bf16.mxu1 %v15308_v54  ;;  %v3668_v31 = vsel %vm3491_vm3, %v3665_v41, %v3667_v5  ;;  %v3669_v26 = vrot.slane %v3356_v24, 7  ;;  %v4118_v15 = vrot.slane %v3356_v24, 1  ;;  %v2397_v52 = vadd.f32 %v19408_v3, %v2396_v51  ;;  %14377 = vmatprep.subr.bf16.mxu1 %v4753_v50  ;;  %v2398_v54 = vpop.f32.mrb[181].mxu0  ;;  %v15311_v41 = vld [vmem:[%s23255_s4 + $0x23c] ss:$28 sps:$4 sm:$0xff]  }
 0x2e1   : > { %v3916_v17 = vmax.f32 %v3668_v31, %v3355_v59  ;;  %14378 = vmatpush3.bf16.msra.mxu1 %v4745_v36  ;;  %v2399_v55 = vpop.f32.mrb[182].mxu0  ;;  %v4117_v34 = vsel %vm3940_vm4, %v4114_v35, %v4116_v56 }
 0x2e2   : > { %v3670_v10 = vsel %vm3491_vm3, %v3667_v5, %v3669_v26  ;;  %v2573_v42 = vmax.f32 %v2397_v52, 0.0  ;;  %v2400_v45 = vadd.f32 %v19408_v3, %v2399_v55  ;;  %v2401_v6 = vpop.f32.mrb[183].mxu0  ;;  %v19515_v23 = vmax.f32 %v3915_v40, %v4117_v34 }
 0x2e3   : > { %v3917_v59 = vmax.f32 %v3670_v10, %v3356_v24  ;;  %v4119_v39 = vsel %vm3940_vm4, %v4116_v56, %v4118_v15 }
 0x2e4   : > { %v3357_v25 = vmul.f32 %v3160_v19, %v2573_v42  ;;  %v2574_v33 = vmax.f32 %v2400_v45, 0.0  ;;  %v4584_v36 = vmax.f32 %v4472_v4, %v19515_v23  ;;  %v19522_v35 = vmax.f32 %v3916_v17, %v4119_v39  ;;  %v3170_v45 = vpop.permute.xlu1 %3169 }
 0x2e5   : > { %v4476_v5 = vmax.f32 %v19458_v12, %v19515_v23 }
 0x2e6   : > { %v3671_v40 = vrot.slane %v3357_v25, 7  ;;  %v4120_v50 = vrot.slane %v3357_v25, 1  ;;  %v3358_v24 = vmul.f32 %v3165_v7, %v2574_v33  ;;  %v4754_v51 = vpack.c.bf16 %v4584_v36, %v4583_v18  ;;  %v15313_v18 = vld [vmem:[%s23255_s4 + $0x238] ss:$28 sps:$4 sm:$0xff]  }
 0x2e7   : > { %5467 = vmatmul.mubr.bf16.gmra.mrb[88].mxu1 %v15310_v62  ;;  %v2404_v56 = vpop.f32.mrb[184].mxu0  ;;  %v4585_v19 = vmax.f32 %v4473_v37, %v19522_v35  ;;  %v4477_v21 = vmax.f32 %v19456_v27, %v19522_v35 }
 0x2e8   : > { %5474 = vmatprep.mubr.bf16.mxu1 %v15311_v41  ;;  %v3672_v4 = vsel %vm3491_vm3, %v3669_v26, %v3671_v40  ;;  %v3673_v31 = vrot.slane %v3358_v24, 7  ;;  %v4122_v52 = vrot.slane %v3358_v24, 1  ;;  %v2405_v54 = vadd.f32 %v19408_v3, %v2404_v56  ;;  %14379 = vmatprep.subr.bf16.mxu1 %v4754_v51  ;;  %v2406_v62 = vpop.f32.mrb[185].mxu0  ;;  %v15314_v26 = vld [vmem:[%s23255_s4 + $0x274] ss:$28 sps:$4 sm:$0xff]   ;;  %v3180_v46 = vpop.permute.xlu1 %3179 }
 0x2e9   : > { %v3918_v17 = vmax.f32 %v3672_v4, %v3357_v25  ;;  %14380 = vmatpush3.bf16.msra.mxu1 %v4746_v29  ;;  %v2407_v1 = vpop.f32.mrb[186].mxu0  ;;  %v4121_v37 = vsel %vm3940_vm4, %v4118_v15, %v4120_v50  ;;  %v3175_v25 = vpop.permute.xlu0 %3174 }
 0x2ea   : > { %v3674_v55 = vsel %vm3491_vm3, %v3671_v40, %v3673_v31  ;;  %v2575_v34 = vmax.f32 %v2405_v54, 0.0  ;;  %v2408_v41 = vadd.f32 %v19408_v3, %v2407_v1  ;;  %v2409_v10 = vpop.f32.mrb[187].mxu0  ;;  %v19546_v42 = vmax.f32 %v3917_v59, %v4121_v37 }
 0x2eb   : > { %v3919_v6 = vmax.f32 %v3674_v55, %v3358_v24  ;;  %v4123_v57 = vsel %vm3940_vm4, %v4120_v50, %v4122_v52  ;;  %v4710_v50 = vld [vmem:[%s23255_s4 + $0x2a8] sm:$0x33] }
 0x2ec   : > { %v3359_v16 = vmul.f32 %v3170_v45, %v2575_v34  ;;  %v2576_v29 = vmax.f32 %v2408_v41, 0.0  ;;  %v4586_v15 = vmax.f32 %v4474_v14, %v19546_v42  ;;  %v19553_v39 = vmax.f32 %v3918_v17, %v4123_v57 }
 0x2ed   : > { %v4478_v59 = vmax.f32 %v19484_v49, %v19546_v42  ;;  %v3185_v57 = vpop.permute.xlu0 %3184 }
 0x2ee   : > { %v3675_v33 = vrot.slane %v3359_v16, 7  ;;  %v4124_v36 = vrot.slane %v3359_v16, 1  ;;  %v3360_v7 = vmul.f32 %v3175_v25, %v2576_v29  ;;  %v4755_v40 = vpack.c.bf16 %v4586_v15, %v4585_v19  ;;  %v15316_v19 = vld [vmem:[%s23255_s4 + $0x270] ss:$28 sps:$4 sm:$0xff]  }
 0x2ef   : > { %5475 = vmatmul.mubr.bf16.gmra.mrb[92].mxu1 %v15313_v18  ;;  %v4587_v47 = vmax.f32 %v4475_v28, %v19553_v39  ;;  %v4479_v14 = vmax.f32 %v19491_v20, %v19553_v39  ;;  %v2412_v4 = vpop.f32.mrb[188].mxu0 }
 0x2f0   : > { %5482 = vmatprep.mubr.bf16.mxu1 %v15314_v26  ;;  %v3676_v24 = vsel %vm3491_vm3, %v3673_v31, %v3675_v33  ;;  %v3677_v51 = vrot.slane %v3360_v7, 7  ;;  %v4126_v56 = vrot.slane %v3360_v7, 1  ;;  %14381 = vmatprep.subr.bf16.mxu1 %v4755_v40  ;;  %v4125_v54 = vsel %vm3940_vm4, %v4122_v52, %v4124_v36  ;;  %v2414_v44 = vpop.f32.mrb[189].mxu0 }
 0x2f1   : > { %v3920_v62 = vmax.f32 %v3676_v24, %v3359_v16  ;;  %v2413_v18 = vadd.f32 %v19408_v3, %v2412_v4  ;;  %14382 = vmatpush3.bf16.msra.mxu1 %v4747_v32  ;;  %v19575_v28 = vmax.f32 %v3919_v6, %v4125_v54  ;;  %v13238_v31 = vcombine.high %v4710_v50, %v4710_v50  ;;  %v2415_v1 = vpop.f32.mrb[190].mxu0 }
 0x2f2   : > { %v3678_v17 = vsel %vm3491_vm3, %v3675_v33, %v3677_v51  ;;  %v4127_v37 = vsel %vm3940_vm4, %v4124_v36, %v4126_v56  ;;  %v2416_v52 = vadd.f32 %v19408_v3, %v2415_v1  ;;  %v2417_v34 = vpop.f32.mrb[191].mxu0  ;;  %v13237_v33 = vcombine.low %v4710_v50, %v4710_v50  ;;  %v3195_v1 = vpop.permute.xlu0 %3194 }
 0x2f3   : > { %v3921_v26 = vmax.f32 %v3678_v17, %v3360_v7  ;;  %v2577_v55 = vmax.f32 %v2413_v18, 0.0  ;;  %v4588_v41 = vmax.f32 %v4476_v5, %v19575_v28  ;;  %v19584_v2 = vmax.f32 %v3920_v62, %v4127_v37 }
 0x2f4   : > { %v4480_v32 = vmax.f32 %v19515_v23, %v19575_v28  ;;  %v2578_v45 = vmax.f32 %v2416_v52, 0.0 }
 0x2f5   : > { %v3361_v10 = vmul.f32 %v3180_v46, %v2577_v55  ;;  %v4756_v6 = vpack.c.bf16 %v4588_v41, %v4587_v47  ;;  %v4589_v16 = vmax.f32 %v4477_v21, %v19584_v2  ;;  %v4481_v12 = vmax.f32 %v19522_v35, %v19584_v2  ;;  %v15321_v47 = vld [vmem:[%s23255_s4 + $0x14] ss:$28 sps:$4 sm:$0xff]  }
 0x2f6   : > { %v3362_v15 = vmul.f32 %v3185_v57, %v2578_v45 }
 0x2f7   : > { %5483 = vmatmul.mubr.bf16.gmra.mrb[96].mxu1 %v15316_v19  ;;  %v3679_v5 = vrot.slane %v3361_v10, 7  ;;  %v4128_v29 = vrot.slane %v3361_v10, 1  ;;  %14383 = vmatprep.subr.bf16.mxu1 %v4756_v6 }
 0x2f8   : > { %5490 = vmatprep.mubr.bf16.mxu1 %v13238_v31  ;;  %14384 = vmatpush3.bf16.msra.mxu1 %v4748_v38  ;;  %v3681_v7 = vrot.slane %v3362_v15, 7  ;;  %v4130_v40 = vrot.slane %v3362_v15, 1 }
 0x2f9   : > { %v3680_v36 = vsel %vm3491_vm3, %v3677_v51, %v3679_v5  ;;  %v4129_v19 = vsel %vm3940_vm4, %v4126_v56, %v4128_v29  ;;  %v3190_v51 = vpop.permute.xlu1 %3189 }
 0x2fa   : > { %v2420_v25 = vpop.f32.mrb[192].mxu0  ;;  %v3922_v24 = vmax.f32 %v3680_v36, %v3361_v10  ;;  %v3682_v54 = vsel %vm3491_vm3, %v3679_v5, %v3681_v7  ;;  %v19605_v50 = vmax.f32 %v3921_v26, %v4129_v19  ;;  %v4131_v18 = vsel %vm3940_vm4, %v4128_v29, %v4130_v40 }
 0x2fb   : > { %v2421_v27 = vadd.f32 %v19408_v3, %v2420_v25  ;;  %v2422_v21 = vpop.f32.mrb[193].mxu0  ;;  %v3923_v62 = vmax.f32 %v3682_v54, %v3362_v15 }
 0x2fc   : > { %v2423_v4 = vpop.f32.mrb[194].mxu0  ;;  %v4590_v56 = vmax.f32 %v4478_v59, %v19605_v50  ;;  %v19612_v17 = vmax.f32 %v3922_v24, %v4131_v18  ;;  %v4482_v37 = vmax.f32 %v19546_v42, %v19605_v50 }
 0x2fd   : > { %v2579_v30 = vmax.f32 %v2421_v27, 0.0  ;;  %v2424_v11 = vadd.f32 %v19408_v3, %v2423_v4  ;;  %v2425_v38 = vpop.f32.mrb[195].mxu0  ;;  %v3200_v36 = vpop.permute.xlu1 %3199 }
 0x2fe   : > { %v4757_v34 = vpack.c.bf16 %v4590_v56, %v4589_v16  ;;  %v4591_v46 = vmax.f32 %v4479_v14, %v19612_v17  ;;  %v4483_v49 = vmax.f32 %v19553_v39, %v19612_v17 }
 0x2ff   : > { %5491 = vmatmul.mubr.bf16.gmra.mrb[100].mxu1 %v13237_v33  ;;  %v3363_v44 = vmul.f32 %v3190_v51, %v2579_v30  ;;  %v2580_v31 = vmax.f32 %v2424_v11, 0.0 }
 0x300   : > { %5530 = vmatprep.mubr.bf16.mxu1 %v15321_v47  ;;  %14385 = vmatprep.subr.bf16.mxu1 %v4757_v34 }
 0x301   : > { %v3683_v26 = vrot.slane %v3363_v44, 7  ;;  %v4132_v55 = vrot.slane %v3363_v44, 1  ;;  %v3364_v52 = vmul.f32 %v3195_v1, %v2580_v31  ;;  %14386 = vmatpush3.bf16.msra.mxu1 %v4749_v60  ;;  %v3205_v60 = vpop.permute.xlu0 %3204 }
 0x302   : > { %v2428_v41 = vpop.f32.mrb[196].mxu0 }
 0x303   : > { %v3684_v59 = vsel %vm3491_vm3, %v3681_v7, %v3683_v26  ;;  %v3685_v10 = vrot.slane %v3364_v52, 7  ;;  %v4134_v45 = vrot.slane %v3364_v52, 1  ;;  %v2429_v6 = vadd.f32 %v19408_v3, %v2428_v41  ;;  %v2430_v57 = vpop.f32.mrb[197].mxu0 }
 0x304   : > { %v3924_v5 = vmax.f32 %v3684_v59, %v3363_v44  ;;  %v2431_v16 = vpop.f32.mrb[198].mxu0  ;;  %v4133_v20 = vsel %vm3940_vm4, %v4130_v40, %v4132_v55 }
 0x305   : > { %v3686_v14 = vsel %vm3491_vm3, %v3683_v26, %v3685_v10  ;;  %v2581_v29 = vmax.f32 %v2429_v6, 0.0  ;;  %v2432_v15 = vadd.f32 %v19408_v3, %v2431_v16  ;;  %v2433_v25 = vpop.f32.mrb[199].mxu0  ;;  %v19630_v33 = vmax.f32 %v3923_v62, %v4133_v20  ;;  %v3210_v6 = vpop.permute.xlu1 %3209 }
 0x306   : > { %v3925_v7 = vmax.f32 %v3686_v14, %v3364_v52  ;;  %v4135_v27 = vsel %vm3940_vm4, %v4132_v55, %v4134_v45 }
 0x307   : > { %v3365_v21 = vmul.f32 %v3200_v36, %v2581_v29  ;;  %v2582_v47 = vmax.f32 %v2432_v15, 0.0  ;;  %v4592_v61 = vmax.f32 %v4480_v32, %v19630_v33  ;;  %v19637_v0 = vmax.f32 %v3924_v5, %v4135_v27  ;;  %v14205_v24 = vpop.f32.mrb[0].mxu1 }
 0x308   : > { %v4484_v40 = vmax.f32 %v19575_v28, %v19630_v33  ;;  %v14206_v11 = vpop.f32.mrb[1].mxu1 }
 0x309   : > { %v3687_v4 = vrot.slane %v3365_v21, 7  ;;  %v4136_v19 = vrot.slane %v3365_v21, 1  ;;  %v3366_v54 = vmul.f32 %v3205_v60, %v2582_v47  ;;  %v4758_v30 = vpack.c.bf16 %v4592_v61, %v4591_v46  ;;  %v14208_v32 = vpop.f32.mrb[2].mxu1 }
 0x30a   : > { %v2436_v38 = vpop.f32.mrb[200].mxu0  ;;  %v4593_v51 = vmax.f32 %v4481_v12, %v19637_v0  ;;  %v19645_v23 = vadd.f32 %v14206_v11, %v14205_v24  ;;  %v4485_v62 = vmax.f32 %v19584_v2, %v19637_v0  ;;  %v14209_v26 = vpop.f32.mrb[3].mxu1  ;;  %v15319_v2 = vld [vmem:[%s23255_s4 + $0x10] ss:$28 sps:$4 sm:$0xff]  }
 0x30b   : > { %v3688_v18 = vsel %vm3491_vm3, %v3685_v10, %v3687_v4  ;;  %v3689_v44 = vrot.slane %v3366_v54, 7  ;;  %v4138_v31 = vrot.slane %v3366_v54, 1  ;;  %v2437_v56 = vadd.f32 %v19408_v3, %v2436_v38  ;;  %14387 = vmatprep.subr.bf16.mxu1 %v4758_v30  ;;  %v2438_v1 = vpop.f32.mrb[201].mxu0 }
 0x30c   : > { %v3926_v55 = vmax.f32 %v3688_v18, %v3365_v21  ;;  %14388 = vmatpush3.bf16.msra.mxu1 %v4750_v58  ;;  %v2439_v35 = vpop.f32.mrb[202].mxu0  ;;  %v4137_v12 = vsel %vm3940_vm4, %v4134_v45, %v4136_v19  ;;  %v19655_v52 = vadd.f32 %v14209_v26, %v14208_v32  ;;  %v3215_v45 = vpop.permute.xlu0 %3214 }
 0x30d   : > { %v3690_v34 = vsel %vm3491_vm3, %v3687_v4, %v3689_v44  ;;  %v2583_v41 = vmax.f32 %v2437_v56, 0.0  ;;  %v2440_v46 = vadd.f32 %v19408_v3, %v2439_v35  ;;  %v2441_v59 = vpop.f32.mrb[203].mxu0  ;;  %v19659_v10 = vmax.f32 %v3925_v7, %v4137_v12  ;;  %v3220_v56 = vpop.permute.xlu1 %3219 }
 0x30e   : > { %v3927_v57 = vmax.f32 %v3690_v34, %v3366_v54  ;;  %v4139_v5 = vsel %vm3940_vm4, %v4136_v19, %v4138_v31 }
 0x30f   : > { %v3367_v16 = vmul.f32 %v3210_v6, %v2583_v41  ;;  %v2584_v9 = vmax.f32 %v2440_v46, 0.0  ;;  %v4594_v8 = vmax.f32 %v4482_v37, %v19659_v10  ;;  %v19666_v58 = vmax.f32 %v3926_v55, %v4139_v5  ;;  %v14211_v14 = vpop.f32.mrb[4].mxu1 }
 0x310   : > { %v4486_v20 = vmax.f32 %v19605_v50, %v19659_v10  ;;  %v14212_v7 = vpop.f32.mrb[5].mxu1  ;;  %v3225_v55 = vpop.permute.xlu0 %3224 }
 0x311   : > { %v3691_v29 = vrot.slane %v3367_v16, 7  ;;  %v4140_v15 = vrot.slane %v3367_v16, 1  ;;  %v19670_v25 = vmul.f32 %v3215_v45, %v2584_v9  ;;  %v4759_v36 = vpack.c.bf16 %v4594_v8, %v4593_v51  ;;  %v14214_v21 = vpop.f32.mrb[6].mxu1  ;;  %v3230_v53 = vpop.permute.xlu1 %3229 }
 0x312   : > { %v2444_v27 = vpop.f32.mrb[204].mxu0  ;;  %v4595_v42 = vmax.f32 %v4483_v49, %v19666_v58  ;;  %v19676_v37 = vadd.f32 %v14212_v7, %v14211_v14  ;;  %v4487_v47 = vmax.f32 %v19612_v17, %v19666_v58  ;;  %v14215_v54 = vpop.f32.mrb[7].mxu1  ;;  %v15322_v7 = vld [vmem:[%s23255_s4 + $0x4c] ss:$28 sps:$4 sm:$0xff]  }
 0x313   : > { %v3692_v61 = vsel %vm3491_vm3, %v3689_v44, %v3691_v29  ;;  %v3693_v60 = vrot.slane %v19670_v25, 7  ;;  %v4142_v24 = vrot.slane %v19670_v25, 1  ;;  %v2445_v4 = vadd.f32 %v19408_v3, %v2444_v27  ;;  %14389 = vmatprep.subr.bf16.mxu1 %v4759_v36  ;;  %v2446_v19 = vpop.f32.mrb[205].mxu0 }
 0x314   : > { %v3928_v30 = vmax.f32 %v3692_v61, %v3367_v16  ;;  %14390 = vmatpush3.bf16.msra.mxu1 %v4751_v48  ;;  %v2447_v39 = vpop.f32.mrb[206].mxu0  ;;  %v4141_v49 = vsel %vm3940_vm4, %v4138_v31, %v4140_v15  ;;  %v19688_v11 = vadd.f32 %v14215_v54, %v14214_v21 }
 0x315   : > { %v3694_v38 = vsel %vm3491_vm3, %v3691_v29, %v3693_v60  ;;  %v2585_v51 = vmax.f32 %v2445_v4, 0.0  ;;  %v2448_v32 = vadd.f32 %v19408_v3, %v2447_v39  ;;  %v2449_v18 = vpop.f32.mrb[207].mxu0  ;;  %v19692_v44 = vmax.f32 %v3927_v57, %v4141_v49  ;;  %v3235_v49 = vpop.permute.xlu0 %3234 }
 0x316   : > { %v3929_v1 = vmax.f32 %v3694_v38, %v19670_v25  ;;  %v4143_v26 = vsel %vm3940_vm4, %v4140_v15, %v4142_v24  ;;  %v23307_v4 = vmov 0.0  }
 0x317   : > { %v3369_v22 = vmul.f32 %v3220_v56, %v2585_v51  ;;  %v2586_v43 = vmax.f32 %v2448_v32, 0.0  ;;  %v4596_v48 = vmax.f32 %v4484_v40, %v19692_v44  ;;  %v19700_v31 = vmax.f32 %v3928_v30, %v4143_v26  ;;  %v14217_v12 = vpop.f32.mrb[8].mxu1 }
 0x318   : > { %v4488_v35 = vmax.f32 %v19630_v33, %v19692_v44  ;;  %v14218_v6 = vpop.f32.mrb[9].mxu1 }
 0x319   : > { %v3695_v34 = vrot.slane %v3369_v22, 7  ;;  %v4144_v41 = vrot.slane %v3369_v22, 1  ;;  %v19704_v46 = vmul.f32 %v3225_v55, %v2586_v43  ;;  %v4760_v59 = vpack.c.bf16 %v4596_v48, %v4595_v42  ;;  %v14220_v5 = vpop.f32.mrb[10].mxu1 }
 0x31a   : > { %v2452_v57 = vpop.f32.mrb[208].mxu0  ;;  %v4597_v28 = vmax.f32 %v4485_v62, %v19700_v31  ;;  %v19710_v40 = vadd.f32 %v14218_v6, %v14217_v12  ;;  %v4489_v16 = vmax.f32 %v19637_v0, %v19700_v31  ;;  %v14221_v62 = vpop.f32.mrb[11].mxu1 }
 0x31b   : > { %v3696_v9 = vsel %vm3491_vm3, %v3693_v60, %v3695_v34  ;;  %v3697_v8 = vrot.slane %v19704_v46, 7  ;;  %v4146_v45 = vrot.slane %v19704_v46, 1  ;;  %v2453_v14 = vadd.f32 %v19408_v3, %v2452_v57  ;;  %14391 = vmatprep.subr.bf16.mxu1 %v4760_v59  ;;  %v2454_v29 = vpop.f32.mrb[209].mxu0  ;;  %v15324_v59 = vld [vmem:[%s23255_s4 + $0x48] ss:$28 sps:$4 sm:$0xff]  }
 0x31c   : > { %v3930_v15 = vmax.f32 %v3696_v9, %v3369_v22  ;;  %14392 = vmatpush3.bf16.msra.mxu1 %v4752_v13  ;;  %v2455_v25 = vpop.f32.mrb[210].mxu0  ;;  %v4145_v36 = vsel %vm3940_vm4, %v4142_v24, %v4144_v41  ;;  %v19728_v27 = vadd.f32 %v14221_v62, %v14220_v5  ;;  %v3240_v62 = vpop.permute.xlu1 %3239 }
 0x31d   : > { %v3698_v42 = vsel %vm3491_vm3, %v3695_v34, %v3697_v8  ;;  %v2587_v21 = vmax.f32 %v2453_v14, 0.0  ;;  %v2456_v61 = vadd.f32 %v19408_v3, %v2455_v25  ;;  %v2457_v60 = vpop.f32.mrb[211].mxu0  ;;  %14812 = vmatprep.subr.bf16.mxu1 %v23307_v4  ;;  %v19733_v63 = vmax.f32 %v3929_v1, %v4145_v36 }
 0x31e   : > { %v3931_v13 = vmax.f32 %v3698_v42, %v19704_v46  ;;  %v4147_v24 = vsel %vm3940_vm4, %v4144_v41, %v4146_v45 }
 0x31f   : > { %v3371_v19 = vmul.f32 %v3230_v53, %v2587_v21  ;;  %v2588_v54 = vmax.f32 %v2456_v61, 0.0  ;;  %5531 = vmatmul.mubr.bf16.vlgmr.msra.gmra.mrb[104].mxu1 %v15319_v2  ;;  %v4598_v30 = vmax.f32 %v4486_v20, %v19733_v63  ;;  %v19741_v39 = vmax.f32 %v3930_v15, %v4147_v24  ;;  %v14223_v51 = vpop.f32.mrb[12].mxu1  ;;  %v3245_v21 = vpop.permute.xlu0 %3244 }
 0x320   : > { %5538 = vmatprep.mubr.bf16.mxu1 %v15322_v7  ;;  %v4490_v38 = vmax.f32 %v19659_v10, %v19733_v63  ;;  %v14224_v26 = vpop.f32.mrb[13].mxu1 }
 0x321   : > { %v3699_v32 = vrot.slane %v3371_v19, 7  ;;  %v4148_v18 = vrot.slane %v3371_v19, 1  ;;  %v3372_v56 = vmul.f32 %v3235_v49, %v2588_v54  ;;  %v4761_v1 = vpack.c.bf16 %v4598_v30, %v4597_v28  ;;  %v14226_v43 = vpop.f32.mrb[14].mxu1  ;;  %v15325_v28 = vld [vmem:[%s23255_s4 + $0x84] ss:$28 sps:$4 sm:$0xff]  }
 0x322   : > { %v2460_v22 = vpop.f32.mrb[212].mxu0  ;;  %v4599_v50 = vmax.f32 %v4487_v47, %v19741_v39  ;;  %v19749_v20 = vadd.f32 %v14224_v26, %v14223_v51  ;;  %v4491_v48 = vmax.f32 %v19666_v58, %v19741_v39  ;;  %v14227_v17 = vpop.f32.mrb[15].mxu1  ;;  %v15331_v58 = vld [vmem:[%s23255_s4 + $0xf4] ss:$28 sps:$4 sm:$0xff]  }
 0x323   : > { %v3700_v55 = vsel %vm3491_vm3, %v3697_v8, %v3699_v32  ;;  %v3701_v12 = vrot.slane %v3372_v56, 7  ;;  %v4150_v34 = vrot.slane %v3372_v56, 1  ;;  %v2461_v41 = vadd.f32 %v19408_v3, %v2460_v22  ;;  %14813 = vmatpush3.bf16.msra.mxu1 %v4761_v1  ;;  %v2462_v46 = vpop.f32.mrb[213].mxu0  ;;  %v15328_v22 = vld [vmem:[%s23255_s4 + $0xbc] ss:$28 sps:$4 sm:$0xff]  }
 0x324   : > { %v3932_v47 = vmax.f32 %v3700_v55, %v3371_v19  ;;  %v2463_v6 = vpop.f32.mrb[214].mxu0  ;;  %14814 = vmatprep.subr.bf16.mxu1 %v23307_v4  ;;  %v4149_v57 = vsel %vm3940_vm4, %v4146_v45, %v4148_v18  ;;  %v19763_v5 = vadd.f32 %v14227_v17, %v14226_v43 }
 0x325   : > { %v3702_v9 = vsel %vm3491_vm3, %v3699_v32, %v3701_v12  ;;  %v2589_v8 = vmax.f32 %v2461_v41, 0.0  ;;  %v2464_v14 = vadd.f32 %v19408_v3, %v2463_v6  ;;  %v2465_v29 = vpop.f32.mrb[215].mxu0  ;;  %v19767_v2 = vmax.f32 %v3931_v13, %v4149_v57 }
 0x326   : > { %v3933_v15 = vmax.f32 %v3702_v9, %v3372_v56  ;;  %v4151_v25 = vsel %vm3940_vm4, %v4148_v18, %v4150_v34  ;;  %v15327_v56 = vld [vmem:[%s23255_s4 + $0x80] ss:$28 sps:$4 sm:$0xff]  }
 0x327   : > { %v3373_v36 = vmul.f32 %v3240_v62, %v2589_v8  ;;  %v2590_v45 = vmax.f32 %v2464_v14, 0.0  ;;  %5539 = vmatmul.mubr.bf16.gmra.mrb[108].mxu1 %v15324_v59  ;;  %v4600_v7 = vmax.f32 %v4488_v35, %v19767_v2  ;;  %v19774_v42 = vmax.f32 %v3932_v47, %v4151_v25  ;;  %v14229_v61 = vpop.f32.mrb[16].mxu1 }
 0x328   : > { %5546 = vmatprep.mubr.bf16.mxu1 %v15325_v28  ;;  %v4492_v60 = vmax.f32 %v19692_v44, %v19767_v2  ;;  %v14230_v54 = vpop.f32.mrb[17].mxu1  ;;  %v15330_v28 = vld [vmem:[%s23255_s4 + $0xb8] ss:$28 sps:$4 sm:$0xff]  }
 0x329   : > { %v3703_v53 = vrot.slane %v3373_v36, 7  ;;  %v4152_v13 = vrot.slane %v3373_v36, 1  ;;  %v19778_v24 = vmul.f32 %v3245_v21, %v2590_v45  ;;  %v4762_v19 = vpack.c.bf16 %v4600_v7, %v4599_v50  ;;  %v14232_v30 = vpop.f32.mrb[18].mxu1  ;;  %v15333_v7 = vld [vmem:[%s23255_s4 + $0xf0] ss:$28 sps:$4 sm:$0xff]  }
 0x32a   : > { %v4601_v33 = vmax.f32 %v4489_v16, %v19774_v42  ;;  %v19784_v35 = vadd.f32 %v14230_v54, %v14229_v61  ;;  %v4493_v49 = vmax.f32 %v19700_v31, %v19774_v42  ;;  %v14233_v16 = vpop.f32.mrb[19].mxu1  ;;  %v15339_v31 = vld [vmem:[%s23255_s4 + $0x160] ss:$28 sps:$4 sm:$0xff]  }
 0x32b   : > { %v3704_v51 = vsel %vm3491_vm3, %v3701_v12, %v3703_v53  ;;  %v3705_v32 = vrot.slane %v19778_v24, 7  ;;  %v4154_v18 = vrot.slane %v19778_v24, 1  ;;  %14815 = vmatpush3.bf16.msra.mxu1 %v4762_v19  ;;  %v4153_v0 = vsel %vm3940_vm4, %v4150_v34, %v4152_v13 }
 0x32c   : > { %v3934_v1 = vmax.f32 %v3704_v51, %v3373_v36  ;;  %14816 = vmatprep.subr.bf16.mxu1 %v23307_v4  ;;  %v19796_v26 = vmax.f32 %v3933_v15, %v4153_v0  ;;  %v19801_v50 = vadd.f32 %v14233_v16, %v14232_v30 }
 0x32d   : > { %v3706_v43 = vsel %vm3491_vm3, %v3703_v53, %v3705_v32  ;;  %v4155_v55 = vsel %vm3940_vm4, %v4152_v13, %v4154_v18  ;;  %v15334_v13 = vld [vmem:[%s23255_s4 + $0x12c] ss:$28 sps:$4 sm:$0xff]  }
 0x32e   : > { %v3935_v12 = vmax.f32 %v3706_v43, %v19778_v24  ;;  %v4602_v34 = vmax.f32 %v4490_v38, %v19796_v26  ;;  %v19812_v41 = vmax.f32 %v3934_v1, %v4155_v55  ;;  %v4494_v46 = vmax.f32 %v19733_v63, %v19796_v26 }
 0x32f   : > { %5547 = vmatmul.mubr.bf16.gmra.mrb[112].mxu1 %v15327_v56  ;;  %v14235_v17 = vpop.f32.mrb[20].mxu1  ;;  %v3255_v56 = vpop.permute.xlu0 %3254 }
 0x330   : > { %v4763_v59 = vpack.c.bf16 %v4602_v34, %v4601_v33  ;;  %5554 = vmatprep.mubr.bf16.mxu1 %v15328_v22  ;;  %v19820_v47 = vmax.f32 %v4491_v48, %v19812_v41  ;;  %v4495_v6 = vmax.f32 %v19741_v39, %v19812_v41  ;;  %v14236_v10 = vpop.f32.mrb[21].mxu1  ;;  %v3250_v33 = vpop.permute.xlu1 %3249  ;;  %v15345_v39 = vld [vmem:[%s23255_s4 + $0x1d0] ss:$28 sps:$4 sm:$0xff]  }
 0x331   : > { %v19824_v38 = vadd.f32 %v14236_v10, %v14235_v17  ;;  %v14238_v57 = vpop.f32.mrb[22].mxu1 }
 0x332   : > { %14817 = vmatpush3.bf16.msra.mxu1 %v4763_v59  ;;  %v14239_v9 = vpop.f32.mrb[23].mxu1 }
 0x333   : > { %14818 = vmatprep.subr.bf16.mxu1 %v23307_v4  ;;  %v19833_v48 = vadd.f32 %v14239_v9, %v14238_v57  ;;  %v15336_v57 = vld [vmem:[%s23255_s4 + $0x128] ss:$28 sps:$4 sm:$0xff]  }
 0x337   : > { %5555 = vmatmul.mubr.bf16.gmra.mrb[116].mxu1 %v15330_v28  ;;  %v14241_v8 = vpop.f32.mrb[24].mxu1  ;;  %v2468_v14 = vpop.f32.mrb[216].mxu0 }
 0x338   : > { %5562 = vmatprep.mubr.bf16.mxu1 %v15331_v58  ;;  %v14242_v29 = vpop.f32.mrb[25].mxu1  ;;  %v2469_v62 = vadd.f32 %v19408_v3, %v2468_v14  ;;  %v2470_v15 = vpop.f32.mrb[217].mxu0 }
 0x339   : > { %v19836_v25 = vadd.f32 %v14242_v29, %v14241_v8  ;;  %v14244_v36 = vpop.f32.mrb[26].mxu1  ;;  %v2471_v45 = vpop.f32.mrb[218].mxu0  ;;  %v15337_v8 = vld [vmem:[%s23255_s4 + $0x164] ss:$28 sps:$4 sm:$0xff]  }
 0x33a   : > { %v14245_v21 = vpop.f32.mrb[27].mxu1  ;;  %v2591_v61 = vmax.f32 %v2469_v62, 0.0  ;;  %v2472_v53 = vadd.f32 %v19408_v3, %v2471_v45  ;;  %v2473_v19 = vpop.f32.mrb[219].mxu0 }
 0x33b   : > { %v19845_v54 = vadd.f32 %v14245_v21, %v14244_v36  ;;  %v15340_v19 = vld [vmem:[%s23255_s4 + $0x19c] ss:$28 sps:$4 sm:$0xff]  }
 0x33c   : > { %v3375_v30 = vmul.f32 %v3250_v33, %v2591_v61  ;;  %v2592_v51 = vmax.f32 %v2472_v53, 0.0 }
 0x33e   : > { %v3707_v0 = vrot.slane %v3375_v30, 7  ;;  %v4156_v16 = vrot.slane %v3375_v30, 1  ;;  %v19847_v1 = vmul.f32 %v3255_v56, %v2592_v51 }
 0x33f   : > { %5563 = vmatmul.mubr.bf16.gmra.mrb[120].mxu1 %v15333_v7  ;;  %v14247_v22 = vpop.f32.mrb[28].mxu1 }
 0x340   : > { %5570 = vmatprep.mubr.bf16.mxu1 %v15334_v13  ;;  %v14248_v43 = vpop.f32.mrb[29].mxu1  ;;  %v3708_v3 = vsel %vm3491_vm3, %v3705_v32, %v3707_v0  ;;  %v3709_v55 = vrot.slane %v19847_v1, 7  ;;  %v4158_v34 = vrot.slane %v19847_v1, 1  ;;  %v4157_v59 = vsel %vm3940_vm4, %v4154_v18, %v4156_v16 }
 0x341   : > { %v14250_v17 = vpop.f32.mrb[30].mxu1  ;;  %v3936_v10 = vmax.f32 %v3708_v3, %v3375_v30  ;;  %v19858_v28 = vmax.f32 %v3935_v12, %v4157_v59  ;;  %v19860_v9 = vadd.f32 %v14248_v43, %v14247_v22  ;;  %v3265_v22 = vpop.permute.xlu0 %3264 }
 0x342   : > { %v14251_v58 = vpop.f32.mrb[31].mxu1  ;;  %v3710_v32 = vsel %vm3491_vm3, %v3707_v0, %v3709_v55  ;;  %v4159_v18 = vsel %vm3940_vm4, %v4156_v16, %v4158_v34  ;;  %v3260_v0 = vpop.permute.xlu1 %3259 }
 0x343   : > { %v19866_v24 = vadd.f32 %v14251_v58, %v14250_v17  ;;  %v3937_v14 = vmax.f32 %v3710_v32, %v19847_v1  ;;  %v4604_v12 = vmax.f32 %v4492_v60, %v19858_v28  ;;  %v4385_v29 = vmax.f32 %v3936_v10, %v4159_v18 }
 0x344   : > { %v4496_v62 = vmax.f32 %v19767_v2, %v19858_v28 }
 0x345   : > { %v4764_v15 = vpack.c.bf16 %v4604_v12, %v19820_v47  ;;  %v4605_v36 = vmax.f32 %v4493_v49, %v4385_v29  ;;  %v4497_v45 = vmax.f32 %v19774_v42, %v4385_v29  ;;  %v15986_v47 = vld [vmem:[%s23346_s2] ss:$0 sm:$0xff]  ;;  %v15342_v12 = vld [vmem:[%s23255_s4 + $0x198] ss:$28 sps:$4 sm:$0xff]  }
 0x347   : > { %5571 = vmatmul.mubr.bf16.gmra.mrb[124].mxu1 %v15336_v57  ;;  %v14253_v7 = vpop.f32.mrb[32].mxu1 }
 0x348   : > { %5578 = vmatprep.mubr.bf16.mxu1 %v15337_v8  ;;  %14819 = vmatpush3.bf16.msra.mxu1 %v4764_v15  ;;  %v14254_v21 = vpop.f32.mrb[33].mxu1 }
 0x349   : > { %14820 = vmatprep.subr.bf16.mxu1 %v23307_v4  ;;  %v19882_v44 = vadd.f32 %v14254_v21, %v14253_v7  ;;  %v14256_v60 = vpop.f32.mrb[34].mxu1 }
 0x34a   : > { %v14257_v42 = vpop.f32.mrb[35].mxu1 }
 0x34b   : > { %v2476_v61 = vpop.f32.mrb[220].mxu0  ;;  %v19893_v33 = vadd.f32 %v14257_v42, %v14256_v60  ;;  %v4609_v42 = vmax.f32 %v4497_v45, 0.0 }
 0x34c   : > { %v2477_v53 = vadd.f32 %v15986_v47, %v2476_v61  ;;  %v2478_v13 = vpop.f32.mrb[221].mxu0  ;;  %v15343_v61 = vld [vmem:[%s23255_s4 + $0x1d4] ss:$28 sps:$4 sm:$0xff]  }
 0x34d   : > { %v2479_v49 = vpop.f32.mrb[222].mxu0 }
 0x34e   : > { %v2593_v30 = vmax.f32 %v2477_v53, 0.0  ;;  %v2480_v51 = vadd.f32 %v15986_v47, %v2479_v49  ;;  %v2481_v56 = vpop.f32.mrb[223].mxu0 }
 0x34f   : > { %5579 = vmatmul.mubr.bf16.gmra.mrb[128].mxu1 %v15339_v31  ;;  %v14259_v43 = vpop.f32.mrb[36].mxu1 }
 0x350   : > { %v3377_v16 = vmul.f32 %v3260_v0, %v2593_v30  ;;  %v2594_v1 = vmax.f32 %v2480_v51, 0.0  ;;  %5586 = vmatprep.mubr.bf16.mxu1 %v15340_v19  ;;  %v14260_v10 = vpop.f32.mrb[37].mxu1 }
 0x351   : > { %v19895_v57 = vadd.f32 %v14260_v10, %v14259_v43  ;;  %v14262_v58 = vpop.f32.mrb[38].mxu1  ;;  %v15348_v10 = vld [vmem:[%s23255_s4 + $0x208] ss:$28 sps:$4 sm:$0xff]  }
 0x352   : > { %v3711_v3 = vrot.slane %v3377_v16, 7  ;;  %v4160_v59 = vrot.slane %v3377_v16, 1  ;;  %v3378_v17 = vmul.f32 %v3265_v22, %v2594_v1  ;;  %v14263_v15 = vpop.f32.mrb[39].mxu1  ;;  %v15346_v1 = vld [vmem:[%s23255_s4 + $0x20c] ss:$28 sps:$4 sm:$0xff]  }
 0x353   : > { %v19905_v60 = vadd.f32 %v14263_v15, %v14262_v58 }
 0x354   : > { %v3712_v32 = vsel %vm3491_vm3, %v3709_v55, %v3711_v3  ;;  %v3713_v8 = vrot.slane %v3378_v17, 7  ;;  %v4162_v18 = vrot.slane %v3378_v17, 1  ;;  %v4161_v29 = vsel %vm3940_vm4, %v4158_v34, %v4160_v59 }
 0x355   : > { %v3938_v7 = vmax.f32 %v3712_v32, %v3377_v16  ;;  %v4386_v21 = vmax.f32 %v3937_v14, %v4161_v29 }
 0x356   : > { %v3714_v47 = vsel %vm3491_vm3, %v3711_v3, %v3713_v8  ;;  %v4163_v55 = vsel %vm3940_vm4, %v4160_v59, %v4162_v18  ;;  %v4276_v14 = vsel %vm3940_vm4, %v4162_v18, 0.0  ;;  %v15349_v8 = vld [vmem:[%s23255_s4 + $0x244] ss:$28 sps:$4 sm:$0xff]   ;;  %v23443_v18 = vmov 0  }
 0x357   : > { %v3939_v53 = vmax.f32 %v3714_v47, %v3378_v17  ;;  %v4606_v13 = vmax.f32 %v4494_v46, %v4386_v21  ;;  %v4387_v31 = vmax.f32 %v3938_v7, %v4163_v55  ;;  %v4498_v34 = vmax.f32 %v19796_v26, %v4386_v21  ;;  %5587 = vmatmul.mubr.bf16.gmra.mrb[132].mxu1 %v15342_v12  ;;  %v14265_v56 = vpop.f32.mrb[40].mxu1  ;;  %v15351_v21 = vld [vmem:[%s23255_s4 + $0x240] ss:$28 sps:$4 sm:$0xff]  }
 0x358   : > { %5594 = vmatprep.mubr.bf16.mxu1 %v15343_v61  ;;  %v14266_v63 = vpop.f32.mrb[41].mxu1  ;;  %v15352_v47 = vld [vmem:[%s23255_s4 + $0x27c] ss:$28 sps:$4 sm:$0xff]  }
 0x359   : > { %v4765_v49 = vpack.c.bf16 %v4606_v13, %v4605_v36  ;;  %v4388_v19 = vmax.f32 %v3939_v53, %v4276_v14  ;;  %v4607_v30 = vmax.f32 %v4495_v6, %v4387_v31  ;;  %v4610_v51 = vmax.f32 %v4498_v34, 0.0  ;;  %v14268_v16 = vpop.f32.mrb[42].mxu1  ;;  %v4711_v53 = vld [vmem:[%s23255_s4 + $0x2b0] sm:$0x33] }
 0x35a   : > { %v4499_v0 = vmax.f32 %v19812_v41, %v4387_v31  ;;  %v19922_v36 = vadd.f32 %v14266_v63, %v14265_v56  ;;  %v14269_v6 = vpop.f32.mrb[43].mxu1  ;;  %v15354_v14 = vld [vmem:[%s23255_s4 + $0x278] ss:$28 sps:$4 sm:$0xff]  }
 0x35b   : > { %14821 = vmatpush3.bf16.msra.mxu1 %v4765_v49  ;;  %v4608_v26 = vmax.f32 %v4496_v62, %v4388_v19  ;;  %v4767_v46 = vpack.c.bf16 %v4610_v51, %v4609_v42  ;;  %v4500_v45 = vmax.f32 %v19858_v28, %v4388_v19  ;;  %v19931_v22 = vadd.f32 %v14269_v6, %v14268_v16 }
 0x35c   : > { %14822 = vmatprep.subr.bf16.mxu1 %v23307_v4  ;;  %v4611_v2 = vmax.f32 %v4499_v0, 0.0  ;;  %v13240_v49 = vcombine.high %v4711_v53, %v4711_v53 }
 0x35d   : > { %v4766_v41 = vpack.c.bf16 %v4608_v26, %v4607_v30  ;;  %v4612_v62 = vmax.f32 %v4500_v45, 0.0 }
 0x35f   : > { %14823 = vmatpush3.bf16.msra.mxu1 %v4766_v41  ;;  %v4768_v28 = vpack.c.bf16 %v4612_v62, %v4611_v2  ;;  %v14271_v43 = vpop.f32.mrb[44].mxu1  ;;  %v15357_v2 = vld [vmem:[%s23255_s4 + $0x18] ss:$28 sps:$4 sm:$0xff]  }
 0x360   : > { %5595 = vmatmul.mubr.bf16.gmra.mrb[136].mxu1 %v15345_v39  ;;  %14824 = vmatprep.subr.bf16.mxu1 %v23307_v4  ;;  %v14272_v3 = vpop.f32.mrb[45].mxu1 }
 0x361   : > { %5602 = vmatprep.mubr.bf16.mxu1 %v15346_v1  ;;  %v19934_v59 = vadd.f32 %v14272_v3, %v14271_v43  ;;  %v14274_v17 = vpop.f32.mrb[46].mxu1 }
 0x362   : > { %v14275_v58 = vpop.f32.mrb[47].mxu1 }
 0x363   : > { %14825 = vmatpush3.bf16.msra.mxu1 %v4767_v46  ;;  %v19940_v32 = vadd.f32 %v14275_v58, %v14274_v17  ;;  %v13239_v46 = vcombine.low %v4711_v53, %v4711_v53  ;;  %v15358_v58 = vld [vmem:[%s23255_s4 + $0x50] ss:$28 sps:$4 sm:$0xff]  }
 0x364   : > { %14826 = vmatprep.subr.bf16.mxu1 %v23307_v4 }
 0x367   : > { %14827 = vmatpush3.bf16.msra.mxu1 %v4768_v28  ;;  %v14277_v12 = vpop.f32.mrb[48].mxu1 }
 0x368   : > { %5603 = vmatmul.mubr.bf16.gmra.mrb[140].mxu1 %v15348_v10  ;;  %5966 = vmatprep.subr.bf16.mxu1 %v23443_v18  ;;  %v14278_v29 = vpop.f32.mrb[49].mxu1 }
 0x369   : > { %5610 = vmatprep.mubr.bf16.mxu1 %v15349_v8  ;;  %v19946_v15 = vadd.f32 %v14278_v29, %v14277_v12  ;;  %v14280_v7 = vpop.f32.mrb[50].mxu1 }
 0x36a   : > { %v14281_v61 = vpop.f32.mrb[51].mxu1 }
 0x370   : > { %5611 = vmatmul.mubr.bf16.gmra.mrb[144].mxu1 %v15351_v21 }
 0x371   : > { %5618 = vmatprep.mubr.bf16.mxu1 %v15352_v47  ;;  %v15359_v47 = vld [vmem:[%s23255_s4 + $0x88] ss:$28 sps:$4 sm:$0xff]  }
 0x372   : > { %v14299_v55 = vpop.f32.mrb[52].mxu1 }
 0x373   : > { %v14300_v13 = vpop.f32.mrb[53].mxu1 }
 0x374   : > { %v14301_v31 = vadd.f32 %v14300_v13, %v14299_v55  ;;  %v14302_v34 = vpop.f32.mrb[54].mxu1 }
 0x375   : > { %v14303_v42 = vpop.f32.mrb[55].mxu1 }
 0x376   : > { %v19961_v19 = vadd.f32 %v14301_v31, %v19645_v23  ;;  %v14304_v30 = vadd.f32 %v14303_v42, %v14302_v34  ;;  %v15360_v42 = vld [vmem:[%s23255_s4 + $0xc0] ss:$28 sps:$4 sm:$0xff]  }
 0x378   : > { %v19964_v51 = vadd.f32 %v14304_v30, %v19655_v52  ;;  %5619 = vmatmul.mubr.bf16.gmra.mrb[148].mxu1 %v15354_v14 }
 0x379   : > { %5626 = vmatprep.mubr.bf16.mxu1 %v13240_v49 }
 0x37a   : > { %v14305_v56 = vpop.f32.mrb[56].mxu1 }
 0x37b   : > { %v14306_v0 = vpop.f32.mrb[57].mxu1 }
 0x37c   : > { %v14307_v63 = vadd.f32 %v14306_v0, %v14305_v56  ;;  %v14308_v26 = vpop.f32.mrb[58].mxu1 }
 0x37d   : > { %v14309_v45 = vpop.f32.mrb[59].mxu1 }
 0x37e   : > { %v19967_v16 = vadd.f32 %v14307_v63, %v19676_v37  ;;  %v14310_v39 = vadd.f32 %v14309_v45, %v14308_v26 }
 0x380   : > { %v19970_v6 = vadd.f32 %v14310_v39, %v19688_v11  ;;  %5627 = vmatmul.mubr.bf16.gmra.mrb[152].mxu1 %v13239_v46  ;;  %v15361_v46 = vld [vmem:[%s23255_s4 + $0xf8] ss:$28 sps:$4 sm:$0xff]  }
 0x381   : > { %14828 = vmatprep.mubr.msk.bf16.mxu1 %vm16056_vm5, %v23307_v4 }
 0x382   : > { %v14311_v23 = vpop.f32.mrb[60].mxu1 }
 0x383   : > { %v14312_v52 = vpop.f32.mrb[61].mxu1 }
 0x384   : > { %v14313_v41 = vadd.f32 %v14312_v52, %v14311_v23  ;;  %v14314_v1 = vpop.f32.mrb[62].mxu1 }
 0x385   : > { %v14315_v62 = vpop.f32.mrb[63].mxu1 }
 0x386   : > { %v19978_v37 = vadd.f32 %v14313_v41, %v19710_v40  ;;  %v14316_v28 = vadd.f32 %v14315_v62, %v14314_v1 }
 0x388   : > { %v19981_v11 = vadd.f32 %v14316_v28, %v19728_v27  ;;  %14829 = vmatmul.mubr.bf16.vlgmr.msra.gmra.mrb[156].mxu1 %v15357_v2  ;;  %v15362_v2 = vld [vmem:[%s23255_s4 + $0x130] ss:$28 sps:$4 sm:$0xff]  }
 0x389   : > { %14832 = vmatprep.mubr.msk.bf16.mxu1 %vm16056_vm5, %v23307_v4 }
 0x38a   : > { %v14317_v43 = vpop.f32.mrb[64].mxu1 }
 0x38b   : > { %v14318_v3 = vpop.f32.mrb[65].mxu1 }
 0x38c   : > { %v14319_v17 = vadd.f32 %v14318_v3, %v14317_v43  ;;  %v14320_v10 = vpop.f32.mrb[66].mxu1 }
 0x38d   : > { %v14321_v8 = vpop.f32.mrb[67].mxu1 }
 0x38e   : > { %v19989_v40 = vadd.f32 %v14319_v17, %v19749_v20  ;;  %v14322_v12 = vadd.f32 %v14321_v8, %v14320_v10 }
 0x390   : > { %v19992_v27 = vadd.f32 %v14322_v12, %v19763_v5  ;;  %14833 = vmatmul.mubr.bf16.gmra.mrb[160].mxu1 %v15358_v58  ;;  %v15363_v58 = vld [vmem:[%s23255_s4 + $0x168] ss:$28 sps:$4 sm:$0xff]  }
 0x391   : > { %14836 = vmatprep.mubr.msk.bf16.mxu1 %vm16056_vm5, %v23307_v4 }
 0x392   : > { %v14323_v29 = vpop.f32.mrb[68].mxu1 }
 0x393   : > { %v14324_v7 = vpop.f32.mrb[69].mxu1 }
 0x394   : > { %v14325_v21 = vadd.f32 %v14324_v7, %v14323_v29  ;;  %v14326_v61 = vpop.f32.mrb[70].mxu1 }
 0x395   : > { %v14327_v55 = vpop.f32.mrb[71].mxu1 }
 0x396   : > { %v20000_v20 = vadd.f32 %v14325_v21, %v19784_v35  ;;  %v14328_v53 = vadd.f32 %v14327_v55, %v14326_v61 }
 0x398   : > { %v20003_v5 = vadd.f32 %v14328_v53, %v19801_v50  ;;  %14837 = vmatmul.mubr.bf16.gmra.mrb[164].mxu1 %v15359_v47  ;;  %v15364_v47 = vld [vmem:[%s23255_s4 + $0x1a0] ss:$28 sps:$4 sm:$0xff]  }
 0x399   : > { %14840 = vmatprep.mubr.msk.bf16.mxu1 %vm16056_vm5, %v23307_v4 }
 0x39a   : > { %v14329_v13 = vpop.f32.mrb[72].mxu1 }
 0x39b   : > { %v14330_v31 = vpop.f32.mrb[73].mxu1 }
 0x39c   : > { %v14331_v34 = vadd.f32 %v14330_v31, %v14329_v13  ;;  %v14332_v14 = vpop.f32.mrb[74].mxu1 }
 0x39d   : > { %v14333_v49 = vpop.f32.mrb[75].mxu1 }
 0x39e   : > { %v20011_v35 = vadd.f32 %v14331_v34, %v19824_v38  ;;  %v14334_v30 = vadd.f32 %v14333_v49, %v14332_v14 }
 0x3a0   : > { %v20014_v50 = vadd.f32 %v14334_v30, %v19833_v48  ;;  %14841 = vmatmul.mubr.bf16.gmra.mrb[168].mxu1 %v15360_v42  ;;  %v15365_v42 = vld [vmem:[%s23255_s4 + $0x1d8] ss:$28 sps:$4 sm:$0xff]  }
 0x3a1   : > { %14844 = vmatprep.mubr.msk.bf16.mxu1 %vm16056_vm5, %v23307_v4 }
 0x3a2   : > { %v14335_v56 = vpop.f32.mrb[76].mxu1 }
 0x3a3   : > { %v14336_v0 = vpop.f32.mrb[77].mxu1 }
 0x3a4   : > { %v14337_v63 = vadd.f32 %v14336_v0, %v14335_v56  ;;  %v14338_v26 = vpop.f32.mrb[78].mxu1 }
 0x3a5   : > { %v14339_v45 = vpop.f32.mrb[79].mxu1 }
 0x3a6   : > { %v20022_v38 = vadd.f32 %v14337_v63, %v19836_v25  ;;  %v14340_v39 = vadd.f32 %v14339_v45, %v14338_v26 }
 0x3a8   : > { %v20025_v48 = vadd.f32 %v14340_v39, %v19845_v54  ;;  %14845 = vmatmul.mubr.bf16.gmra.mrb[172].mxu1 %v15361_v46  ;;  %v15366_v46 = vld [vmem:[%s23255_s4 + $0x210] ss:$28 sps:$4 sm:$0xff]  }
 0x3a9   : > { %14848 = vmatprep.mubr.msk.bf16.mxu1 %vm16056_vm5, %v23307_v4 }
 0x3aa   : > { %v14341_v23 = vpop.f32.mrb[80].mxu1 }
 0x3ab   : > { %v14342_v52 = vpop.f32.mrb[81].mxu1 }
 0x3ac   : > { %v14343_v41 = vadd.f32 %v14342_v52, %v14341_v23  ;;  %v14344_v1 = vpop.f32.mrb[82].mxu1 }
 0x3ad   : > { %v14345_v62 = vpop.f32.mrb[83].mxu1 }
 0x3ae   : > { %v20033_v25 = vadd.f32 %v14343_v41, %v19860_v9  ;;  %v14346_v28 = vadd.f32 %v14345_v62, %v14344_v1  ;;  %v15367_v1 = vld [vmem:[%s23255_s4 + $0x248] ss:$28 sps:$4 sm:$0xff]  }
 0x3b0   : > { %v20036_v54 = vadd.f32 %v14346_v28, %v19866_v24  ;;  %14849 = vmatmul.mubr.bf16.gmra.mrb[176].mxu1 %v15362_v2  ;;  %v15369_v28 = vld [vmem:[%s23255_s4 + $0x2b8] ss:$0 sps:$4 sm:$0x33]  }
 0x3b1   : > { %14852 = vmatprep.mubr.msk.bf16.mxu1 %vm16056_vm5, %v23307_v4 }
 0x3b2   : > { %v14347_v43 = vpop.f32.mrb[84].mxu1 }
 0x3b3   : > { %v14348_v3 = vpop.f32.mrb[85].mxu1 }
 0x3b4   : > { %v14349_v17 = vadd.f32 %v14348_v3, %v14347_v43  ;;  %v14350_v10 = vpop.f32.mrb[86].mxu1 }
 0x3b5   : > { %v14351_v8 = vpop.f32.mrb[87].mxu1 }
 0x3b6   : > { %v20044_v9 = vadd.f32 %v14349_v17, %v19882_v44  ;;  %v14352_v12 = vadd.f32 %v14351_v8, %v14350_v10 }
 0x3b8   : > { %v20047_v24 = vadd.f32 %v14352_v12, %v19893_v33  ;;  %14853 = vmatmul.mubr.bf16.gmra.mrb[180].mxu1 %v15363_v58 }
 0x3b9   : > { %14856 = vmatprep.mubr.msk.bf16.mxu1 %vm16056_vm5, %v23307_v4 }
 0x3ba   : > { %v14353_v29 = vpop.f32.mrb[88].mxu1 }
 0x3bb   : > { %v14354_v7 = vpop.f32.mrb[89].mxu1 }
 0x3bc   : > { %v14355_v21 = vadd.f32 %v14354_v7, %v14353_v29  ;;  %v14356_v61 = vpop.f32.mrb[90].mxu1 }
 0x3bd   : > { %v14357_v55 = vpop.f32.mrb[91].mxu1 }
 0x3be   : > { %v20055_v44 = vadd.f32 %v14355_v21, %v19895_v57  ;;  %v14358_v53 = vadd.f32 %v14357_v55, %v14356_v61 }
 0x3c0   : > { %v20058_v33 = vadd.f32 %v14358_v53, %v19905_v60  ;;  %14857 = vmatmul.mubr.bf16.gmra.mrb[184].mxu1 %v15364_v47 }
 0x3c1   : > { %14860 = vmatprep.mubr.msk.bf16.mxu1 %vm16056_vm5, %v23307_v4 }
 0x3c2   : > { %v14359_v13 = vpop.f32.mrb[92].mxu1 }
 0x3c3   : > { %v14360_v31 = vpop.f32.mrb[93].mxu1 }
 0x3c4   : > { %v14361_v34 = vadd.f32 %v14360_v31, %v14359_v13  ;;  %v14362_v14 = vpop.f32.mrb[94].mxu1 }
 0x3c5   : > { %v14363_v49 = vpop.f32.mrb[95].mxu1 }
 0x3c6   : > { %v20066_v57 = vadd.f32 %v14361_v34, %v19922_v36  ;;  %v14364_v30 = vadd.f32 %v14363_v49, %v14362_v14 }
 0x3c8   : > { %v20069_v60 = vadd.f32 %v14364_v30, %v19931_v22  ;;  %14861 = vmatmul.mubr.bf16.gmra.mrb[188].mxu1 %v15365_v42 }
 0x3c9   : > { %14864 = vmatprep.mubr.msk.bf16.mxu1 %vm16056_vm5, %v23307_v4 }
 0x3ca   : > { %v14365_v56 = vpop.f32.mrb[96].mxu1 }
 0x3cb   : > { %v14366_v0 = vpop.f32.mrb[97].mxu1 }
 0x3cc   : > { %v14367_v63 = vadd.f32 %v14366_v0, %v14365_v56  ;;  %v14368_v26 = vpop.f32.mrb[98].mxu1 }
 0x3cd   : > { %v14369_v45 = vpop.f32.mrb[99].mxu1 }
 0x3ce   : > { %v20077_v36 = vadd.f32 %v14367_v63, %v19934_v59  ;;  %v14370_v39 = vadd.f32 %v14369_v45, %v14368_v26 }
 0x3d0   : > { %v20080_v22 = vadd.f32 %v14370_v39, %v19940_v32  ;;  %14865 = vmatmul.mubr.bf16.gmra.mrb[192].mxu1 %v15366_v46  ;;  %v15368_v32 = vld [vmem:[%s23255_s4 + $0x280] ss:$28 sps:$4 sm:$0xff]  }
 0x3d1   : > { %14868 = vmatprep.mubr.msk.bf16.mxu1 %vm16056_vm5, %v23307_v4 }
 0x3d2   : > { %v14371_v23 = vpop.f32.mrb[100].mxu1 }
 0x3d3   : > { %v14372_v52 = vpop.f32.mrb[101].mxu1 }
 0x3d4   : > { %v14373_v41 = vadd.f32 %v14372_v52, %v14371_v23  ;;  %v14374_v2 = vpop.f32.mrb[102].mxu1 }
 0x3d5   : > { %v14375_v62 = vpop.f32.mrb[103].mxu1 }
 0x3d6   : > { %v20088_v59 = vadd.f32 %v14373_v41, %v19946_v15 }
 0x3d8   : > { %14869 = vmatmul.mubr.bf16.gmra.mrb[196].mxu1 %v15367_v1 }
 0x3d9   : > { %14872 = vmatprep.mubr.msk.bf16.mxu1 %vm16056_vm5, %v23307_v4 }
 0x3e0   : > { %14873 = vmatmul.mubr.bf16.gmra.mrb[200].mxu1 %v15368_v32 }
 0x3e1   : > { %14876 = vmatprep.mubr.msk.bf16.mxu1 %vm16056_vm5, %v23307_v4 }
 0x3e8   : > { %14877 = vmatmul.mubr.bf16.gmra.mrb[204].mxu1 %v15369_v28 }
 0x3f2   : > { %v14393_v43 = vpop.f32.mrb[104].mxu1 }
 0x3f3   : > { %v14394_v15 = vpop.f32.mrb[105].mxu1 }
 0x3f4   : > { %v14395_v3 = vadd.f32 %v14394_v15, %v14393_v43  ;;  %v14396_v17 = vpop.f32.mrb[106].mxu1 }
 0x3f5   : > { %v14397_v10 = vpop.f32.mrb[107].mxu1 }
 0x3f6   : > { %v14398_v58 = vadd.f32 %v14397_v10, %v14396_v17  ;;  %v20101_v8 = vadd.f32 %v14395_v3, %v19961_v19 }
 0x3f8   : > { %v20104_v12 = vadd.f32 %v14398_v58, %v19964_v51 }
 0x3fa   : > { %v14399_v29 = vpop.f32.mrb[108].mxu1 }
 0x3fb   : > { %v14400_v7 = vpop.f32.mrb[109].mxu1 }
 0x3fc   : > { %v14401_v21 = vadd.f32 %v14400_v7, %v14399_v29  ;;  %v14402_v61 = vpop.f32.mrb[110].mxu1 }
 0x3fd   : > { %v14403_v47 = vpop.f32.mrb[111].mxu1 }
 0x3fe   : > { %v14404_v55 = vadd.f32 %v14403_v47, %v14402_v61  ;;  %v20107_v53 = vadd.f32 %v14401_v21, %v19967_v16 }
 0x400   : > { %v20110_v13 = vadd.f32 %v14404_v55, %v19970_v6 }
 0x402   : > { %v14405_v31 = vpop.f32.mrb[112].mxu1 }
 0x403   : > { %v14406_v34 = vpop.f32.mrb[113].mxu1 }
 0x404   : > { %v14407_v14 = vadd.f32 %v14406_v34, %v14405_v31  ;;  %v14408_v19 = vpop.f32.mrb[114].mxu1 }
 0x405   : > { %v14409_v42 = vpop.f32.mrb[115].mxu1 }
 0x406   : > { %v14410_v49 = vadd.f32 %v14409_v42, %v14408_v19  ;;  %v20113_v51 = vadd.f32 %v14407_v14, %v19978_v37 }
 0x408   : > { %v20116_v30 = vadd.f32 %v14410_v49, %v19981_v11 }
 0x40a   : > { %v14411_v56 = vpop.f32.mrb[116].mxu1 }
 0x40b   : > { %v14412_v0 = vpop.f32.mrb[117].mxu1 }
 0x40c   : > { %v14413_v63 = vadd.f32 %v14412_v0, %v14411_v56  ;;  %v14414_v16 = vpop.f32.mrb[118].mxu1 }
 0x40d   : > { %v14415_v26 = vpop.f32.mrb[119].mxu1 }
 0x40e   : > { %v14416_v46 = vadd.f32 %v14415_v26, %v14414_v16  ;;  %v20119_v6 = vadd.f32 %v14413_v63, %v19989_v40 }
 0x410   : > { %v20122_v45 = vadd.f32 %v14416_v46, %v19992_v27 }
 0x412   : > { %v14417_v39 = vpop.f32.mrb[120].mxu1 }
 0x413   : > { %v14418_v23 = vpop.f32.mrb[121].mxu1 }
 0x414   : > { %v14419_v52 = vadd.f32 %v14418_v23, %v14417_v39  ;;  %v14420_v37 = vpop.f32.mrb[122].mxu1 }
 0x415   : > { %v14421_v41 = vpop.f32.mrb[123].mxu1 }
 0x416   : > { %v14422_v1 = vadd.f32 %v14421_v41, %v14420_v37  ;;  %v20125_v11 = vadd.f32 %v14419_v52, %v20000_v20 }
 0x418   : > { %v20128_v2 = vadd.f32 %v14422_v1, %v20003_v5 }
 0x41a   : > { %v14423_v62 = vpop.f32.mrb[124].mxu1 }
 0x41b   : > { %v14424_v32 = vpop.f32.mrb[125].mxu1 }
 0x41c   : > { %v14425_v28 = vadd.f32 %v14424_v32, %v14423_v62  ;;  %v14426_v40 = vpop.f32.mrb[126].mxu1 }
 0x41d   : > { %v14427_v43 = vpop.f32.mrb[127].mxu1 }
 0x41e   : > { %v14428_v15 = vadd.f32 %v14427_v43, %v14426_v40  ;;  %v20131_v27 = vadd.f32 %v14425_v28, %v20011_v35 }
 0x420   : > { %v20134_v3 = vadd.f32 %v14428_v15, %v20014_v50 }
 0x422   : > { %v14429_v17 = vpop.f32.mrb[128].mxu1 }
 0x423   : > { %v14430_v10 = vpop.f32.mrb[129].mxu1 }
 0x424   : > { %v14431_v58 = vadd.f32 %v14430_v10, %v14429_v17  ;;  %v14432_v20 = vpop.f32.mrb[130].mxu1 }
 0x425   : > { %v14433_v29 = vpop.f32.mrb[131].mxu1 }
 0x426   : > { %v14434_v7 = vadd.f32 %v14433_v29, %v14432_v20  ;;  %v20137_v5 = vadd.f32 %v14431_v58, %v20022_v38 }
 0x428   : > { %v20140_v21 = vadd.f32 %v14434_v7, %v20025_v48 }
 0x42a   : > { %v14435_v61 = vpop.f32.mrb[132].mxu1 }
 0x42b   : > { %v14436_v47 = vpop.f32.mrb[133].mxu1 }
 0x42c   : > { %v14437_v55 = vadd.f32 %v14436_v47, %v14435_v61  ;;  %v14438_v35 = vpop.f32.mrb[134].mxu1 }
 0x42d   : > { %v14439_v31 = vpop.f32.mrb[135].mxu1 }
 0x42e   : > { %v14440_v34 = vadd.f32 %v14439_v31, %v14438_v35  ;;  %v20143_v50 = vadd.f32 %v14437_v55, %v20033_v25 }
 0x430   : > { %v20146_v14 = vadd.f32 %v14440_v34, %v20036_v54 }
 0x433   : > { %v14441_v19 = vpop.f32.mrb[136].mxu1 }
 0x434   : > { %v14442_v42 = vpop.f32.mrb[137].mxu1 }
 0x435   : > { %v14443_v49 = vadd.f32 %v14442_v42, %v14441_v19  ;;  %v14444_v38 = vpop.f32.mrb[138].mxu1 }
 0x436   : > { %v14445_v56 = vpop.f32.mrb[139].mxu1 }
 0x437   : > { %v14446_v0 = vadd.f32 %v14445_v56, %v14444_v38  ;;  %v20149_v48 = vadd.f32 %v14443_v49, %v20044_v9  ;;  %v15372_v9 = vld [vmem:[%s23256_s5 + $0x4] ss:$8 sps:$4 sm:$0xff]  }
 0x438   : > { %13268 = vmatprep.mubr.msk.bf16.mxu1 %vm5922_vm6, %v15372_v9 }
 0x439   : > { %v20152_v63 = vadd.f32 %v14446_v0, %v20047_v24  ;;  %v15375_v24 = vld [vmem:[%s23256_s5 + $0xcc] ss:$8 sps:$4 sm:$0xff]  }
 0x43a   : > { %13332 = vmatprep.mubr.msk.bf16.mxu0 %vm5922_vm6, %v15375_v24 }
 0x43b   : > { %v14447_v16 = vpop.f32.mrb[140].mxu1 }
 0x43c   : > { %v14448_v26 = vpop.f32.mrb[141].mxu1 }
 0x43d   : > { %v14449_v46 = vadd.f32 %v14448_v26, %v14447_v16  ;;  %v14450_v25 = vpop.f32.mrb[142].mxu1 }
 0x43e   : > { %v14451_v39 = vpop.f32.mrb[143].mxu1 }
 0x43f   : > { %v14452_v23 = vadd.f32 %v14451_v39, %v14450_v25  ;;  %v20155_v54 = vadd.f32 %v14449_v46, %v20055_v44 }
 0x441   : > { %v20158_v52 = vadd.f32 %v14452_v23, %v20058_v33 }
 0x443   : > { %v14453_v37 = vpop.f32.mrb[144].mxu1 }
 0x444   : > { %v14454_v41 = vpop.f32.mrb[145].mxu1 }
 0x445   : > { %v14455_v44 = vadd.f32 %v14454_v41, %v14453_v37  ;;  %v14456_v1 = vpop.f32.mrb[146].mxu1 }
 0x446   : > { %v14457_v62 = vpop.f32.mrb[147].mxu1 }
 0x447   : > { %v14458_v33 = vadd.f32 %v14457_v62, %v14456_v1  ;;  %v20169_v32 = vadd.f32 %v14455_v44, %v20066_v57 }
 0x449   : > { %v20172_v28 = vadd.f32 %v14458_v33, %v20069_v60 }
 0x44b   : > { %v14459_v40 = vpop.f32.mrb[148].mxu1 }
 0x44c   : > { %v14460_v43 = vpop.f32.mrb[149].mxu1 }
 0x44d   : > { %v14461_v15 = vadd.f32 %v14460_v43, %v14459_v40  ;;  %v14462_v17 = vpop.f32.mrb[150].mxu1 }
 0x44e   : > { %v14463_v10 = vpop.f32.mrb[151].mxu1 }
 0x44f   : > { %v14464_v58 = vadd.f32 %v14463_v10, %v14462_v17  ;;  %v20175_v20 = vadd.f32 %v14461_v15, %v20077_v36 }
 0x451   : > { %v20178_v29 = vadd.f32 %v14464_v58, %v20080_v22 }
 0x453   : > { %v14465_v7 = vpop.f32.mrb[152].mxu1 }
 0x454   : > { %v14466_v61 = vpop.f32.mrb[153].mxu1 }
 0x455   : > { %v14467_v47 = vadd.f32 %v14466_v61, %v14465_v7  ;;  %v14468_v57 = vpop.f32.mrb[154].mxu1 }
 0x456   : > { %v14469_v55 = vpop.f32.mrb[155].mxu1 }
 0x457   : > { %v20181_v60 = vadd.f32 %v14467_v47, %v20088_v59 }
 0x45b   : > { %v5668_v35 = vpop.f32.mrb[156].mxu1 }
 0x45c   : > { %v5669_v31 = vadd.f32 %v5668_v35, %v20101_v8  ;;  %v14830_v34 = vpop.f32.mrb[157].mxu1 }
 0x45d   : > { %v5671_v19 = vpop.f32.mrb[158].mxu1 }
 0x45e   : > { %v5672_v42 = vadd.f32 %v5671_v19, %v20104_v12  ;;  %v14831_v36 = vpop.f32.mrb[159].mxu1 }
 0x460   : > { %v20185_v49 = vpack.c.bf16 %v5672_v42, %v5669_v31 }
 0x462   : > { %5967 = vmatpush1.bf16.msra.mxu1 %v20185_v49  ;;  %6295 = vmatpush1.bf16.msra.mxu0 %v20185_v49 }
 0x463   : > { %v5676_v22 = vpop.f32.mrb[160].mxu1  ;;  %5968 = vmatprep.subr.bf16.mxu1 %v23443_v18  ;;  %6296 = vmatprep.subr.bf16.mxu0 %v23443_v18 }
 0x464   : > { %v5677_v59 = vadd.f32 %v5676_v22, %v20107_v53  ;;  %v14834_v38 = vpop.f32.mrb[161].mxu1 }
 0x465   : > { %v5679_v8 = vpop.f32.mrb[162].mxu1 }
 0x466   : > { %v5680_v56 = vadd.f32 %v5679_v8, %v20110_v13  ;;  %v14835_v0 = vpop.f32.mrb[163].mxu1 }
 0x468   : > { %v20193_v12 = vpack.c.bf16 %v5680_v56, %v5677_v59 }
 0x46a   : > { %5969 = vmatpush1.bf16.msra.mxu1 %v20193_v12  ;;  %6297 = vmatpush1.bf16.msra.mxu0 %v20193_v12 }
 0x46b   : > { %v5684_v16 = vpop.f32.mrb[164].mxu1  ;;  %5970 = vmatprep.subr.bf16.mxu1 %v23443_v18  ;;  %6298 = vmatprep.subr.bf16.mxu0 %v23443_v18 }
 0x46c   : > { %v5685_v26 = vadd.f32 %v5684_v16, %v20113_v51  ;;  %v14838_v46 = vpop.f32.mrb[165].mxu1 }
 0x46d   : > { %v5687_v53 = vpop.f32.mrb[166].mxu1 }
 0x46e   : > { %v5688_v25 = vadd.f32 %v5687_v53, %v20116_v30  ;;  %v14839_v39 = vpop.f32.mrb[167].mxu1 }
 0x470   : > { %v20201_v13 = vpack.c.bf16 %v5688_v25, %v5685_v26 }
 0x472   : > { %5971 = vmatpush1.bf16.msra.mxu1 %v20201_v13  ;;  %6299 = vmatpush1.bf16.msra.mxu0 %v20201_v13 }
 0x473   : > { %v5692_v23 = vpop.f32.mrb[168].mxu1  ;;  %5972 = vmatprep.subr.bf16.mxu1 %v23443_v18  ;;  %6300 = vmatprep.subr.bf16.mxu0 %v23443_v18 }
 0x474   : > { %v5693_v9 = vadd.f32 %v5692_v23, %v20119_v6  ;;  %v14842_v24 = vpop.f32.mrb[169].mxu1 }
 0x475   : > { %v5695_v51 = vpop.f32.mrb[170].mxu1 }
 0x476   : > { %v5696_v37 = vadd.f32 %v5695_v51, %v20122_v45  ;;  %v14843_v41 = vpop.f32.mrb[171].mxu1 }
 0x478   : > { %v20209_v30 = vpack.c.bf16 %v5696_v37, %v5693_v9 }
 0x47a   : > { %5973 = vmatpush1.bf16.msra.mxu1 %v20209_v30  ;;  %6301 = vmatpush1.bf16.msra.mxu0 %v20209_v30 }
 0x47b   : > { %v5700_v44 = vpop.f32.mrb[172].mxu1  ;;  %5974 = vmatprep.subr.bf16.mxu1 %v23443_v18  ;;  %6302 = vmatprep.subr.bf16.mxu0 %v23443_v18 }
 0x47c   : > { %v5701_v1 = vadd.f32 %v5700_v44, %v20125_v11  ;;  %v14846_v62 = vpop.f32.mrb[173].mxu1 }
 0x47d   : > { %v5703_v6 = vpop.f32.mrb[174].mxu1 }
 0x47e   : > { %v5704_v33 = vadd.f32 %v5703_v6, %v20128_v2  ;;  %v14847_v40 = vpop.f32.mrb[175].mxu1 }
 0x480   : > { %v20217_v45 = vpack.c.bf16 %v5704_v33, %v5701_v1 }
 0x482   : > { %5975 = vmatpush1.bf16.msra.mxu1 %v20217_v45  ;;  %6303 = vmatpush1.bf16.msra.mxu0 %v20217_v45 }
 0x483   : > { %v5708_v43 = vpop.f32.mrb[176].mxu1  ;;  %5976 = vmatprep.subr.bf16.mxu1 %v23443_v18  ;;  %6304 = vmatprep.subr.bf16.mxu0 %v23443_v18 }
 0x484   : > { %v5709_v15 = vadd.f32 %v5708_v43, %v20131_v27  ;;  %v14850_v17 = vpop.f32.mrb[177].mxu1  ;;  %v15370_v43 = vld [vmem:[%s23256_s5] ss:$8 sps:$4 sm:$0xff]  }
 0x485   : > { %v5711_v11 = vpop.f32.mrb[178].mxu1  ;;  %v15378_v17 = vld [vmem:[%s23256_s5 + $0xdc] ss:$8 sps:$4 sm:$0xff]  }
 0x486   : > { %v5712_v10 = vadd.f32 %v5711_v11, %v20134_v3  ;;  %v14851_v58 = vpop.f32.mrb[179].mxu1  ;;  %v15380_v11 = vld [vmem:[%s23256_s5 + $0x10] ss:$8 sps:$4 sm:$0xff]  }
 0x487   : > { %v15382_v58 = vld [vmem:[%s23256_s5 + $0x24] ss:$8 sps:$4 sm:$0xff]  }
 0x488   : > { %v20225_v2 = vpack.c.bf16 %v5712_v10, %v5709_v15  ;;  %v15373_v15 = vld [vmem:[%s23256_s5 + $0xc8] ss:$8 sps:$4 sm:$0xff]   ;;  %v15381_v10 = vld [vmem:[%s23256_s5 + $0xd8] ss:$8 sps:$4 sm:$0xff]  }
 0x48a   : > { %5977 = vmatpush1.bf16.msra.mxu1 %v20225_v2  ;;  %6305 = vmatpush1.bf16.msra.mxu0 %v20225_v2 }
 0x48b   : > { %v5716_v7 = vpop.f32.mrb[180].mxu1  ;;  %5978 = vmatprep.subr.bf16.mxu1 %v23443_v18  ;;  %6306 = vmatprep.subr.bf16.mxu0 %v23443_v18 }
 0x48c   : > { %v5717_v61 = vadd.f32 %v5716_v7, %v20137_v5  ;;  %v14854_v47 = vpop.f32.mrb[181].mxu1  ;;  %v15384_v7 = vld [vmem:[%s23256_s5 + $0xec] ss:$8 sps:$4 sm:$0xff]  }
 0x48d   : > { %v5719_v27 = vpop.f32.mrb[182].mxu1  ;;  %v15387_v47 = vld [vmem:[%s23256_s5 + $0xe8] ss:$8 sps:$4 sm:$0xff]  }
 0x48e   : > { %v5720_v57 = vadd.f32 %v5719_v27, %v20140_v21  ;;  %v14855_v55 = vpop.f32.mrb[183].mxu1  ;;  %v15388_v27 = vld [vmem:[%s23256_s5 + $0x34] ss:$8 sps:$4 sm:$0xff]  }
 0x48f   : > { %v15392_v55 = vld [vmem:[%s23256_s5 + $0x30] ss:$8 sps:$4 sm:$0xff]  }
 0x490   : > { %v20233_v3 = vpack.c.bf16 %v5720_v57, %v5717_v61  ;;  %v15386_v61 = vld [vmem:[%s23256_s5 + $0x20] ss:$8 sps:$4 sm:$0xff]   ;;  %v15390_v57 = vld [vmem:[%s23256_s5 + $0xfc] ss:$8 sps:$4 sm:$0xff]  }
 0x492   : > { %5979 = vmatpush1.bf16.msra.mxu1 %v20233_v3  ;;  %6307 = vmatpush1.bf16.msra.mxu0 %v20233_v3 }
 0x493   : > { %v5724_v35 = vpop.f32.mrb[184].mxu1  ;;  %5980 = vmatprep.subr.bf16.mxu1 %v23443_v18  ;;  %6308 = vmatprep.subr.bf16.mxu0 %v23443_v18 }
 0x494   : > { %v5725_v31 = vadd.f32 %v5724_v35, %v20143_v50  ;;  %v14858_v34 = vpop.f32.mrb[185].mxu1  ;;  %v15393_v35 = vld [vmem:[%s23256_s5 + $0xf8] ss:$8 sps:$4 sm:$0xff]  }
 0x495   : > { %v5727_v5 = vpop.f32.mrb[186].mxu1  ;;  %v15396_v34 = vld [vmem:[%s23256_s5 + $0x10c] ss:$8 sps:$4 sm:$0xff]  }
 0x496   : > { %v5728_v19 = vadd.f32 %v5727_v5, %v20146_v14  ;;  %v14859_v42 = vpop.f32.mrb[187].mxu1  ;;  %v15398_v5 = vld [vmem:[%s23256_s5 + $0x40] ss:$8 sps:$4 sm:$0xff]  }
 0x497   : > { %v15400_v42 = vld [vmem:[%s23256_s5 + $0x54] ss:$8 sps:$4 sm:$0xff]  }
 0x498   : > { %v20241_v21 = vpack.c.bf16 %v5728_v19, %v5725_v31  ;;  %v15394_v31 = vld [vmem:[%s23256_s5 + $0x44] ss:$8 sps:$4 sm:$0xff]   ;;  %v15399_v19 = vld [vmem:[%s23256_s5 + $0x108] ss:$8 sps:$4 sm:$0xff]  }
 0x49a   : > { %5981 = vmatpush1.bf16.msra.mxu1 %v20241_v21  ;;  %6309 = vmatpush1.bf16.msra.mxu0 %v20241_v21 }
 0x49b   : > { %v5732_v36 = vpop.f32.mrb[188].mxu1  ;;  %5982 = vmatprep.subr.bf16.mxu1 %v23443_v18  ;;  %6310 = vmatprep.subr.bf16.mxu0 %v23443_v18 }
 0x49c   : > { %v5733_v22 = vadd.f32 %v5732_v36, %v20149_v48  ;;  %v14862_v59 = vpop.f32.mrb[189].mxu1  ;;  %v15402_v36 = vld [vmem:[%s23256_s5 + $0x11c] ss:$8 sps:$4 sm:$0xff]  }
 0x49d   : > { %v5735_v50 = vpop.f32.mrb[190].mxu1  ;;  %v15405_v59 = vld [vmem:[%s23256_s5 + $0x118] ss:$8 sps:$4 sm:$0xff]  }
 0x49e   : > { %v5736_v38 = vadd.f32 %v5735_v50, %v20152_v63  ;;  %v14863_v8 = vpop.f32.mrb[191].mxu1  ;;  %v15406_v50 = vld [vmem:[%s23256_s5 + $0x64] ss:$8 sps:$4 sm:$0xff]  }
 0x49f   : > { %v15410_v8 = vld [vmem:[%s23256_s5 + $0x60] ss:$8 sps:$4 sm:$0xff]  }
 0x4a0   : > { %v20249_v14 = vpack.c.bf16 %v5736_v38, %v5733_v22  ;;  %v15404_v22 = vld [vmem:[%s23256_s5 + $0x50] ss:$8 sps:$4 sm:$0xff]   ;;  %v15408_v38 = vld [vmem:[%s23256_s5 + $0x12c] ss:$8 sps:$4 sm:$0xff]  }
 0x4a2   : > { %5983 = vmatpush1.bf16.msra.mxu1 %v20249_v14  ;;  %6311 = vmatpush1.bf16.msra.mxu0 %v20249_v14 }
 0x4a3   : > { %v5740_v56 = vpop.f32.mrb[192].mxu1  ;;  %5984 = vmatprep.subr.bf16.mxu1 %v23443_v18  ;;  %6312 = vmatprep.subr.bf16.mxu0 %v23443_v18 }
 0x4a4   : > { %v5741_v0 = vadd.f32 %v5740_v56, %v20155_v54  ;;  %v14866_v16 = vpop.f32.mrb[193].mxu1  ;;  %v15411_v56 = vld [vmem:[%s23256_s5 + $0x128] ss:$8 sps:$4 sm:$0xff]  }
 0x4a5   : > { %v5743_v48 = vpop.f32.mrb[194].mxu1  ;;  %v15414_v16 = vld [vmem:[%s23256_s5 + $0x13c] ss:$8 sps:$4 sm:$0xff]  }
 0x4a6   : > { %v5744_v26 = vadd.f32 %v5743_v48, %v20158_v52  ;;  %v14867_v46 = vpop.f32.mrb[195].mxu1  ;;  %v15416_v48 = vld [vmem:[%s23256_s5 + $0x70] ss:$8 sps:$4 sm:$0xff]  }
 0x4a7   : > { %v15418_v46 = vld [vmem:[%s23256_s5 + $0x84] ss:$8 sps:$4 sm:$0xff]  }
 0x4a8   : > { %v20257_v63 = vpack.c.bf16 %v5744_v26, %v5741_v0  ;;  %v15412_v0 = vld [vmem:[%s23256_s5 + $0x74] ss:$8 sps:$4 sm:$0xff]   ;;  %v15417_v26 = vld [vmem:[%s23256_s5 + $0x138] ss:$8 sps:$4 sm:$0xff]  }
 0x4aa   : > { %5985 = vmatpush1.bf16.msra.mxu1 %v20257_v63  ;;  %6313 = vmatpush1.bf16.msra.mxu0 %v20257_v63 }
 0x4ab   : > { %v5748_v53 = vpop.f32.mrb[196].mxu1  ;;  %5986 = vmatprep.subr.bf16.mxu1 %v23443_v18  ;;  %6314 = vmatprep.subr.bf16.mxu0 %v23443_v18 }
 0x4ac   : > { %v5749_v25 = vadd.f32 %v5748_v53, %v20169_v32  ;;  %v14870_v39 = vpop.f32.mrb[197].mxu1  ;;  %v15422_v53 = vld [vmem:[%s23256_s5 + $0x14c] ss:$8 sps:$4 sm:$0xff]  }
 0x4ad   : > { %v5751_v54 = vpop.f32.mrb[198].mxu1  ;;  %v15423_v39 = vld [vmem:[%s23256_s5 + $0x80] ss:$8 sps:$4 sm:$0xff]  }
 0x4ae   : > { %v5752_v23 = vadd.f32 %v5751_v54, %v20172_v28  ;;  %v14871_v9 = vpop.f32.mrb[199].mxu1  ;;  %v15424_v54 = vld [vmem:[%s23256_s5 + $0x94] ss:$8 sps:$4 sm:$0xff]  }
 0x4af   : > { %v15426_v9 = vld [vmem:[%s23256_s5 + $0x158] ss:$8 sps:$4 sm:$0xff]  }
 0x4b0   : > { %v20265_v52 = vpack.c.bf16 %v5752_v23, %v5749_v25  ;;  %v15420_v25 = vld [vmem:[%s23256_s5 + $0x148] ss:$8 sps:$4 sm:$0xff]   ;;  %v15428_v23 = vld [vmem:[%s23256_s5 + $0x15c] ss:$8 sps:$4 sm:$0xff]  }
 0x4b2   : > { %5987 = vmatpush1.bf16.msra.mxu1 %v20265_v52  ;;  %6315 = vmatpush1.bf16.msra.mxu0 %v20265_v52 }
 0x4b3   : > { %v5756_v24 = vpop.f32.mrb[200].mxu1  ;;  %5988 = vmatprep.subr.bf16.mxu1 %v23443_v18  ;;  %6316 = vmatprep.subr.bf16.mxu0 %v23443_v18 }
 0x4b4   : > { %v5757_v51 = vadd.f32 %v5756_v24, %v20175_v20  ;;  %v14874_v37 = vpop.f32.mrb[201].mxu1  ;;  %v15429_v24 = vld [vmem:[%s23256_s5 + $0x90] ss:$8 sps:$4 sm:$0xff]  }
 0x4b5   : > { %v5759_v32 = vpop.f32.mrb[202].mxu1  ;;  %v15434_v37 = vld [vmem:[%s23256_s5 + $0x16c] ss:$8 sps:$4 sm:$0xff]  }
 0x4b6   : > { %v5760_v41 = vadd.f32 %v5759_v32, %v20178_v29  ;;  %v14875_v44 = vpop.f32.mrb[203].mxu1  ;;  %v15432_v32 = vld [vmem:[%s23256_s5 + $0x168] ss:$8 sps:$4 sm:$0xff]  }
 0x4b7   : > { %v15436_v44 = vld [vmem:[%s23256_s5 + $0xb4] ss:$8 sps:$4 sm:$0xff]  }
 0x4b8   : > { %v20273_v28 = vpack.c.bf16 %v5760_v41, %v5757_v51  ;;  %v15430_v51 = vld [vmem:[%s23256_s5 + $0xa4] ss:$8 sps:$4 sm:$0xff]   ;;  %v15435_v41 = vld [vmem:[%s23256_s5 + $0xa0] ss:$8 sps:$4 sm:$0xff]  }
 0x4ba   : > { %5989 = vmatpush1.bf16.msra.mxu1 %v20273_v28  ;;  %6317 = vmatpush1.bf16.msra.mxu0 %v20273_v28 }
 0x4bb   : > { %v5764_v1 = vpop.f32.mrb[204].mxu1  ;;  %5990 = vmatprep.subr.bf16.mxu1 %v23443_v18  ;;  %6318 = vmatprep.subr.bf16.mxu0 %v23443_v18 }
 0x4bc   : > { %v5765_v62 = vadd.f32 %v5764_v1, %v20181_v60  ;;  %v14878_v6 = vpop.f32.mrb[205].mxu1  ;;  %v15376_v60 = vld [vmem:[%s23256_s5 + $0x14] ss:$8 sps:$4 sm:$0xff]  }
 0x4bd   : > { %v5767_v20 = vpop.f32.mrb[206].mxu1  ;;  %v15440_v1 = vld [vmem:[%s23256_s5 + $0x17c] ss:$8 sps:$4 sm:$0xff]   ;;  %v13305_v6 = vld [vmem:[%s23256_s5 + $0x188] sm:$0x33] }
 0x4be   : > { %v5782_v33 = vpack.c.bf16 %v5765_v62, %v5765_v62  ;;  %v14879_v40 = vpop.f32.mrb[207].mxu1  ;;  %v5807_v62 = vld [vmem:[%s23256_s5 + $0xc0] sm:$0x33] }
 0x4bf   : > { %v15438_v20 = vld [vmem:[%s23256_s5 + $0x178] ss:$8 sps:$4 sm:$0xff]   ;;  %v13267_v40 = vcombine.high %v5807_v62, %v5807_v62 }
 0x4c0   : > { %v20281_v29 = vsel %vm5962_vm7, %v5782_v33, 0  ;;  %v15441_v33 = vld [vmem:[%s23256_s5 + $0xb0] ss:$8 sps:$4 sm:$0xff]  }
 0x4c1   : > { %5991 = vmatpush1.bf16.msra.mxu1 %v20281_v29  ;;  %6319 = vmatpush1.bf16.msra.mxu0 %v20281_v29 }
 0x4c2   : > { %6622 = vmatprep.subr.bf16.mxu1 %v23443_v18  ;;  %6950 = vmatprep.subr.bf16.mxu0 %v23443_v18 }
 0x4c4   : > { %5999 = vmatmul.mubr.bf16.vlgmr.msra.gmra.mrb[208].mxu1 %v15370_v43  ;;  %6327 = vmatmul.mubr.bf16.vlgmr.msra.gmra.mrb[224].mxu0 %v15373_v15  ;;  %v13331_v43 = vcombine.high %v13305_v6, %v13305_v6  ;;  %v13266_v15 = vcombine.low %v5807_v62, %v5807_v62  ;;  %v15511_v62 = vld [vmem:[%s23256_s5 + $0x2fc] ss:$8 sps:$4 sm:$0xff]  }
 0x4c5   : > { %6623 = vmatpush1.bf16.msra.mxu1 %v20185_v49  ;;  %6951 = vmatpush1.bf16.msra.mxu0 %v20185_v49 }
 0x4c6   : > { %6624 = vmatprep.subr.bf16.mxu1 %v23443_v18  ;;  %6952 = vmatprep.subr.bf16.mxu0 %v23443_v18 }
 0x4c7   : > { %13269 = vmatprep.mubr.msk.bf16.mxu1 %vm5922_vm6, %v15376_v60  ;;  %13333 = vmatprep.mubr.msk.bf16.mxu0 %vm5922_vm6, %v15378_v17  ;;  %v13330_v60 = vcombine.low %v13305_v6, %v13305_v6  ;;  %v15448_v17 = vld [vmem:[%s23256_s5 + $0x194] ss:$8 sps:$4 sm:$0xff]   ;;  %v15506_v6 = vld [vmem:[%s23256_s5 + $0x230] ss:$8 sps:$4 sm:$0xff]  }
 0x4c9   : > { %6625 = vmatpush1.bf16.msra.mxu1 %v20193_v12  ;;  %6953 = vmatpush1.bf16.msra.mxu0 %v20193_v12 }
 0x4ca   : > { %6626 = vmatprep.subr.bf16.mxu1 %v23443_v18  ;;  %6954 = vmatprep.subr.bf16.mxu0 %v23443_v18 }
 0x4cc   : > { %6007 = vmatmul.mubr.bf16.gmra.mrb[212].mxu1 %v15380_v11  ;;  %6335 = vmatmul.mubr.bf16.gmra.mrb[228].mxu0 %v15381_v10  ;;  %v15451_v11 = vld [vmem:[%s23256_s5 + $0x25c] ss:$8 sps:$4 sm:$0xff]   ;;  %v15446_v10 = vld [vmem:[%s23256_s5 + $0x190] ss:$8 sps:$4 sm:$0xff]  }
 0x4cd   : > { %6627 = vmatpush1.bf16.msra.mxu1 %v20201_v13  ;;  %6955 = vmatpush1.bf16.msra.mxu0 %v20201_v13 }
 0x4ce   : > { %6628 = vmatprep.subr.bf16.mxu1 %v23443_v18  ;;  %6956 = vmatprep.subr.bf16.mxu0 %v23443_v18 }
 0x4cf   : > { %13270 = vmatprep.mubr.msk.bf16.mxu1 %vm5922_vm6, %v15382_v58  ;;  %13334 = vmatprep.mubr.msk.bf16.mxu0 %vm5922_vm6, %v15384_v7  ;;  %v15449_v58 = vld [vmem:[%s23256_s5 + $0x258] ss:$8 sps:$4 sm:$0xff]   ;;  %v15454_v7 = vld [vmem:[%s23256_s5 + $0x1a4] ss:$8 sps:$4 sm:$0xff]  }
 0x4d1   : > { %6629 = vmatpush1.bf16.msra.mxu1 %v20209_v30  ;;  %6957 = vmatpush1.bf16.msra.mxu0 %v20209_v30 }
 0x4d2   : > { %6630 = vmatprep.subr.bf16.mxu1 %v23443_v18  ;;  %6958 = vmatprep.subr.bf16.mxu0 %v23443_v18 }
 0x4d4   : > { %6015 = vmatmul.mubr.bf16.gmra.mrb[216].mxu1 %v15386_v61  ;;  %6343 = vmatmul.mubr.bf16.gmra.mrb[232].mxu0 %v15387_v47  ;;  %v15457_v61 = vld [vmem:[%s23256_s5 + $0x26c] ss:$8 sps:$4 sm:$0xff]   ;;  %v15452_v47 = vld [vmem:[%s23256_s5 + $0x1a0] ss:$8 sps:$4 sm:$0xff]  }
 0x4d5   : > { %6631 = vmatpush1.bf16.msra.mxu1 %v20217_v45  ;;  %6959 = vmatpush1.bf16.msra.mxu0 %v20217_v45 }
 0x4d6   : > { %6632 = vmatprep.subr.bf16.mxu1 %v23443_v18  ;;  %6960 = vmatprep.subr.bf16.mxu0 %v23443_v18 }
 0x4d7   : > { %13271 = vmatprep.mubr.msk.bf16.mxu1 %vm5922_vm6, %v15388_v27  ;;  %13335 = vmatprep.mubr.msk.bf16.mxu0 %vm5922_vm6, %v15390_v57  ;;  %v15455_v27 = vld [vmem:[%s23256_s5 + $0x268] ss:$8 sps:$4 sm:$0xff]   ;;  %v15460_v57 = vld [vmem:[%s23256_s5 + $0x1b4] ss:$8 sps:$4 sm:$0xff]  }
 0x4d9   : > { %6633 = vmatpush1.bf16.msra.mxu1 %v20225_v2  ;;  %6961 = vmatpush1.bf16.msra.mxu0 %v20225_v2 }
 0x4da   : > { %6634 = vmatprep.subr.bf16.mxu1 %v23443_v18  ;;  %6962 = vmatprep.subr.bf16.mxu0 %v23443_v18 }
 0x4dc   : > { %6023 = vmatmul.mubr.bf16.gmra.mrb[220].mxu1 %v15392_v55  ;;  %6351 = vmatmul.mubr.bf16.gmra.mrb[236].mxu0 %v15393_v35  ;;  %v15463_v55 = vld [vmem:[%s23256_s5 + $0x27c] ss:$8 sps:$4 sm:$0xff]   ;;  %v15458_v35 = vld [vmem:[%s23256_s5 + $0x1b0] ss:$8 sps:$4 sm:$0xff]  }
 0x4dd   : > { %6635 = vmatpush1.bf16.msra.mxu1 %v20233_v3  ;;  %6963 = vmatpush1.bf16.msra.mxu0 %v20233_v3 }
 0x4de   : > { %6636 = vmatprep.subr.bf16.mxu1 %v23443_v18  ;;  %6964 = vmatprep.subr.bf16.mxu0 %v23443_v18 }
 0x4df   : > { %13272 = vmatprep.mubr.msk.bf16.mxu1 %vm5922_vm6, %v15394_v31  ;;  %13336 = vmatprep.mubr.msk.bf16.mxu0 %vm5922_vm6, %v15396_v34  ;;  %v15461_v31 = vld [vmem:[%s23256_s5 + $0x278] ss:$8 sps:$4 sm:$0xff]   ;;  %v15466_v34 = vld [vmem:[%s23256_s5 + $0x1c4] ss:$8 sps:$4 sm:$0xff]  }
 0x4e1   : > { %6637 = vmatpush1.bf16.msra.mxu1 %v20241_v21  ;;  %6965 = vmatpush1.bf16.msra.mxu0 %v20241_v21 }
 0x4e2   : > { %6638 = vmatprep.subr.bf16.mxu1 %v23443_v18  ;;  %6966 = vmatprep.subr.bf16.mxu0 %v23443_v18 }
 0x4e4   : > { %6031 = vmatmul.mubr.bf16.gmra.mrb[224].mxu1 %v15398_v5  ;;  %6359 = vmatmul.mubr.bf16.gmra.mrb[240].mxu0 %v15399_v19  ;;  %v15469_v5 = vld [vmem:[%s23256_s5 + $0x28c] ss:$8 sps:$4 sm:$0xff]   ;;  %v15464_v19 = vld [vmem:[%s23256_s5 + $0x1c0] ss:$8 sps:$4 sm:$0xff]  }
 0x4e5   : > { %6639 = vmatpush1.bf16.msra.mxu1 %v20249_v14  ;;  %6967 = vmatpush1.bf16.msra.mxu0 %v20249_v14 }
 0x4e6   : > { %6640 = vmatprep.subr.bf16.mxu1 %v23443_v18  ;;  %6968 = vmatprep.subr.bf16.mxu0 %v23443_v18 }
 0x4e7   : > { %13273 = vmatprep.mubr.msk.bf16.mxu1 %vm5922_vm6, %v15400_v42  ;;  %13337 = vmatprep.mubr.msk.bf16.mxu0 %vm5922_vm6, %v15402_v36  ;;  %v15467_v42 = vld [vmem:[%s23256_s5 + $0x288] ss:$8 sps:$4 sm:$0xff]   ;;  %v15472_v36 = vld [vmem:[%s23256_s5 + $0x1d4] ss:$8 sps:$4 sm:$0xff]  }
 0x4e9   : > { %6641 = vmatpush1.bf16.msra.mxu1 %v20257_v63  ;;  %6969 = vmatpush1.bf16.msra.mxu0 %v20257_v63 }
 0x4ea   : > { %6642 = vmatprep.subr.bf16.mxu1 %v23443_v18  ;;  %6970 = vmatprep.subr.bf16.mxu0 %v23443_v18 }
 0x4ec   : > { %6039 = vmatmul.mubr.bf16.gmra.mrb[228].mxu1 %v15404_v22  ;;  %6367 = vmatmul.mubr.bf16.gmra.mrb[244].mxu0 %v15405_v59  ;;  %v15475_v22 = vld [vmem:[%s23256_s5 + $0x29c] ss:$8 sps:$4 sm:$0xff]   ;;  %v15470_v59 = vld [vmem:[%s23256_s5 + $0x1d0] ss:$8 sps:$4 sm:$0xff]  }
 0x4ed   : > { %6643 = vmatpush1.bf16.msra.mxu1 %v20265_v52  ;;  %6971 = vmatpush1.bf16.msra.mxu0 %v20265_v52 }
 0x4ee   : > { %6644 = vmatprep.subr.bf16.mxu1 %v23443_v18  ;;  %6972 = vmatprep.subr.bf16.mxu0 %v23443_v18 }
 0x4ef   : > { %13274 = vmatprep.mubr.msk.bf16.mxu1 %vm5922_vm6, %v15406_v50  ;;  %13338 = vmatprep.mubr.msk.bf16.mxu0 %vm5922_vm6, %v15408_v38  ;;  %v15473_v50 = vld [vmem:[%s23256_s5 + $0x298] ss:$8 sps:$4 sm:$0xff]   ;;  %v15478_v38 = vld [vmem:[%s23256_s5 + $0x1e4] ss:$8 sps:$4 sm:$0xff]  }
 0x4f1   : > { %6645 = vmatpush1.bf16.msra.mxu1 %v20273_v28  ;;  %6973 = vmatpush1.bf16.msra.mxu0 %v20273_v28 }
 0x4f2   : > { %6646 = vmatprep.subr.bf16.mxu1 %v23443_v18  ;;  %6974 = vmatprep.subr.bf16.mxu0 %v23443_v18 }
 0x4f4   : > { %6047 = vmatmul.mubr.bf16.gmra.mrb[232].mxu1 %v15410_v8  ;;  %6375 = vmatmul.mubr.bf16.gmra.mrb[248].mxu0 %v15411_v56  ;;  %v15481_v8 = vld [vmem:[%s23256_s5 + $0x2ac] ss:$8 sps:$4 sm:$0xff]   ;;  %v15476_v56 = vld [vmem:[%s23256_s5 + $0x1e0] ss:$8 sps:$4 sm:$0xff]  }
 0x4f5   : > { %6647 = vmatpush1.bf16.msra.mxu1 %v20281_v29  ;;  %6975 = vmatpush1.bf16.msra.mxu0 %v20281_v29 }
 0x4f6   : > { %13275 = vmatprep.mubr.msk.bf16.mxu1 %vm5922_vm6, %v15412_v0  ;;  %13339 = vmatprep.mubr.msk.bf16.mxu0 %vm5922_vm6, %v15414_v16  ;;  %v15479_v0 = vld [vmem:[%s23256_s5 + $0x2a8] ss:$8 sps:$4 sm:$0xff]   ;;  %v15484_v16 = vld [vmem:[%s23256_s5 + $0x1f4] ss:$8 sps:$4 sm:$0xff]  }
 0x4f7   : > { %7278 = vmatprep.subr.bf16.mxu1 %v23443_v18  ;;  %7606 = vmatprep.subr.bf16.mxu0 %v23443_v18 }
 0x4fc   : > { %6055 = vmatmul.mubr.bf16.gmra.mrb[236].mxu1 %v15416_v48  ;;  %6383 = vmatmul.mubr.bf16.gmra.mrb[252].mxu0 %v15417_v26  ;;  %v15487_v48 = vld [vmem:[%s23256_s5 + $0x2bc] ss:$8 sps:$4 sm:$0xff]   ;;  %v15482_v26 = vld [vmem:[%s23256_s5 + $0x1f0] ss:$8 sps:$4 sm:$0xff]  }
 0x4fd   : > { %13276 = vmatprep.mubr.msk.bf16.mxu1 %vm5922_vm6, %v15418_v46  ;;  %13340 = vmatprep.mubr.msk.bf16.mxu0 %vm5922_vm6, %v15422_v53  ;;  %v15485_v46 = vld [vmem:[%s23256_s5 + $0x2b8] ss:$8 sps:$4 sm:$0xff]   ;;  %v15490_v53 = vld [vmem:[%s23256_s5 + $0x204] ss:$8 sps:$4 sm:$0xff]  }
 0x504   : > { %6063 = vmatmul.mubr.bf16.gmra.mrb[240].mxu1 %v15423_v39  ;;  %6391 = vmatmul.mubr.bf16.gmra.mrb[0].mxu0 %v15420_v25  ;;  %v15493_v25 = vld [vmem:[%s23256_s5 + $0x2cc] ss:$8 sps:$4 sm:$0xff]   ;;  %v15488_v39 = vld [vmem:[%s23256_s5 + $0x200] ss:$8 sps:$4 sm:$0xff]  }
 0x505   : > { %13277 = vmatprep.mubr.msk.bf16.mxu1 %vm5922_vm6, %v15424_v54  ;;  %13341 = vmatprep.mubr.msk.bf16.mxu0 %vm5922_vm6, %v15428_v23  ;;  %v15491_v54 = vld [vmem:[%s23256_s5 + $0x2c8] ss:$8 sps:$4 sm:$0xff]   ;;  %v15496_v23 = vld [vmem:[%s23256_s5 + $0x214] ss:$8 sps:$4 sm:$0xff]  }
 0x50c   : > { %6071 = vmatmul.mubr.bf16.gmra.mrb[244].mxu1 %v15429_v24  ;;  %6399 = vmatmul.mubr.bf16.gmra.mrb[4].mxu0 %v15426_v9  ;;  %v15499_v9 = vld [vmem:[%s23256_s5 + $0x2dc] ss:$8 sps:$4 sm:$0xff]   ;;  %v15494_v24 = vld [vmem:[%s23256_s5 + $0x210] ss:$8 sps:$4 sm:$0xff]  }
 0x50d   : > { %13278 = vmatprep.mubr.msk.bf16.mxu1 %vm5922_vm6, %v15430_v51  ;;  %13342 = vmatprep.mubr.msk.bf16.mxu0 %vm5922_vm6, %v15434_v37  ;;  %v15497_v51 = vld [vmem:[%s23256_s5 + $0x2d8] ss:$8 sps:$4 sm:$0xff]   ;;  %v15502_v37 = vld [vmem:[%s23256_s5 + $0x224] ss:$8 sps:$4 sm:$0xff]  }
 0x514   : > { %6079 = vmatmul.mubr.bf16.gmra.mrb[248].mxu1 %v15435_v41  ;;  %6407 = vmatmul.mubr.bf16.gmra.mrb[8].mxu0 %v15432_v32  ;;  %v15505_v32 = vld [vmem:[%s23256_s5 + $0x2ec] ss:$8 sps:$4 sm:$0xff]   ;;  %v15500_v41 = vld [vmem:[%s23256_s5 + $0x220] ss:$8 sps:$4 sm:$0xff]  }
 0x515   : > { %13279 = vmatprep.mubr.msk.bf16.mxu1 %vm5922_vm6, %v15436_v44  ;;  %13343 = vmatprep.mubr.msk.bf16.mxu0 %vm5922_vm6, %v15440_v1  ;;  %v15503_v44 = vld [vmem:[%s23256_s5 + $0x2e8] ss:$8 sps:$4 sm:$0xff]   ;;  %v15508_v1 = vld [vmem:[%s23256_s5 + $0x234] ss:$8 sps:$4 sm:$0xff]  }
 0x51c   : > { %6087 = vmatmul.mubr.bf16.gmra.mrb[252].mxu1 %v15441_v33  ;;  %6415 = vmatmul.mubr.bf16.gmra.mrb[12].mxu0 %v15438_v20  ;;  %v15509_v20 = vld [vmem:[%s23256_s5 + $0x2f8] ss:$8 sps:$4 sm:$0xff]   ;;  %v15514_v33 = vld [vmem:[%s23256_s5 + $0x244] ss:$8 sps:$4 sm:$0xff]  }
 0x51d   : > { %13280 = vmatprep.mubr.msk.bf16.mxu1 %vm5922_vm6, %v13267_v40  ;;  %13344 = vmatprep.mubr.msk.bf16.mxu0 %vm5922_vm6, %v13331_v43  ;;  %v15517_v40 = vld [vmem:[%s23256_s5 + $0x30c] ss:$8 sps:$4 sm:$0xff]  }
 0x51e   : > { %v13369_v43 = vld [vmem:[%s23256_s5 + $0x250] sm:$0x33] }
 0x524   : > { %6095 = vmatmul.mubr.bf16.gmra.mrb[0].mxu1 %v13266_v15  ;;  %6423 = vmatmul.mubr.bf16.gmra.mrb[16].mxu0 %v13330_v60  ;;  %v13433_v15 = vld [vmem:[%s23256_s5 + $0x318] sm:$0x33]  ;;  %v15512_v60 = vld [vmem:[%s23256_s5 + $0x240] ss:$8 sps:$4 sm:$0xff]  }
 0x525   : > { %13396 = vmatprep.mubr.msk.bf16.mxu1 %vm5922_vm6, %v15448_v17  ;;  %13460 = vmatprep.mubr.msk.bf16.mxu0 %vm5922_vm6, %v15451_v11  ;;  %v15515_v17 = vld [vmem:[%s23256_s5 + $0x308] ss:$8 sps:$4 sm:$0xff]   ;;  %v13395_v11 = vcombine.high %v13369_v43, %v13369_v43 }
 0x52c   : > { %6655 = vmatmul.mubr.bf16.vlgmr.msra.gmra.mrb[4].mxu1 %v15446_v10  ;;  %6983 = vmatmul.mubr.bf16.vlgmr.msra.gmra.mrb[20].mxu0 %v15449_v58  ;;  %v13459_v10 = vcombine.high %v13433_v15, %v13433_v15  ;;  %v13394_v58 = vcombine.low %v13369_v43, %v13369_v43 }
 0x52d   : > { %7279 = vmatpush1.bf16.msra.mxu1 %v20185_v49  ;;  %7607 = vmatpush1.bf16.msra.mxu0 %v20185_v49 }
 0x52e   : > { %7280 = vmatprep.subr.bf16.mxu1 %v23443_v18  ;;  %7608 = vmatprep.subr.bf16.mxu0 %v23443_v18 }
 0x52f   : > { %13397 = vmatprep.mubr.msk.bf16.mxu1 %vm5922_vm6, %v15454_v7  ;;  %13461 = vmatprep.mubr.msk.bf16.mxu0 %vm5922_vm6, %v15457_v61  ;;  %v13458_v7 = vcombine.low %v13433_v15, %v13433_v15  ;;  %v15524_v61 = vld [vmem:[%s23256_s5 + $0x324] ss:$8 sps:$4 sm:$0xff]  }
 0x531   : > { %7281 = vmatpush1.bf16.msra.mxu1 %v20193_v12  ;;  %7609 = vmatpush1.bf16.msra.mxu0 %v20193_v12 }
 0x532   : > { %7282 = vmatprep.subr.bf16.mxu1 %v23443_v18  ;;  %7610 = vmatprep.subr.bf16.mxu0 %v23443_v18 }
 0x534   : > { %6663 = vmatmul.mubr.bf16.gmra.mrb[8].mxu1 %v15452_v47  ;;  %6991 = vmatmul.mubr.bf16.gmra.mrb[24].mxu0 %v15455_v27  ;;  %v15527_v47 = vld [vmem:[%s23256_s5 + $0x3ec] ss:$8 sps:$4 sm:$0xff]   ;;  %v15522_v27 = vld [vmem:[%s23256_s5 + $0x320] ss:$8 sps:$4 sm:$0xff]  }
 0x535   : > { %7283 = vmatpush1.bf16.msra.mxu1 %v20201_v13  ;;  %7611 = vmatpush1.bf16.msra.mxu0 %v20201_v13 }
 0x536   : > { %7284 = vmatprep.subr.bf16.mxu1 %v23443_v18  ;;  %7612 = vmatprep.subr.bf16.mxu0 %v23443_v18 }
 0x537   : > { %13398 = vmatprep.mubr.msk.bf16.mxu1 %vm5922_vm6, %v15460_v57  ;;  %13462 = vmatprep.mubr.msk.bf16.mxu0 %vm5922_vm6, %v15463_v55  ;;  %v15525_v57 = vld [vmem:[%s23256_s5 + $0x3e8] ss:$8 sps:$4 sm:$0xff]   ;;  %v15530_v55 = vld [vmem:[%s23256_s5 + $0x334] ss:$8 sps:$4 sm:$0xff]  }
 0x539   : > { %7285 = vmatpush1.bf16.msra.mxu1 %v20209_v30  ;;  %7613 = vmatpush1.bf16.msra.mxu0 %v20209_v30 }
 0x53a   : > { %7286 = vmatprep.subr.bf16.mxu1 %v23443_v18  ;;  %7614 = vmatprep.subr.bf16.mxu0 %v23443_v18 }
 0x53c   : > { %6671 = vmatmul.mubr.bf16.gmra.mrb[12].mxu1 %v15458_v35  ;;  %6999 = vmatmul.mubr.bf16.gmra.mrb[28].mxu0 %v15461_v31  ;;  %v15533_v35 = vld [vmem:[%s23256_s5 + $0x3fc] ss:$8 sps:$4 sm:$0xff]  }
 0x53d   : > { %7287 = vmatpush1.bf16.msra.mxu1 %v20217_v45  ;;  %7615 = vmatpush1.bf16.msra.mxu0 %v20217_v45 }
 0x53e   : > { %7288 = vmatprep.subr.bf16.mxu1 %v23443_v18  ;;  %7616 = vmatprep.subr.bf16.mxu0 %v23443_v18 }
 0x53f   : > { %13399 = vmatprep.mubr.msk.bf16.mxu1 %vm5922_vm6, %v15466_v34  ;;  %13463 = vmatprep.mubr.msk.bf16.mxu0 %vm5922_vm6, %v15469_v5  ;;  %v15528_v5 = vld [vmem:[%s23256_s5 + $0x330] ss:$8 sps:$4 sm:$0xff]  }
 0x541   : > { %7289 = vmatpush1.bf16.msra.mxu1 %v20225_v2  ;;  %7617 = vmatpush1.bf16.msra.mxu0 %v20225_v2 }
 0x542   : > { %7290 = vmatprep.subr.bf16.mxu1 %v23443_v18  ;;  %7618 = vmatprep.subr.bf16.mxu0 %v23443_v18 }
 0x544   : > { %6679 = vmatmul.mubr.bf16.gmra.mrb[16].mxu1 %v15464_v19  ;;  %7007 = vmatmul.mubr.bf16.gmra.mrb[32].mxu0 %v15467_v42  ;;  %v15531_v19 = vld [vmem:[%s23256_s5 + $0x3f8] ss:$8 sps:$4 sm:$0xff]  }
 0x545   : > { %7291 = vmatpush1.bf16.msra.mxu1 %v20233_v3  ;;  %7619 = vmatpush1.bf16.msra.mxu0 %v20233_v3 }
 0x546   : > { %7292 = vmatprep.subr.bf16.mxu1 %v23443_v18  ;;  %7620 = vmatprep.subr.bf16.mxu0 %v23443_v18 }
 0x547   : > { %13400 = vmatprep.mubr.msk.bf16.mxu1 %vm5922_vm6, %v15472_v36  ;;  %13464 = vmatprep.mubr.msk.bf16.mxu0 %vm5922_vm6, %v15475_v22 }
 0x549   : > { %7293 = vmatpush1.bf16.msra.mxu1 %v20241_v21  ;;  %7621 = vmatpush1.bf16.msra.mxu0 %v20241_v21 }
 0x54a   : > { %7294 = vmatprep.subr.bf16.mxu1 %v23443_v18  ;;  %7622 = vmatprep.subr.bf16.mxu0 %v23443_v18 }
 0x54c   : > { %6687 = vmatmul.mubr.bf16.gmra.mrb[20].mxu1 %v15470_v59  ;;  %7015 = vmatmul.mubr.bf16.gmra.mrb[36].mxu0 %v15473_v50 }
 0x54d   : > { %7295 = vmatpush1.bf16.msra.mxu1 %v20249_v14  ;;  %7623 = vmatpush1.bf16.msra.mxu0 %v20249_v14 }
 0x54e   : > { %7296 = vmatprep.subr.bf16.mxu1 %v23443_v18  ;;  %7624 = vmatprep.subr.bf16.mxu0 %v23443_v18 }
 0x54f   : > { %13401 = vmatprep.mubr.msk.bf16.mxu1 %vm5922_vm6, %v15478_v38  ;;  %13465 = vmatprep.mubr.msk.bf16.mxu0 %vm5922_vm6, %v15481_v8 }
 0x551   : > { %7297 = vmatpush1.bf16.msra.mxu1 %v20257_v63  ;;  %7625 = vmatpush1.bf16.msra.mxu0 %v20257_v63 }
 0x552   : > { %7298 = vmatprep.subr.bf16.mxu1 %v23443_v18  ;;  %7626 = vmatprep.subr.bf16.mxu0 %v23443_v18 }
 0x554   : > { %6695 = vmatmul.mubr.bf16.gmra.mrb[24].mxu1 %v15476_v56  ;;  %7023 = vmatmul.mubr.bf16.gmra.mrb[40].mxu0 %v15479_v0  ;;  %v15536_v0 = vld [vmem:[%s23256_s5 + $0x344] ss:$8 sps:$4 sm:$0xff]  }
 0x555   : > { %7299 = vmatpush1.bf16.msra.mxu1 %v20265_v52  ;;  %7627 = vmatpush1.bf16.msra.mxu0 %v20265_v52 }
 0x556   : > { %7300 = vmatprep.subr.bf16.mxu1 %v23443_v18  ;;  %7628 = vmatprep.subr.bf16.mxu0 %v23443_v18 }
 0x557   : > { %13402 = vmatprep.mubr.msk.bf16.mxu1 %vm5922_vm6, %v15484_v16  ;;  %13466 = vmatprep.mubr.msk.bf16.mxu0 %vm5922_vm6, %v15487_v48  ;;  %v15539_v16 = vld [vmem:[%s23256_s5 + $0x40c] ss:$8 sps:$4 sm:$0xff]  }
 0x559   : > { %7301 = vmatpush1.bf16.msra.mxu1 %v20273_v28  ;;  %7629 = vmatpush1.bf16.msra.mxu0 %v20273_v28 }
 0x55a   : > { %7302 = vmatprep.subr.bf16.mxu1 %v23443_v18  ;;  %7630 = vmatprep.subr.bf16.mxu0 %v23443_v18 }
 0x55c   : > { %6703 = vmatmul.mubr.bf16.gmra.mrb[28].mxu1 %v15482_v26  ;;  %7031 = vmatmul.mubr.bf16.gmra.mrb[44].mxu0 %v15485_v46  ;;  %v15534_v46 = vld [vmem:[%s23256_s5 + $0x340] ss:$8 sps:$4 sm:$0xff]  }
 0x55d   : > { %7303 = vmatpush1.bf16.msra.mxu1 %v20281_v29  ;;  %7631 = vmatpush1.bf16.msra.mxu0 %v20281_v29 }
 0x55e   : > { %13403 = vmatprep.mubr.msk.bf16.mxu1 %vm5922_vm6, %v15490_v53  ;;  %13467 = vmatprep.mubr.msk.bf16.mxu0 %vm5922_vm6, %v15493_v25  ;;  %v15537_v53 = vld [vmem:[%s23256_s5 + $0x408] ss:$8 sps:$4 sm:$0xff]  }
 0x55f   : > { %7934 = vmatprep.subr.bf16.mxu1 %v23443_v18  ;;  %8262 = vmatprep.subr.bf16.mxu0 %v23443_v18 }
 0x564   : > { %6711 = vmatmul.mubr.bf16.gmra.mrb[32].mxu1 %v15488_v39  ;;  %7039 = vmatmul.mubr.bf16.gmra.mrb[48].mxu0 %v15491_v54 }
 0x565   : > { %13404 = vmatprep.mubr.msk.bf16.mxu1 %vm5922_vm6, %v15496_v23  ;;  %13468 = vmatprep.mubr.msk.bf16.mxu0 %vm5922_vm6, %v15499_v9 }
 0x56c   : > { %6719 = vmatmul.mubr.bf16.gmra.mrb[36].mxu1 %v15494_v24  ;;  %7047 = vmatmul.mubr.bf16.gmra.mrb[52].mxu0 %v15497_v51 }
 0x56d   : > { %13405 = vmatprep.mubr.msk.bf16.mxu1 %vm5922_vm6, %v15502_v37  ;;  %13469 = vmatprep.mubr.msk.bf16.mxu0 %vm5922_vm6, %v15505_v32  ;;  %v15542_v32 = vld [vmem:[%s23256_s5 + $0x354] ss:$8 sps:$4 sm:$0xff]  }
 0x574   : > { %6727 = vmatmul.mubr.bf16.gmra.mrb[40].mxu1 %v15500_v41  ;;  %7055 = vmatmul.mubr.bf16.gmra.mrb[56].mxu0 %v15503_v44  ;;  %v15545_v41 = vld [vmem:[%s23256_s5 + $0x41c] ss:$8 sps:$4 sm:$0xff]  }
 0x575   : > { %13406 = vmatprep.mubr.msk.bf16.mxu1 %vm5922_vm6, %v15508_v1  ;;  %13470 = vmatprep.mubr.msk.bf16.mxu0 %vm5922_vm6, %v15511_v62  ;;  %v15540_v62 = vld [vmem:[%s23256_s5 + $0x350] ss:$8 sps:$4 sm:$0xff]  }
 0x57c   : > { %6735 = vmatmul.mubr.bf16.gmra.mrb[44].mxu1 %v15506_v6  ;;  %7063 = vmatmul.mubr.bf16.gmra.mrb[60].mxu0 %v15509_v20  ;;  %v15543_v6 = vld [vmem:[%s23256_s5 + $0x418] ss:$8 sps:$4 sm:$0xff]  }
 0x57d   : > { %13407 = vmatprep.mubr.msk.bf16.mxu1 %vm5922_vm6, %v15514_v33  ;;  %13471 = vmatprep.mubr.msk.bf16.mxu0 %vm5922_vm6, %v15517_v40 }
 0x584   : > { %6743 = vmatmul.mubr.bf16.gmra.mrb[48].mxu1 %v15512_v60  ;;  %7071 = vmatmul.mubr.bf16.gmra.mrb[64].mxu0 %v15515_v17 }
 0x585   : > { %13408 = vmatprep.mubr.msk.bf16.mxu1 %vm5922_vm6, %v13395_v11  ;;  %13472 = vmatprep.mubr.msk.bf16.mxu0 %vm5922_vm6, %v13459_v10  ;;  %v15548_v10 = vld [vmem:[%s23256_s5 + $0x364] ss:$8 sps:$4 sm:$0xff]  }
 0x58c   : > { %6751 = vmatmul.mubr.bf16.gmra.mrb[52].mxu1 %v13394_v58  ;;  %7079 = vmatmul.mubr.bf16.gmra.mrb[68].mxu0 %v13458_v7  ;;  %v15551_v58 = vld [vmem:[%s23256_s5 + $0x42c] ss:$8 sps:$4 sm:$0xff]  }
 0x58d   : > { %13524 = vmatprep.mubr.msk.bf16.mxu1 %vm5922_vm6, %v15524_v61  ;;  %13588 = vmatprep.mubr.msk.bf16.mxu0 %vm5922_vm6, %v15527_v47  ;;  %v15546_v47 = vld [vmem:[%s23256_s5 + $0x360] ss:$8 sps:$4 sm:$0xff]  }
 0x594   : > { %7311 = vmatmul.mubr.bf16.vlgmr.msra.gmra.mrb[56].mxu1 %v15522_v27  ;;  %7639 = vmatmul.mubr.bf16.vlgmr.msra.gmra.mrb[72].mxu0 %v15525_v57  ;;  %v15549_v27 = vld [vmem:[%s23256_s5 + $0x428] ss:$8 sps:$4 sm:$0xff]  }
 0x595   : > { %7935 = vmatpush1.bf16.msra.mxu1 %v20185_v49  ;;  %8263 = vmatpush1.bf16.msra.mxu0 %v20185_v49 }
 0x596   : > { %7936 = vmatprep.subr.bf16.mxu1 %v23443_v18  ;;  %8264 = vmatprep.subr.bf16.mxu0 %v23443_v18 }
 0x597   : > { %13525 = vmatprep.mubr.msk.bf16.mxu1 %vm5922_vm6, %v15530_v55  ;;  %13589 = vmatprep.mubr.msk.bf16.mxu0 %vm5922_vm6, %v15533_v35  ;;  %v20761_v31 = vpop.f32.mrb[208].mxu1  ;;  %v6328_v34 = vpop.f32.mrb[224].mxu0 }
 0x598   : > { %v6002_v42 = vpop.f32.mrb[209].mxu1  ;;  %v6330_v36 = vpop.f32.mrb[225].mxu0 }
 0x599   : > { %7937 = vmatpush1.bf16.msra.mxu1 %v20193_v12  ;;  %8265 = vmatpush1.bf16.msra.mxu0 %v20193_v12  ;;  %v20771_v22 = vpop.f32.mrb[210].mxu1  ;;  %v6331_v59 = vpop.f32.mrb[226].mxu0 }
 0x59a   : > { %7938 = vmatprep.subr.bf16.mxu1 %v23443_v18  ;;  %8266 = vmatprep.subr.bf16.mxu0 %v23443_v18  ;;  %v6430_v38 = vpack.c.bf16 %v6331_v59, %v6328_v34  ;;  %v6005_v8 = vpop.f32.mrb[211].mxu1  ;;  %v6333_v56 = vpop.f32.mrb[227].mxu0  ;;  %v15554_v59 = vld [vmem:[%s23256_s5 + $0x374] ss:$8 sps:$4 sm:$0xff]  }
 0x59c   : > { %7319 = vmatmul.mubr.bf16.gmra.mrb[60].mxu1 %v15528_v5  ;;  %7647 = vmatmul.mubr.bf16.gmra.mrb[76].mxu0 %v15531_v19 }
 0x59d   : > { %7939 = vmatpush1.bf16.msra.mxu1 %v20201_v13  ;;  %8267 = vmatpush1.bf16.msra.mxu0 %v20201_v13 }
 0x59e   : > { %7940 = vmatprep.subr.bf16.mxu1 %v23443_v18  ;;  %8268 = vmatprep.subr.bf16.mxu0 %v23443_v18 }
 0x59f   : > { %13526 = vmatprep.mubr.msk.bf16.mxu1 %vm5922_vm6, %v15536_v0  ;;  %13590 = vmatprep.mubr.msk.bf16.mxu0 %vm5922_vm6, %v15539_v16  ;;  %v20789_v48 = vpop.f32.mrb[212].mxu1  ;;  %v6336_v26 = vpop.f32.mrb[228].mxu0  ;;  %v15552_v0 = vld [vmem:[%s23256_s5 + $0x370] ss:$8 sps:$4 sm:$0xff]  }
 0x5a0   : > { %v6010_v25 = vpop.f32.mrb[213].mxu1  ;;  %v6338_v39 = vpop.f32.mrb[229].mxu0  ;;  %8752 = vrot.lane.b32.xlu0 %v6430_v38, %s23347_s19  ;;  %v15557_v38 = vld [vmem:[%s23256_s5 + $0x43c] ss:$8 sps:$4 sm:$0xff]   ;;  %v15555_v16 = vld [vmem:[%s23256_s5 + $0x438] ss:$8 sps:$4 sm:$0xff]  }
 0x5a1   : > { %7941 = vmatpush1.bf16.msra.mxu1 %v20209_v30  ;;  %8269 = vmatpush1.bf16.msra.mxu0 %v20209_v30  ;;  %v20800_v54 = vpop.f32.mrb[214].mxu1  ;;  %v6339_v23 = vpop.f32.mrb[230].mxu0  ;;  %v15692_v39 = vld [vmem:[%s23256_s5 + $0x6a0] ss:$8 sps:$4 sm:$0xff]  }
 0x5a2   : > { %7942 = vmatprep.subr.bf16.mxu1 %v23443_v18  ;;  %8270 = vmatprep.subr.bf16.mxu0 %v23443_v18  ;;  %v6431_v24 = vpack.c.bf16 %v6339_v23, %v6336_v26  ;;  %v6013_v51 = vpop.f32.mrb[215].mxu1  ;;  %v6341_v37 = vpop.f32.mrb[231].mxu0 }
 0x5a3   : > { %v15560_v37 = vld [vmem:[%s23256_s5 + $0x384] ss:$8 sps:$4 sm:$0xff]  }
 0x5a4   : > { %7327 = vmatmul.mubr.bf16.gmra.mrb[64].mxu1 %v15534_v46  ;;  %7655 = vmatmul.mubr.bf16.gmra.mrb[80].mxu0 %v15537_v53 }
 0x5a5   : > { %7943 = vmatpush1.bf16.msra.mxu1 %v20217_v45  ;;  %8271 = vmatpush1.bf16.msra.mxu0 %v20217_v45 }
 0x5a6   : > { %7944 = vmatprep.subr.bf16.mxu1 %v23443_v18  ;;  %8272 = vmatprep.subr.bf16.mxu0 %v23443_v18 }
 0x5a7   : > { %13527 = vmatprep.mubr.msk.bf16.mxu1 %vm5922_vm6, %v15542_v32  ;;  %13591 = vmatprep.mubr.msk.bf16.mxu0 %vm5922_vm6, %v15545_v41  ;;  %v20818_v44 = vpop.f32.mrb[216].mxu1  ;;  %v6344_v1 = vpop.f32.mrb[232].mxu0  ;;  %v15563_v32 = vld [vmem:[%s23256_s5 + $0x44c] ss:$8 sps:$4 sm:$0xff]  }
 0x5a8   : > { %v6018_v20 = vpop.f32.mrb[217].mxu1  ;;  %v6346_v33 = vpop.f32.mrb[233].mxu0  ;;  %8754 = vrot.lane.b32.xlu0 %v6431_v24, %s23347_s19 }
 0x5a9   : > { %7945 = vmatpush1.bf16.msra.mxu1 %v20225_v2  ;;  %8273 = vmatpush1.bf16.msra.mxu0 %v20225_v2  ;;  %v20829_v40 = vpop.f32.mrb[218].mxu1  ;;  %v6347_v43 = vpop.f32.mrb[234].mxu0 }
 0x5aa   : > { %7946 = vmatprep.subr.bf16.mxu1 %v23443_v18  ;;  %8274 = vmatprep.subr.bf16.mxu0 %v23443_v18  ;;  %v6432_v60 = vpack.c.bf16 %v6347_v43, %v6344_v1  ;;  %v6021_v17 = vpop.f32.mrb[219].mxu1  ;;  %v6349_v11 = vpop.f32.mrb[235].mxu0 }
 0x5ab   : > { %v15566_v17 = vld [vmem:[%s23256_s5 + $0x394] ss:$8 sps:$4 sm:$0xff]  }
 0x5ac   : > { %7335 = vmatmul.mubr.bf16.gmra.mrb[68].mxu1 %v15540_v62  ;;  %7663 = vmatmul.mubr.bf16.gmra.mrb[84].mxu0 %v15543_v6  ;;  %v15558_v62 = vld [vmem:[%s23256_s5 + $0x380] ss:$8 sps:$4 sm:$0xff]   ;;  %v15569_v11 = vld [vmem:[%s23256_s5 + $0x45c] ss:$8 sps:$4 sm:$0xff]  }
 0x5ad   : > { %7947 = vmatpush1.bf16.msra.mxu1 %v20233_v3  ;;  %8275 = vmatpush1.bf16.msra.mxu0 %v20233_v3  ;;  %v15561_v6 = vld [vmem:[%s23256_s5 + $0x448] ss:$8 sps:$4 sm:$0xff]  }
 0x5ae   : > { %7948 = vmatprep.subr.bf16.mxu1 %v23443_v18  ;;  %8276 = vmatprep.subr.bf16.mxu0 %v23443_v18 }
 0x5af   : > { %13528 = vmatprep.mubr.msk.bf16.mxu1 %vm5922_vm6, %v15548_v10  ;;  %13592 = vmatprep.mubr.msk.bf16.mxu0 %vm5922_vm6, %v15551_v58  ;;  %v20847_v7 = vpop.f32.mrb[220].mxu1  ;;  %v6352_v61 = vpop.f32.mrb[236].mxu0 }
 0x5b0   : > { %v6026_v57 = vpop.f32.mrb[221].mxu1  ;;  %v6354_v55 = vpop.f32.mrb[237].mxu0  ;;  %8756 = vrot.lane.b32.xlu0 %v6432_v60, %s23347_s19 }
 0x5b1   : > { %7949 = vmatpush1.bf16.msra.mxu1 %v20241_v21  ;;  %8277 = vmatpush1.bf16.msra.mxu0 %v20241_v21  ;;  %v20858_v35 = vpop.f32.mrb[222].mxu1  ;;  %v6355_v34 = vpop.f32.mrb[238].mxu0  ;;  %v15564_v55 = vld [vmem:[%s23256_s5 + $0x390] ss:$8 sps:$4 sm:$0xff]  }
 0x5b2   : > { %7950 = vmatprep.subr.bf16.mxu1 %v23443_v18  ;;  %8278 = vmatprep.subr.bf16.mxu0 %v23443_v18  ;;  %v6433_v19 = vpack.c.bf16 %v6355_v34, %v6352_v61  ;;  %v6029_v42 = vpop.f32.mrb[223].mxu1  ;;  %v6357_v36 = vpop.f32.mrb[239].mxu0  ;;  %v15567_v34 = vld [vmem:[%s23256_s5 + $0x458] ss:$8 sps:$4 sm:$0xff]  }
 0x5b3   : > { %v15572_v36 = vld [vmem:[%s23256_s5 + $0x3a4] ss:$8 sps:$4 sm:$0xff]  }
 0x5b4   : > { %7343 = vmatmul.mubr.bf16.gmra.mrb[72].mxu1 %v15546_v47  ;;  %7671 = vmatmul.mubr.bf16.gmra.mrb[88].mxu0 %v15549_v27 }
 0x5b5   : > { %7951 = vmatpush1.bf16.msra.mxu1 %v20249_v14  ;;  %8279 = vmatpush1.bf16.msra.mxu0 %v20249_v14 }
 0x5b6   : > { %7952 = vmatprep.subr.bf16.mxu1 %v23443_v18  ;;  %8280 = vmatprep.subr.bf16.mxu0 %v23443_v18 }
 0x5b7   : > { %13529 = vmatprep.mubr.msk.bf16.mxu1 %vm5922_vm6, %v15554_v59  ;;  %13593 = vmatprep.mubr.msk.bf16.mxu0 %vm5922_vm6, %v15557_v38  ;;  %v20876_v8 = vpop.f32.mrb[224].mxu1  ;;  %v6360_v56 = vpop.f32.mrb[240].mxu0  ;;  %v15575_v59 = vld [vmem:[%s23256_s5 + $0x46c] ss:$8 sps:$4 sm:$0xff]  }
 0x5b8   : > { %v6034_v26 = vpop.f32.mrb[225].mxu1  ;;  %v6362_v46 = vpop.f32.mrb[241].mxu0  ;;  %8758 = vrot.lane.b32.xlu0 %v6433_v19, %s23347_s19 }
 0x5b9   : > { %7953 = vmatpush1.bf16.msra.mxu1 %v20257_v63  ;;  %8281 = vmatpush1.bf16.msra.mxu0 %v20257_v63  ;;  %v20887_v53 = vpop.f32.mrb[226].mxu1  ;;  %v6363_v25 = vpop.f32.mrb[242].mxu0 }
 0x5ba   : > { %7954 = vmatprep.subr.bf16.mxu1 %v23443_v18  ;;  %8282 = vmatprep.subr.bf16.mxu0 %v23443_v18  ;;  %v6434_v23 = vpack.c.bf16 %v6363_v25, %v6360_v56  ;;  %v6037_v24 = vpop.f32.mrb[227].mxu1  ;;  %v6365_v51 = vpop.f32.mrb[243].mxu0 }
 0x5bb   : > { %v15570_v24 = vld [vmem:[%s23256_s5 + $0x3a0] ss:$8 sps:$4 sm:$0xff]  }
 0x5bc   : > { %7351 = vmatmul.mubr.bf16.gmra.mrb[76].mxu1 %v15552_v0  ;;  %7679 = vmatmul.mubr.bf16.gmra.mrb[92].mxu0 %v15555_v16  ;;  %v15573_v51 = vld [vmem:[%s23256_s5 + $0x468] ss:$8 sps:$4 sm:$0xff]  }
 0x5bd   : > { %7955 = vmatpush1.bf16.msra.mxu1 %v20265_v52  ;;  %8283 = vmatpush1.bf16.msra.mxu0 %v20265_v52 }
 0x5be   : > { %7956 = vmatprep.subr.bf16.mxu1 %v23443_v18  ;;  %8284 = vmatprep.subr.bf16.mxu0 %v23443_v18 }
 0x5bf   : > { %13530 = vmatprep.mubr.msk.bf16.mxu1 %vm5922_vm6, %v15560_v37  ;;  %13594 = vmatprep.mubr.msk.bf16.mxu0 %vm5922_vm6, %v15563_v32  ;;  %v20905_v41 = vpop.f32.mrb[228].mxu1  ;;  %v6368_v1 = vpop.f32.mrb[244].mxu0 }
 0x5c0   : > { %v6042_v20 = vpop.f32.mrb[229].mxu1  ;;  %v6370_v33 = vpop.f32.mrb[245].mxu0  ;;  %8760 = vrot.lane.b32.xlu0 %v6434_v23, %s23347_s19 }
 0x5c1   : > { %7957 = vmatpush1.bf16.msra.mxu1 %v20273_v28  ;;  %8285 = vmatpush1.bf16.msra.mxu0 %v20273_v28  ;;  %v20916_v43 = vpop.f32.mrb[230].mxu1  ;;  %v6371_v60 = vpop.f32.mrb[246].mxu0 }
 0x5c2   : > { %7958 = vmatprep.subr.bf16.mxu1 %v23443_v18  ;;  %8286 = vmatprep.subr.bf16.mxu0 %v23443_v18  ;;  %v6435_v58 = vpack.c.bf16 %v6371_v60, %v6368_v1  ;;  %v6045_v61 = vpop.f32.mrb[231].mxu1  ;;  %v6373_v47 = vpop.f32.mrb[247].mxu0  ;;  %v15578_v1 = vld [vmem:[%s23256_s5 + $0x3b4] ss:$8 sps:$4 sm:$0xff]  }
 0x5c3   : > { %v15576_v47 = vld [vmem:[%s23256_s5 + $0x3b0] ss:$8 sps:$4 sm:$0xff]  }
 0x5c4   : > { %7359 = vmatmul.mubr.bf16.gmra.mrb[80].mxu1 %v15558_v62  ;;  %7687 = vmatmul.mubr.bf16.gmra.mrb[96].mxu0 %v15561_v6  ;;  %v15581_v62 = vld [vmem:[%s23256_s5 + $0x47c] ss:$8 sps:$4 sm:$0xff]  }
 0x5c5   : > { %7959 = vmatpush1.bf16.msra.mxu1 %v20281_v29  ;;  %8287 = vmatpush1.bf16.msra.mxu0 %v20281_v29 }
 0x5c6   : > { %13531 = vmatprep.mubr.msk.bf16.mxu1 %vm5922_vm6, %v15566_v17  ;;  %13595 = vmatprep.mubr.msk.bf16.mxu0 %vm5922_vm6, %v15569_v11 }
 0x5c7   : > { %8590 = vmatprep.subr.bf16.mxu1 %v23443_v18  ;;  %v20933_v27 = vpop.f32.mrb[232].mxu1  ;;  %v6376_v57 = vpop.f32.mrb[248].mxu0  ;;  %8762 = vrot.lane.b32.xlu0 %v6435_v58, %s23347_s19 }
 0x5c8   : > { %23444 = vst [vmem:[#allocation12_spill] sm:$0xff] %v20933_v27  ;;  %v6050_v19 = vpop.f32.mrb[233].mxu1  ;;  %v6378_v42 = vpop.f32.mrb[249].mxu0 }
 0x5c9   : > { %v20948_v38 = vpop.f32.mrb[234].mxu1  ;;  %v6379_v56 = vpop.f32.mrb[250].mxu0  ;;  %v15584_v19 = vld [vmem:[%s23256_s5 + $0x3c4] ss:$8 sps:$4 sm:$0xff]  }
 0x5ca   : > { %23445 = vst [vmem:[#allocation16_spill] sm:$0xff] %v20948_v38  ;;  %v6436_v16 = vpack.c.bf16 %v6379_v56, %v6376_v57  ;;  %v6053_v26 = vpop.f32.mrb[235].mxu1  ;;  %v6381_v46 = vpop.f32.mrb[251].mxu0  ;;  %v15579_v57 = vld [vmem:[%s23256_s5 + $0x478] ss:$8 sps:$4 sm:$0xff]  }
 0x5cb   : > { %v15587_v42 = vld [vmem:[%s23256_s5 + $0x48c] ss:$8 sps:$4 sm:$0xff]  }
 0x5cc   : > { %7367 = vmatmul.mubr.bf16.gmra.mrb[84].mxu1 %v15564_v55  ;;  %7695 = vmatmul.mubr.bf16.gmra.mrb[100].mxu0 %v15567_v34 }
 0x5cd   : > { %13532 = vmatprep.mubr.msk.bf16.mxu1 %vm5922_vm6, %v15572_v36  ;;  %13596 = vmatprep.mubr.msk.bf16.mxu0 %vm5922_vm6, %v15575_v59 }
 0x5ce   : > { %8764 = vrot.lane.b32.xlu0 %v6436_v16, %s23347_s19 }
 0x5cf   : > { %v20955_v25 = vpop.f32.mrb[236].mxu1  ;;  %v6384_v23 = vpop.f32.mrb[252].mxu0 }
 0x5d0   : > { %23446 = vst [vmem:[#allocation15_spill] sm:$0xff] %v20955_v25  ;;  %v6058_v37 = vpop.f32.mrb[237].mxu1  ;;  %v6386_v32 = vpop.f32.mrb[253].mxu0 }
 0x5d1   : > { %v20969_v6 = vpop.f32.mrb[238].mxu1  ;;  %v6387_v20 = vpop.f32.mrb[254].mxu0  ;;  %v15585_v37 = vld [vmem:[%s23256_s5 + $0x488] ss:$8 sps:$4 sm:$0xff]  }
 0x5d2   : > { %23447 = vst [vmem:[#allocation18_spill] sm:$0xff] %v20969_v6  ;;  %v6437_v60 = vpack.c.bf16 %v6387_v20, %v6384_v23  ;;  %v6061_v17 = vpop.f32.mrb[239].mxu1  ;;  %v6389_v11 = vpop.f32.mrb[255].mxu0  ;;  %v15593_v20 = vld [vmem:[%s23256_s5 + $0x49c] ss:$8 sps:$4 sm:$0xff]  }
 0x5d4   : > { %7375 = vmatmul.mubr.bf16.gmra.mrb[88].mxu1 %v15570_v24  ;;  %7703 = vmatmul.mubr.bf16.gmra.mrb[104].mxu0 %v15573_v51  ;;  %v15582_v51 = vld [vmem:[%s23256_s5 + $0x3c0] ss:$8 sps:$4 sm:$0xff]  }
 0x5d5   : > { %13533 = vmatprep.mubr.msk.bf16.mxu1 %vm5922_vm6, %v15578_v1  ;;  %13597 = vmatprep.mubr.msk.bf16.mxu0 %vm5922_vm6, %v15581_v62  ;;  %v15590_v62 = vld [vmem:[%s23256_s5 + $0x3d4] ss:$8 sps:$4 sm:$0xff]  }
 0x5d6   : > { %8766 = vrot.lane.b32.xlu0 %v6437_v60, %s23347_s19 }
 0x5d7   : > { %v20976_v58 = vpop.f32.mrb[240].mxu1  ;;  %v6392_v61 = vpop.f32.mrb[0].mxu0 }
 0x5d8   : > { %23448 = vst [vmem:[#allocation19_spill] sm:$0xff] %v20976_v58  ;;  %v6066_v55 = vpop.f32.mrb[241].mxu1  ;;  %v6394_v34 = vpop.f32.mrb[1].mxu0 }
 0x5d9   : > { %v20990_v36 = vpop.f32.mrb[242].mxu1  ;;  %v6395_v59 = vpop.f32.mrb[2].mxu0  ;;  %v13497_v55 = vld [vmem:[%s23256_s5 + $0x3e0] sm:$0x33]  ;;  %v13561_v34 = vld [vmem:[%s23256_s5 + $0x4a8] sm:$0x33] }
 0x5da   : > { %23449 = vst [vmem:[#allocation17_spill] sm:$0xff] %v20990_v36  ;;  %v6438_v16 = vpack.c.bf16 %v6395_v59, %v6392_v61  ;;  %v6069_v26 = vpop.f32.mrb[243].mxu1  ;;  %v6397_v46 = vpop.f32.mrb[3].mxu0  ;;  %v15588_v59 = vld [vmem:[%s23256_s5 + $0x3d0] ss:$8 sps:$4 sm:$0xff]  }
 0x5dc   : > { %7383 = vmatmul.mubr.bf16.gmra.mrb[92].mxu1 %v15576_v47  ;;  %7711 = vmatmul.mubr.bf16.gmra.mrb[108].mxu0 %v15579_v57 }
 0x5dd   : > { %13534 = vmatprep.mubr.msk.bf16.mxu1 %vm5922_vm6, %v15584_v19  ;;  %13598 = vmatprep.mubr.msk.bf16.mxu0 %vm5922_vm6, %v15587_v42 }
 0x5de   : > { %8768 = vrot.lane.b32.xlu0 %v6438_v16, %s23347_s19  ;;  %v15591_v16 = vld [vmem:[%s23256_s5 + $0x498] ss:$8 sps:$4 sm:$0xff]  }
 0x5df   : > { %v20997_v23 = vpop.f32.mrb[244].mxu1  ;;  %v6400_v24 = vpop.f32.mrb[4].mxu0 }
 0x5e0   : > { %23450 = vst [vmem:[#allocation13_spill] sm:$0xff] %v20997_v23  ;;  %v6074_v32 = vpop.f32.mrb[245].mxu1  ;;  %v6402_v1 = vpop.f32.mrb[5].mxu0 }
 0x5e1   : > { %v21011_v60 = vpop.f32.mrb[246].mxu1  ;;  %v6403_v17 = vpop.f32.mrb[6].mxu0 }
 0x5e2   : > { %23451 = vst [vmem:[#allocation11_spill] sm:$0xff] %v21011_v60  ;;  %v6439_v61 = vpack.c.bf16 %v6403_v17, %v6400_v24  ;;  %v6077_v47 = vpop.f32.mrb[247].mxu1  ;;  %v6405_v57 = vpop.f32.mrb[7].mxu0  ;;  %v13523_v24 = vcombine.high %v13497_v55, %v13497_v55  ;;  %v15721_v60 = vld [vmem:[%s23257_s6 + $0x20] sm:$0xff]  }
 0x5e3   : > { %v13522_v57 = vcombine.low %v13497_v55, %v13497_v55 }
 0x5e4   : > { %7391 = vmatmul.mubr.bf16.gmra.mrb[96].mxu1 %v15582_v51  ;;  %7719 = vmatmul.mubr.bf16.gmra.mrb[112].mxu0 %v15585_v37  ;;  %v13587_v51 = vcombine.high %v13561_v34, %v13561_v34 }
 0x5e5   : > { %13535 = vmatprep.mubr.msk.bf16.mxu1 %vm5922_vm6, %v15590_v62  ;;  %13599 = vmatprep.mubr.msk.bf16.mxu0 %vm5922_vm6, %v15593_v20 }
 0x5e6   : > { %8770 = vrot.lane.b32.xlu0 %v6439_v61, %s23347_s19 }
 0x5e7   : > { %v21024_v19 = vpop.f32.mrb[248].mxu1  ;;  %v6408_v42 = vpop.f32.mrb[8].mxu0 }
 0x5e8   : > { %v6082_v26 = vpop.f32.mrb[249].mxu1  ;;  %v6410_v46 = vpop.f32.mrb[9].mxu0 }
 0x5e9   : > { %v21032_v37 = vpop.f32.mrb[250].mxu1  ;;  %v6411_v32 = vpop.f32.mrb[10].mxu0  ;;  %v13586_v26 = vcombine.low %v13561_v34, %v13561_v34 }
 0x5ea   : > { %v6112_v1 = vpack.c.bf16 %v21032_v37, %v21024_v19  ;;  %v6440_v62 = vpack.c.bf16 %v6411_v32, %v6408_v42  ;;  %v6085_v20 = vpop.f32.mrb[251].mxu1  ;;  %v6413_v17 = vpop.f32.mrb[11].mxu0  ;;  %v15600_v42 = vld [vmem:[%s23256_s5 + $0x4b4] ss:$8 sps:$4 sm:$0xff]   ;;  %v15682_v19 = vld [vmem:[%s23256_s5 + $0x664] ss:$8 sps:$4 sm:$0xff]  }
 0x5eb   : > { %v15598_v20 = vld [vmem:[%s23256_s5 + $0x4b0] ss:$8 sps:$4 sm:$0xff]  }
 0x5ec   : > { %7399 = vmatmul.mubr.bf16.gmra.mrb[100].mxu1 %v15588_v59  ;;  %7727 = vmatmul.mubr.bf16.gmra.mrb[116].mxu0 %v15591_v16  ;;  %v15603_v59 = vld [vmem:[%s23256_s5 + $0x57c] ss:$8 sps:$4 sm:$0xff]   ;;  %v15601_v17 = vld [vmem:[%s23256_s5 + $0x578] ss:$8 sps:$4 sm:$0xff]  }
 0x5ed   : > { %13536 = vmatprep.mubr.msk.bf16.mxu1 %vm5922_vm6, %v13523_v24  ;;  %13600 = vmatprep.mubr.msk.bf16.mxu0 %vm5922_vm6, %v13587_v51 }
 0x5ee   : > { %8772 = vrot.lane.b32.xlu0 %v6440_v62, %s23347_s19 }
 0x5ef   : > { %v21039_v61 = vpop.f32.mrb[252].mxu1  ;;  %v6416_v47 = vpop.f32.mrb[12].mxu0 }
 0x5f0   : > { %v6090_v46 = vpop.f32.mrb[253].mxu1  ;;  %v6418_v11 = vpop.f32.mrb[13].mxu0 }
 0x5f1   : > { %v21047_v16 = vpop.f32.mrb[254].mxu1  ;;  %v6419_v24 = vpop.f32.mrb[14].mxu0  ;;  %v15606_v46 = vld [vmem:[%s23256_s5 + $0x4c4] ss:$8 sps:$4 sm:$0xff]  }
 0x5f2   : > { %v6113_v51 = vpack.c.bf16 %v21047_v16, %v21039_v61  ;;  %v6441_v32 = vpack.c.bf16 %v6419_v24, %v6416_v47  ;;  %v6093_v62 = vpop.f32.mrb[255].mxu1  ;;  %v6421_v55 = vpop.f32.mrb[15].mxu0  ;;  %v15609_v24 = vld [vmem:[%s23256_s5 + $0x58c] ss:$8 sps:$4 sm:$0xff]  }
 0x5f4   : > { %7407 = vmatmul.mubr.bf16.gmra.mrb[104].mxu1 %v13522_v57  ;;  %7735 = vmatmul.mubr.bf16.gmra.mrb[120].mxu0 %v13586_v26 }
 0x5f5   : > { %13652 = vmatprep.mubr.msk.bf16.mxu1 %vm5922_vm6, %v15600_v42  ;;  %13716 = vmatprep.mubr.msk.bf16.mxu0 %vm5922_vm6, %v15603_v59 }
 0x5f6   : > { %8774 = vrot.lane.b32.xlu0 %v6441_v32, %s23347_s19 }
 0x5f7   : > { %v21054_v11 = vpop.f32.mrb[0].mxu1  ;;  %v6424_v34 = vpop.f32.mrb[16].mxu0 }
 0x5f8   : > { %v6442_v47 = vpack.c.bf16 %v6424_v34, %v6424_v34  ;;  %v6098_v57 = vpop.f32.mrb[1].mxu1  ;;  %v6426_v26 = vpop.f32.mrb[17].mxu0  ;;  %v6114_v16 = vpack.c.bf16 %v21054_v11, %v21054_v11  ;;  %v15683_v11 = vld [vmem:[%s23256_s5 + $0x670] ss:$8 sps:$4 sm:$0xff]  }
 0x5f9   : > { %v6099_v42 = vpop.f32.mrb[2].mxu1  ;;  %v6427_v59 = vpop.f32.mrb[18].mxu0  ;;  %v15604_v57 = vld [vmem:[%s23256_s5 + $0x4c0] ss:$8 sps:$4 sm:$0xff]  }
 0x5fa   : > { %v6100_v32 = vpop.f32.mrb[3].mxu1  ;;  %v6428_v62 = vpop.f32.mrb[19].mxu0  ;;  %8776 = vrot.lane.b32.xlu0 %v6442_v47, %s23347_s19  ;;  %v15607_v47 = vld [vmem:[%s23256_s5 + $0x588] ss:$8 sps:$4 sm:$0xff]   ;;  %v15615_v42 = vld [vmem:[%s23256_s5 + $0x59c] ss:$8 sps:$4 sm:$0xff]  }
 0x5fc   : > { %7967 = vmatmul.mubr.bf16.vlgmr.msra.gmra.mrb[108].mxu1 %v15598_v20  ;;  %8295 = vmatmul.mubr.bf16.vlgmr.msra.gmra.mrb[124].mxu0 %v15601_v17 }
 0x5fd   : > { %8591 = vmatpush1.bf16.msra.mxu1 %v20185_v49  ;;  %13653 = vmatprep.mubr.msk.bf16.mxu1 %vm5922_vm6, %v15606_v46  ;;  %v15612_v49 = vld [vmem:[%s23256_s5 + $0x4d4] ss:$8 sps:$4 sm:$0xff]  }
 0x5fe   : > { %8592 = vmatprep.subr.bf16.mxu1 %v23443_v18  ;;  %13717 = vmatprep.mubr.msk.bf16.mxu0 %vm5922_vm6, %v15609_v24 }
 0x5ff   : > { %v6656_v55 = vpop.f32.mrb[4].mxu1  ;;  %v6984_v34 = vpop.f32.mrb[20].mxu0 }
 0x600   : > { %v6658_v20 = vpop.f32.mrb[5].mxu1  ;;  %v6986_v17 = vpop.f32.mrb[21].mxu0 }
 0x601   : > { %8593 = vmatpush1.bf16.msra.mxu1 %v20193_v12  ;;  %v6659_v26 = vpop.f32.mrb[6].mxu1  ;;  %v6987_v46 = vpop.f32.mrb[22].mxu0 }
 0x602   : > { %8594 = vmatprep.subr.bf16.mxu1 %v23443_v18  ;;  %v6758_v59 = vpack.c.bf16 %v6659_v26, %v6656_v55  ;;  %v7086_v24 = vpack.c.bf16 %v6987_v46, %v6984_v34  ;;  %v6661_v32 = vpop.f32.mrb[7].mxu1  ;;  %v6989_v62 = vpop.f32.mrb[23].mxu0  ;;  %v15610_v55 = vld [vmem:[%s23256_s5 + $0x4d0] ss:$8 sps:$4 sm:$0xff]   ;;  %v15621_v26 = vld [vmem:[%s23256_s5 + $0x5ac] ss:$8 sps:$4 sm:$0xff]  }
 0x603   : > { %v15613_v34 = vld [vmem:[%s23256_s5 + $0x598] ss:$8 sps:$4 sm:$0xff]  }
 0x604   : > { %7975 = vmatmul.mubr.bf16.gmra.mrb[112].mxu1 %v15604_v57  ;;  %8303 = vmatmul.mubr.bf16.gmra.mrb[128].mxu0 %v15607_v47  ;;  %v15618_v47 = vld [vmem:[%s23256_s5 + $0x4e4] ss:$8 sps:$4 sm:$0xff]  }
 0x605   : > { %8595 = vmatpush1.bf16.msra.mxu1 %v20201_v13  ;;  %13654 = vmatprep.mubr.msk.bf16.mxu1 %vm5922_vm6, %v15612_v49 }
 0x606   : > { %8596 = vmatprep.subr.bf16.mxu1 %v23443_v18  ;;  %13718 = vmatprep.mubr.msk.bf16.mxu0 %vm5922_vm6, %v15615_v42 }
 0x607   : > { %v6664_v12 = vpop.f32.mrb[8].mxu1  ;;  %v6992_v20 = vpop.f32.mrb[24].mxu0  ;;  %8791 = vrot.lane.b32.xlu0 %v6758_v59, %s23339_s22 }
 0x608   : > { %v6666_v57 = vpop.f32.mrb[9].mxu1  ;;  %v6994_v13 = vpop.f32.mrb[25].mxu0 }
 0x609   : > { %8597 = vmatpush1.bf16.msra.mxu1 %v20209_v30  ;;  %v6667_v17 = vpop.f32.mrb[10].mxu1  ;;  %v6995_v49 = vpop.f32.mrb[26].mxu0  ;;  %v15627_v13 = vld [vmem:[%s23256_s5 + $0x5bc] ss:$8 sps:$4 sm:$0xff]  }
 0x60a   : > { %8598 = vmatprep.subr.bf16.mxu1 %v23443_v18  ;;  %v6759_v46 = vpack.c.bf16 %v6667_v17, %v6664_v12  ;;  %v7087_v42 = vpack.c.bf16 %v6995_v49, %v6992_v20  ;;  %v6669_v59 = vpop.f32.mrb[11].mxu1  ;;  %v6997_v32 = vpop.f32.mrb[27].mxu0  ;;  %v15616_v12 = vld [vmem:[%s23256_s5 + $0x4e0] ss:$8 sps:$4 sm:$0xff]  }
 0x60b   : > { %8830 = vrot.lane.b32.xlu0 %v7086_v24, %s23338_s20  ;;  %v15619_v24 = vld [vmem:[%s23256_s5 + $0x5a8] ss:$8 sps:$4 sm:$0xff]  }
 0x60c   : > { %7983 = vmatmul.mubr.bf16.gmra.mrb[116].mxu1 %v15610_v55  ;;  %8311 = vmatmul.mubr.bf16.gmra.mrb[132].mxu0 %v15613_v34  ;;  %v15624_v55 = vld [vmem:[%s23256_s5 + $0x4f4] ss:$8 sps:$4 sm:$0xff]  }
 0x60d   : > { %8599 = vmatpush1.bf16.msra.mxu1 %v20217_v45  ;;  %13655 = vmatprep.mubr.msk.bf16.mxu1 %vm5922_vm6, %v15618_v47 }
 0x60e   : > { %8600 = vmatprep.subr.bf16.mxu1 %v23443_v18  ;;  %13719 = vmatprep.mubr.msk.bf16.mxu0 %vm5922_vm6, %v15621_v26 }
 0x60f   : > { %v6672_v30 = vpop.f32.mrb[12].mxu1  ;;  %v7000_v62 = vpop.f32.mrb[28].mxu0  ;;  %8793 = vrot.lane.b32.xlu0 %v6759_v46, %s23339_s22 }
 0x610   : > { %v6674_v20 = vpop.f32.mrb[13].mxu1  ;;  %v7002_v45 = vpop.f32.mrb[29].mxu0 }
 0x611   : > { %8601 = vmatpush1.bf16.msra.mxu1 %v20225_v2  ;;  %v6675_v34 = vpop.f32.mrb[14].mxu1  ;;  %v7003_v57 = vpop.f32.mrb[30].mxu0  ;;  %v15633_v20 = vld [vmem:[%s23256_s5 + $0x5cc] ss:$8 sps:$4 sm:$0xff]  }
 0x612   : > { %8602 = vmatprep.subr.bf16.mxu1 %v23443_v18  ;;  %v6760_v47 = vpack.c.bf16 %v6675_v34, %v6672_v30  ;;  %v7088_v17 = vpack.c.bf16 %v7003_v57, %v7000_v62  ;;  %v6677_v49 = vpop.f32.mrb[15].mxu1  ;;  %v7005_v26 = vpop.f32.mrb[31].mxu0  ;;  %v15630_v62 = vld [vmem:[%s23256_s5 + $0x504] ss:$8 sps:$4 sm:$0xff]  }
 0x613   : > { %8832 = vrot.lane.b32.xlu0 %v7087_v42, %s23338_s20  ;;  %v21131_v2 = vpop.permute.xlu0 %8752  ;;  %v15622_v42 = vld [vmem:[%s23256_s5 + $0x4f0] ss:$8 sps:$4 sm:$0xff]  }
 0x614   : > { %7991 = vmatmul.mubr.bf16.gmra.mrb[120].mxu1 %v15616_v12  ;;  %8319 = vmatmul.mubr.bf16.gmra.mrb[136].mxu0 %v15619_v24 }
 0x615   : > { %8603 = vmatpush1.bf16.msra.mxu1 %v20233_v3  ;;  %13656 = vmatprep.mubr.msk.bf16.mxu1 %vm5922_vm6, %v15624_v55  ;;  %v15625_v3 = vld [vmem:[%s23256_s5 + $0x5b8] ss:$8 sps:$4 sm:$0xff]  }
 0x616   : > { %8604 = vmatprep.subr.bf16.mxu1 %v23443_v18  ;;  %13720 = vmatprep.mubr.msk.bf16.mxu0 %vm5922_vm6, %v15627_v13 }
 0x617   : > { %v6680_v46 = vpop.f32.mrb[16].mxu1  ;;  %v7008_v59 = vpop.f32.mrb[32].mxu0  ;;  %8795 = vrot.lane.b32.xlu0 %v6760_v47, %s23339_s22 }
 0x618   : > { %v6682_v32 = vpop.f32.mrb[17].mxu1  ;;  %v7010_v30 = vpop.f32.mrb[33].mxu0 }
 0x619   : > { %8605 = vmatpush1.bf16.msra.mxu1 %v20241_v21  ;;  %v6683_v12 = vpop.f32.mrb[18].mxu1  ;;  %v7011_v24 = vpop.f32.mrb[34].mxu0 }
 0x61a   : > { %8606 = vmatprep.subr.bf16.mxu1 %v23443_v18  ;;  %v6761_v45 = vpack.c.bf16 %v6683_v12, %v6680_v46  ;;  %v7089_v55 = vpack.c.bf16 %v7011_v24, %v7008_v59  ;;  %v6685_v34 = vpop.f32.mrb[19].mxu1  ;;  %v7013_v57 = vpop.f32.mrb[35].mxu0  ;;  %v15636_v46 = vld [vmem:[%s23256_s5 + $0x514] ss:$8 sps:$4 sm:$0xff]  }
 0x61b   : > { %8834 = vrot.lane.b32.xlu0 %v7088_v17, %s23338_s20  ;;  %v21153_v21 = vpop.permute.xlu0 %8754  ;;  %v15628_v17 = vld [vmem:[%s23256_s5 + $0x500] ss:$8 sps:$4 sm:$0xff]   ;;  %v15642_v57 = vld [vmem:[%s23256_s5 + $0x524] ss:$8 sps:$4 sm:$0xff]  }
 0x61c   : > { %7999 = vmatmul.mubr.bf16.gmra.mrb[124].mxu1 %v15622_v42  ;;  %8327 = vmatmul.mubr.bf16.gmra.mrb[140].mxu0 %v15625_v3  ;;  %v15639_v3 = vld [vmem:[%s23256_s5 + $0x5dc] ss:$8 sps:$4 sm:$0xff]  }
 0x61d   : > { %8607 = vmatpush1.bf16.msra.mxu1 %v20249_v14  ;;  %13657 = vmatprep.mubr.msk.bf16.mxu1 %vm5922_vm6, %v15630_v62  ;;  %v15631_v14 = vld [vmem:[%s23256_s5 + $0x5c8] ss:$8 sps:$4 sm:$0xff]  }
 0x61e   : > { %8608 = vmatprep.subr.bf16.mxu1 %v23443_v18  ;;  %13721 = vmatprep.mubr.msk.bf16.mxu0 %vm5922_vm6, %v15633_v20 }
 0x61f   : > { %v6688_v13 = vpop.f32.mrb[20].mxu1  ;;  %v7016_v47 = vpop.f32.mrb[36].mxu0  ;;  %8797 = vrot.lane.b32.xlu0 %v6761_v45, %s23339_s22  ;;  %v15634_v45 = vld [vmem:[%s23256_s5 + $0x510] ss:$8 sps:$4 sm:$0xff]  }
 0x620   : > { %v6690_v49 = vpop.f32.mrb[21].mxu1  ;;  %v7018_v26 = vpop.f32.mrb[37].mxu0 }
 0x621   : > { %8609 = vmatpush1.bf16.msra.mxu1 %v20257_v63  ;;  %v6691_v59 = vpop.f32.mrb[22].mxu1  ;;  %v7019_v42 = vpop.f32.mrb[38].mxu0 }
 0x622   : > { %8610 = vmatprep.subr.bf16.mxu1 %v23443_v18  ;;  %v6762_v32 = vpack.c.bf16 %v6691_v59, %v6688_v13  ;;  %v7090_v30 = vpack.c.bf16 %v7019_v42, %v7016_v47  ;;  %v7021_v62 = vpop.f32.mrb[39].mxu0  ;;  %v6693_v12 = vpop.f32.mrb[23].mxu1 }
 0x623   : > { %8836 = vrot.lane.b32.xlu0 %v7089_v55, %s23338_s20  ;;  %v21175_v63 = vpop.permute.xlu0 %8756  ;;  %v15648_v62 = vld [vmem:[%s23256_s5 + $0x534] ss:$8 sps:$4 sm:$0xff]  }
 0x624   : > { %8007 = vmatmul.mubr.bf16.gmra.mrb[128].mxu1 %v15628_v17  ;;  %8335 = vmatmul.mubr.bf16.gmra.mrb[144].mxu0 %v15631_v14  ;;  %v15645_v17 = vld [vmem:[%s23256_s5 + $0x5ec] ss:$8 sps:$4 sm:$0xff]   ;;  %v15651_v12 = vld [vmem:[%s23256_s5 + $0x5fc] ss:$8 sps:$4 sm:$0xff]  }
 0x625   : > { %8611 = vmatpush1.bf16.msra.mxu1 %v20265_v52  ;;  %13658 = vmatprep.mubr.msk.bf16.mxu1 %vm5922_vm6, %v15636_v46  ;;  %v15637_v52 = vld [vmem:[%s23256_s5 + $0x5d8] ss:$8 sps:$4 sm:$0xff]  }
 0x626   : > { %8612 = vmatprep.subr.bf16.mxu1 %v23443_v18  ;;  %13722 = vmatprep.mubr.msk.bf16.mxu0 %vm5922_vm6, %v15639_v3  ;;  %v15640_v3 = vld [vmem:[%s23256_s5 + $0x520] ss:$8 sps:$4 sm:$0xff]  }
 0x627   : > { %v6696_v24 = vpop.f32.mrb[24].mxu1  ;;  %v7024_v20 = vpop.f32.mrb[40].mxu0  ;;  %8799 = vrot.lane.b32.xlu0 %v6762_v32, %s23339_s22 }
 0x628   : > { %v6698_v55 = vpop.f32.mrb[25].mxu1  ;;  %v7026_v34 = vpop.f32.mrb[41].mxu0 }
 0x629   : > { %8613 = vmatpush1.bf16.msra.mxu1 %v20273_v28  ;;  %v6699_v13 = vpop.f32.mrb[26].mxu1  ;;  %v7027_v47 = vpop.f32.mrb[42].mxu0 }
 0x62a   : > { %8614 = vmatprep.subr.bf16.mxu1 %v23443_v18  ;;  %v6763_v14 = vpack.c.bf16 %v6699_v13, %v6696_v24  ;;  %v7091_v49 = vpack.c.bf16 %v7027_v47, %v7024_v20  ;;  %v7029_v26 = vpop.f32.mrb[43].mxu0  ;;  %v6701_v46 = vpop.f32.mrb[27].mxu1 }
 0x62b   : > { %8838 = vrot.lane.b32.xlu0 %v7090_v30, %s23338_s20  ;;  %v21196_v28 = vpop.permute.xlu0 %8758  ;;  %v15654_v46 = vld [vmem:[%s23256_s5 + $0x544] ss:$8 sps:$4 sm:$0xff]  }
 0x62c   : > { %8015 = vmatmul.mubr.bf16.gmra.mrb[132].mxu1 %v15634_v45  ;;  %8343 = vmatmul.mubr.bf16.gmra.mrb[148].mxu0 %v15637_v52 }
 0x62d   : > { %8615 = vmatpush1.bf16.msra.mxu1 %v20281_v29  ;;  %13659 = vmatprep.mubr.msk.bf16.mxu1 %vm5922_vm6, %v15642_v57  ;;  %v15643_v29 = vld [vmem:[%s23256_s5 + $0x5e8] ss:$8 sps:$4 sm:$0xff]  }
 0x62e   : > { %13723 = vmatprep.mubr.msk.bf16.mxu0 %vm5922_vm6, %v15645_v17  ;;  %14880 = vmatprep.subr.bf16.mxu1 %v23307_v4  ;;  %v15646_v17 = vld [vmem:[%s23256_s5 + $0x530] ss:$8 sps:$4 sm:$0xff]  }
 0x62f   : > { %v6704_v59 = vpop.f32.mrb[28].mxu1  ;;  %v7032_v42 = vpop.f32.mrb[44].mxu0  ;;  %8801 = vrot.lane.b32.xlu0 %v6763_v14, %s23339_s22  ;;  %v15649_v14 = vld [vmem:[%s23256_s5 + $0x5f8] ss:$8 sps:$4 sm:$0xff]  }
 0x630   : > { %v6706_v32 = vpop.f32.mrb[29].mxu1  ;;  %v7034_v30 = vpop.f32.mrb[45].mxu0 }
 0x631   : > { %v6707_v24 = vpop.f32.mrb[30].mxu1  ;;  %v7035_v20 = vpop.f32.mrb[46].mxu0 }
 0x632   : > { %v6764_v45 = vpack.c.bf16 %v6707_v24, %v6704_v59  ;;  %v7092_v52 = vpack.c.bf16 %v7035_v20, %v7032_v42  ;;  %v7037_v55 = vpop.f32.mrb[47].mxu0  ;;  %v6709_v34 = vpop.f32.mrb[31].mxu1  ;;  %v15657_v59 = vld [vmem:[%s23256_s5 + $0x60c] ss:$8 sps:$4 sm:$0xff]  }
 0x633   : > { %8840 = vrot.lane.b32.xlu0 %v7091_v49, %s23338_s20  ;;  %v21215_v57 = vpop.permute.xlu0 %8760 }
 0x634   : > { %8023 = vmatmul.mubr.bf16.gmra.mrb[136].mxu1 %v15640_v3  ;;  %8351 = vmatmul.mubr.bf16.gmra.mrb[152].mxu0 %v15643_v29 }
 0x635   : > { %13660 = vmatprep.mubr.msk.bf16.mxu1 %vm5922_vm6, %v15648_v62  ;;  %13724 = vmatprep.mubr.msk.bf16.mxu0 %vm5922_vm6, %v15651_v12 }
 0x637   : > { %v6712_v13 = vpop.f32.mrb[32].mxu1  ;;  %v7040_v47 = vpop.f32.mrb[48].mxu0  ;;  %8803 = vrot.lane.b32.xlu0 %v6764_v45, %s23339_s22  ;;  %v15652_v45 = vld [vmem:[%s23256_s5 + $0x540] ss:$8 sps:$4 sm:$0xff]  }
 0x638   : > { %v6714_v49 = vpop.f32.mrb[33].mxu1  ;;  %v7042_v26 = vpop.f32.mrb[49].mxu0 }
 0x639   : > { %v6715_v42 = vpop.f32.mrb[34].mxu1  ;;  %v7043_v3 = vpop.f32.mrb[50].mxu0 }
 0x63a   : > { %v6765_v29 = vpack.c.bf16 %v6715_v42, %v6712_v13  ;;  %v7093_v32 = vpack.c.bf16 %v7043_v3, %v7040_v47  ;;  %v7045_v30 = vpop.f32.mrb[51].mxu0  ;;  %v6717_v62 = vpop.f32.mrb[35].mxu1  ;;  %v15660_v13 = vld [vmem:[%s23256_s5 + $0x554] ss:$8 sps:$4 sm:$0xff]  }
 0x63b   : > { %8842 = vrot.lane.b32.xlu0 %v7092_v52, %s23338_s20  ;;  %v21233_v12 = vpop.permute.xlu0 %8762  ;;  %v15655_v52 = vld [vmem:[%s23256_s5 + $0x608] ss:$8 sps:$4 sm:$0xff]   ;;  %v15663_v47 = vld [vmem:[%s23256_s5 + $0x61c] ss:$8 sps:$4 sm:$0xff]  }
 0x63c   : > { %8031 = vmatmul.mubr.bf16.gmra.mrb[140].mxu1 %v15646_v17  ;;  %8359 = vmatmul.mubr.bf16.gmra.mrb[156].mxu0 %v15649_v14  ;;  %v15658_v30 = vld [vmem:[%s23256_s5 + $0x550] ss:$8 sps:$4 sm:$0xff]  }
 0x63d   : > { %13661 = vmatprep.mubr.msk.bf16.mxu1 %vm5922_vm6, %v15654_v46  ;;  %13725 = vmatprep.mubr.msk.bf16.mxu0 %vm5922_vm6, %v15657_v59 }
 0x63f   : > { %v6720_v24 = vpop.f32.mrb[36].mxu1  ;;  %v7048_v20 = vpop.f32.mrb[52].mxu0  ;;  %8805 = vrot.lane.b32.xlu0 %v6765_v29, %s23339_s22 }
 0x640   : > { %v6722_v55 = vpop.f32.mrb[37].mxu1  ;;  %v7050_v34 = vpop.f32.mrb[53].mxu0 }
 0x641   : > { %v6723_v17 = vpop.f32.mrb[38].mxu1  ;;  %v7051_v14 = vpop.f32.mrb[54].mxu0 }
 0x642   : > { %v6766_v49 = vpack.c.bf16 %v6723_v17, %v6720_v24  ;;  %v7094_v26 = vpack.c.bf16 %v7051_v14, %v7048_v20  ;;  %v7053_v46 = vpop.f32.mrb[55].mxu0  ;;  %v6725_v59 = vpop.f32.mrb[39].mxu1  ;;  %v15666_v20 = vld [vmem:[%s23256_s5 + $0x564] ss:$8 sps:$4 sm:$0xff]   ;;  %v13625_v14 = vld [vmem:[%s23256_s5 + $0x570] sm:$0x33] }
 0x643   : > { %8844 = vrot.lane.b32.xlu0 %v7093_v32, %s23338_s20  ;;  %v21251_v42 = vpop.permute.xlu0 %8764  ;;  %v15661_v32 = vld [vmem:[%s23256_s5 + $0x618] ss:$8 sps:$4 sm:$0xff]   ;;  %v13650_v56 = vcombine.low %v13625_v14, %v13625_v14 }
 0x644   : > { %8039 = vmatmul.mubr.bf16.gmra.mrb[144].mxu1 %v15652_v45  ;;  %8367 = vmatmul.mubr.bf16.gmra.mrb[160].mxu0 %v15655_v52  ;;  %23452 = vst [vmem:[#allocation14_spill] sm:$0xff] %v21251_v42  ;;  %v15669_v45 = vld [vmem:[%s23256_s5 + $0x62c] ss:$8 sps:$4 sm:$0xff]  }
 0x645   : > { %13662 = vmatprep.mubr.msk.bf16.mxu1 %vm5922_vm6, %v15660_v13  ;;  %13726 = vmatprep.mubr.msk.bf16.mxu0 %vm5922_vm6, %v15663_v47 }
 0x647   : > { %v6728_v3 = vpop.f32.mrb[40].mxu1  ;;  %v7056_v29 = vpop.f32.mrb[56].mxu0  ;;  %8807 = vrot.lane.b32.xlu0 %v6766_v49, %s23339_s22  ;;  %v13689_v49 = vld [vmem:[%s23256_s5 + $0x638] sm:$0x33] }
 0x648   : > { %v6730_v62 = vpop.f32.mrb[41].mxu1  ;;  %v7058_v24 = vpop.f32.mrb[57].mxu0  ;;  %v13714_v33 = vcombine.low %v13689_v49, %v13689_v49 }
 0x649   : > { %v6731_v52 = vpop.f32.mrb[42].mxu1  ;;  %v7059_v55 = vpop.f32.mrb[58].mxu0  ;;  %v13651_v62 = vcombine.high %v13625_v14, %v13625_v14  ;;  %v13715_v24 = vcombine.high %v13689_v49, %v13689_v49 }
 0x64a   : > { %v6767_v34 = vpack.c.bf16 %v6731_v52, %v6728_v3  ;;  %v7095_v13 = vpack.c.bf16 %v7059_v55, %v7056_v29  ;;  %v7061_v47 = vpop.f32.mrb[59].mxu0  ;;  %v6733_v17 = vpop.f32.mrb[43].mxu1  ;;  %v15667_v29 = vld [vmem:[%s23256_s5 + $0x628] ss:$8 sps:$4 sm:$0xff]  }
 0x64b   : > { %8846 = vrot.lane.b32.xlu0 %v7094_v26, %s23338_s20  ;;  %v21275_v46 = vpop.permute.xlu0 %8766  ;;  %v15664_v26 = vld [vmem:[%s23256_s5 + $0x560] ss:$8 sps:$4 sm:$0xff]  }
 0x64c   : > { %8047 = vmatmul.mubr.bf16.gmra.mrb[148].mxu1 %v15658_v30  ;;  %8375 = vmatmul.mubr.bf16.gmra.mrb[164].mxu0 %v15661_v32  ;;  %23453 = vst [vmem:[#allocation10_spill] sm:$0xff] %v21275_v46 }
 0x64d   : > { %13663 = vmatprep.mubr.msk.bf16.mxu1 %vm5922_vm6, %v15666_v20  ;;  %13727 = vmatprep.mubr.msk.bf16.mxu0 %vm5922_vm6, %v15669_v45 }
 0x64f   : > { %v6736_v59 = vpop.f32.mrb[44].mxu1  ;;  %v7064_v3 = vpop.f32.mrb[60].mxu0  ;;  %8809 = vrot.lane.b32.xlu0 %v6767_v34, %s23339_s22 }
 0x650   : > { %v6738_v30 = vpop.f32.mrb[45].mxu1  ;;  %v7066_v32 = vpop.f32.mrb[61].mxu0 }
 0x651   : > { %v6739_v20 = vpop.f32.mrb[46].mxu1  ;;  %v7067_v45 = vpop.f32.mrb[62].mxu0 }
 0x652   : > { %v6768_v52 = vpack.c.bf16 %v6739_v20, %v6736_v59  ;;  %v7096_v55 = vpack.c.bf16 %v7067_v45, %v7064_v3  ;;  %v7069_v47 = vpop.f32.mrb[63].mxu0  ;;  %v6741_v17 = vpop.f32.mrb[47].mxu1 }
 0x653   : > { %8848 = vrot.lane.b32.xlu0 %v7095_v13, %s23338_s20  ;;  %v21287_v34 = vpop.permute.xlu0 %8768  ;;  %v15676_v13 = vld [vmem:[%s23256_s5 + $0x644] ss:$8 sps:$4 sm:$0xff]   ;;  %v15674_v47 = vld [vmem:[%s23256_s5 + $0x640] ss:$8 sps:$4 sm:$0xff]  }
 0x654   : > { %8055 = vmatmul.mubr.bf16.gmra.mrb[152].mxu1 %v15664_v26  ;;  %8383 = vmatmul.mubr.bf16.gmra.mrb[168].mxu0 %v15667_v29  ;;  %23454 = vst [vmem:[#allocation20_spill] sm:$0xff] %v21287_v34 }
 0x655   : > { %13664 = vmatprep.mubr.msk.bf16.mxu1 %vm5922_vm6, %v13651_v62  ;;  %13728 = vmatprep.mubr.msk.bf16.mxu0 %vm5922_vm6, %v13715_v24 }
 0x657   : > { %v6744_v30 = vpop.f32.mrb[48].mxu1  ;;  %v7072_v32 = vpop.f32.mrb[64].mxu0  ;;  %8811 = vrot.lane.b32.xlu0 %v6768_v52, %s23339_s22 }
 0x658   : > { %v6746_v59 = vpop.f32.mrb[49].mxu1  ;;  %v7074_v3 = vpop.f32.mrb[65].mxu0 }
 0x659   : > { %v6747_v26 = vpop.f32.mrb[50].mxu1  ;;  %v7075_v29 = vpop.f32.mrb[66].mxu0 }
 0x65a   : > { %v6769_v20 = vpack.c.bf16 %v6747_v26, %v6744_v30  ;;  %v7097_v62 = vpack.c.bf16 %v7075_v29, %v7072_v32  ;;  %v7077_v45 = vpop.f32.mrb[67].mxu0  ;;  %v6749_v24 = vpop.f32.mrb[51].mxu1 }
 0x65b   : > { %8850 = vrot.lane.b32.xlu0 %v7096_v55, %s23338_s20  ;;  %v21295_v14 = vpop.permute.xlu0 %8770  ;;  %v15679_v55 = vld [vmem:[%s23256_s5 + $0x654] ss:$8 sps:$4 sm:$0xff]  }
 0x65c   : > { %8063 = vmatmul.mubr.bf16.gmra.mrb[156].mxu1 %v13650_v56  ;;  %8391 = vmatmul.mubr.bf16.gmra.mrb[172].mxu0 %v13714_v33  ;;  %23455 = vst [vmem:[#allocation21_spill] sm:$0xff] %v21295_v14  ;;  %v15722_v14 = vld [vmem:[%s23257_s6 + $0x68] sm:$0xff]  }
 0x65d   : > { %13780 = vmatprep.mubr.msk.bf16.mxu1 %vm5922_vm6, %v15676_v13 }
 0x65f   : > { %v6752_v49 = vpop.f32.mrb[52].mxu1  ;;  %v7080_v52 = vpop.f32.mrb[68].mxu0  ;;  %8813 = vrot.lane.b32.xlu0 %v6769_v20, %s23339_s22 }
 0x660   : > { %v6754_v17 = vpop.f32.mrb[53].mxu1  ;;  %v7082_v30 = vpop.f32.mrb[69].mxu0  ;;  %v6770_v26 = vpack.c.bf16 %v6752_v49, %v6752_v49  ;;  %v7098_v37 = vpack.c.bf16 %v7080_v52, %v7080_v52  ;;  %v15701_v49 = vld [vmem:[%s23256_s5 + $0x6d0] ss:$8 sps:$4 sm:$0xff]  }
 0x661   : > { %v6755_v56 = vpop.f32.mrb[54].mxu1  ;;  %v7083_v33 = vpop.f32.mrb[70].mxu0 }
 0x662   : > { %v7084_v32 = vpop.f32.mrb[71].mxu0  ;;  %v6756_v59 = vpop.f32.mrb[55].mxu1 }
 0x663   : > { %8852 = vrot.lane.b32.xlu0 %v7097_v62, %s23338_s20  ;;  %v8773_v3 = vpop.permute.xlu0 %8772  ;;  %v15677_v62 = vld [vmem:[%s23256_s5 + $0x650] ss:$8 sps:$4 sm:$0xff]   ;;  %v15680_v59 = vld [vmem:[%s23256_s5 + $0x660] ss:$8 sps:$4 sm:$0xff]  }
 0x664   : > { %8623 = vmatmul.mubr.bf16.vlgmr.msra.gmra.mrb[160].mxu1 %v15674_v47  ;;  %v21309_v13 = vsel %vm1344_vm0, %v6112_v1, %v8773_v3 }
 0x665   : > { %23456 = vst [vmem:[#allocation22_spill] sm:$0xff] %v21309_v13  ;;  %13781 = vmatprep.mubr.msk.bf16.mxu1 %vm5922_vm6, %v15679_v55 }
 0x667   : > { %v21312_v29 = vpop.f32.mrb[56].mxu1  ;;  %v7640_v20 = vpop.f32.mrb[72].mxu0  ;;  %8815 = vrot.lane.b32.xlu0 %v6770_v26, %s23339_s22 }
 0x668   : > { %v7314_v45 = vpop.f32.mrb[57].mxu1  ;;  %v7642_v24 = vpop.f32.mrb[73].mxu0 }
 0x669   : > { %v21321_v1 = vpop.f32.mrb[58].mxu1  ;;  %v7643_v47 = vpop.f32.mrb[74].mxu0 }
 0x66a   : > { %v7742_v17 = vpack.c.bf16 %v7643_v47, %v7640_v20  ;;  %v7645_v30 = vpop.f32.mrb[75].mxu0  ;;  %v7317_v55 = vpop.f32.mrb[59].mxu1  ;;  %v15685_v20 = vld [vmem:[%s23256_s5 + $0x674] ss:$8 sps:$4 sm:$0xff]  }
 0x66b   : > { %8854 = vrot.lane.b32.xlu0 %v7098_v37, %s23338_s20  ;;  %v8775_v56 = vpop.permute.xlu0 %8774 }
 0x66c   : > { %8631 = vmatmul.mubr.bf16.gmra.mrb[164].mxu1 %v15677_v62  ;;  %8869 = vrot.lane.b32.xlu1 %v7742_v17, %s23347_s19  ;;  %v21331_v52 = vsel %vm1344_vm0, %v6113_v51, %v8775_v56  ;;  %v15698_v51 = vld [vmem:[%s23256_s5 + $0x6c0] ss:$8 sps:$4 sm:$0xff]  }
 0x66d   : > { %23457 = vst [vmem:[#allocation23_spill] sm:$0xff] %v21331_v52  ;;  %13782 = vmatprep.mubr.msk.bf16.mxu1 %vm5922_vm6, %v15682_v19  ;;  %v15717_v52 = vld [vmem:[%s23257_s6 + $0x10] sm:$0xff]  }
 0x66f   : > { %v21334_v33 = vpop.f32.mrb[60].mxu1  ;;  %v7648_v32 = vpop.f32.mrb[76].mxu0 }
 0x670   : > { %v7322_v3 = vpop.f32.mrb[61].mxu1  ;;  %v7650_v26 = vpop.f32.mrb[77].mxu0 }
 0x671   : > { %v21342_v62 = vpop.f32.mrb[62].mxu1  ;;  %v7651_v61 = vpop.f32.mrb[78].mxu0 }
 0x672   : > { %v7743_v45 = vpack.c.bf16 %v7651_v61, %v7648_v32  ;;  %v7653_v24 = vpop.f32.mrb[79].mxu0  ;;  %v7325_v19 = vpop.f32.mrb[63].mxu1  ;;  %v15688_v32 = vld [vmem:[%s23256_s5 + $0x684] ss:$8 sps:$4 sm:$0xff]  }
 0x673   : > { %v8777_v37 = vpop.permute.xlu0 %8776  ;;  %v15686_v19 = vld [vmem:[%s23256_s5 + $0x680] ss:$8 sps:$4 sm:$0xff]  }
 0x674   : > { %8639 = vmatmul.mubr.bf16.gmra.mrb[168].mxu1 %v15680_v59  ;;  %8871 = vrot.lane.b32.xlu1 %v7743_v45, %s23347_s19  ;;  %v21350_v47 = vsel %vm1344_vm0, %v6114_v16, %v8777_v37 }
 0x675   : > { %23458 = vst [vmem:[#allocation24_spill] sm:$0xff] %v21350_v47  ;;  %13783 = vmatprep.mubr.msk.bf16.mxu1 %vm5922_vm6, %v15685_v20  ;;  %v15716_v47 = vld [vmem:[%s23257_s6 + $0x50] sm:$0xff]  }
 0x677   : > { %v21353_v17 = vpop.f32.mrb[64].mxu1  ;;  %v7656_v30 = vpop.f32.mrb[80].mxu0 }
 0x678   : > { %v7330_v55 = vpop.f32.mrb[65].mxu1  ;;  %v7658_v56 = vpop.f32.mrb[81].mxu0 }
 0x679   : > { %v21361_v59 = vpop.f32.mrb[66].mxu1  ;;  %v7659_v3 = vpop.f32.mrb[82].mxu0 }
 0x67a   : > { %v7744_v20 = vpack.c.bf16 %v7659_v3, %v7656_v30  ;;  %v7661_v61 = vpop.f32.mrb[83].mxu0  ;;  %v7333_v16 = vpop.f32.mrb[67].mxu1  ;;  %v15691_v30 = vld [vmem:[%s23256_s5 + $0x694] ss:$8 sps:$4 sm:$0xff]  }
 0x67c   : > { %8647 = vmatmul.mubr.bf16.gmra.mrb[172].mxu1 %v15683_v11  ;;  %8873 = vrot.lane.b32.xlu1 %v7744_v20, %s23347_s19 }
 0x67d   : > { %13784 = vmatprep.mubr.msk.bf16.mxu1 %vm5922_vm6, %v15688_v32 }
 0x67f   : > { %v21367_v45 = vpop.f32.mrb[68].mxu1  ;;  %v7664_v24 = vpop.f32.mrb[84].mxu0 }
 0x680   : > { %v7338_v37 = vpop.f32.mrb[69].mxu1  ;;  %v7666_v55 = vpop.f32.mrb[85].mxu0 }
 0x681   : > { %v21375_v56 = vpop.f32.mrb[70].mxu1  ;;  %v7667_v11 = vpop.f32.mrb[86].mxu0  ;;  %v15689_v55 = vld [vmem:[%s23256_s5 + $0x690] ss:$8 sps:$4 sm:$0xff]  }
 0x682   : > { %v7745_v32 = vpack.c.bf16 %v7667_v11, %v7664_v24  ;;  %v7669_v20 = vpop.f32.mrb[87].mxu0  ;;  %v7341_v61 = vpop.f32.mrb[71].mxu1  ;;  %v15694_v24 = vld [vmem:[%s23256_s5 + $0x6a4] ss:$8 sps:$4 sm:$0xff]  }
 0x684   : > { %8655 = vmatmul.mubr.bf16.gmra.mrb[176].mxu1 %v15686_v19  ;;  %8875 = vrot.lane.b32.xlu1 %v7745_v32, %s23347_s19 }
 0x685   : > { %13785 = vmatprep.mubr.msk.bf16.mxu1 %vm5922_vm6, %v15691_v30 }
 0x687   : > { %v21381_v16 = vpop.f32.mrb[72].mxu1  ;;  %v7672_v37 = vpop.f32.mrb[88].mxu0 }
 0x688   : > { %v7346_v0 = vpop.f32.mrb[73].mxu1  ;;  %v7674_v10 = vpop.f32.mrb[89].mxu0 }
 0x689   : > { %v21389_v11 = vpop.f32.mrb[74].mxu1  ;;  %v7675_v19 = vpop.f32.mrb[90].mxu0 }
 0x68a   : > { %v7746_v30 = vpack.c.bf16 %v7675_v19, %v7672_v37  ;;  %v7677_v20 = vpop.f32.mrb[91].mxu0  ;;  %v7349_v61 = vpop.f32.mrb[75].mxu1  ;;  %v15697_v37 = vld [vmem:[%s23256_s5 + $0x6b4] ss:$8 sps:$4 sm:$0xff]  }
 0x68b   : > { %v15695_v20 = vld [vmem:[%s23256_s5 + $0x6b0] ss:$8 sps:$4 sm:$0xff]  }
 0x68c   : > { %8663 = vmatmul.mubr.bf16.gmra.mrb[180].mxu1 %v15689_v55  ;;  %8877 = vrot.lane.b32.xlu1 %v7746_v30, %s23347_s19 }
 0x68d   : > { %13786 = vmatprep.mubr.msk.bf16.mxu1 %vm5922_vm6, %v15694_v24 }
 0x68f   : > { %v21395_v0 = vpop.f32.mrb[76].mxu1  ;;  %v7680_v10 = vpop.f32.mrb[92].mxu0 }
 0x690   : > { %v7354_v5 = vpop.f32.mrb[77].mxu1  ;;  %v7682_v3 = vpop.f32.mrb[93].mxu0 }
 0x691   : > { %v21400_v15 = vpop.f32.mrb[78].mxu1  ;;  %v7683_v32 = vpop.f32.mrb[94].mxu0 }
 0x692   : > { %v7747_v24 = vpack.c.bf16 %v7683_v32, %v7680_v10  ;;  %v7685_v19 = vpop.f32.mrb[95].mxu0  ;;  %v7357_v30 = vpop.f32.mrb[79].mxu1 }
 0x694   : > { %8671 = vmatmul.mubr.bf16.gmra.mrb[184].mxu1 %v15692_v39  ;;  %8879 = vrot.lane.b32.xlu1 %v7747_v24, %s23347_s19  ;;  %v15700_v39 = vld [vmem:[%s23256_s5 + $0x6c4] ss:$8 sps:$4 sm:$0xff]  }
 0x695   : > { %13787 = vmatprep.mubr.msk.bf16.mxu1 %vm5922_vm6, %v15697_v37 }
 0x697   : > { %v21409_v5 = vpop.f32.mrb[80].mxu1  ;;  %v7688_v3 = vpop.f32.mrb[96].mxu0 }
 0x698   : > { %23459 = vst [vmem:[#allocation25_spill] sm:$0xff] %v21409_v5  ;;  %v7362_v61 = vpop.f32.mrb[81].mxu1  ;;  %v7690_v26 = vpop.f32.mrb[97].mxu0 }
 0x699   : > { %v21414_v9 = vpop.f32.mrb[82].mxu1  ;;  %v7691_v55 = vpop.f32.mrb[98].mxu0 }
 0x69a   : > { %23460 = vst [vmem:[#allocation26_spill] sm:$0xff] %v21414_v9  ;;  %v7748_v10 = vpack.c.bf16 %v7691_v55, %v7688_v3  ;;  %v7693_v37 = vpop.f32.mrb[99].mxu0  ;;  %v7365_v24 = vpop.f32.mrb[83].mxu1  ;;  %v15703_v55 = vld [vmem:[%s23256_s5 + $0x6d4] ss:$8 sps:$4 sm:$0xff]  }
 0x69c   : > { %8679 = vmatmul.mubr.bf16.gmra.mrb[188].mxu1 %v15695_v20  ;;  %8881 = vrot.lane.b32.xlu1 %v7748_v10, %s23347_s19 }
 0x69d   : > { %13788 = vmatprep.mubr.msk.bf16.mxu1 %vm5922_vm6, %v15700_v39 }
 0x69f   : > { %v21423_v19 = vpop.f32.mrb[84].mxu1  ;;  %v7696_v26 = vpop.f32.mrb[100].mxu0 }
 0x6a0   : > { %23461 = vst [vmem:[#allocation27_spill] sm:$0xff] %v21423_v19  ;;  %v7370_v30 = vpop.f32.mrb[85].mxu1  ;;  %v7698_v61 = vpop.f32.mrb[101].mxu0 }
 0x6a1   : > { %v21428_v50 = vpop.f32.mrb[86].mxu1  ;;  %v7699_v32 = vpop.f32.mrb[102].mxu0 }
 0x6a2   : > { %23462 = vst [vmem:[#allocation28_spill] sm:$0xff] %v21428_v50  ;;  %v7749_v20 = vpack.c.bf16 %v7699_v32, %v7696_v26  ;;  %v7701_v39 = vpop.f32.mrb[103].mxu0  ;;  %v7373_v10 = vpop.f32.mrb[87].mxu1 }
 0x6a3   : > { %v15712_v39 = vld [vmem:[%s23257_s6 + $0x40] sm:$0xff]  }
 0x6a4   : > { %8687 = vmatmul.mubr.bf16.gmra.mrb[192].mxu1 %v15698_v51  ;;  %8883 = vrot.lane.b32.xlu1 %v7749_v20, %s23347_s19  ;;  %v15706_v51 = vld [vmem:[%s23256_s5 + $0x6e4] ss:$8 sps:$4 sm:$0xff]  }
 0x6a5   : > { %13789 = vmatprep.mubr.msk.bf16.mxu1 %vm5922_vm6, %v15703_v55  ;;  %v15713_v10 = vld [vmem:[%s23257_s6] sm:$0xff]   ;;  %14492 = vmatprep.subr.bf16.mxu0 %v15712_v39  ;;  %v15709_v39 = vld [vmem:[%s23256_s5 + $0x6f4] ss:$8 sps:$4 sm:$0xff]  }
 0x6a6   : > { %14493 = vmatpush3.bf16.msra.mxu0 %v15713_v10 }
 0x6a7   : > { %v21437_v37 = vpop.f32.mrb[88].mxu1  ;;  %v7704_v24 = vpop.f32.mrb[104].mxu0 }
 0x6a8   : > { %23463 = vst [vmem:[#allocation29_spill] sm:$0xff] %v21437_v37  ;;  %v7378_v30 = vpop.f32.mrb[89].mxu1  ;;  %v7706_v61 = vpop.f32.mrb[105].mxu0 }
 0x6a9   : > { %v21442_v4 = vpop.f32.mrb[90].mxu1  ;;  %v7707_v3 = vpop.f32.mrb[106].mxu0 }
 0x6aa   : > { %23464 = vst [vmem:[#allocation30_spill] sm:$0xff] %v21442_v4  ;;  %v7750_v26 = vpack.c.bf16 %v7707_v3, %v7704_v24  ;;  %v7709_v55 = vpop.f32.mrb[107].mxu0  ;;  %v7381_v20 = vpop.f32.mrb[91].mxu1 }
 0x6ab   : > { %v15715_v55 = vld [vmem:[%s23257_s6 + $0x8] sm:$0xff]  }
 0x6ac   : > { %8885 = vrot.lane.b32.xlu1 %v7750_v26, %s23347_s19  ;;  %8695 = vmatmul.mubr.bf16.gmra.mrb[196].mxu1 %v15701_v49  ;;  %v15704_v49 = vld [vmem:[%s23256_s5 + $0x6e0] ss:$8 sps:$4 sm:$0xff]  }
 0x6ad   : > { %13790 = vmatprep.mubr.msk.bf16.mxu1 %vm5922_vm6, %v15706_v51  ;;  %v15714_v26 = vld [vmem:[%s23257_s6 + $0x48] sm:$0xff]  }
 0x6ae   : > { %14494 = vmatprep.subr.bf16.mxu0 %v15714_v26 }
 0x6af   : > { %v21457_v30 = vpop.f32.mrb[92].mxu1  ;;  %v7712_v61 = vpop.f32.mrb[108].mxu0  ;;  %14495 = vmatpush3.bf16.msra.mxu0 %v15715_v55 }
 0x6b0   : > { %23465 = vst [vmem:[#allocation31_spill] sm:$0xff] %v21457_v30  ;;  %v7386_v3 = vpop.f32.mrb[93].mxu1  ;;  %v7714_v24 = vpop.f32.mrb[109].mxu0  ;;  %14496 = vmatprep.subr.bf16.mxu0 %v15716_v47 }
 0x6b1   : > { %v21468_v51 = vpop.f32.mrb[94].mxu1  ;;  %v7715_v20 = vpop.f32.mrb[110].mxu0 }
 0x6b2   : > { %23466 = vst [vmem:[#allocation32_spill] sm:$0xff] %v21468_v51  ;;  %v7751_v3 = vpack.c.bf16 %v7715_v20, %v7712_v61  ;;  %v7717_v24 = vpop.f32.mrb[111].mxu0  ;;  %v7389_v32 = vpop.f32.mrb[95].mxu1  ;;  %v13753_v61 = vld [vmem:[%s23256_s5 + $0x700] sm:$0x33] }
 0x6b3   : > { %14497 = vmatpush3.bf16.msra.mxu0 %v15717_v52  ;;  %v15707_v20 = vld [vmem:[%s23256_s5 + $0x6f0] ss:$8 sps:$4 sm:$0xff]   ;;  %v13779_v10 = vcombine.high %v13753_v61, %v13753_v61  ;;  %v15720_v52 = vld [vmem:[%s23257_s6 + $0x60] sm:$0xff]  }
 0x6b4   : > { %8887 = vrot.lane.b32.xlu1 %v7751_v3, %s23347_s19  ;;  %8703 = vmatmul.mubr.bf16.gmra.mrb[200].mxu1 %v15704_v49  ;;  %v15718_v3 = vld [vmem:[%s23257_s6 + $0x58] sm:$0xff]  }
 0x6b5   : > { %13791 = vmatprep.mubr.msk.bf16.mxu1 %vm5922_vm6, %v15709_v39  ;;  %v15719_v39 = vld [vmem:[%s23257_s6 + $0x18] sm:$0xff]   ;;  %14498 = vmatprep.subr.bf16.mxu0 %v15718_v3 }
 0x6b7   : > { %v21486_v32 = vpop.f32.mrb[96].mxu1  ;;  %v7720_v26 = vpop.f32.mrb[112].mxu0  ;;  %14499 = vmatpush3.bf16.msra.mxu0 %v15719_v39  ;;  %v13778_v39 = vcombine.low %v13753_v61, %v13753_v61 }
 0x6b8   : > { %v7394_v49 = vpop.f32.mrb[97].mxu1  ;;  %v7722_v55 = vpop.f32.mrb[113].mxu0  ;;  %14500 = vmatprep.subr.bf16.mxu0 %v15720_v52 }
 0x6b9   : > { %v21497_v24 = vpop.f32.mrb[98].mxu1  ;;  %v7723_v47 = vpop.f32.mrb[114].mxu0 }
 0x6ba   : > { %v7752_v55 = vpack.c.bf16 %v7723_v47, %v7720_v26  ;;  %v7725_v13 = vpop.f32.mrb[115].mxu0  ;;  %v7397_v23 = vpop.f32.mrb[99].mxu1 }
 0x6bb   : > { %14501 = vmatpush3.bf16.msra.mxu0 %v15721_v60  ;;  %v15723_v23 = vld [vmem:[%s23257_s6 + $0x28] sm:$0xff]  }
 0x6bc   : > { %8889 = vrot.lane.b32.xlu1 %v7752_v55, %s23347_s19  ;;  %8711 = vmatmul.mubr.bf16.gmra.mrb[204].mxu1 %v15707_v20 }
 0x6bd   : > { %13792 = vmatprep.mubr.msk.bf16.mxu1 %vm5922_vm6, %v13779_v10  ;;  %14502 = vmatprep.subr.bf16.mxu0 %v15722_v14  ;;  %v15724_v10 = vld [vmem:[%s23257_s6 + $0x70] sm:$0xff]   ;;  %v23467_v14 = vmov 0.0  }
 0x6bf   : > { %v21512_v49 = vpop.f32.mrb[100].mxu1  ;;  %v7728_v13 = vpop.f32.mrb[116].mxu0  ;;  %14503 = vmatpush3.bf16.msra.mxu0 %v15723_v23 }
 0x6c0   : > { %v7402_v26 = vpop.f32.mrb[101].mxu1  ;;  %v7730_v3 = vpop.f32.mrb[117].mxu0  ;;  %14504 = vmatprep.subr.bf16.mxu0 %v15724_v10 }
 0x6c1   : > { %v21517_v20 = vpop.f32.mrb[102].mxu1  ;;  %v7731_v47 = vpop.f32.mrb[118].mxu0  ;;  %v15725_v26 = vld [vmem:[%s23257_s6 + $0x30] sm:$0xff]  }
 0x6c2   : > { %v7753_v55 = vpack.c.bf16 %v7731_v47, %v7728_v13  ;;  %v7405_v60 = vpop.f32.mrb[103].mxu1  ;;  %v7733_v30 = vpop.f32.mrb[119].mxu0  ;;  %v15727_v13 = vld [vmem:[%s23257_s6 + $0x38] sm:$0xff]  }
 0x6c3   : > { %14505 = vmatpush3.bf16.msra.mxu0 %v15725_v26  ;;  %v15726_v30 = vld [vmem:[%s23257_s6 + $0x78] sm:$0xff]   ;;  %v15728_v26 = vld [vmem:[%s23257_s6 + $0x80] sm:$0xff]  }
 0x6c4   : > { %8891 = vrot.lane.b32.xlu1 %v7753_v55, %s23347_s19  ;;  %8719 = vmatmul.mubr.bf16.gmra.mrb[208].mxu1 %v13778_v39 }
 0x6c5   : > { %14884 = vmatprep.mubr.msk.bf16.mxu1 %vm16056_vm5, %v23467_v14  ;;  %14506 = vmatprep.subr.bf16.mxu0 %v15726_v30  ;;  %v15729_v30 = vld [vmem:[%s23257_s6 + $0x88] sm:$0xff]  }
 0x6c6   : > { %14881 = vmatpush3.bf16.msra.mxu1 %v15728_v26 }
 0x6c7   : > { %v21530_v61 = vpop.f32.mrb[104].mxu1  ;;  %v7736_v3 = vpop.f32.mrb[120].mxu0  ;;  %14507 = vmatpush3.bf16.msra.mxu0 %v15727_v13  ;;  %14882 = vmatprep.subr.bf16.mxu1 %v23467_v14 }
 0x6c8   : > { %v7410_v23 = vpop.f32.mrb[105].mxu1  ;;  %v7754_v47 = vpack.c.bf16 %v7736_v3, %v7736_v3  ;;  %v7738_v55 = vpop.f32.mrb[121].mxu0  ;;  %9762 = vmatprep.subr.bf16.mxu0 %v23443_v18 }
 0x6c9   : > { %v7411_v39 = vpop.f32.mrb[106].mxu1  ;;  %v7739_v10 = vpop.f32.mrb[122].mxu0 }
 0x6ca   : > { %v7412_v60 = vpop.f32.mrb[107].mxu1  ;;  %8893 = vrot.lane.b32.xlu1 %v7754_v47, %s23347_s19  ;;  %v7740_v52 = vpop.f32.mrb[123].mxu0  ;;  %14883 = vmatpush3.bf16.msra.mxu1 %v15729_v30 }
 0x6cb   : > { %10004 = vmatprep.subr.bf16.mxu1 %v23443_v18 }
 0x6cf   : > { %v7968_v23 = vpop.f32.mrb[108].mxu1  ;;  %v8296_v3 = vpop.f32.mrb[124].mxu0 }
 0x6d0   : > { %v7970_v55 = vpop.f32.mrb[109].mxu1  ;;  %v8298_v39 = vpop.f32.mrb[125].mxu0 }
 0x6d1   : > { %v7971_v47 = vpop.f32.mrb[110].mxu1  ;;  %v8299_v52 = vpop.f32.mrb[126].mxu0 }
 0x6d2   : > { %v8070_v10 = vpack.c.bf16 %v7971_v47, %v7968_v23  ;;  %v8398_v60 = vpack.c.bf16 %v8299_v52, %v8296_v3  ;;  %v7973_v51 = vpop.f32.mrb[111].mxu1  ;;  %v8301_v13 = vpop.f32.mrb[127].mxu0 }
 0x6d4   : > { %8908 = vrot.lane.b32.xlu1 %v8070_v10, %s23339_s22 }
 0x6d7   : > { %v7976_v26 = vpop.f32.mrb[112].mxu1  ;;  %v8304_v58 = vpop.f32.mrb[128].mxu0 }
 0x6d8   : > { %8947 = vrot.lane.b32.xlu1 %v8398_v60, %s23338_s20  ;;  %v7978_v36 = vpop.f32.mrb[113].mxu1  ;;  %v8306_v34 = vpop.f32.mrb[129].mxu0 }
 0x6d9   : > { %v7979_v37 = vpop.f32.mrb[114].mxu1  ;;  %v8307_v55 = vpop.f32.mrb[130].mxu0 }
 0x6da   : > { %v8071_v39 = vpack.c.bf16 %v7979_v37, %v7976_v26  ;;  %v8399_v4 = vpack.c.bf16 %v8307_v55, %v8304_v58  ;;  %v7981_v25 = vpop.f32.mrb[115].mxu1  ;;  %v8309_v30 = vpop.f32.mrb[131].mxu0 }
 0x6dc   : > { %8910 = vrot.lane.b32.xlu1 %v8071_v39, %s23339_s22 }
 0x6de   : > { %v21551_v51 = vpop.permute.xlu1 %8869 }
 0x6df   : > { %v7984_v23 = vpop.f32.mrb[116].mxu1  ;;  %v8312_v3 = vpop.f32.mrb[132].mxu0 }
 0x6e0   : > { %8949 = vrot.lane.b32.xlu1 %v8399_v4, %s23338_s20  ;;  %v7986_v47 = vpop.f32.mrb[117].mxu1  ;;  %v8314_v52 = vpop.f32.mrb[133].mxu0 }
 0x6e1   : > { %v7987_v10 = vpop.f32.mrb[118].mxu1  ;;  %v8315_v60 = vpop.f32.mrb[134].mxu0 }
 0x6e2   : > { %v8072_v36 = vpack.c.bf16 %v7987_v10, %v7984_v23  ;;  %v8400_v34 = vpack.c.bf16 %v8315_v60, %v8312_v3  ;;  %v7989_v13 = vpop.f32.mrb[119].mxu1  ;;  %v8317_v18 = vpop.f32.mrb[135].mxu0 }
 0x6e4   : > { %8912 = vrot.lane.b32.xlu1 %v8072_v36, %s23339_s22 }
 0x6e6   : > { %v21555_v25 = vpop.permute.xlu1 %8871 }
 0x6e7   : > { %v7992_v58 = vpop.f32.mrb[120].mxu1  ;;  %v8320_v37 = vpop.f32.mrb[136].mxu0 }
 0x6e8   : > { %8951 = vrot.lane.b32.xlu1 %v8400_v34, %s23338_s20  ;;  %v7994_v26 = vpop.f32.mrb[121].mxu1  ;;  %v8322_v55 = vpop.f32.mrb[137].mxu0 }
 0x6e9   : > { %v7995_v39 = vpop.f32.mrb[122].mxu1  ;;  %v8323_v4 = vpop.f32.mrb[138].mxu0 }
 0x6ea   : > { %v8073_v30 = vpack.c.bf16 %v7995_v39, %v7992_v58  ;;  %v8401_v47 = vpack.c.bf16 %v8323_v4, %v8320_v37  ;;  %v7997_v52 = vpop.f32.mrb[123].mxu1  ;;  %v8325_v6 = vpop.f32.mrb[139].mxu0 }
 0x6ec   : > { %8914 = vrot.lane.b32.xlu1 %v8073_v30, %s23339_s22 }
 0x6ee   : > { %v21559_v23 = vpop.permute.xlu1 %8873 }
 0x6ef   : > { %v8000_v18 = vpop.f32.mrb[124].mxu1  ;;  %v8328_v3 = vpop.f32.mrb[140].mxu0 }
 0x6f0   : > { %8953 = vrot.lane.b32.xlu1 %v8401_v47, %s23338_s20  ;;  %v8002_v10 = vpop.f32.mrb[125].mxu1  ;;  %v8330_v60 = vpop.f32.mrb[141].mxu0 }
 0x6f1   : > { %v8003_v36 = vpop.f32.mrb[126].mxu1  ;;  %v8331_v34 = vpop.f32.mrb[142].mxu0 }
 0x6f2   : > { %v8074_v13 = vpack.c.bf16 %v8003_v36, %v8000_v18  ;;  %v8402_v26 = vpack.c.bf16 %v8331_v34, %v8328_v3  ;;  %v8005_v55 = vpop.f32.mrb[127].mxu1  ;;  %v8333_v46 = vpop.f32.mrb[143].mxu0 }
 0x6f4   : > { %8916 = vrot.lane.b32.xlu1 %v8074_v13, %s23339_s22 }
 0x6f6   : > { %v21563_v58 = vpop.permute.xlu1 %8875 }
 0x6f7   : > { %v8008_v6 = vpop.f32.mrb[128].mxu1  ;;  %v8336_v37 = vpop.f32.mrb[144].mxu0 }
 0x6f8   : > { %8955 = vrot.lane.b32.xlu1 %v8402_v26, %s23338_s20  ;;  %v8010_v39 = vpop.f32.mrb[129].mxu1  ;;  %v8338_v4 = vpop.f32.mrb[145].mxu0 }
 0x6f9   : > { %v8011_v30 = vpop.f32.mrb[130].mxu1  ;;  %v8339_v47 = vpop.f32.mrb[146].mxu0 }
 0x6fa   : > { %v8075_v52 = vpack.c.bf16 %v8011_v30, %v8008_v6  ;;  %v8403_v10 = vpack.c.bf16 %v8339_v47, %v8336_v37  ;;  %v8013_v60 = vpop.f32.mrb[131].mxu1  ;;  %v8341_v19 = vpop.f32.mrb[147].mxu0 }
 0x6fb   : > { %v21571_v6 = vpop.permute.xlu0 %8791 }
 0x6fc   : > { %8918 = vrot.lane.b32.xlu1 %v8075_v52, %s23339_s22 }
 0x6fe   : > { %v21567_v18 = vpop.permute.xlu1 %8877 }
 0x6ff   : > { %v8016_v46 = vpop.f32.mrb[132].mxu1  ;;  %v8344_v3 = vpop.f32.mrb[148].mxu0 }
 0x700   : > { %8957 = vrot.lane.b32.xlu1 %v8403_v10, %s23338_s20  ;;  %v8018_v36 = vpop.f32.mrb[133].mxu1  ;;  %v8346_v34 = vpop.f32.mrb[149].mxu0 }
 0x701   : > { %v8019_v13 = vpop.f32.mrb[134].mxu1  ;;  %v8347_v26 = vpop.f32.mrb[150].mxu0 }
 0x702   : > { %v8076_v55 = vpack.c.bf16 %v8019_v13, %v8016_v46  ;;  %v8404_v39 = vpack.c.bf16 %v8347_v26, %v8344_v3  ;;  %v8021_v4 = vpop.f32.mrb[135].mxu1  ;;  %v8349_v50 = vpop.f32.mrb[151].mxu0 }
 0x703   : > { %v21577_v50 = vpop.permute.xlu0 %8830 }
 0x704   : > { %8920 = vrot.lane.b32.xlu1 %v8076_v55, %s23339_s22 }
 0x706   : > { %v21573_v19 = vpop.permute.xlu1 %8879 }
 0x707   : > { %v8024_v37 = vpop.f32.mrb[136].mxu1  ;;  %v8352_v30 = vpop.f32.mrb[152].mxu0 }
 0x708   : > { %8959 = vrot.lane.b32.xlu1 %v8404_v39, %s23338_s20  ;;  %v8026_v47 = vpop.f32.mrb[137].mxu1  ;;  %v8354_v52 = vpop.f32.mrb[153].mxu0 }
 0x709   : > { %v8027_v10 = vpop.f32.mrb[138].mxu1  ;;  %v8355_v60 = vpop.f32.mrb[154].mxu0 }
 0x70a   : > { %v8077_v36 = vpack.c.bf16 %v8027_v10, %v8024_v37  ;;  %v8405_v34 = vpack.c.bf16 %v8355_v60, %v8352_v30  ;;  %v8029_v46 = vpop.f32.mrb[139].mxu1  ;;  %v8357_v3 = vpop.f32.mrb[155].mxu0 }
 0x70b   : > { %v21583_v10 = vpop.permute.xlu0 %8793 }
 0x70c   : > { %8922 = vrot.lane.b32.xlu1 %v8077_v36, %s23339_s22 }
 0x70e   : > { %v21579_v13 = vpop.permute.xlu1 %8881 }
 0x70f   : > { %23468 = vst [vmem:[#allocation33_spill] sm:$0xff] %v21579_v13  ;;  %v8032_v26 = vpop.f32.mrb[140].mxu1  ;;  %v8360_v55 = vpop.f32.mrb[156].mxu0 }
 0x710   : > { %8961 = vrot.lane.b32.xlu1 %v8405_v34, %s23338_s20  ;;  %v8034_v4 = vpop.f32.mrb[141].mxu1  ;;  %v8362_v39 = vpop.f32.mrb[157].mxu0 }
 0x711   : > { %v8035_v47 = vpop.f32.mrb[142].mxu1  ;;  %v8363_v52 = vpop.f32.mrb[158].mxu0 }
 0x712   : > { %v8078_v27 = vpack.c.bf16 %v8035_v47, %v8032_v26  ;;  %v8406_v38 = vpack.c.bf16 %v8363_v52, %v8360_v55  ;;  %v8037_v37 = vpop.f32.mrb[143].mxu1  ;;  %v8365_v30 = vpop.f32.mrb[159].mxu0 }
 0x713   : > { %v21589_v47 = vpop.permute.xlu0 %8832 }
 0x714   : > { %8924 = vrot.lane.b32.xlu1 %v8078_v27, %s23339_s22 }
 0x716   : > { %v21585_v60 = vpop.permute.xlu1 %8883 }
 0x717   : > { %23469 = vst [vmem:[#allocation34_spill] sm:$0xff] %v21585_v60  ;;  %v8040_v36 = vpop.f32.mrb[144].mxu1  ;;  %v8368_v46 = vpop.f32.mrb[160].mxu0 }
 0x718   : > { %8963 = vrot.lane.b32.xlu1 %v8406_v38, %s23338_s20  ;;  %v8042_v3 = vpop.f32.mrb[145].mxu1  ;;  %v8370_v34 = vpop.f32.mrb[161].mxu0 }
 0x719   : > { %v8043_v4 = vpop.f32.mrb[146].mxu1  ;;  %v8371_v39 = vpop.f32.mrb[162].mxu0 }
 0x71a   : > { %v8079_v42 = vpack.c.bf16 %v8043_v4, %v8040_v36  ;;  %v8407_v5 = vpack.c.bf16 %v8371_v39, %v8368_v46  ;;  %v8045_v26 = vpop.f32.mrb[147].mxu1  ;;  %v8373_v55 = vpop.f32.mrb[163].mxu0 }
 0x71b   : > { %v21595_v4 = vpop.permute.xlu0 %8795 }
 0x71c   : > { %8926 = vrot.lane.b32.xlu1 %v8079_v42, %s23339_s22 }
 0x71e   : > { %v21591_v27 = vpop.permute.xlu1 %8885 }
 0x71f   : > { %23470 = vst [vmem:[#allocation35_spill] sm:$0xff] %v21591_v27  ;;  %v8048_v52 = vpop.f32.mrb[148].mxu1  ;;  %v8376_v37 = vpop.f32.mrb[164].mxu0 }
 0x720   : > { %8965 = vrot.lane.b32.xlu1 %v8407_v5, %s23338_s20  ;;  %v8050_v30 = vpop.f32.mrb[149].mxu1  ;;  %v8378_v38 = vpop.f32.mrb[165].mxu0 }
 0x721   : > { %v8051_v3 = vpop.f32.mrb[150].mxu1  ;;  %v8379_v34 = vpop.f32.mrb[166].mxu0 }
 0x722   : > { %v8080_v60 = vpack.c.bf16 %v8051_v3, %v8048_v52  ;;  %v8408_v9 = vpack.c.bf16 %v8379_v34, %v8376_v37  ;;  %v8053_v36 = vpop.f32.mrb[151].mxu1  ;;  %v8381_v46 = vpop.f32.mrb[167].mxu0 }
 0x723   : > { %v23472_v36 = vpack.c.bf16 %v21497_v24, %v21486_v32  ;;  %v23473_v32 = vpack.c.bf16 %v21517_v20, %v21512_v49 }
 0x724   : > { %8928 = vrot.lane.b32.xlu1 %v8080_v60, %s23339_s22 }
 0x726   : > { %v21597_v42 = vpop.permute.xlu1 %8887 }
 0x727   : > { %23471 = vst [vmem:[#allocation36_spill] sm:$0xff] %v21597_v42  ;;  %v8056_v39 = vpop.f32.mrb[152].mxu1  ;;  %v8384_v26 = vpop.f32.mrb[168].mxu0 }
 0x728   : > { %8967 = vrot.lane.b32.xlu1 %v8408_v9, %s23338_s20  ;;  %v8058_v55 = vpop.f32.mrb[153].mxu1  ;;  %v8386_v5 = vpop.f32.mrb[169].mxu0 }
 0x729   : > { %v8059_v30 = vpop.f32.mrb[154].mxu1  ;;  %v8387_v38 = vpop.f32.mrb[170].mxu0 }
 0x72a   : > { %v8081_v27 = vpack.c.bf16 %v8059_v30, %v8056_v39  ;;  %v8409_v13 = vpack.c.bf16 %v8387_v38, %v8384_v26  ;;  %v8061_v52 = vpop.f32.mrb[155].mxu1  ;;  %v8389_v37 = vpop.f32.mrb[171].mxu0 }
 0x72b   : > { %v21607_v9 = vpop.permute.xlu0 %8834 }
 0x72c   : > { %8930 = vrot.lane.b32.xlu1 %v8081_v27, %s23339_s22 }
 0x72e   : > { %v8890_v3 = vpop.permute.xlu1 %8889 }
 0x72f   : > { %v8064_v60 = vpop.f32.mrb[156].mxu1  ;;  %v8392_v34 = vpop.f32.mrb[172].mxu0  ;;  %v21605_v46 = vsel %vm1344_vm0, %v23472_v36, %v8890_v3 }
 0x730   : > { %8969 = vrot.lane.b32.xlu1 %v8409_v13, %s23338_s20  ;;  %v8082_v55 = vpack.c.bf16 %v8064_v60, %v8064_v60  ;;  %v8066_v39 = vpop.f32.mrb[157].mxu1  ;;  %v8394_v5 = vpop.f32.mrb[173].mxu0  ;;  %v8410_v52 = vpack.c.bf16 %v8392_v34, %v8392_v34 }
 0x731   : > { %v8067_v26 = vpop.f32.mrb[158].mxu1  ;;  %v8395_v38 = vpop.f32.mrb[174].mxu0 }
 0x732   : > { %v8068_v30 = vpop.f32.mrb[159].mxu1  ;;  %v8396_v27 = vpop.f32.mrb[175].mxu0 }
 0x733   : > { %v21611_v42 = vpop.permute.xlu0 %8797 }
 0x734   : > { %8932 = vrot.lane.b32.xlu1 %v8082_v55, %s23339_s22  ;;  %v7426_v55 = vpack.c.bf16 %v21530_v61, %v21530_v61 }
 0x736   : > { %v8892_v37 = vpop.permute.xlu1 %8891 }
 0x737   : > { %v21617_v24 = vsel %vm1344_vm0, %v23473_v32, %v8892_v37  ;;  %v8624_v13 = vpop.f32.mrb[160].mxu1  ;;  %v21623_v26 = vpop.permute.xlu0 %8836 }
 0x738   : > { %8971 = vrot.lane.b32.xlu1 %v8410_v52, %s23338_s20  ;;  %v8626_v3 = vpop.f32.mrb[161].mxu1 }
 0x739   : > { %v8627_v60 = vpop.f32.mrb[162].mxu1  ;;  %v23474_v3 = vpack.c.bf16 %v21321_v1, %v21312_v29 }
 0x73a   : > { %v8726_v36 = vpack.c.bf16 %v8627_v60, %v8624_v13  ;;  %v8629_v39 = vpop.f32.mrb[163].mxu1 }
 0x73b   : > { %v21630_v52 = vpop.permute.xlu0 %8799  ;;  %v9079_v60 = vsel %vm1344_vm0, %v23474_v3, %v21551_v51  ;;  %v23475_v39 = vpack.c.bf16 %v20771_v22, %v20761_v31  ;;  %v23476_v51 = vpack.c.bf16 %v21342_v62, %v21334_v33 }
 0x73c   : > { %v8894_v34 = vpop.permute.xlu1 %8893  ;;  %14885 = vmatmul.mubr.msk.bf16.vlgmr.msra.gmra.mrb[212].mxu1 %vm1344_vm0, %v8726_v36 }
 0x73d   : > { %v21626_v49 = vsel %vm1344_vm0, %v7426_v55, %v8894_v34  ;;  %14888 = vmatprep.mubr.msk.bf16.mxu1 %vm16056_vm5, %v23467_v14  ;;  %v8975_v55 = vsel %vm1344_vm0, %v23475_v39, %v21131_v2 }
 0x73f   : > { %v8632_v20 = vpop.f32.mrb[164].mxu1  ;;  %v21635_v13 = vpop.permute.xlu0 %8838 }
 0x740   : > { %v8634_v5 = vpop.f32.mrb[165].mxu1 }
 0x741   : > { %v8635_v30 = vpop.f32.mrb[166].mxu1 }
 0x742   : > { %v8727_v38 = vpack.c.bf16 %v8635_v30, %v8632_v20  ;;  %v8637_v27 = vpop.f32.mrb[167].mxu1 }
 0x743   : > { %v21656_v22 = vpop.permute.xlu0 %8801 }
 0x744   : > { %14889 = vmatmul.mubr.msk.bf16.gmra.mrb[216].mxu1 %vm1344_vm0, %v8727_v38  ;;  %v9013_v38 = vsel %vm1513_vm1, %v8975_v55, %v21571_v6  ;;  %v9082_v6 = vsel %vm1344_vm0, %v23476_v51, %v21555_v25  ;;  %v23478_v25 = vpack.c.bf16 %v21361_v59, %v21353_v17 }
 0x745   : > { %14892 = vmatprep.mubr.msk.bf16.mxu1 %vm16056_vm5, %v23467_v14  ;;  %v9039_v29 = vsel %vm1626_vm2, %v9013_v38, %v21577_v50  ;;  %v23477_v50 = vpack.c.bf16 %v20800_v54, %v20789_v48 }
 0x746   : > { %v8909_v61 = vpop.permute.xlu1 %8908 }
 0x747   : > { %v8640_v37 = vpop.f32.mrb[168].mxu1  ;;  %v9117_v34 = vsel %vm1513_vm1, %v9079_v60, %v8909_v61  ;;  %v21675_v62 = vpop.permute.xlu0 %8840 }
 0x748   : > { %v8642_v32 = vpop.f32.mrb[169].mxu1 }
 0x749   : > { %v8643_v36 = vpop.f32.mrb[170].mxu1 }
 0x74a   : > { %v8948_v20 = vpop.permute.xlu1 %8947  ;;  %v8728_v5 = vpack.c.bf16 %v8643_v36, %v8640_v37  ;;  %v8645_v30 = vpop.f32.mrb[171].mxu1  ;;  %v8978_v37 = vsel %vm1344_vm0, %v23477_v50, %v21153_v21 }
 0x74b   : > { %v9143_v27 = vsel %vm1626_vm2, %v9117_v34, %v8948_v20  ;;  %v9015_v39 = vsel %vm1513_vm1, %v8978_v37, %v21583_v10  ;;  %v9085_v10 = vsel %vm1344_vm0, %v23478_v25, %v21559_v23  ;;  %v23480_v23 = vpack.c.bf16 %v21375_v56, %v21367_v45 }
 0x74c   : > { %9403 = vmatprep.mubr.bf16.mxu0 %v9143_v27  ;;  %14893 = vmatmul.mubr.msk.bf16.gmra.mrb[220].mxu1 %vm1344_vm0, %v8728_v5  ;;  %v9042_v33 = vsel %vm1626_vm2, %v9015_v39, %v21589_v47  ;;  %v23479_v47 = vpack.c.bf16 %v20829_v40, %v20818_v44 }
 0x74d   : > { %9404 = vmatmul.mubr.bf16.vlgmr.msra.gmra.mrb[176].mxu0 %v9039_v29  ;;  %14896 = vmatprep.mubr.msk.bf16.mxu1 %vm16056_vm5, %v23467_v14 }
 0x74e   : > { %v8911_v31 = vpop.permute.xlu1 %8910  ;;  %v8981_v20 = vsel %vm1344_vm0, %v23479_v47, %v21175_v63 }
 0x74f   : > { %v8648_v2 = vpop.f32.mrb[172].mxu1  ;;  %v9119_v32 = vsel %vm1513_vm1, %v9082_v6, %v8911_v31  ;;  %v9017_v29 = vsel %vm1513_vm1, %v8981_v20, %v21595_v4  ;;  %v21692_v31 = vpop.permute.xlu0 %8803  ;;  %v9088_v4 = vsel %vm1344_vm0, %v23480_v23, %v21563_v58 }
 0x750   : > { %v8650_v1 = vpop.f32.mrb[173].mxu1  ;;  %v9045_v59 = vsel %vm1626_vm2, %v9017_v29, %v21607_v9  ;;  %v23481_v9 = vpack.c.bf16 %v20858_v35, %v20847_v7  ;;  %v23488_v29 = vld [vmem:[#allocation25_spill] sm:$0xff] }
 0x751   : > { %v8651_v61 = vpop.f32.mrb[174].mxu1 }
 0x752   : > { %v8950_v3 = vpop.permute.xlu1 %8949  ;;  %v8729_v60 = vpack.c.bf16 %v8651_v61, %v8648_v2  ;;  %v8653_v36 = vpop.f32.mrb[175].mxu1  ;;  %v8984_v51 = vsel %vm1344_vm0, %v23481_v9, %v21196_v28 }
 0x753   : > { %v9146_v55 = vsel %vm1626_vm2, %v9119_v32, %v8950_v3  ;;  %v21705_v2 = vpop.permute.xlu0 %8842  ;;  %v9019_v32 = vsel %vm1513_vm1, %v8984_v51, %v21611_v42  ;;  %v23482_v42 = vpack.c.bf16 %v21389_v11, %v21381_v16 }
 0x754   : > { %9411 = vmatprep.mubr.bf16.mxu0 %v9146_v55  ;;  %14897 = vmatmul.mubr.msk.bf16.gmra.mrb[224].mxu1 %vm1344_vm0, %v8729_v60  ;;  %v9048_v56 = vsel %vm1626_vm2, %v9019_v32, %v21623_v26  ;;  %v23483_v26 = vpack.c.bf16 %v20887_v53, %v20876_v8 }
 0x755   : > { %9412 = vmatmul.mubr.bf16.gmra.mrb[180].mxu0 %v9042_v33  ;;  %14900 = vmatprep.mubr.msk.bf16.mxu1 %vm16056_vm5, %v23467_v14  ;;  %v9091_v3 = vsel %vm1344_vm0, %v23482_v42, %v21567_v18  ;;  %v23484_v18 = vpack.c.bf16 %v21400_v15, %v21395_v0  ;;  %v23496_v42 = vld [vmem:[#allocation27_spill] sm:$0xff] }
 0x756   : > { %v8913_v48 = vpop.permute.xlu1 %8912  ;;  %v8987_v36 = vsel %vm1344_vm0, %v23483_v26, %v21215_v57  ;;  %v23498_v26 = vld [vmem:[#allocation10_spill] sm:$0xff] }
 0x757   : > { %v8656_v54 = vpop.f32.mrb[176].mxu1  ;;  %v9121_v5 = vsel %vm1513_vm1, %v9085_v10, %v8913_v48  ;;  %v21721_v35 = vpop.permute.xlu0 %8805 }
 0x758   : > { %v8658_v21 = vpop.f32.mrb[177].mxu1 }
 0x759   : > { %v8659_v34 = vpop.f32.mrb[178].mxu1 }
 0x75a   : > { %v8952_v30 = vpop.permute.xlu1 %8951  ;;  %v8730_v38 = vpack.c.bf16 %v8659_v34, %v8656_v54  ;;  %v8661_v27 = vpop.f32.mrb[179].mxu1  ;;  %v9021_v54 = vsel %vm1513_vm1, %v8987_v36, %v21630_v52  ;;  %v9094_v52 = vsel %vm1344_vm0, %v23484_v18, %v21573_v19  ;;  %v23486_v19 = vld [vmem:[#allocation33_spill] sm:$0xff]  ;;  %v23500_v36 = vld [vmem:[#allocation15_spill] sm:$0xff] }
 0x75b   : > { %v9149_v17 = vsel %vm1626_vm2, %v9121_v5, %v8952_v30  ;;  %v9051_v16 = vsel %vm1626_vm2, %v9021_v54, %v21635_v13  ;;  %v8845_v11 = vpop.permute.xlu0 %8844  ;;  %v23485_v13 = vpack.c.bf16 %v20916_v43, %v20905_v41  ;;  %v23487_v27 = vld [vmem:[#allocation26_spill] sm:$0xff] }
 0x75c   : > { %9419 = vmatprep.mubr.bf16.mxu0 %v9149_v17  ;;  %14901 = vmatmul.mubr.msk.bf16.gmra.mrb[228].mxu1 %vm1344_vm0, %v8730_v38 }
 0x75d   : > { %9420 = vmatmul.mubr.bf16.gmra.mrb[184].mxu0 %v9045_v59  ;;  %14904 = vmatprep.mubr.msk.bf16.mxu1 %vm16056_vm5, %v23467_v14  ;;  %v8990_v10 = vsel %vm1344_vm0, %v23485_v13, %v21233_v12  ;;  %v23502_v13 = vld [vmem:[#allocation35_spill] sm:$0xff] }
 0x75e   : > { %v8915_v44 = vpop.permute.xlu1 %8914  ;;  %v9023_v30 = vsel %vm1513_vm1, %v8990_v10, %v21656_v22  ;;  %v23489_v22 = vpack.c.bf16 %v23487_v27, %v23488_v29  ;;  %v23503_v10 = vld [vmem:[#allocation30_spill] sm:$0xff] }
 0x75f   : > { %v8664_v40 = vpop.f32.mrb[180].mxu1  ;;  %v9123_v6 = vsel %vm1513_vm1, %v9088_v4, %v8915_v44  ;;  %v8808_v38 = vpop.permute.xlu0 %8807  ;;  %v9054_v0 = vsel %vm1626_vm2, %v9023_v30, %v21675_v62  ;;  %v23491_v62 = vld [vmem:[#allocation16_spill] sm:$0xff]  ;;  %v23508_v30 = vld [vmem:[#allocation19_spill] sm:$0xff] }
 0x760   : > { %v8666_v63 = vpop.f32.mrb[181].mxu1  ;;  %v9097_v17 = vsel %vm1344_vm0, %v23489_v22, %v23486_v19 }
 0x761   : > { %v8667_v1 = vpop.f32.mrb[182].mxu1  ;;  %v23492_v63 = vld [vmem:[#allocation12_spill] sm:$0xff] }
 0x762   : > { %v8954_v61 = vpop.permute.xlu1 %8953  ;;  %v8731_v50 = vpack.c.bf16 %v8667_v1, %v8664_v40  ;;  %v8669_v37 = vpop.f32.mrb[183].mxu1  ;;  %v23490_v40 = vld [vmem:[#allocation14_spill] sm:$0xff]  ;;  %v23493_v23 = vpack.c.bf16 %v23491_v62, %v23492_v63  ;;  %v23510_v63 = vld [vmem:[#allocation36_spill] sm:$0xff] }
 0x763   : > { %v9152_v45 = vsel %vm1626_vm2, %v9123_v6, %v8954_v61  ;;  %v8847_v59 = vpop.permute.xlu0 %8846 }
 0x764   : > { %9427 = vmatprep.mubr.bf16.mxu0 %v9152_v45  ;;  %14905 = vmatmul.mubr.msk.bf16.gmra.mrb[232].mxu1 %vm1344_vm0, %v8731_v50  ;;  %v8993_v4 = vsel %vm1344_vm0, %v23493_v23, %v23490_v40  ;;  %v23511_v23 = vld [vmem:[#allocation32_spill] sm:$0xff] }
 0x765   : > { %9428 = vmatmul.mubr.bf16.gmra.mrb[188].mxu0 %v9048_v56  ;;  %14908 = vmatprep.mubr.msk.bf16.mxu1 %vm16056_vm5, %v23467_v14  ;;  %v9025_v61 = vsel %vm1513_vm1, %v8993_v4, %v21692_v31  ;;  %v23512_v4 = vld [vmem:[#allocation31_spill] sm:$0xff] }
 0x766   : > { %v8917_v7 = vpop.permute.xlu1 %8916  ;;  %v9057_v37 = vsel %vm1626_vm2, %v9025_v61, %v21705_v2  ;;  %v23499_v2 = vld [vmem:[#allocation18_spill] sm:$0xff]  ;;  %v23516_v61 = vld [vmem:[#allocation13_spill] sm:$0xff] }
 0x767   : > { %v8672_v28 = vpop.f32.mrb[184].mxu1  ;;  %v9125_v39 = vsel %vm1513_vm1, %v9091_v3, %v8917_v7  ;;  %v8810_v45 = vpop.permute.xlu0 %8809 }
 0x768   : > { %v8674_v58 = vpop.f32.mrb[185].mxu1 }
 0x769   : > { %v8675_v60 = vpop.f32.mrb[186].mxu1  ;;  %v23495_v58 = vld [vmem:[#allocation28_spill] sm:$0xff] }
 0x76a   : > { %v8956_v55 = vpop.permute.xlu1 %8955  ;;  %v8732_v33 = vpack.c.bf16 %v8675_v60, %v8672_v28  ;;  %v8677_v48 = vpop.f32.mrb[187].mxu1  ;;  %v23494_v28 = vld [vmem:[#allocation34_spill] sm:$0xff]  ;;  %v23497_v31 = vpack.c.bf16 %v23495_v58, %v23496_v42 }
 0x76b   : > { %v9155_v21 = vsel %vm1626_vm2, %v9125_v39, %v8956_v55  ;;  %v23501_v39 = vpack.c.bf16 %v23499_v2, %v23500_v36 }
 0x76c   : > { %9435 = vmatprep.mubr.bf16.mxu0 %v9155_v21  ;;  %14909 = vmatmul.mubr.msk.bf16.gmra.mrb[236].mxu1 %vm1344_vm0, %v8732_v33  ;;  %v9100_v3 = vsel %vm1344_vm0, %v23497_v31, %v23494_v28 }
 0x76d   : > { %9436 = vmatmul.mubr.bf16.gmra.mrb[192].mxu0 %v9051_v16  ;;  %14912 = vmatprep.mubr.msk.bf16.mxu1 %vm16056_vm5, %v23467_v14  ;;  %v8996_v55 = vsel %vm1344_vm0, %v23501_v39, %v23498_v26 }
 0x76e   : > { %v8919_v8 = vpop.permute.xlu1 %8918  ;;  %v9027_v16 = vsel %vm1513_vm1, %v8996_v55, %v21721_v35 }
 0x76f   : > { %v8680_v53 = vpop.f32.mrb[188].mxu1  ;;  %v9127_v34 = vsel %vm1513_vm1, %v9094_v52, %v8919_v8 }
 0x770   : > { %v8682_v57 = vpop.f32.mrb[189].mxu1 }
 0x771   : > { %v8683_v25 = vpop.f32.mrb[190].mxu1  ;;  %v8849_v57 = vpop.permute.xlu0 %8848 }
 0x772   : > { %v8958_v47 = vpop.permute.xlu1 %8957  ;;  %v8733_v20 = vpack.c.bf16 %v8683_v25, %v8680_v53  ;;  %v8685_v5 = vpop.f32.mrb[191].mxu1  ;;  %v9060_v53 = vsel %vm1626_vm2, %v9027_v16, %v8845_v11  ;;  %v23507_v11 = vld [vmem:[#allocation17_spill] sm:$0xff] }
 0x773   : > { %v9158_v15 = vsel %vm1626_vm2, %v9127_v34, %v8958_v47  ;;  %v23504_v34 = vld [vmem:[#allocation29_spill] sm:$0xff]  ;;  %v23506_v5 = vld [vmem:[#allocation20_spill] sm:$0xff] }
 0x774   : > { %9443 = vmatprep.mubr.bf16.mxu0 %v9158_v15  ;;  %14913 = vmatmul.mubr.msk.bf16.gmra.mrb[240].mxu1 %vm1344_vm0, %v8733_v20  ;;  %v23505_v47 = vpack.c.bf16 %v23503_v10, %v23504_v34  ;;  %v23509_v15 = vpack.c.bf16 %v23507_v11, %v23508_v30 }
 0x775   : > { %9444 = vmatmul.mubr.bf16.gmra.mrb[196].mxu0 %v9054_v0  ;;  %14916 = vmatprep.mubr.msk.bf16.mxu1 %vm16056_vm5, %v23467_v14  ;;  %v8812_v29 = vpop.permute.xlu0 %8811 }
 0x776   : > { %v8921_v41 = vpop.permute.xlu1 %8920  ;;  %v9103_v35 = vsel %vm1344_vm0, %v23505_v47, %v23502_v13  ;;  %v8999_v0 = vsel %vm1344_vm0, %v23509_v15, %v23506_v5  ;;  %v23520_v5 = vld [vmem:[#allocation24_spill] sm:$0xff]  ;;  %v15732_v15 = vld [vmem:[%s23259_s8 + $0x4] ss:$8 sps:$4 sm:$0xff]  }
 0x777   : > { %v8688_v43 = vpop.f32.mrb[192].mxu1  ;;  %v9129_v1 = vsel %vm1513_vm1, %v9097_v17, %v8921_v41  ;;  %v9029_v27 = vsel %vm1513_vm1, %v8999_v0, %v8808_v38  ;;  %v15735_v0 = vld [vmem:[%s23259_s8 + $0x74] ss:$8 sps:$4 sm:$0xff]  }
 0x778   : > { %v8690_v12 = vpop.f32.mrb[193].mxu1  ;;  %v9063_v17 = vsel %vm1626_vm2, %v9029_v27, %v8847_v59  ;;  %v23515_v59 = vld [vmem:[#allocation11_spill] sm:$0xff] }
 0x779   : > { %v8691_v44 = vpop.f32.mrb[194].mxu1 }
 0x77a   : > { %v8960_v9 = vpop.permute.xlu1 %8959  ;;  %v8734_v51 = vpack.c.bf16 %v8691_v44, %v8688_v43  ;;  %v8693_v6 = vpop.f32.mrb[195].mxu1 }
 0x77b   : > { %v9161_v50 = vsel %vm1626_vm2, %v9129_v1, %v8960_v9  ;;  %v23513_v1 = vpack.c.bf16 %v23511_v23, %v23512_v4  ;;  %v8851_v9 = vpop.permute.xlu0 %8850  ;;  %v23514_v6 = vld [vmem:[#allocation21_spill] sm:$0xff] }
 0x77c   : > { %9451 = vmatprep.mubr.bf16.mxu0 %v9161_v50  ;;  %14917 = vmatmul.mubr.msk.bf16.gmra.mrb[244].mxu1 %vm1344_vm0, %v8734_v51  ;;  %v23517_v50 = vpack.c.bf16 %v23515_v59, %v23516_v61 }
 0x77d   : > { %9452 = vmatmul.mubr.bf16.gmra.mrb[200].mxu0 %v9057_v37  ;;  %14920 = vmatprep.mubr.msk.bf16.mxu1 %vm16056_vm5, %v23467_v14  ;;  %v9106_v38 = vsel %vm1344_vm0, %v23513_v1, %v23510_v63  ;;  %v21862_v63 = vld [vmem:[%s23258_s7] ss:$0 sm:$0xff] }
 0x77e   : > { %v8923_v32 = vpop.permute.xlu1 %8922  ;;  %v9002_v37 = vsel %vm1344_vm0, %v23517_v50, %v23514_v6 }
 0x77f   : > { %v8696_v56 = vpop.f32.mrb[196].mxu1  ;;  %v9131_v33 = vsel %vm1513_vm1, %v9100_v3, %v8923_v32  ;;  %v9031_v58 = vsel %vm1513_vm1, %v9002_v37, %v8810_v45 }
 0x780   : > { %v8698_v7 = vpop.f32.mrb[197].mxu1  ;;  %v9066_v31 = vsel %vm1626_vm2, %v9031_v58, %v8849_v57 }
 0x781   : > { %v8699_v60 = vpop.f32.mrb[198].mxu1 }
 0x782   : > { %v8962_v48 = vpop.permute.xlu1 %8961  ;;  %v8735_v54 = vpack.c.bf16 %v8699_v60, %v8696_v56  ;;  %v8701_v21 = vpop.f32.mrb[199].mxu1 }
 0x783   : > { %v9164_v8 = vsel %vm1626_vm2, %v9131_v33, %v8962_v48  ;;  %v8814_v60 = vpop.permute.xlu0 %8813  ;;  %v23518_v48 = vld [vmem:[#allocation22_spill] sm:$0xff] }
 0x784   : > { %9459 = vmatprep.mubr.bf16.mxu0 %v9164_v8  ;;  %14921 = vmatmul.mubr.msk.bf16.gmra.mrb[248].mxu1 %vm1344_vm0, %v8735_v54  ;;  %v9033_v54 = vsel %vm1513_vm1, %v23518_v48, %v8812_v29 }
 0x785   : > { %9460 = vmatmul.mubr.bf16.gmra.mrb[204].mxu0 %v9060_v53  ;;  %14924 = vmatprep.mubr.msk.bf16.mxu1 %vm16056_vm5, %v23467_v14  ;;  %v9069_v16 = vsel %vm1626_vm2, %v9033_v54, %v8851_v9 }
 0x786   : > { %v8925_v18 = vpop.permute.xlu1 %8924 }
 0x787   : > { %v8704_v52 = vpop.f32.mrb[200].mxu1  ;;  %v9133_v41 = vsel %vm1513_vm1, %v9103_v35, %v8925_v18  ;;  %v8853_v8 = vpop.permute.xlu0 %8852 }
 0x788   : > { %v8706_v25 = vpop.f32.mrb[201].mxu1 }
 0x789   : > { %v8707_v20 = vpop.f32.mrb[202].mxu1 }
 0x78a   : > { %v8964_v43 = vpop.permute.xlu1 %8963  ;;  %v8736_v12 = vpack.c.bf16 %v8707_v20, %v8704_v52  ;;  %v8709_v19 = vpop.f32.mrb[203].mxu1 }
 0x78b   : > { %v9167_v22 = vsel %vm1626_vm2, %v9133_v41, %v8964_v43  ;;  %v8816_v25 = vpop.permute.xlu0 %8815 }
 0x78c   : > { %9467 = vmatprep.mubr.bf16.mxu0 %v9167_v22  ;;  %14925 = vmatmul.mubr.msk.bf16.gmra.mrb[252].mxu1 %vm1344_vm0, %v8736_v12 }
 0x78d   : > { %9468 = vmatmul.mubr.bf16.gmra.mrb[208].mxu0 %v9063_v17  ;;  %14928 = vmatprep.mubr.msk.bf16.mxu1 %vm16056_vm5, %v23467_v14 }
 0x78e   : > { %v8927_v44 = vpop.permute.xlu1 %8926 }
 0x78f   : > { %v8712_v40 = vpop.f32.mrb[204].mxu1  ;;  %v9135_v32 = vsel %vm1513_vm1, %v9106_v38, %v8927_v44  ;;  %v8855_v47 = vpop.permute.xlu0 %8854 }
 0x790   : > { %v8714_v62 = vpop.f32.mrb[205].mxu1 }
 0x791   : > { %v8715_v51 = vpop.f32.mrb[206].mxu1 }
 0x792   : > { %v8966_v56 = vpop.permute.xlu1 %8965  ;;  %v8737_v7 = vpack.c.bf16 %v8715_v51, %v8712_v40  ;;  %v8717_v28 = vpop.f32.mrb[207].mxu1 }
 0x793   : > { %v9170_v42 = vsel %vm1626_vm2, %v9135_v32, %v8966_v56 }
 0x794   : > { %9475 = vmatprep.mubr.bf16.mxu0 %v9170_v42  ;;  %14929 = vmatmul.mubr.msk.bf16.gmra.mrb[0].mxu1 %vm1344_vm0, %v8737_v7 }
 0x795   : > { %9476 = vmatmul.mubr.bf16.gmra.mrb[212].mxu0 %v9066_v31  ;;  %14932 = vmatprep.mubr.msk.bf16.mxu1 %vm16056_vm5, %v23467_v14 }
 0x796   : > { %v8929_v3 = vpop.permute.xlu1 %8928 }
 0x797   : > { %v8720_v26 = vpop.f32.mrb[208].mxu1  ;;  %v9137_v45 = vsel %vm1513_vm1, %v21605_v46, %v8929_v3  ;;  %v23519_v46 = vld [vmem:[#allocation23_spill] sm:$0xff] }
 0x798   : > { %v8738_v2 = vpack.c.bf16 %v8720_v26, %v8720_v26  ;;  %v8722_v36 = vpop.f32.mrb[209].mxu1  ;;  %v9035_v52 = vsel %vm1513_vm1, %v23519_v46, %v8814_v60 }
 0x799   : > { %v8723_v39 = vpop.f32.mrb[210].mxu1  ;;  %v9072_v10 = vsel %vm1626_vm2, %v9035_v52, %v8853_v8 }
 0x79a   : > { %v8968_v55 = vpop.permute.xlu1 %8967  ;;  %v8724_v33 = vpop.f32.mrb[211].mxu1 }
 0x79b   : > { %v9173_v21 = vsel %vm1626_vm2, %v9137_v45, %v8968_v55  ;;  %v23521_v33 = vmov 0  }
 0x79c   : > { %9483 = vmatprep.mubr.bf16.mxu0 %v9173_v21  ;;  %14933 = vmatmul.mubr.msk.bf16.gmra.mrb[4].mxu1 %vm1344_vm0, %v8738_v2 }
 0x79d   : > { %9484 = vmatmul.mubr.bf16.gmra.mrb[216].mxu0 %v9069_v16  ;;  %13871 = vmatprep.mubr.msk.bf16.mxu1 %vm5922_vm6, %v15735_v0 }
 0x79e   : > { %v8931_v53 = vpop.permute.xlu1 %8930 }
 0x79f   : > { %v9139_v57 = vsel %vm1513_vm1, %v21617_v24, %v8931_v53  ;;  %v9037_v24 = vsel %vm1513_vm1, %v23520_v5, %v8816_v25 }
 0x7a0   : > { %v9075_v30 = vsel %vm1626_vm2, %v9037_v24, %v8855_v47 }
 0x7a2   : > { %v8970_v18 = vpop.permute.xlu1 %8969 }
 0x7a3   : > { %v9176_v13 = vsel %vm1626_vm2, %v9139_v57, %v8970_v18 }
 0x7a4   : > { %9491 = vmatprep.mubr.bf16.mxu0 %v9176_v13 }
 0x7a5   : > { %9492 = vmatmul.mubr.bf16.gmra.mrb[220].mxu0 %v9072_v10 }
 0x7a6   : > { %v8933_v34 = vpop.permute.xlu1 %8932 }
 0x7a7   : > { %v9141_v35 = vsel %vm1513_vm1, %v21626_v49, %v8933_v34 }
 0x7aa   : > { %v8972_v20 = vpop.permute.xlu1 %8971 }
 0x7ab   : > { %v9179_v11 = vsel %vm1626_vm2, %v9141_v35, %v8972_v20 }
 0x7ac   : > { %9499 = vmatprep.mubr.bf16.mxu0 %v9179_v11 }
 0x7ad   : > { %9500 = vmatmul.mubr.bf16.gmra.mrb[224].mxu0 %v9075_v30 }
 0x7ae   : > { %13833 = vmatprep.mubr.msk.bf16.mxu0 %vm5922_vm6, %v15732_v15 }
 0x80f   : > { %v9541_v41 = vpop.f32.mrb[212].mxu1 }
 0x810   : > { %v14886_v49 = vpop.f32.mrb[213].mxu1 }
 0x811   : > { %v9544_v43 = vpop.f32.mrb[214].mxu1 }
 0x812   : > { %v14887_v12 = vpop.f32.mrb[215].mxu1 }
 0x817   : > { %v9549_v19 = vpop.f32.mrb[216].mxu1 }
 0x818   : > { %v14890_v27 = vpop.f32.mrb[217].mxu1 }
 0x819   : > { %v9552_v29 = vpop.f32.mrb[218].mxu1 }
 0x81a   : > { %v14891_v22 = vpop.f32.mrb[219].mxu1 }
 0x81f   : > { %v9557_v17 = vpop.f32.mrb[220].mxu1 }
 0x820   : > { %v14508_v44 = vpop.f32.mrb[176].mxu0  ;;  %v14894_v40 = vpop.f32.mrb[221].mxu1 }
 0x821   : > { %v14509_v62 = vpop.f32.mrb[177].mxu0  ;;  %v9560_v23 = vpop.f32.mrb[222].mxu1 }
 0x822   : > { %v14510_v4 = vadd.f32 %v14509_v62, %v14508_v44  ;;  %v14511_v1 = vpop.f32.mrb[178].mxu0  ;;  %v14895_v38 = vpop.f32.mrb[223].mxu1 }
 0x823   : > { %v14512_v9 = vpop.f32.mrb[179].mxu0 }
 0x824   : > { %v14513_v51 = vadd.f32 %v14512_v9, %v14511_v1  ;;  %v9406_v6 = vadd.f32 %v14510_v4, %v21862_v63 }
 0x826   : > { %v9542_v59 = vadd.f32 %v9541_v41, %v9406_v6  ;;  %v9409_v61 = vadd.f32 %v14513_v51, %v21862_v63 }
 0x827   : > { %v21872_v50 = vpop.f32.mrb[224].mxu1 }
 0x828   : > { %v9643_v37 = vmax.f32 %v9542_v59, 0.0  ;;  %v9545_v32 = vadd.f32 %v9544_v43, %v9409_v61  ;;  %v14514_v56 = vpop.f32.mrb[180].mxu0  ;;  %v14898_v7 = vpop.f32.mrb[225].mxu1 }
 0x829   : > { %v14515_v28 = vpop.f32.mrb[181].mxu0  ;;  %v21874_v58 = vpop.f32.mrb[226].mxu1 }
 0x82a   : > { %9668 = vst.msk [vmem:[%s21870_s23] sm:$0xff] %vm1344_vm0, %v9643_v37  ;;  %v9644_v42 = vmax.f32 %v9545_v32, 0.0  ;;  %v14516_v31 = vadd.f32 %v14515_v28, %v14514_v56  ;;  %v14517_v3 = vpop.f32.mrb[182].mxu0  ;;  %v14899_v60 = vpop.f32.mrb[227].mxu1 }
 0x82b   : > { %v14518_v26 = vpop.f32.mrb[183].mxu0 }
 0x82c   : > { %9669 = vst.msk [vmem:[%s21870_s23 + $0x8] sm:$0xff] %vm1344_vm0, %v9644_v42  ;;  %v21880_v2 = vpack.c.bf16 %v9644_v42, %v9643_v37  ;;  %v14519_v36 = vadd.f32 %v14518_v26, %v14517_v3  ;;  %v9414_v39 = vadd.f32 %v14516_v31, %v21862_v63 }
 0x82e   : > { %v9550_v45 = vadd.f32 %v9549_v19, %v9414_v39  ;;  %9763 = vmatpush1.bf16.msra.mxu0 %v21880_v2  ;;  %10005 = vmatpush1.bf16.msra.mxu1 %v21880_v2  ;;  %v9417_v55 = vadd.f32 %v14519_v36, %v21862_v63 }
 0x82f   : > { %9764 = vmatprep.subr.bf16.mxu0 %v23521_v33  ;;  %10006 = vmatprep.subr.bf16.mxu1 %v23521_v33  ;;  %v21888_v48 = vpop.f32.mrb[228].mxu1 }
 0x830   : > { %v9645_v54 = vmax.f32 %v9550_v45, 0.0  ;;  %v9553_v21 = vadd.f32 %v9552_v29, %v9417_v55  ;;  %v14520_v16 = vpop.f32.mrb[184].mxu0  ;;  %v14902_v8 = vpop.f32.mrb[229].mxu1 }
 0x831   : > { %v14521_v53 = vpop.f32.mrb[185].mxu0  ;;  %v21890_v57 = vpop.f32.mrb[230].mxu1 }
 0x832   : > { %9670 = vst.msk [vmem:[%s21870_s23 + $0x10] sm:$0xff] %vm1344_vm0, %v9645_v54  ;;  %v9646_v18 = vmax.f32 %v9553_v21, 0.0  ;;  %v14522_v46 = vadd.f32 %v14521_v53, %v14520_v16  ;;  %v14523_v52 = vpop.f32.mrb[186].mxu0  ;;  %v14903_v25 = vpop.f32.mrb[231].mxu1 }
 0x833   : > { %v14524_v13 = vpop.f32.mrb[187].mxu0 }
 0x834   : > { %9671 = vst.msk [vmem:[%s21870_s23 + $0x18] sm:$0xff] %vm1344_vm0, %v9646_v18  ;;  %v21896_v10 = vpack.c.bf16 %v9646_v18, %v9645_v54  ;;  %v14525_v34 = vadd.f32 %v14524_v13, %v14523_v52  ;;  %v9422_v47 = vadd.f32 %v14522_v46, %v21862_v63 }
 0x836   : > { %v9558_v35 = vadd.f32 %v9557_v17, %v9422_v47  ;;  %9765 = vmatpush1.bf16.msra.mxu0 %v21896_v10  ;;  %10007 = vmatpush1.bf16.msra.mxu1 %v21896_v10  ;;  %v9425_v20 = vadd.f32 %v14525_v34, %v21862_v63 }
 0x837   : > { %9766 = vmatprep.subr.bf16.mxu0 %v23521_v33  ;;  %10008 = vmatprep.subr.bf16.mxu1 %v23521_v33  ;;  %v21904_v5 = vpop.f32.mrb[232].mxu1 }
 0x838   : > { %v9647_v24 = vmax.f32 %v9558_v35, 0.0  ;;  %v9561_v11 = vadd.f32 %v9560_v23, %v9425_v20  ;;  %v14526_v30 = vpop.f32.mrb[188].mxu0  ;;  %v14906_v15 = vpop.f32.mrb[233].mxu1 }
 0x839   : > { %v14527_v0 = vpop.f32.mrb[189].mxu0  ;;  %v21906_v41 = vpop.f32.mrb[234].mxu1 }
 0x83a   : > { %9672 = vst.msk [vmem:[%s21870_s23 + $0x20] sm:$0xff] %vm1344_vm0, %v9647_v24  ;;  %v9648_v49 = vmax.f32 %v9561_v11, 0.0  ;;  %v14528_v43 = vadd.f32 %v14527_v0, %v14526_v30  ;;  %v14529_v12 = vpop.f32.mrb[190].mxu0  ;;  %v14907_v19 = vpop.f32.mrb[235].mxu1 }
 0x83b   : > { %v14530_v27 = vpop.f32.mrb[191].mxu0 }
 0x83c   : > { %9673 = vst.msk [vmem:[%s21870_s23 + $0x28] sm:$0xff] %vm1344_vm0, %v9648_v49  ;;  %v21912_v29 = vpack.c.bf16 %v9648_v49, %v9647_v24  ;;  %v14531_v22 = vadd.f32 %v14530_v27, %v14529_v12  ;;  %v9430_v17 = vadd.f32 %v14528_v43, %v21862_v63 }
 0x83e   : > { %v9566_v44 = vadd.f32 %v21872_v50, %v9430_v17  ;;  %9767 = vmatpush1.bf16.msra.mxu0 %v21912_v29  ;;  %10009 = vmatpush1.bf16.msra.mxu1 %v21912_v29  ;;  %v9433_v40 = vadd.f32 %v14531_v22, %v21862_v63 }
 0x83f   : > { %9768 = vmatprep.subr.bf16.mxu0 %v23521_v33  ;;  %10010 = vmatprep.subr.bf16.mxu1 %v23521_v33  ;;  %v21921_v62 = vpop.f32.mrb[236].mxu1 }
 0x840   : > { %v9649_v23 = vmax.f32 %v9566_v44, 0.0  ;;  %v9569_v4 = vadd.f32 %v21874_v58, %v9433_v40  ;;  %v14532_v1 = vpop.f32.mrb[192].mxu0  ;;  %v14910_v38 = vpop.f32.mrb[237].mxu1 }
 0x841   : > { %v14533_v9 = vpop.f32.mrb[193].mxu0  ;;  %v21924_v51 = vpop.f32.mrb[238].mxu1 }
 0x842   : > { %9674 = vst.msk [vmem:[%s21870_s23 + $0x30] sm:$0xff] %vm1344_vm0, %v9649_v23  ;;  %v9650_v6 = vmax.f32 %v9569_v4, 0.0  ;;  %v14534_v59 = vadd.f32 %v14533_v9, %v14532_v1  ;;  %v14535_v61 = vpop.f32.mrb[194].mxu0  ;;  %v14911_v50 = vpop.f32.mrb[239].mxu1 }
 0x843   : > { %v14536_v37 = vpop.f32.mrb[195].mxu0 }
 0x844   : > { %9675 = vst.msk [vmem:[%s21870_s23 + $0x38] sm:$0xff] %vm1344_vm0, %v9650_v6  ;;  %v21930_v32 = vpack.c.bf16 %v9650_v6, %v9649_v23  ;;  %v14537_v56 = vadd.f32 %v14536_v37, %v14535_v61  ;;  %v9438_v7 = vadd.f32 %v14534_v59, %v21862_v63 }
 0x846   : > { %v9574_v28 = vadd.f32 %v21888_v48, %v9438_v7  ;;  %9769 = vmatpush1.bf16.msra.mxu0 %v21930_v32  ;;  %10011 = vmatpush1.bf16.msra.mxu1 %v21930_v32  ;;  %v9441_v58 = vadd.f32 %v14537_v56, %v21862_v63 }
 0x847   : > { %9770 = vmatprep.subr.bf16.mxu0 %v23521_v33  ;;  %10012 = vmatprep.subr.bf16.mxu1 %v23521_v33  ;;  %v21939_v42 = vpop.f32.mrb[240].mxu1 }
 0x848   : > { %v9651_v31 = vmax.f32 %v9574_v28, 0.0  ;;  %v9577_v3 = vadd.f32 %v21890_v57, %v9441_v58  ;;  %v14538_v60 = vpop.f32.mrb[196].mxu0  ;;  %v14914_v26 = vpop.f32.mrb[241].mxu1 }
 0x849   : > { %v14539_v36 = vpop.f32.mrb[197].mxu0  ;;  %v21942_v39 = vpop.f32.mrb[242].mxu1 }
 0x84a   : > { %9676 = vst.msk [vmem:[%s21870_s23 + $0x40] sm:$0xff] %vm1344_vm0, %v9651_v31  ;;  %v9652_v45 = vmax.f32 %v9577_v3, 0.0  ;;  %v14540_v55 = vadd.f32 %v14539_v36, %v14538_v60  ;;  %v14541_v48 = vpop.f32.mrb[198].mxu0  ;;  %v14915_v54 = vpop.f32.mrb[243].mxu1 }
 0x84b   : > { %v14542_v21 = vpop.f32.mrb[199].mxu0 }
 0x84c   : > { %9677 = vst.msk [vmem:[%s21870_s23 + $0x48] sm:$0xff] %vm1344_vm0, %v9652_v45  ;;  %v21948_v16 = vpack.c.bf16 %v9652_v45, %v9651_v31  ;;  %v14543_v8 = vadd.f32 %v14542_v21, %v14541_v48  ;;  %v9446_v53 = vadd.f32 %v14540_v55, %v21862_v63 }
 0x84e   : > { %v9582_v57 = vadd.f32 %v21904_v5, %v9446_v53  ;;  %9771 = vmatpush1.bf16.msra.mxu0 %v21948_v16  ;;  %10013 = vmatpush1.bf16.msra.mxu1 %v21948_v16  ;;  %v9449_v18 = vadd.f32 %v14543_v8, %v21862_v63 }
 0x84f   : > { %9772 = vmatprep.subr.bf16.mxu0 %v23521_v33  ;;  %10014 = vmatprep.subr.bf16.mxu1 %v23521_v33  ;;  %v21957_v46 = vpop.f32.mrb[244].mxu1 }
 0x850   : > { %v9653_v52 = vmax.f32 %v9582_v57, 0.0  ;;  %v9585_v25 = vadd.f32 %v21906_v41, %v9449_v18  ;;  %v14544_v13 = vpop.f32.mrb[200].mxu0  ;;  %v14918_v34 = vpop.f32.mrb[245].mxu1 }
 0x851   : > { %v14545_v47 = vpop.f32.mrb[201].mxu0  ;;  %v21960_v35 = vpop.f32.mrb[246].mxu1 }
 0x852   : > { %9678 = vst.msk [vmem:[%s21870_s23 + $0x50] sm:$0xff] %vm1344_vm0, %v9653_v52  ;;  %v9654_v20 = vmax.f32 %v9585_v25, 0.0  ;;  %v14546_v5 = vadd.f32 %v14545_v47, %v14544_v13  ;;  %v14547_v24 = vpop.f32.mrb[202].mxu0  ;;  %v14919_v11 = vpop.f32.mrb[247].mxu1 }
 0x853   : > { %v14548_v30 = vpop.f32.mrb[203].mxu0 }
 0x854   : > { %9679 = vst.msk [vmem:[%s21870_s23 + $0x58] sm:$0xff] %vm1344_vm0, %v9654_v20  ;;  %v21966_v15 = vpack.c.bf16 %v9654_v20, %v9653_v52  ;;  %v14549_v0 = vadd.f32 %v14548_v30, %v14547_v24  ;;  %v9454_v41 = vadd.f32 %v14546_v5, %v21862_v63 }
 0x856   : > { %v9590_v49 = vadd.f32 %v21921_v62, %v9454_v41  ;;  %9773 = vmatpush1.bf16.msra.mxu0 %v21966_v15  ;;  %10015 = vmatpush1.bf16.msra.mxu1 %v21966_v15  ;;  %v9457_v43 = vadd.f32 %v14549_v0, %v21862_v63 }
 0x857   : > { %9774 = vmatprep.subr.bf16.mxu0 %v23521_v33  ;;  %10016 = vmatprep.subr.bf16.mxu1 %v23521_v33  ;;  %v21975_v12 = vpop.f32.mrb[248].mxu1 }
 0x858   : > { %v9655_v19 = vmax.f32 %v9590_v49, 0.0  ;;  %v9593_v27 = vadd.f32 %v21924_v51, %v9457_v43  ;;  %v14550_v22 = vpop.f32.mrb[204].mxu0  ;;  %v14922_v17 = vpop.f32.mrb[249].mxu1 }
 0x859   : > { %v14551_v44 = vpop.f32.mrb[205].mxu0  ;;  %v21978_v40 = vpop.f32.mrb[250].mxu1 }
 0x85a   : > { %9680 = vst.msk [vmem:[%s21870_s23 + $0x60] sm:$0xff] %vm1344_vm0, %v9655_v19  ;;  %v9656_v62 = vmax.f32 %v9593_v27, 0.0  ;;  %v14552_v23 = vadd.f32 %v14551_v44, %v14550_v22  ;;  %v14553_v4 = vpop.f32.mrb[206].mxu0  ;;  %v14923_v1 = vpop.f32.mrb[251].mxu1 }
 0x85b   : > { %v14554_v38 = vpop.f32.mrb[207].mxu0 }
 0x85c   : > { %9681 = vst.msk [vmem:[%s21870_s23 + $0x68] sm:$0xff] %vm1344_vm0, %v9656_v62  ;;  %v21984_v9 = vpack.c.bf16 %v9656_v62, %v9655_v19  ;;  %v14555_v6 = vadd.f32 %v14554_v38, %v14553_v4  ;;  %v9462_v51 = vadd.f32 %v14552_v23, %v21862_v63 }
 0x85e   : > { %v9598_v59 = vadd.f32 %v21939_v42, %v9462_v51  ;;  %9775 = vmatpush1.bf16.msra.mxu0 %v21984_v9  ;;  %10017 = vmatpush1.bf16.msra.mxu1 %v21984_v9  ;;  %v9465_v61 = vadd.f32 %v14555_v6, %v21862_v63 }
 0x85f   : > { %9776 = vmatprep.subr.bf16.mxu0 %v23521_v33  ;;  %10018 = vmatprep.subr.bf16.mxu1 %v23521_v33  ;;  %v21993_v50 = vpop.f32.mrb[252].mxu1 }
 0x860   : > { %v9657_v37 = vmax.f32 %v9598_v59, 0.0  ;;  %v9601_v56 = vadd.f32 %v21942_v39, %v9465_v61  ;;  %v14556_v7 = vpop.f32.mrb[208].mxu0  ;;  %v14926_v28 = vpop.f32.mrb[253].mxu1 }
 0x861   : > { %v14557_v58 = vpop.f32.mrb[209].mxu0  ;;  %v21996_v42 = vpop.f32.mrb[254].mxu1 }
 0x862   : > { %9682 = vst.msk [vmem:[%s21870_s23 + $0x70] sm:$0xff] %vm1344_vm0, %v9657_v37  ;;  %v9658_v31 = vmax.f32 %v9601_v56, 0.0  ;;  %v14558_v3 = vadd.f32 %v14557_v58, %v14556_v7  ;;  %v14559_v60 = vpop.f32.mrb[210].mxu0  ;;  %v14927_v26 = vpop.f32.mrb[255].mxu1 }
 0x863   : > { %v14560_v36 = vpop.f32.mrb[211].mxu0 }
 0x864   : > { %9683 = vst.msk [vmem:[%s21870_s23 + $0x78] sm:$0xff] %vm1344_vm0, %v9658_v31  ;;  %v22002_v45 = vpack.c.bf16 %v9658_v31, %v9657_v37  ;;  %v14561_v55 = vadd.f32 %v14560_v36, %v14559_v60  ;;  %v9470_v39 = vadd.f32 %v14558_v3, %v21862_v63 }
 0x866   : > { %v9606_v48 = vadd.f32 %v21957_v46, %v9470_v39  ;;  %9777 = vmatpush1.bf16.msra.mxu0 %v22002_v45  ;;  %10019 = vmatpush1.bf16.msra.mxu1 %v22002_v45  ;;  %v9473_v54 = vadd.f32 %v14561_v55, %v21862_v63 }
 0x867   : > { %9778 = vmatprep.subr.bf16.mxu0 %v23521_v33  ;;  %10020 = vmatprep.subr.bf16.mxu1 %v23521_v33  ;;  %v9629_v21 = vpop.f32.mrb[0].mxu1 }
 0x868   : > { %v9659_v8 = vmax.f32 %v9606_v48, 0.0  ;;  %v9609_v53 = vadd.f32 %v21960_v35, %v9473_v54  ;;  %v14562_v57 = vpop.f32.mrb[212].mxu0  ;;  %v14930_v18 = vpop.f32.mrb[1].mxu1 }
 0x869   : > { %v14563_v52 = vpop.f32.mrb[213].mxu0  ;;  %v9632_v25 = vpop.f32.mrb[2].mxu1 }
 0x86a   : > { %9684 = vst.msk [vmem:[%s21870_s23 + $0x80] sm:$0xff] %vm1344_vm0, %v9659_v8  ;;  %v9660_v46 = vmax.f32 %v9609_v53, 0.0  ;;  %v14564_v13 = vadd.f32 %v14563_v52, %v14562_v57  ;;  %v14565_v34 = vpop.f32.mrb[214].mxu0  ;;  %v14931_v47 = vpop.f32.mrb[3].mxu1 }
 0x86b   : > { %v14566_v20 = vpop.f32.mrb[215].mxu0  ;;  %v15741_v47 = vld [vmem:[%s23259_s8 + $0x84] ss:$8 sps:$4 sm:$0xff]  }
 0x86c   : > { %9685 = vst.msk [vmem:[%s21870_s23 + $0x88] sm:$0xff] %vm1344_vm0, %v9660_v46  ;;  %v22016_v5 = vpack.c.bf16 %v9660_v46, %v9659_v8  ;;  %v14567_v24 = vadd.f32 %v14566_v20, %v14565_v34  ;;  %v9478_v11 = vadd.f32 %v14564_v13, %v21862_v63  ;;  %v15733_v13 = vld [vmem:[%s23259_s8 + $0x70] ss:$8 sps:$4 sm:$0xff]   ;;  %v15738_v34 = vld [vmem:[%s23259_s8 + $0x14] ss:$8 sps:$4 sm:$0xff]  }
 0x86d   : > { %v15736_v20 = vld [vmem:[%s23259_s8 + $0x10] ss:$8 sps:$4 sm:$0xff]  }
 0x86e   : > { %v9614_v35 = vadd.f32 %v21975_v12, %v9478_v11  ;;  %9779 = vmatpush1.bf16.msra.mxu0 %v22016_v5  ;;  %10021 = vmatpush1.bf16.msra.mxu1 %v22016_v5  ;;  %v9481_v30 = vadd.f32 %v14567_v24, %v21862_v63  ;;  %v15739_v24 = vld [vmem:[%s23259_s8 + $0x80] ss:$8 sps:$4 sm:$0xff]   ;;  %v15744_v11 = vld [vmem:[%s23259_s8 + $0x24] ss:$8 sps:$4 sm:$0xff]  }
 0x86f   : > { %9780 = vmatprep.subr.bf16.mxu0 %v23521_v33  ;;  %10022 = vmatprep.subr.bf16.mxu1 %v23521_v33  ;;  %v9637_v0 = vpop.f32.mrb[4].mxu1 }
 0x870   : > { %v9661_v41 = vmax.f32 %v9614_v35, 0.0  ;;  %v9617_v49 = vadd.f32 %v21978_v40, %v9481_v30  ;;  %v14568_v43 = vpop.f32.mrb[216].mxu0  ;;  %v14934_v19 = vpop.f32.mrb[5].mxu1  ;;  %v15747_v35 = vld [vmem:[%s23259_s8 + $0x94] ss:$8 sps:$4 sm:$0xff]  }
 0x871   : > { %v14569_v27 = vpop.f32.mrb[217].mxu0  ;;  %v9640_v22 = vpop.f32.mrb[6].mxu1  ;;  %v15742_v30 = vld [vmem:[%s23259_s8 + $0x20] ss:$8 sps:$4 sm:$0xff]  }
 0x872   : > { %9686 = vst.msk [vmem:[%s21870_s23 + $0x90] sm:$0xff] %vm1344_vm0, %v9661_v41  ;;  %v9662_v12 = vmax.f32 %v9617_v49, 0.0  ;;  %v14570_v17 = vadd.f32 %v14569_v27, %v14568_v43  ;;  %v14571_v44 = vpop.f32.mrb[218].mxu0  ;;  %v14935_v62 = vpop.f32.mrb[7].mxu1  ;;  %v13862_v49 = vld [vmem:[%s23259_s8 + $0xa0] sm:$0x11] }
 0x873   : > { %v14572_v23 = vpop.f32.mrb[219].mxu0  ;;  %v13870_v19 = vcombine.high %v13862_v49, %v13862_v49  ;;  %v13869_v22 = vcombine.low %v13862_v49, %v13862_v49  ;;  %v15755_v62 = vld [vmem:[%s23259_s8 + $0xe0] ss:$8 sps:$4 sm:$0xff]   ;;  %v15826_v49 = vld [vmem:[%s23259_s8 + $0x1e4] ss:$8 sps:$4 sm:$0xff]  }
 0x874   : > { %9687 = vst.msk [vmem:[%s21870_s23 + $0x98] sm:$0xff] %vm1344_vm0, %v9662_v12  ;;  %v22030_v4 = vpack.c.bf16 %v9662_v12, %v9661_v41  ;;  %v14573_v1 = vadd.f32 %v14572_v23, %v14571_v44  ;;  %v9486_v38 = vadd.f32 %v14570_v17, %v21862_v63  ;;  %v9713_v41 = vld [vmem:[%s23259_s8 + $0x30] sm:$0x11]  ;;  %v15754_v12 = vld [vmem:[%s23259_s8 + $0x3c] ss:$8 sps:$4 sm:$0xff]  }
 0x875   : > { %v13832_v43 = vcombine.high %v9713_v41, %v9713_v41  ;;  %v13831_v27 = vcombine.low %v9713_v41, %v9713_v41  ;;  %v15757_v17 = vld [vmem:[%s23259_s8 + $0xe4] ss:$8 sps:$4 sm:$0xff]   ;;  %v15752_v44 = vld [vmem:[%s23259_s8 + $0x38] ss:$8 sps:$4 sm:$0xff]  }
 0x876   : > { %v9622_v40 = vadd.f32 %v21993_v50, %v9486_v38  ;;  %9781 = vmatpush1.bf16.msra.mxu0 %v22030_v4  ;;  %10023 = vmatpush1.bf16.msra.mxu1 %v22030_v4  ;;  %v9489_v6 = vadd.f32 %v14573_v1, %v21862_v63  ;;  %v15760_v23 = vld [vmem:[%s23259_s8 + $0x4c] ss:$8 sps:$4 sm:$0xff]   ;;  %v15758_v38 = vld [vmem:[%s23259_s8 + $0x48] ss:$8 sps:$4 sm:$0xff]  }
 0x877   : > { %9782 = vmatprep.subr.bf16.mxu0 %v23521_v33  ;;  %10024 = vmatprep.subr.bf16.mxu1 %v23521_v33  ;;  %v15763_v1 = vld [vmem:[%s23259_s8 + $0xf4] ss:$8 sps:$4 sm:$0xff]   ;;  %v15821_v41 = vld [vmem:[%s23259_s8 + $0x1d0] ss:$8 sps:$4 sm:$0xff]  }
 0x878   : > { %v9663_v51 = vmax.f32 %v9622_v40, 0.0  ;;  %v9625_v59 = vadd.f32 %v21996_v42, %v9489_v6  ;;  %v14574_v61 = vpop.f32.mrb[220].mxu0  ;;  %v15761_v40 = vld [vmem:[%s23259_s8 + $0xf0] ss:$8 sps:$4 sm:$0xff]   ;;  %v15766_v6 = vld [vmem:[%s23259_s8 + $0x5c] ss:$8 sps:$4 sm:$0xff]  }
 0x879   : > { %v14575_v37 = vpop.f32.mrb[221].mxu0 }
 0x87a   : > { %9688 = vst.msk [vmem:[%s21870_s23 + $0xa0] sm:$0xff] %vm1344_vm0, %v9663_v51  ;;  %v9664_v56 = vmax.f32 %v9625_v59, 0.0  ;;  %v14576_v7 = vadd.f32 %v14575_v37, %v14574_v61  ;;  %v14577_v50 = vpop.f32.mrb[222].mxu0  ;;  %v15764_v59 = vld [vmem:[%s23259_s8 + $0x58] ss:$8 sps:$4 sm:$0xff]  }
 0x87b   : > { %v14578_v28 = vpop.f32.mrb[223].mxu0  ;;  %v15767_v61 = vld [vmem:[%s23259_s8 + $0x100] ss:$8 sps:$4 sm:$0xff]  }
 0x87c   : > { %9689 = vst.msk [vmem:[%s21870_s23 + $0xa8] sm:$0xff] %vm1344_vm0, %v9664_v56  ;;  %v22044_v58 = vpack.c.bf16 %v9664_v56, %v9663_v51  ;;  %v14579_v31 = vadd.f32 %v14578_v28, %v14577_v50  ;;  %v9494_v3 = vadd.f32 %v14576_v7, %v21862_v63  ;;  %v15769_v51 = vld [vmem:[%s23259_s8 + $0x104] ss:$8 sps:$4 sm:$0xff]   ;;  %v13900_v56 = vld [vmem:[%s23259_s8 + $0x110] sm:$0x11] }
 0x87d   : > { %v13843_v37 = vld [vmem:[%s23259_s8 + $0x68] sm:$0x11]  ;;  %v13908_v50 = vcombine.high %v13900_v56, %v13900_v56 }
 0x87e   : > { %v9630_v60 = vadd.f32 %v9629_v21, %v9494_v3  ;;  %9783 = vmatpush1.bf16.msra.mxu0 %v22044_v58  ;;  %10025 = vmatpush1.bf16.msra.mxu1 %v22044_v58  ;;  %v9497_v42 = vadd.f32 %v14579_v31, %v21862_v63  ;;  %v13851_v7 = vcombine.high %v13843_v37, %v13843_v37  ;;  %v15776_v3 = vld [vmem:[%s23259_s8 + $0xac] ss:$8 sps:$4 sm:$0xff]  }
 0x87f   : > { %9784 = vmatprep.subr.bf16.mxu0 %v23521_v33  ;;  %10026 = vmatprep.subr.bf16.mxu1 %v23521_v33  ;;  %v13850_v28 = vcombine.low %v13843_v37, %v13843_v37  ;;  %v13907_v31 = vcombine.low %v13900_v56, %v13900_v56 }
 0x880   : > { %v9665_v26 = vmax.f32 %v9630_v60, 0.0  ;;  %v9633_v36 = vadd.f32 %v9632_v25, %v9497_v42  ;;  %v14580_v55 = vpop.f32.mrb[224].mxu0  ;;  %v15779_v60 = vld [vmem:[%s23259_s8 + $0x154] ss:$8 sps:$4 sm:$0xff]   ;;  %v15774_v42 = vld [vmem:[%s23259_s8 + $0xa8] ss:$8 sps:$4 sm:$0xff]  }
 0x881   : > { %v14581_v39 = vpop.f32.mrb[225].mxu0 }
 0x882   : > { %9690 = vst.msk [vmem:[%s21870_s23 + $0xb0] sm:$0xff] %vm1344_vm0, %v9665_v26  ;;  %v9666_v48 = vmax.f32 %v9633_v36, 0.0  ;;  %v14582_v54 = vadd.f32 %v14581_v39, %v14580_v55  ;;  %v14583_v21 = vpop.f32.mrb[226].mxu0  ;;  %v15782_v36 = vld [vmem:[%s23259_s8 + $0xbc] ss:$8 sps:$4 sm:$0xff]  }
 0x883   : > { %v14584_v8 = vpop.f32.mrb[227].mxu0  ;;  %v15799_v55 = vld [vmem:[%s23259_s8 + $0x164] ss:$8 sps:$4 sm:$0xff]   ;;  %v15780_v39 = vld [vmem:[%s23259_s8 + $0xb8] ss:$8 sps:$4 sm:$0xff]  }
 0x884   : > { %9691 = vst.msk [vmem:[%s21870_s23 + $0xb8] sm:$0xff] %vm1344_vm0, %v9666_v48  ;;  %v22056_v53 = vpack.c.bf16 %v9666_v48, %v9665_v26  ;;  %v9502_v57 = vadd.f32 %v14582_v54, %v21862_v63  ;;  %v15730_v63 = vld [vmem:[%s23259_s8] ss:$8 sps:$4 sm:$0xff]   ;;  %v15777_v26 = vld [vmem:[%s23259_s8 + $0x150] ss:$8 sps:$4 sm:$0xff]  }
 0x885   : > { %v15797_v48 = vld [vmem:[%s23259_s8 + $0x160] ss:$8 sps:$4 sm:$0xff]   ;;  %v15785_v54 = vld [vmem:[%s23259_s8 + $0xcc] ss:$8 sps:$4 sm:$0xff]  }
 0x886   : > { %v9638_v18 = vadd.f32 %v9637_v0, %v9502_v57  ;;  %9785 = vmatpush1.bf16.msra.mxu0 %v22056_v53  ;;  %10027 = vmatpush1.bf16.msra.mxu1 %v22056_v53  ;;  %v15745_v0 = vld [vmem:[%s23259_s8 + $0x90] ss:$8 sps:$4 sm:$0xff]   ;;  %v15807_v21 = vld [vmem:[%s23259_s8 + $0x174] ss:$8 sps:$4 sm:$0xff]  }
 0x887   : > { %9786 = vmatprep.subr.bf16.mxu0 %v23521_v33  ;;  %10028 = vmatprep.subr.bf16.mxu1 %v23521_v33  ;;  %v15783_v8 = vld [vmem:[%s23259_s8 + $0xc8] ss:$8 sps:$4 sm:$0xff]   ;;  %v13881_v57 = vld [vmem:[%s23259_s8 + $0xd8] sm:$0x11] }
 0x888   : > { %v9667_v52 = vmax.f32 %v9638_v18, 0.0  ;;  %v15805_v18 = vld [vmem:[%s23259_s8 + $0x170] ss:$8 sps:$4 sm:$0xff]  }
 0x88a   : > { %9693 = vst.msk [vmem:[%s21870_s23 + $0xc0] sm:$0xf] %vm9692_vm8, %v9667_v52  ;;  %v9706_v25 = vpack.c.bf16 %v9667_v52, %v9667_v52  ;;  %v13938_v52 = vld [vmem:[%s23259_s8 + $0x180] sm:$0x11] }
 0x88c   : > { %v22065_v46 = vsel %vm5962_vm7, %v9706_v25, 0  ;;  %v13889_v25 = vcombine.high %v13881_v57, %v13881_v57 }
 0x88d   : > { %9787 = vmatpush1.bf16.msra.mxu0 %v22065_v46  ;;  %10029 = vmatpush1.bf16.msra.mxu1 %v22065_v46 }
 0x88e   : > { %9883 = vmatprep.subr.bf16.mxu0 %v23521_v33  ;;  %10246 = vmatprep.subr.bf16.mxu1 %v23521_v33 }
 0x890   : > { %9795 = vmatmul.mubr.bf16.vlgmr.msra.gmra.mrb[228].mxu0 %v15730_v63  ;;  %10037 = vmatmul.mubr.bf16.vlgmr.msra.gmra.mrb[8].mxu1 %v15733_v13  ;;  %v13946_v63 = vcombine.high %v13938_v52, %v13938_v52  ;;  %v13888_v13 = vcombine.low %v13881_v57, %v13881_v57 }
 0x891   : > { %9884 = vmatpush1.bf16.msra.mxu0 %v21880_v2  ;;  %10247 = vmatpush1.bf16.msra.mxu1 %v21880_v2 }
 0x892   : > { %9885 = vmatprep.subr.bf16.mxu0 %v23521_v33  ;;  %10248 = vmatprep.subr.bf16.mxu1 %v23521_v33 }
 0x893   : > { %13834 = vmatprep.mubr.msk.bf16.mxu0 %vm5922_vm6, %v15738_v34  ;;  %13872 = vmatprep.mubr.msk.bf16.mxu1 %vm5922_vm6, %v15741_v47  ;;  %v13945_v34 = vcombine.low %v13938_v52, %v13938_v52  ;;  %v15790_v47 = vld [vmem:[%s23259_s8 + $0x11c] ss:$8 sps:$4 sm:$0xff]  }
 0x895   : > { %9886 = vmatpush1.bf16.msra.mxu0 %v21896_v10  ;;  %10249 = vmatpush1.bf16.msra.mxu1 %v21896_v10 }
 0x896   : > { %9887 = vmatprep.subr.bf16.mxu0 %v23521_v33  ;;  %10250 = vmatprep.subr.bf16.mxu1 %v23521_v33 }
 0x898   : > { %9803 = vmatmul.mubr.bf16.gmra.mrb[232].mxu0 %v15736_v20  ;;  %10045 = vmatmul.mubr.bf16.gmra.mrb[12].mxu1 %v15739_v24  ;;  %v15820_v20 = vld [vmem:[%s23259_s8 + $0x1c4] ss:$8 sps:$4 sm:$0xff]   ;;  %v15788_v24 = vld [vmem:[%s23259_s8 + $0x118] ss:$8 sps:$4 sm:$0xff]  }
 0x899   : > { %9888 = vmatpush1.bf16.msra.mxu0 %v21912_v29  ;;  %10251 = vmatpush1.bf16.msra.mxu1 %v21912_v29 }
 0x89a   : > { %9889 = vmatprep.subr.bf16.mxu0 %v23521_v33  ;;  %10252 = vmatprep.subr.bf16.mxu1 %v23521_v33 }
 0x89b   : > { %13835 = vmatprep.mubr.msk.bf16.mxu0 %vm5922_vm6, %v15744_v11  ;;  %13873 = vmatprep.mubr.msk.bf16.mxu1 %vm5922_vm6, %v15747_v35  ;;  %v15818_v11 = vld [vmem:[%s23259_s8 + $0x1c0] ss:$8 sps:$4 sm:$0xff]   ;;  %v15793_v35 = vld [vmem:[%s23259_s8 + $0x12c] ss:$8 sps:$4 sm:$0xff]  }
 0x89d   : > { %9890 = vmatpush1.bf16.msra.mxu0 %v21930_v32  ;;  %10253 = vmatpush1.bf16.msra.mxu1 %v21930_v32 }
 0x89e   : > { %9891 = vmatprep.subr.bf16.mxu0 %v23521_v33  ;;  %10254 = vmatprep.subr.bf16.mxu1 %v23521_v33 }
 0x8a0   : > { %9811 = vmatmul.mubr.bf16.gmra.mrb[236].mxu0 %v15742_v30  ;;  %10053 = vmatmul.mubr.bf16.gmra.mrb[16].mxu1 %v15745_v0  ;;  %v15823_v30 = vld [vmem:[%s23259_s8 + $0x1d4] ss:$8 sps:$4 sm:$0xff]   ;;  %v15791_v0 = vld [vmem:[%s23259_s8 + $0x128] ss:$8 sps:$4 sm:$0xff]  }
 0x8a1   : > { %9892 = vmatpush1.bf16.msra.mxu0 %v21948_v16  ;;  %10255 = vmatpush1.bf16.msra.mxu1 %v21948_v16 }
 0x8a2   : > { %9893 = vmatprep.subr.bf16.mxu0 %v23521_v33  ;;  %10256 = vmatprep.subr.bf16.mxu1 %v23521_v33 }
 0x8a3   : > { %13836 = vmatprep.mubr.msk.bf16.mxu0 %vm5922_vm6, %v13832_v43  ;;  %13874 = vmatprep.mubr.msk.bf16.mxu1 %vm5922_vm6, %v13870_v19  ;;  %v13976_v43 = vld [vmem:[%s23259_s8 + $0x1f0] sm:$0x11]  ;;  %v15794_v19 = vld [vmem:[%s23259_s8 + $0x138] ss:$8 sps:$4 sm:$0xff]  }
 0x8a5   : > { %9894 = vmatpush1.bf16.msra.mxu0 %v21966_v15  ;;  %10257 = vmatpush1.bf16.msra.mxu1 %v21966_v15 }
 0x8a6   : > { %9895 = vmatprep.subr.bf16.mxu0 %v23521_v33  ;;  %10258 = vmatprep.subr.bf16.mxu1 %v23521_v33 }
 0x8a8   : > { %9819 = vmatmul.mubr.bf16.gmra.mrb[240].mxu0 %v13831_v27  ;;  %10061 = vmatmul.mubr.bf16.gmra.mrb[20].mxu1 %v13869_v22  ;;  %v13984_v22 = vcombine.high %v13976_v43, %v13976_v43 }
 0x8a9   : > { %9896 = vmatpush1.bf16.msra.mxu0 %v21984_v9  ;;  %10259 = vmatpush1.bf16.msra.mxu1 %v21984_v9 }
 0x8aa   : > { %9897 = vmatprep.subr.bf16.mxu0 %v23521_v33  ;;  %10260 = vmatprep.subr.bf16.mxu1 %v23521_v33 }
 0x8ab   : > { %13852 = vmatprep.mubr.msk.bf16.mxu0 %vm5922_vm6, %v15754_v12  ;;  %13909 = vmatprep.mubr.msk.bf16.mxu1 %vm5922_vm6, %v15757_v17  ;;  %v13983_v17 = vcombine.low %v13976_v43, %v13976_v43 }
 0x8ad   : > { %9898 = vmatpush1.bf16.msra.mxu0 %v22002_v45  ;;  %10261 = vmatpush1.bf16.msra.mxu1 %v22002_v45 }
 0x8ae   : > { %9899 = vmatprep.subr.bf16.mxu0 %v23521_v33  ;;  %10262 = vmatprep.subr.bf16.mxu1 %v23521_v33 }
 0x8b1   : > { %9900 = vmatpush1.bf16.msra.mxu0 %v22016_v5  ;;  %10263 = vmatpush1.bf16.msra.mxu1 %v22016_v5 }
 0x8b2   : > { %9901 = vmatprep.subr.bf16.mxu0 %v23521_v33  ;;  %10264 = vmatprep.subr.bf16.mxu1 %v23521_v33 }
 0x8b5   : > { %9902 = vmatpush1.bf16.msra.mxu0 %v22030_v4  ;;  %10265 = vmatpush1.bf16.msra.mxu1 %v22030_v4 }
 0x8b6   : > { %9903 = vmatprep.subr.bf16.mxu0 %v23521_v33  ;;  %10266 = vmatprep.subr.bf16.mxu1 %v23521_v33 }
 0x8b9   : > { %9904 = vmatpush1.bf16.msra.mxu0 %v22044_v58  ;;  %10267 = vmatpush1.bf16.msra.mxu1 %v22044_v58 }
 0x8ba   : > { %9905 = vmatprep.subr.bf16.mxu0 %v23521_v33  ;;  %10268 = vmatprep.subr.bf16.mxu1 %v23521_v33 }
 0x8bd   : > { %9906 = vmatpush1.bf16.msra.mxu0 %v22056_v53  ;;  %10269 = vmatpush1.bf16.msra.mxu1 %v22056_v53 }
 0x8be   : > { %9907 = vmatprep.subr.bf16.mxu0 %v23521_v33  ;;  %10270 = vmatprep.subr.bf16.mxu1 %v23521_v33 }
 0x8c1   : > { %9908 = vmatpush1.bf16.msra.mxu0 %v22065_v46  ;;  %10271 = vmatpush1.bf16.msra.mxu1 %v22065_v46 }
 0x8c2   : > { %10125 = vmatprep.subr.bf16.mxu0 %v23521_v33  ;;  %10488 = vmatprep.subr.bf16.mxu1 %v23521_v33 }
 0x8c4   : > { %9916 = vmatmul.mubr.bf16.vlgmr.msra.gmra.mrb[244].mxu0 %v15752_v44  ;;  %10279 = vmatmul.mubr.bf16.vlgmr.msra.gmra.mrb[24].mxu1 %v15755_v62 }
 0x8c5   : > { %10126 = vmatpush1.bf16.msra.mxu0 %v21880_v2  ;;  %10489 = vmatpush1.bf16.msra.mxu1 %v21880_v2 }
 0x8c6   : > { %10127 = vmatprep.subr.bf16.mxu0 %v23521_v33  ;;  %10490 = vmatprep.subr.bf16.mxu1 %v23521_v33 }
 0x8c7   : > { %13853 = vmatprep.mubr.msk.bf16.mxu0 %vm5922_vm6, %v15760_v23  ;;  %13910 = vmatprep.mubr.msk.bf16.mxu1 %vm5922_vm6, %v15763_v1 }
 0x8c9   : > { %10128 = vmatpush1.bf16.msra.mxu0 %v21896_v10  ;;  %10491 = vmatpush1.bf16.msra.mxu1 %v21896_v10 }
 0x8ca   : > { %10129 = vmatprep.subr.bf16.mxu0 %v23521_v33  ;;  %10492 = vmatprep.subr.bf16.mxu1 %v23521_v33 }
 0x8cc   : > { %9924 = vmatmul.mubr.bf16.gmra.mrb[248].mxu0 %v15758_v38  ;;  %10287 = vmatmul.mubr.bf16.gmra.mrb[28].mxu1 %v15761_v40  ;;  %v13957_v40 = vld [vmem:[%s23259_s8 + $0x1b8] sm:$0x11] }
 0x8cd   : > { %10130 = vmatpush1.bf16.msra.mxu0 %v21912_v29  ;;  %10493 = vmatpush1.bf16.msra.mxu1 %v21912_v29  ;;  %v13965_v56 = vcombine.high %v13957_v40, %v13957_v40 }
 0x8ce   : > { %10131 = vmatprep.subr.bf16.mxu0 %v23521_v33  ;;  %10494 = vmatprep.subr.bf16.mxu1 %v23521_v33 }
 0x8cf   : > { %13854 = vmatprep.mubr.msk.bf16.mxu0 %vm5922_vm6, %v15766_v6  ;;  %13911 = vmatprep.mubr.msk.bf16.mxu1 %vm5922_vm6, %v15769_v51 }
 0x8d1   : > { %10132 = vmatpush1.bf16.msra.mxu0 %v21930_v32  ;;  %10495 = vmatpush1.bf16.msra.mxu1 %v21930_v32 }
 0x8d2   : > { %10133 = vmatprep.subr.bf16.mxu0 %v23521_v33  ;;  %10496 = vmatprep.subr.bf16.mxu1 %v23521_v33 }
 0x8d4   : > { %9932 = vmatmul.mubr.bf16.gmra.mrb[252].mxu0 %v15764_v59  ;;  %10295 = vmatmul.mubr.bf16.gmra.mrb[32].mxu1 %v15767_v61  ;;  %v15811_v59 = vld [vmem:[%s23259_s8 + $0x1a8] ss:$8 sps:$4 sm:$0xff]  }
 0x8d5   : > { %10134 = vmatpush1.bf16.msra.mxu0 %v21948_v16  ;;  %10497 = vmatpush1.bf16.msra.mxu1 %v21948_v16 }
 0x8d6   : > { %10135 = vmatprep.subr.bf16.mxu0 %v23521_v33  ;;  %10498 = vmatprep.subr.bf16.mxu1 %v23521_v33 }
 0x8d7   : > { %13855 = vmatprep.mubr.msk.bf16.mxu0 %vm5922_vm6, %v13851_v7  ;;  %13912 = vmatprep.mubr.msk.bf16.mxu1 %vm5922_vm6, %v13908_v50 }
 0x8d9   : > { %10136 = vmatpush1.bf16.msra.mxu0 %v21966_v15  ;;  %10499 = vmatpush1.bf16.msra.mxu1 %v21966_v15 }
 0x8da   : > { %10137 = vmatprep.subr.bf16.mxu0 %v23521_v33  ;;  %10500 = vmatprep.subr.bf16.mxu1 %v23521_v33 }
 0x8dc   : > { %9940 = vmatmul.mubr.bf16.gmra.mrb[0].mxu0 %v13850_v28  ;;  %10303 = vmatmul.mubr.bf16.gmra.mrb[36].mxu1 %v13907_v31 }
 0x8dd   : > { %10138 = vmatpush1.bf16.msra.mxu0 %v21984_v9  ;;  %10501 = vmatpush1.bf16.msra.mxu1 %v21984_v9 }
 0x8de   : > { %10139 = vmatprep.subr.bf16.mxu0 %v23521_v33  ;;  %10502 = vmatprep.subr.bf16.mxu1 %v23521_v33 }
 0x8df   : > { %13890 = vmatprep.mubr.msk.bf16.mxu0 %vm5922_vm6, %v15776_v3  ;;  %13947 = vmatprep.mubr.msk.bf16.mxu1 %vm5922_vm6, %v15779_v60 }
 0x8e1   : > { %10140 = vmatpush1.bf16.msra.mxu0 %v22002_v45  ;;  %10503 = vmatpush1.bf16.msra.mxu1 %v22002_v45 }
 0x8e2   : > { %10141 = vmatprep.subr.bf16.mxu0 %v23521_v33  ;;  %10504 = vmatprep.subr.bf16.mxu1 %v23521_v33 }
 0x8e5   : > { %10142 = vmatpush1.bf16.msra.mxu0 %v22016_v5  ;;  %10505 = vmatpush1.bf16.msra.mxu1 %v22016_v5 }
 0x8e6   : > { %10143 = vmatprep.subr.bf16.mxu0 %v23521_v33  ;;  %10506 = vmatprep.subr.bf16.mxu1 %v23521_v33 }
 0x8e9   : > { %10144 = vmatpush1.bf16.msra.mxu0 %v22030_v4  ;;  %10507 = vmatpush1.bf16.msra.mxu1 %v22030_v4 }
 0x8ea   : > { %10145 = vmatprep.subr.bf16.mxu0 %v23521_v33  ;;  %10508 = vmatprep.subr.bf16.mxu1 %v23521_v33 }
 0x8ed   : > { %10146 = vmatpush1.bf16.msra.mxu0 %v22044_v58  ;;  %10509 = vmatpush1.bf16.msra.mxu1 %v22044_v58 }
 0x8ee   : > { %10147 = vmatprep.subr.bf16.mxu0 %v23521_v33  ;;  %10510 = vmatprep.subr.bf16.mxu1 %v23521_v33 }
 0x8f1   : > { %10148 = vmatpush1.bf16.msra.mxu0 %v22056_v53  ;;  %10511 = vmatpush1.bf16.msra.mxu1 %v22056_v53 }
 0x8f2   : > { %10149 = vmatprep.subr.bf16.mxu0 %v23521_v33  ;;  %10512 = vmatprep.subr.bf16.mxu1 %v23521_v33 }
 0x8f5   : > { %10150 = vmatpush1.bf16.msra.mxu0 %v22065_v46  ;;  %10513 = vmatpush1.bf16.msra.mxu1 %v22065_v46 }
 0x8f6   : > { %10367 = vmatprep.subr.bf16.mxu0 %v23521_v33  ;;  %10730 = vmatprep.subr.bf16.mxu1 %v23521_v33 }
 0x8f8   : > { %10158 = vmatmul.mubr.bf16.vlgmr.msra.gmra.mrb[4].mxu0 %v15774_v42  ;;  %10521 = vmatmul.mubr.bf16.vlgmr.msra.gmra.mrb[40].mxu1 %v15777_v26 }
 0x8f9   : > { %10368 = vmatpush1.bf16.msra.mxu0 %v21880_v2  ;;  %10731 = vmatpush1.bf16.msra.mxu1 %v21880_v2 }
 0x8fa   : > { %10369 = vmatprep.subr.bf16.mxu0 %v23521_v33  ;;  %10732 = vmatprep.subr.bf16.mxu1 %v23521_v33 }
 0x8fb   : > { %13891 = vmatprep.mubr.msk.bf16.mxu0 %vm5922_vm6, %v15782_v36  ;;  %13948 = vmatprep.mubr.msk.bf16.mxu1 %vm5922_vm6, %v15799_v55  ;;  %v13964_v36 = vcombine.low %v13957_v40, %v13957_v40 }
 0x8fd   : > { %10370 = vmatpush1.bf16.msra.mxu0 %v21896_v10  ;;  %10733 = vmatpush1.bf16.msra.mxu1 %v21896_v10 }
 0x8fe   : > { %10371 = vmatprep.subr.bf16.mxu0 %v23521_v33  ;;  %10734 = vmatprep.subr.bf16.mxu1 %v23521_v33 }
 0x900   : > { %10166 = vmatmul.mubr.bf16.gmra.mrb[8].mxu0 %v15780_v39  ;;  %10529 = vmatmul.mubr.bf16.gmra.mrb[44].mxu1 %v15797_v48 }
 0x901   : > { %10372 = vmatpush1.bf16.msra.mxu0 %v21912_v29  ;;  %10735 = vmatpush1.bf16.msra.mxu1 %v21912_v29 }
 0x902   : > { %10373 = vmatprep.subr.bf16.mxu0 %v23521_v33  ;;  %10736 = vmatprep.subr.bf16.mxu1 %v23521_v33 }
 0x903   : > { %13892 = vmatprep.mubr.msk.bf16.mxu0 %vm5922_vm6, %v15785_v54  ;;  %13949 = vmatprep.mubr.msk.bf16.mxu1 %vm5922_vm6, %v15807_v21 }
 0x905   : > { %10374 = vmatpush1.bf16.msra.mxu0 %v21930_v32  ;;  %10737 = vmatpush1.bf16.msra.mxu1 %v21930_v32 }
 0x906   : > { %10375 = vmatprep.subr.bf16.mxu0 %v23521_v33  ;;  %10738 = vmatprep.subr.bf16.mxu1 %v23521_v33 }
 0x908   : > { %10174 = vmatmul.mubr.bf16.gmra.mrb[12].mxu0 %v15783_v8  ;;  %10537 = vmatmul.mubr.bf16.gmra.mrb[48].mxu1 %v15805_v18 }
 0x909   : > { %10376 = vmatpush1.bf16.msra.mxu0 %v21948_v16  ;;  %10739 = vmatpush1.bf16.msra.mxu1 %v21948_v16 }
 0x90a   : > { %10377 = vmatprep.subr.bf16.mxu0 %v23521_v33  ;;  %10740 = vmatprep.subr.bf16.mxu1 %v23521_v33 }
 0x90b   : > { %13893 = vmatprep.mubr.msk.bf16.mxu0 %vm5922_vm6, %v13889_v25  ;;  %13950 = vmatprep.mubr.msk.bf16.mxu1 %vm5922_vm6, %v13946_v63 }
 0x90d   : > { %10378 = vmatpush1.bf16.msra.mxu0 %v21966_v15  ;;  %10741 = vmatpush1.bf16.msra.mxu1 %v21966_v15 }
 0x90e   : > { %10379 = vmatprep.subr.bf16.mxu0 %v23521_v33  ;;  %10742 = vmatprep.subr.bf16.mxu1 %v23521_v33 }
 0x910   : > { %10182 = vmatmul.mubr.bf16.gmra.mrb[16].mxu0 %v13888_v13  ;;  %10545 = vmatmul.mubr.bf16.gmra.mrb[52].mxu1 %v13945_v34 }
 0x911   : > { %10380 = vmatpush1.bf16.msra.mxu0 %v21984_v9  ;;  %10743 = vmatpush1.bf16.msra.mxu1 %v21984_v9 }
 0x912   : > { %10381 = vmatprep.subr.bf16.mxu0 %v23521_v33  ;;  %10744 = vmatprep.subr.bf16.mxu1 %v23521_v33 }
 0x913   : > { %13928 = vmatprep.mubr.msk.bf16.mxu0 %vm5922_vm6, %v15790_v47  ;;  %13985 = vmatprep.mubr.msk.bf16.mxu1 %vm5922_vm6, %v15820_v20 }
 0x915   : > { %10382 = vmatpush1.bf16.msra.mxu0 %v22002_v45  ;;  %10745 = vmatpush1.bf16.msra.mxu1 %v22002_v45 }
 0x916   : > { %10383 = vmatprep.subr.bf16.mxu0 %v23521_v33  ;;  %10746 = vmatprep.subr.bf16.mxu1 %v23521_v33 }
 0x919   : > { %10384 = vmatpush1.bf16.msra.mxu0 %v22016_v5  ;;  %10747 = vmatpush1.bf16.msra.mxu1 %v22016_v5 }
 0x91a   : > { %10385 = vmatprep.subr.bf16.mxu0 %v23521_v33  ;;  %10748 = vmatprep.subr.bf16.mxu1 %v23521_v33 }
 0x91d   : > { %10386 = vmatpush1.bf16.msra.mxu0 %v22030_v4  ;;  %10749 = vmatpush1.bf16.msra.mxu1 %v22030_v4 }
 0x91e   : > { %10387 = vmatprep.subr.bf16.mxu0 %v23521_v33  ;;  %10750 = vmatprep.subr.bf16.mxu1 %v23521_v33 }
 0x921   : > { %10388 = vmatpush1.bf16.msra.mxu0 %v22044_v58  ;;  %10751 = vmatpush1.bf16.msra.mxu1 %v22044_v58 }
 0x922   : > { %10389 = vmatprep.subr.bf16.mxu0 %v23521_v33  ;;  %10752 = vmatprep.subr.bf16.mxu1 %v23521_v33 }
 0x925   : > { %10390 = vmatpush1.bf16.msra.mxu0 %v22056_v53  ;;  %10753 = vmatpush1.bf16.msra.mxu1 %v22056_v53 }
 0x926   : > { %10391 = vmatprep.subr.bf16.mxu0 %v23521_v33  ;;  %10754 = vmatprep.subr.bf16.mxu1 %v23521_v33 }
 0x929   : > { %10392 = vmatpush1.bf16.msra.mxu0 %v22065_v46  ;;  %10755 = vmatpush1.bf16.msra.mxu1 %v22065_v46 }
 0x92a   : > { %10609 = vmatprep.subr.bf16.mxu0 %v23521_v33 }
 0x92c   : > { %10400 = vmatmul.mubr.bf16.vlgmr.msra.gmra.mrb[20].mxu0 %v15788_v24  ;;  %10763 = vmatmul.mubr.bf16.vlgmr.msra.gmra.mrb[56].mxu1 %v15818_v11 }
 0x92d   : > { %10610 = vmatpush1.bf16.msra.mxu0 %v21880_v2  ;;  %13929 = vmatprep.mubr.msk.bf16.mxu0 %vm5922_vm6, %v15793_v35  ;;  %v15796_v2 = vld [vmem:[%s23259_s8 + $0x13c] ss:$8 sps:$4 sm:$0xff]  }
 0x92e   : > { %10611 = vmatprep.subr.bf16.mxu0 %v23521_v33  ;;  %13986 = vmatprep.mubr.msk.bf16.mxu1 %vm5922_vm6, %v15823_v30 }
 0x931   : > { %10612 = vmatpush1.bf16.msra.mxu0 %v21896_v10  ;;  %v13919_v10 = vld [vmem:[%s23259_s8 + $0x148] sm:$0x11] }
 0x932   : > { %10613 = vmatprep.subr.bf16.mxu0 %v23521_v33  ;;  %v13927_v27 = vcombine.high %v13919_v10, %v13919_v10  ;;  %v13926_v12 = vcombine.low %v13919_v10, %v13919_v10 }
 0x934   : > { %10408 = vmatmul.mubr.bf16.gmra.mrb[24].mxu0 %v15791_v0  ;;  %10771 = vmatmul.mubr.bf16.gmra.mrb[60].mxu1 %v15821_v41 }
 0x935   : > { %10614 = vmatpush1.bf16.msra.mxu0 %v21912_v29  ;;  %13930 = vmatprep.mubr.msk.bf16.mxu0 %vm5922_vm6, %v15796_v2  ;;  %v15824_v29 = vld [vmem:[%s23259_s8 + $0x1e0] ss:$8 sps:$4 sm:$0xff]  }
 0x936   : > { %10615 = vmatprep.subr.bf16.mxu0 %v23521_v33  ;;  %13987 = vmatprep.mubr.msk.bf16.mxu1 %vm5922_vm6, %v15826_v49 }
 0x939   : > { %10616 = vmatpush1.bf16.msra.mxu0 %v21930_v32  ;;  %v15804_v32 = vld [vmem:[%s23259_s8 + $0x18c] ss:$8 sps:$4 sm:$0xff]  }
 0x93a   : > { %10617 = vmatprep.subr.bf16.mxu0 %v23521_v33 }
 0x93c   : > { %10416 = vmatmul.mubr.bf16.gmra.mrb[28].mxu0 %v15794_v19  ;;  %10779 = vmatmul.mubr.bf16.gmra.mrb[64].mxu1 %v15824_v29 }
 0x93d   : > { %10618 = vmatpush1.bf16.msra.mxu0 %v21948_v16  ;;  %13931 = vmatprep.mubr.msk.bf16.mxu0 %vm5922_vm6, %v13927_v27  ;;  %v15802_v16 = vld [vmem:[%s23259_s8 + $0x188] ss:$8 sps:$4 sm:$0xff]  }
 0x93e   : > { %10619 = vmatprep.subr.bf16.mxu0 %v23521_v33  ;;  %13988 = vmatprep.mubr.msk.bf16.mxu1 %vm5922_vm6, %v13984_v22 }
 0x941   : > { %10620 = vmatpush1.bf16.msra.mxu0 %v21966_v15  ;;  %v15810_v15 = vld [vmem:[%s23259_s8 + $0x19c] ss:$8 sps:$4 sm:$0xff]  }
 0x942   : > { %10621 = vmatprep.subr.bf16.mxu0 %v23521_v33 }
 0x944   : > { %10424 = vmatmul.mubr.bf16.gmra.mrb[32].mxu0 %v13926_v12  ;;  %10787 = vmatmul.mubr.bf16.gmra.mrb[68].mxu1 %v13983_v17 }
 0x945   : > { %10622 = vmatpush1.bf16.msra.mxu0 %v21984_v9  ;;  %13966 = vmatprep.mubr.msk.bf16.mxu0 %vm5922_vm6, %v15804_v32 }
 0x946   : > { %10623 = vmatprep.subr.bf16.mxu0 %v23521_v33 }
 0x949   : > { %10624 = vmatpush1.bf16.msra.mxu0 %v22002_v45 }
 0x94a   : > { %10625 = vmatprep.subr.bf16.mxu0 %v23521_v33 }
 0x94d   : > { %10626 = vmatpush1.bf16.msra.mxu0 %v22016_v5  ;;  %v15808_v5 = vld [vmem:[%s23259_s8 + $0x198] ss:$8 sps:$4 sm:$0xff]  }
 0x94e   : > { %10627 = vmatprep.subr.bf16.mxu0 %v23521_v33 }
 0x951   : > { %10628 = vmatpush1.bf16.msra.mxu0 %v22030_v4 }
 0x952   : > { %10629 = vmatprep.subr.bf16.mxu0 %v23521_v33 }
 0x955   : > { %10630 = vmatpush1.bf16.msra.mxu0 %v22044_v58 }
 0x956   : > { %10631 = vmatprep.subr.bf16.mxu0 %v23521_v33 }
 0x959   : > { %10632 = vmatpush1.bf16.msra.mxu0 %v22056_v53  ;;  %v15813_v53 = vld [vmem:[%s23259_s8 + $0x1ac] ss:$8 sps:$4 sm:$0xff]  }
 0x95a   : > { %10633 = vmatprep.subr.bf16.mxu0 %v23521_v33 }
 0x95d   : > { %10634 = vmatpush1.bf16.msra.mxu0 %v22065_v46 }
 0x960   : > { %10642 = vmatmul.mubr.bf16.vlgmr.msra.gmra.mrb[36].mxu0 %v15802_v16 }
 0x961   : > { %13967 = vmatprep.mubr.msk.bf16.mxu0 %vm5922_vm6, %v15810_v15 }
 0x963   : > { %v22454_v9 = vpop.f32.mrb[228].mxu0  ;;  %v10038_v45 = vpop.f32.mrb[8].mxu1 }
 0x964   : > { %v9798_v4 = vpop.f32.mrb[229].mxu0  ;;  %v10040_v58 = vpop.f32.mrb[9].mxu1 }
 0x965   : > { %v22462_v46 = vpop.f32.mrb[230].mxu0  ;;  %v10041_v44 = vpop.f32.mrb[10].mxu1 }
 0x966   : > { %v9826_v62 = vpack.c.bf16 %v22462_v46, %v22454_v9  ;;  %v9801_v23 = vpop.f32.mrb[231].mxu0  ;;  %v10068_v1 = vpack.c.bf16 %v10041_v44, %v10038_v45  ;;  %v10043_v38 = vpop.f32.mrb[11].mxu1 }
 0x968   : > { %10650 = vmatmul.mubr.bf16.gmra.mrb[40].mxu0 %v15808_v5  ;;  %10814 = vrot.lane.b32.xlu0 %v10068_v1, %s23339_s22 }
 0x969   : > { %13968 = vmatprep.mubr.msk.bf16.mxu0 %vm5922_vm6, %v15813_v53 }
 0x96b   : > { %v22471_v6 = vpop.f32.mrb[232].mxu0  ;;  %v10046_v51 = vpop.f32.mrb[12].mxu1 }
 0x96c   : > { %v9806_v61 = vpop.f32.mrb[233].mxu0  ;;  %v10048_v37 = vpop.f32.mrb[13].mxu1 }
 0x96d   : > { %v22476_v7 = vpop.f32.mrb[234].mxu0  ;;  %v10049_v50 = vpop.f32.mrb[14].mxu1 }
 0x96e   : > { %v9827_v28 = vpack.c.bf16 %v22476_v7, %v22471_v6  ;;  %v9809_v31 = vpop.f32.mrb[235].mxu0  ;;  %v10069_v3 = vpack.c.bf16 %v10049_v50, %v10046_v51  ;;  %v10051_v60 = vpop.f32.mrb[15].mxu1 }
 0x970   : > { %10658 = vmatmul.mubr.bf16.gmra.mrb[44].mxu0 %v15811_v59  ;;  %10816 = vrot.lane.b32.xlu0 %v10069_v3, %s23339_s22 }
 0x971   : > { %13969 = vmatprep.mubr.msk.bf16.mxu0 %vm5922_vm6, %v13965_v56 }
 0x973   : > { %v22482_v42 = vpop.f32.mrb[236].mxu0  ;;  %v22484_v26 = vpop.f32.mrb[16].mxu1 }
 0x974   : > { %v9814_v55 = vpop.f32.mrb[237].mxu0  ;;  %v10056_v39 = vpop.f32.mrb[17].mxu1 }
 0x975   : > { %v22486_v48 = vpop.f32.mrb[238].mxu0  ;;  %v22488_v54 = vpop.f32.mrb[18].mxu1 }
 0x976   : > { %v9828_v21 = vpack.c.bf16 %v22486_v48, %v22482_v42  ;;  %v9817_v8 = vpop.f32.mrb[239].mxu0  ;;  %v10070_v57 = vpack.c.bf16 %v22488_v54, %v22484_v26  ;;  %v10059_v18 = vpop.f32.mrb[19].mxu1  ;;  %v15838_v26 = vld [vmem:[%s23260_s9 + $0x20] sm:$0xff]  }
 0x978   : > { %10666 = vmatmul.mubr.bf16.gmra.mrb[48].mxu0 %v13964_v36 }
 0x97b   : > { %v22494_v52 = vpop.f32.mrb[240].mxu0  ;;  %v22496_v25 = vpop.f32.mrb[20].mxu1 }
 0x97c   : > { %v9822_v63 = vpop.f32.mrb[241].mxu0  ;;  %v10064_v13 = vpop.f32.mrb[21].mxu1  ;;  %v9829_v42 = vpack.c.bf16 %v22494_v52, %v22494_v52 }
 0x97d   : > { %v9823_v34 = vpop.f32.mrb[242].mxu0  ;;  %v10065_v47 = vpop.f32.mrb[22].mxu1 }
 0x97e   : > { %v9824_v20 = vpop.f32.mrb[243].mxu0  ;;  %v10066_v24 = vpop.f32.mrb[23].mxu1 }
 0x997   : > { %v9917_v11 = vpop.f32.mrb[244].mxu0  ;;  %v22498_v35 = vpop.f32.mrb[24].mxu1 }
 0x998   : > { %v9919_v30 = vpop.f32.mrb[245].mxu0  ;;  %v10282_v0 = vpop.f32.mrb[25].mxu1 }
 0x999   : > { %v9920_v41 = vpop.f32.mrb[246].mxu0  ;;  %v22500_v2 = vpop.f32.mrb[26].mxu1  ;;  %v15830_v30 = vld [vmem:[%s23260_s9] sm:$0xff]   ;;  %v15831_v0 = vld [vmem:[%s23260_s9 + $0x48] sm:$0xff]  }
 0x99a   : > { %v9947_v49 = vpack.c.bf16 %v9920_v41, %v9917_v11  ;;  %v9922_v10 = vpop.f32.mrb[247].mxu0  ;;  %v10310_v43 = vpack.c.bf16 %v22500_v2, %v22498_v35  ;;  %v10285_v19 = vpop.f32.mrb[27].mxu1  ;;  %v15829_v11 = vld [vmem:[%s23260_s9 + $0x40] sm:$0xff]  }
 0x99b   : > { %14601 = vmatprep.subr.bf16.mxu0 %v15829_v11  ;;  %v15832_v10 = vld [vmem:[%s23260_s9 + $0x8] sm:$0xff]  }
 0x99c   : > { %10802 = vrot.lane.b32.xlu0 %v9947_v49, %s23347_s19  ;;  %14602 = vmatpush3.bf16.msra.mxu0 %v15830_v30  ;;  %v15840_v30 = vld [vmem:[%s23260_s9 + $0x28] sm:$0xff]  }
 0x99d   : > { %14603 = vmatprep.subr.bf16.mxu0 %v15831_v0 }
 0x99f   : > { %v9925_v29 = vpop.f32.mrb[248].mxu0  ;;  %v22505_v27 = vpop.f32.mrb[28].mxu1 }
 0x9a0   : > { %v9927_v22 = vpop.f32.mrb[249].mxu0  ;;  %v10290_v12 = vpop.f32.mrb[29].mxu1  ;;  %14604 = vmatpush3.bf16.msra.mxu0 %v15832_v10 }
 0x9a1   : > { %v9928_v17 = vpop.f32.mrb[250].mxu0  ;;  %v22507_v32 = vpop.f32.mrb[30].mxu1 }
 0x9a2   : > { %v9948_v16 = vpack.c.bf16 %v9928_v17, %v9925_v29  ;;  %v9930_v15 = vpop.f32.mrb[251].mxu0  ;;  %v10311_v45 = vpack.c.bf16 %v22507_v32, %v22505_v27  ;;  %v10293_v5 = vpop.f32.mrb[31].mxu1  ;;  %v15833_v17 = vld [vmem:[%s23260_s9 + $0x50] sm:$0xff]  }
 0x9a3   : > { %14605 = vmatprep.subr.bf16.mxu0 %v15833_v17  ;;  %v15844_v17 = vld [vmem:[%s23260_s9 + $0x38] sm:$0xff]  }
 0x9a4   : > { %10804 = vrot.lane.b32.xlu0 %v9948_v16, %s23347_s19 }
 0x9a7   : > { %v9933_v4 = vpop.f32.mrb[252].mxu0  ;;  %v22512_v58 = vpop.f32.mrb[32].mxu1 }
 0x9a8   : > { %v9935_v53 = vpop.f32.mrb[253].mxu0  ;;  %v10298_v44 = vpop.f32.mrb[33].mxu1 }
 0x9a9   : > { %v9936_v23 = vpop.f32.mrb[254].mxu0  ;;  %v22514_v1 = vpop.f32.mrb[34].mxu1  ;;  %v15834_v53 = vld [vmem:[%s23260_s9 + $0x10] sm:$0xff]   ;;  %v15835_v44 = vld [vmem:[%s23260_s9 + $0x58] sm:$0xff]  }
 0x9aa   : > { %v9949_v38 = vpack.c.bf16 %v9936_v23, %v9933_v4  ;;  %v9938_v40 = vpop.f32.mrb[255].mxu0  ;;  %v10312_v51 = vpack.c.bf16 %v22514_v1, %v22512_v58  ;;  %v10301_v59 = vpop.f32.mrb[35].mxu1  ;;  %14606 = vmatpush3.bf16.msra.mxu0 %v15834_v53 }
 0x9ab   : > { %v15836_v40 = vld [vmem:[%s23260_s9 + $0x18] sm:$0xff]   ;;  %14607 = vmatprep.subr.bf16.mxu0 %v15835_v44 }
 0x9ac   : > { %10806 = vrot.lane.b32.xlu0 %v9949_v38, %s23347_s19 }
 0x9ae   : > { %14608 = vmatpush3.bf16.msra.mxu0 %v15836_v40 }
 0x9af   : > { %v22519_v61 = vpop.f32.mrb[0].mxu0  ;;  %v22521_v37 = vpop.f32.mrb[36].mxu1 }
 0x9b0   : > { %v9943_v56 = vpop.f32.mrb[1].mxu0  ;;  %v10306_v50 = vpop.f32.mrb[37].mxu1  ;;  %v9950_v54 = vpack.c.bf16 %v22519_v61, %v22519_v61  ;;  %v15839_v61 = vld [vmem:[%s23260_s9 + $0x68] sm:$0xff]   ;;  %v10313_v1 = vpack.c.bf16 %v22521_v37, %v22521_v37 }
 0x9b1   : > { %v9944_v31 = vpop.f32.mrb[2].mxu0  ;;  %v10307_v3 = vpop.f32.mrb[38].mxu1  ;;  %v15837_v50 = vld [vmem:[%s23260_s9 + $0x60] sm:$0xff]  }
 0x9b2   : > { %v9945_v60 = vpop.f32.mrb[3].mxu0  ;;  %v10308_v36 = vpop.f32.mrb[39].mxu1  ;;  %14609 = vmatprep.subr.bf16.mxu0 %v15837_v50 }
 0x9b3   : > { %14610 = vmatpush3.bf16.msra.mxu0 %v15838_v26 }
 0x9b4   : > { %14611 = vmatprep.subr.bf16.mxu0 %v15839_v61 }
 0x9b7   : > { %14612 = vmatpush3.bf16.msra.mxu0 %v15840_v30 }
 0x9cb   : > { %v10159_v55 = vpop.f32.mrb[4].mxu0  ;;  %v10522_v39 = vpop.f32.mrb[40].mxu1 }
 0x9cc   : > { %v10161_v8 = vpop.f32.mrb[5].mxu0  ;;  %v10524_v18 = vpop.f32.mrb[41].mxu1 }
 0x9cd   : > { %v10162_v63 = vpop.f32.mrb[6].mxu0  ;;  %v10525_v13 = vpop.f32.mrb[42].mxu1 }
 0x9ce   : > { %v10189_v34 = vpack.c.bf16 %v10162_v63, %v10159_v55  ;;  %v10164_v47 = vpop.f32.mrb[7].mxu0  ;;  %v10552_v20 = vpack.c.bf16 %v10525_v13, %v10522_v39  ;;  %v10527_v24 = vpop.f32.mrb[43].mxu1 }
 0x9cf   : > { %v10071_v47 = vpack.c.bf16 %v22496_v25, %v22496_v25  ;;  %v15841_v25 = vld [vmem:[%s23260_s9 + $0x70] sm:$0xff]  }
 0x9d0   : > { %10850 = vrot.lane.b32.xlu1 %v10552_v20, %s23339_s22  ;;  %10826 = vrot.lane.b32.xlu0 %v10189_v34, %s23338_s20 }
 0x9d1   : > { %14613 = vmatprep.subr.bf16.mxu0 %v15841_v25 }
 0x9d3   : > { %v10167_v41 = vpop.f32.mrb[8].mxu0  ;;  %v10530_v49 = vpop.f32.mrb[44].mxu1 }
 0x9d4   : > { %v10169_v19 = vpop.f32.mrb[9].mxu0  ;;  %v10532_v29 = vpop.f32.mrb[45].mxu1 }
 0x9d5   : > { %v10170_v22 = vpop.f32.mrb[10].mxu0  ;;  %v10533_v12 = vpop.f32.mrb[46].mxu1 }
 0x9d6   : > { %v10190_v16 = vpack.c.bf16 %v10170_v22, %v10167_v41  ;;  %v10172_v15 = vpop.f32.mrb[11].mxu0  ;;  %v10553_v5 = vpack.c.bf16 %v10533_v12, %v10530_v49  ;;  %v10535_v4 = vpop.f32.mrb[47].mxu1  ;;  %v15842_v41 = vld [vmem:[%s23260_s9 + $0x30] sm:$0xff]   ;;  %v15843_v12 = vld [vmem:[%s23260_s9 + $0x78] sm:$0xff]  }
 0x9d7   : > { %14614 = vmatpush3.bf16.msra.mxu0 %v15842_v41 }
 0x9d8   : > { %10852 = vrot.lane.b32.xlu1 %v10553_v5, %s23339_s22  ;;  %10828 = vrot.lane.b32.xlu0 %v10190_v16, %s23338_s20 }
 0x9d9   : > { %14615 = vmatprep.subr.bf16.mxu0 %v15843_v12 }
 0x9db   : > { %v10175_v23 = vpop.f32.mrb[12].mxu0  ;;  %v22548_v38 = vpop.f32.mrb[48].mxu1  ;;  %14616 = vmatpush3.bf16.msra.mxu0 %v15844_v17 }
 0x9dc   : > { %v10177_v59 = vpop.f32.mrb[13].mxu0  ;;  %v10540_v56 = vpop.f32.mrb[49].mxu1  ;;  %10818 = vrot.lane.b32.xlu0 %v10070_v57, %s23339_s22 }
 0x9dd   : > { %v10178_v31 = vpop.f32.mrb[14].mxu0  ;;  %v22560_v3 = vpop.f32.mrb[50].mxu1 }
 0x9de   : > { %v10191_v60 = vpack.c.bf16 %v10178_v31, %v10175_v23  ;;  %v10180_v36 = vpop.f32.mrb[15].mxu0  ;;  %v10554_v55 = vpack.c.bf16 %v22560_v3, %v22548_v38  ;;  %v10543_v39 = vpop.f32.mrb[51].mxu1 }
 0x9e0   : > { %10830 = vrot.lane.b32.xlu0 %v10191_v60, %s23338_s20 }
 0x9e3   : > { %v10183_v57 = vpop.f32.mrb[16].mxu0  ;;  %v22570_v8 = vpop.f32.mrb[52].mxu1 }
 0x9e4   : > { %v10185_v18 = vpop.f32.mrb[17].mxu0  ;;  %10808 = vrot.lane.b32.xlu0 %v9950_v54, %s23347_s19  ;;  %v10548_v63 = vpop.f32.mrb[53].mxu1  ;;  %v10192_v11 = vpack.c.bf16 %v10183_v57, %v10183_v57 }
 0x9e5   : > { %v10186_v13 = vpop.f32.mrb[18].mxu0  ;;  %v10549_v34 = vpop.f32.mrb[54].mxu1  ;;  %v15845_v18 = vld [vmem:[%s23260_s9 + $0x80] sm:$0xff]  }
 0x9e6   : > { %v10187_v20 = vpop.f32.mrb[19].mxu0  ;;  %v10550_v24 = vpop.f32.mrb[55].mxu1  ;;  %14936 = vmatprep.subr.bf16.mxu1 %v15845_v18 }
 0x9e7   : > { %14937 = vmatpush3.bf16.msra.mxu1 %v15845_v18 }
 0x9e8   : > { %10820 = vrot.lane.b32.xlu0 %v10071_v47, %s23339_s22  ;;  %v15846_v47 = vld [vmem:[%s23260_s9 + $0x88] sm:$0xff]  }
 0x9e9   : > { %14938 = vmatprep.subr.bf16.mxu1 %v15846_v47 }
 0x9eb   : > { %14939 = vmatpush3.bf16.msra.mxu1 %v15846_v47 }
 0x9ec   : > { %10832 = vrot.lane.b32.xlu0 %v10192_v11, %s23338_s20 }
 0x9ff   : > { %v10401_v0 = vpop.f32.mrb[20].mxu0  ;;  %v10764_v36 = vpop.f32.mrb[56].mxu1 }
 0xa00   : > { %v10403_v49 = vpop.f32.mrb[21].mxu0  ;;  %v10766_v26 = vpop.f32.mrb[57].mxu1 }
 0xa01   : > { %v10404_v10 = vpop.f32.mrb[22].mxu0  ;;  %v10767_v34 = vpop.f32.mrb[58].mxu1 }
 0xa02   : > { %v10431_v19 = vpack.c.bf16 %v10404_v10, %v10401_v0  ;;  %v10406_v29 = vpop.f32.mrb[23].mxu0  ;;  %v10794_v20 = vpack.c.bf16 %v10767_v34, %v10764_v36  ;;  %v10769_v24 = vpop.f32.mrb[59].mxu1 }
 0xa04   : > { %10838 = vrot.lane.b32.xlu1 %v10431_v19, %s23347_s19  ;;  %14940 = vmatprep.mubr.msk.bf16.mxu1 %vm1344_vm0, %v10794_v20 }
 0xa07   : > { %v10409_v22 = vpop.f32.mrb[24].mxu0  ;;  %v10772_v11 = vpop.f32.mrb[60].mxu1 }
 0xa08   : > { %v10411_v16 = vpop.f32.mrb[25].mxu0  ;;  %v10774_v61 = vpop.f32.mrb[61].mxu1 }
 0xa09   : > { %v10412_v15 = vpop.f32.mrb[26].mxu0  ;;  %v10775_v0 = vpop.f32.mrb[62].mxu1 }
 0xa0a   : > { %v10432_v5 = vpack.c.bf16 %v10412_v15, %v10409_v22  ;;  %v10414_v4 = vpop.f32.mrb[27].mxu0  ;;  %v10795_v41 = vpack.c.bf16 %v10775_v0, %v10772_v11  ;;  %v10777_v49 = vpop.f32.mrb[63].mxu1 }
 0xa0c   : > { %10840 = vrot.lane.b32.xlu1 %v10432_v5, %s23347_s19  ;;  %14941 = vmatmul.mubr.msk.bf16.vlgmr.msra.gmra.mrb[72].mxu1 %vm1344_vm0, %v10795_v41 }
 0xa0f   : > { %v10417_v53 = vpop.f32.mrb[28].mxu0  ;;  %v10780_v22 = vpop.f32.mrb[64].mxu1 }
 0xa10   : > { %v10419_v44 = vpop.f32.mrb[29].mxu0  ;;  %v10782_v12 = vpop.f32.mrb[65].mxu1 }
 0xa11   : > { %v10420_v23 = vpop.f32.mrb[30].mxu0  ;;  %v10783_v17 = vpop.f32.mrb[66].mxu1 }
 0xa12   : > { %v10433_v40 = vpack.c.bf16 %v10420_v23, %v10417_v53  ;;  %v10422_v59 = vpop.f32.mrb[31].mxu0  ;;  %v10796_v15 = vpack.c.bf16 %v10783_v17, %v10780_v22  ;;  %v10785_v4 = vpop.f32.mrb[67].mxu1 }
 0xa14   : > { %10842 = vrot.lane.b32.xlu1 %v10433_v40, %s23347_s19  ;;  %14944 = vmatprep.mubr.msk.bf16.mxu1 %vm1344_vm0, %v10796_v15 }
 0xa17   : > { %v10425_v56 = vpop.f32.mrb[32].mxu0  ;;  %v10788_v38 = vpop.f32.mrb[68].mxu1 }
 0xa18   : > { %v10427_v50 = vpop.f32.mrb[33].mxu0  ;;  %v10434_v16 = vpack.c.bf16 %v10425_v56, %v10425_v56  ;;  %v10790_v44 = vpop.f32.mrb[69].mxu1  ;;  %v10555_v56 = vpack.c.bf16 %v22570_v8, %v22570_v8 }
 0xa19   : > { %v10428_v31 = vpop.f32.mrb[34].mxu0  ;;  %v10791_v59 = vpop.f32.mrb[70].mxu1 }
 0xa1a   : > { %v10429_v60 = vpop.f32.mrb[35].mxu0  ;;  %v10792_v50 = vpop.f32.mrb[71].mxu1 }
 0xa33   : > { %v10643_v39 = vpop.f32.mrb[36].mxu0 }
 0xa34   : > { %v10645_v54 = vpop.f32.mrb[37].mxu0 }
 0xa35   : > { %v10646_v57 = vpop.f32.mrb[38].mxu0  ;;  %v10815_v54 = vpop.permute.xlu0 %10814 }
 0xa36   : > { %v10673_v63 = vpack.c.bf16 %v10646_v57, %v10643_v39  ;;  %v10648_v13 = vpop.f32.mrb[39].mxu0 }
 0xa38   : > { %10862 = vrot.lane.b32.xlu1 %v10673_v63, %s23338_s20 }
 0xa39   : > { %v10817_v57 = vpop.permute.xlu0 %10816 }
 0xa3b   : > { %v10651_v30 = vpop.f32.mrb[40].mxu0 }
 0xa3c   : > { %v10653_v25 = vpop.f32.mrb[41].mxu0  ;;  %10854 = vrot.lane.b32.xlu1 %v10554_v55, %s23339_s22  ;;  %v10797_v55 = vpack.c.bf16 %v10788_v38, %v10788_v38 }
 0xa3d   : > { %v10654_v10 = vpop.f32.mrb[42].mxu0  ;;  %v10803_v63 = vpop.permute.xlu0 %10802 }
 0xa3e   : > { %v10674_v19 = vpack.c.bf16 %v10654_v10, %v10651_v30  ;;  %v10656_v29 = vpop.f32.mrb[43].mxu0  ;;  %14945 = vmatmul.mubr.msk.bf16.gmra.mrb[76].mxu1 %vm1344_vm0, %v10797_v55  ;;  %v10872_v0 = vsel %vm1344_vm0, %v9826_v62, %v10803_v63 }
 0xa3f   : > { %v10883_v10 = vsel %vm1513_vm1, %v10872_v0, %v10815_v54  ;;  %v13989_v54 = vld [vmem:[%s23261_s10] ss:$0 sm:$0xff] }
 0xa40   : > { %10864 = vrot.lane.b32.xlu1 %v10674_v19, %s23338_s20 }
 0xa41   : > { %v10805_v13 = vpop.permute.xlu0 %10804 }
 0xa42   : > { %v10851_v18 = vpop.permute.xlu1 %10850  ;;  %v10875_v62 = vsel %vm1344_vm0, %v9827_v28, %v10805_v13 }
 0xa43   : > { %v10659_v5 = vpop.f32.mrb[44].mxu0  ;;  %v10885_v22 = vsel %vm1513_vm1, %v10875_v62, %v10817_v57 }
 0xa44   : > { %v10661_v53 = vpop.f32.mrb[45].mxu0  ;;  %10844 = vrot.lane.b32.xlu1 %v10434_v16, %s23347_s19 }
 0xa45   : > { %v10662_v3 = vpop.f32.mrb[46].mxu0  ;;  %v10807_v47 = vpop.permute.xlu0 %10806 }
 0xa46   : > { %v10675_v23 = vpack.c.bf16 %v10662_v3, %v10659_v5  ;;  %v10664_v40 = vpop.f32.mrb[47].mxu0  ;;  %v10878_v7 = vsel %vm1344_vm0, %v9828_v21, %v10807_v47 }
 0xa48   : > { %10866 = vrot.lane.b32.xlu1 %v10675_v23, %s23338_s20 }
 0xa49   : > { %v10827_v24 = vpop.permute.xlu0 %10826 }
 0xa4a   : > { %v10853_v34 = vpop.permute.xlu1 %10852  ;;  %v10891_v29 = vsel %vm1626_vm2, %v10883_v10, %v10827_v24 }
 0xa4b   : > { %v10667_v31 = vpop.f32.mrb[48].mxu0 }
 0xa4c   : > { %10856 = vrot.lane.b32.xlu1 %v10555_v56, %s23339_s22  ;;  %v10676_v60 = vpack.c.bf16 %v10667_v31, %v10667_v31  ;;  %v10669_v36 = vpop.f32.mrb[49].mxu0 }
 0xa4d   : > { %v10670_v39 = vpop.f32.mrb[50].mxu0  ;;  %v10829_v8 = vpop.permute.xlu0 %10828  ;;  %v15848_v36 = vld [vmem:[%s23262_s11 + $0x1c] sm:$0xff]  }
 0xa4e   : > { %v10671_v26 = vpop.f32.mrb[51].mxu0  ;;  %v10894_v17 = vsel %vm1626_vm2, %v10885_v22, %v10829_v8 }
 0xa50   : > { %10868 = vrot.lane.b32.xlu1 %v10676_v60, %s23338_s20  ;;  %v15847_v60 = vld [vmem:[%s23262_s11] sm:$0xff]   ;;  %s547_s20 = sand.u32 1, %s16041_s25  }
 0xa51   : > { %v10819_v25 = vpop.permute.xlu0 %10818  ;;  %14956 = vmatprep.mubr.msk.bf16.mxu1 %vm11261_vm9, %v15847_v60  ;;  %v15859_v60 = vld [vmem:[%s23262_s11 + $0x48] sm:$0xff]   ;;  %s548_s2 = scalar_lea.vmem [#allocation2], %s547_s20  ;;  %s12919_s30 = scalar_lea.sflag [#allocation3], %s547_s20 }
 0xa52   : > { %v10887_v16 = vsel %vm1513_vm1, %v10878_v7, %v10819_v25  ;;  %s12934_s23 = sshll.u32 %s548_s2, 4  ;;  %s23211_s23 = int_to_ptr.vmem [resolvable:$true] %s12934_s23 }
 0xa53   : > { %s15987_s28 = scalar_lea.vmem %s23211_s23, 16 }
 0xa54   : > { %p15988_p11 = scmp.ne.s32.totalorder %s23211_s23, %s15987_s28 }
 0xa55   : > { %v10831_v46 = vpop.permute.xlu0 %10830 }
 0xa56   : > { %v10897_v4 = vsel %vm1626_vm2, %v10887_v16, %v10831_v46  ;;  %p15989_p12 = pnand %p15988_p11, %p16186_p5 }
 0xa58   : > { %p15990_p13 = pneg %p15989_p12 }
 0xa59   : > { %v10809_v27 = vpop.permute.xlu0 %10808 }
 0xa5d   : > { %v10821_v5 = vpop.permute.xlu0 %10820 }
 0xa61   : > { %v10833_v21 = vpop.permute.xlu0 %10832 }
 0xa76   : > { %v10839_v20 = vpop.permute.xlu1 %10838 }
 0xa77   : > { %v10904_v30 = vsel %vm1344_vm0, %v10310_v43, %v10839_v20 }
 0xa78   : > { %v10915_v49 = vsel %vm1513_vm1, %v10904_v30, %v10851_v18 }
 0xa7e   : > { %v10841_v11 = vpop.permute.xlu1 %10840 }
 0xa7f   : > { %v10907_v9 = vsel %vm1344_vm0, %v10311_v45, %v10841_v11 }
 0xa80   : > { %v10917_v43 = vsel %vm1513_vm1, %v10907_v9, %v10853_v34 }
 0xa86   : > { %v10843_v61 = vpop.permute.xlu1 %10842 }
 0xa87   : > { %v10910_v6 = vsel %vm1344_vm0, %v10312_v51, %v10843_v61  ;;  %v10881_v51 = vsel %vm1344_vm0, %v9829_v42, %v10809_v27 }
 0xa88   : > { %v10889_v3 = vsel %vm1513_vm1, %v10881_v51, %v10821_v5 }
 0xa89   : > { %v10900_v44 = vsel %vm1626_vm2, %v10889_v3, %v10833_v21 }
 0xaaa   : > { %v10863_v41 = vpop.permute.xlu1 %10862 }
 0xaab   : > { %v10923_v19 = vsel %vm1626_vm2, %v10915_v49, %v10863_v41 }
 0xaac   : > { %11129 = vmatprep.mubr.bf16.mxu0 %v10923_v19 }
 0xaad   : > { %11130 = vmatmul.mubr.bf16.vlgmr.msra.gmra.mrb[52].mxu0 %v10891_v29 }
 0xaae   : > { %v10855_v35 = vpop.permute.xlu1 %10854 }
 0xaaf   : > { %v10919_v28 = vsel %vm1513_vm1, %v10910_v6, %v10855_v35 }
 0xab2   : > { %v10865_v2 = vpop.permute.xlu1 %10864 }
 0xab3   : > { %v10926_v12 = vsel %vm1626_vm2, %v10917_v43, %v10865_v2 }
 0xab4   : > { %11137 = vmatprep.mubr.bf16.mxu0 %v10926_v12 }
 0xab5   : > { %11138 = vmatmul.mubr.bf16.gmra.mrb[56].mxu0 %v10894_v17 }
 0xab6   : > { %v10845_v32 = vpop.permute.xlu1 %10844 }
 0xab7   : > { %v10913_v48 = vsel %vm1344_vm0, %v10313_v1, %v10845_v32 }
 0xaba   : > { %v10867_v45 = vpop.permute.xlu1 %10866 }
 0xabb   : > { %v10929_v15 = vsel %vm1626_vm2, %v10919_v28, %v10867_v45 }
 0xabc   : > { %11145 = vmatprep.mubr.bf16.mxu0 %v10929_v15 }
 0xabd   : > { %11146 = vmatmul.mubr.bf16.gmra.mrb[60].mxu0 %v10897_v4 }
 0xabe   : > { %v10857_v58 = vpop.permute.xlu1 %10856 }
 0xabf   : > { %v10921_v53 = vsel %vm1513_vm1, %v10913_v48, %v10857_v58 }
 0xac2   : > { %v10869_v38 = vpop.permute.xlu1 %10868 }
 0xac3   : > { %v10932_v55 = vsel %vm1626_vm2, %v10921_v53, %v10869_v38  ;;  %v11275_v38 = vsel %vm3491_vm3, 65535, %v23521_v33  ;;  %v15851_v33 = vld [vmem:[%s23262_s11 + $0x10] sm:$0xff]  }
 0xac4   : > { %11153 = vmatprep.mubr.bf16.mxu0 %v10932_v55 }
 0xac5   : > { %11154 = vmatmul.mubr.bf16.gmra.mrb[64].mxu0 %v10900_v44  ;;  %v15849_v44 = vld [vmem:[%s23262_s11 + $0x8] sm:$0xff]  }
 0xac6   : > { %14972 = vmatprep.mubr.msk.bf16.mxu0 %vm11261_vm9, %v15848_v36  ;;  %v15860_v36 = vld [vmem:[%s23262_s11 + $0x64] sm:$0xff]  }
 0xadf   : > { %v14942_v37 = vpop.f32.mrb[72].mxu1 }
 0xae0   : > { %v11195_v23 = vpop.f32.mrb[73].mxu1 }
 0xae1   : > { %v14943_v40 = vpop.f32.mrb[74].mxu1 }
 0xae2   : > { %v11198_v52 = vpop.f32.mrb[75].mxu1 }
 0xb11   : > { %v22666_v59 = vpop.f32.mrb[76].mxu1 }
 0xb12   : > { %v11211_v50 = vpop.f32.mrb[77].mxu1 }
 0xb13   : > { %v14947_v56 = vpop.f32.mrb[78].mxu1 }
 0xb14   : > { %v11214_v31 = vpop.f32.mrb[79].mxu1  ;;  %v15857_v56 = vld [vmem:[%s23262_s11 + $0x40] sm:$0xff]  }
 0xb80   : > { %v14617_v39 = vpop.f32.mrb[52].mxu0 }
 0xb81   : > { %v14618_v26 = vpop.f32.mrb[53].mxu0 }
 0xb82   : > { %v14619_v57 = vadd.f32 %v14618_v26, %v14617_v39  ;;  %v14620_v18 = vpop.f32.mrb[54].mxu0  ;;  %v15861_v39 = vld [vmem:[%s23262_s11 + $0x50] ss:$0 sps:$4 sm:$0x11]  }
 0xb83   : > { %v14621_v63 = vpop.f32.mrb[55].mxu0  ;;  %v15862_v26 = vld [vmem:[%s23262_s11 + $0x6c] ss:$0 sps:$4 sm:$0x11]  }
 0xb84   : > { %v14622_v13 = vadd.f32 %v14621_v63, %v14620_v18  ;;  %v11132_v34 = vadd.f32 %v14619_v57, %v13989_v54  ;;  %v15864_v57 = vld [vmem:[%s23262_s11 + $0x8c] sm:$0xff]   ;;  %v15865_v18 = vld [vmem:[%s23262_s11 + $0x78] sm:$0xff]  }
 0xb85   : > { %v15866_v63 = vld [vmem:[%s23262_s11 + $0x94] sm:$0xff]  }
 0xb86   : > { %v11196_v47 = vadd.f32 %v11195_v23, %v11132_v34  ;;  %v11135_v20 = vadd.f32 %v14622_v13, %v13989_v54  ;;  %v15852_v23 = vld [vmem:[%s23262_s11 + $0x2c] sm:$0xff]   ;;  %v15867_v13 = vld [vmem:[%s23262_s11 + $0x80] sm:$0xff]  }
 0xb87   : > { %v15871_v34 = vld [vmem:[%s23262_s11 + $0x9c] sm:$0xff]  }
 0xb88   : > { %v14623_v24 = vpop.f32.mrb[56].mxu0  ;;  %v11199_v11 = vadd.f32 %v11198_v52, %v11135_v20  ;;  %v11225_v30 = vmax.f32 %v11196_v47, 0.0  ;;  %v15854_v52 = vld [vmem:[%s23262_s11 + $0x34] ss:$0 sps:$4 sm:$0x11]  }
 0xb89   : > { %v14624_v8 = vpop.f32.mrb[57].mxu0  ;;  %v15868_v47 = vld [vmem:[%s23262_s11 + $0x88] ss:$0 sps:$4 sm:$0x11]  }
 0xb8a   : > { %v14625_v61 = vadd.f32 %v14624_v8, %v14623_v24  ;;  %v14626_v0 = vpop.f32.mrb[58].mxu0  ;;  %v11226_v25 = vmax.f32 %v11199_v11, 0.0  ;;  %v15872_v20 = vld [vmem:[%s23262_s11 + $0xa4] ss:$0 sps:$4 sm:$0x11]   ;;  %v15869_v24 = vld [vmem:[%s23262_s11 + $0xa8] sm:$0xff]  }
 0xb8b   : > { %v14627_v41 = vpop.f32.mrb[59].mxu0  ;;  %v15873_v11 = vld [vmem:[%s23262_s11 + $0xc4] sm:$0xff]   ;;  %v15870_v8 = vld [vmem:[%s23262_s11 + $0xb0] sm:$0xff]  }
 0xb8c   : > { %v11140_v49 = vadd.f32 %v14625_v61, %v13989_v54  ;;  %v14628_v10 = vadd.f32 %v14627_v41, %v14626_v0  ;;  %v22679_v19 = vpack.c.bf16 %v11226_v25, %v11225_v30  ;;  %v15874_v61 = vld [vmem:[%s23262_s11 + $0xcc] sm:$0xff]   ;;  %v15875_v30 = vld [vmem:[%s23262_s11 + $0xd4] sm:$0xff]   ;;  %v15876_v25 = vld [vmem:[%s23262_s11 + $0xdc] ss:$0 sps:$4 sm:$0x11]  }
 0xb8d   : > { %v15877_v0 = vld [vmem:[%s23262_s11 + $0xb8] sm:$0xff]   ;;  %v15878_v41 = vld [vmem:[%s23262_s11 + $0xc0] ss:$0 sps:$4 sm:$0x11]  }
 0xb8e   : > { %v11204_v29 = vadd.f32 %v14942_v37, %v11140_v49  ;;  %v11143_v35 = vadd.f32 %v14628_v10, %v13989_v54  ;;  %14948 = vmatprep.subr.bf16.mxu1 %v22679_v19  ;;  %14964 = vmatprep.subr.bf16.mxu0 %v22679_v19  ;;  %v15850_v37 = vld [vmem:[%s23262_s11 + $0x24] sm:$0xff]  }
 0xb8f   : > { %14949 = vmatpush3.bf16.msra.mxu1 %v22679_v19  ;;  %14965 = vmatpush3.bf16.msra.mxu0 %v22679_v19  ;;  %v15879_v49 = vld [vmem:[%s23262_s11 + $0xe0] sm:$0xff]   ;;  %v15880_v10 = vld [vmem:[%s23262_s11 + $0xe8] sm:$0xff]  }
 0xb90   : > { %v11207_v9 = vadd.f32 %v14943_v40, %v11143_v35  ;;  %v14629_v46 = vpop.f32.mrb[60].mxu0  ;;  %v11227_v2 = vmax.f32 %v11204_v29, 0.0  ;;  %v15853_v40 = vld [vmem:[%s23262_s11 + $0x18] ss:$0 sps:$4 sm:$0x11]   ;;  %v15883_v35 = vld [vmem:[%s23263_s12 + $0x40] sm:$0xff]  }
 0xb91   : > { %v14630_v62 = vpop.f32.mrb[61].mxu0  ;;  %v15882_v29 = vld [vmem:[%s23262_s11 + $0xf8] ss:$0 sps:$4 sm:$0x11]  }
 0xb92   : > { %v11228_v43 = vmax.f32 %v11207_v9, 0.0  ;;  %v14631_v22 = vadd.f32 %v14630_v62, %v14629_v46  ;;  %v14632_v12 = vpop.f32.mrb[62].mxu0  ;;  %v15884_v9 = vld [vmem:[%s23263_s12] sm:$0xff]   ;;  %v15885_v46 = vld [vmem:[%s23263_s12 + $0x48] sm:$0xff]  }
 0xb93   : > { %v14633_v17 = vpop.f32.mrb[63].mxu0  ;;  %v15886_v62 = vld [vmem:[%s23263_s12 + $0x8] sm:$0xff]  }
 0xb94   : > { %v22685_v27 = vpack.c.bf16 %v11228_v43, %v11227_v2  ;;  %v14634_v32 = vadd.f32 %v14633_v17, %v14632_v12  ;;  %v11148_v6 = vadd.f32 %v14631_v22, %v13989_v54  ;;  %v15892_v2 = vld [vmem:[%s23263_s12 + $0xc0] sm:$0xff]   ;;  %v15887_v22 = vld [vmem:[%s23263_s12 + $0x50] sm:$0xff]   ;;  %v15896_v12 = vld [vmem:[%s23263_s12 + $0xc8] sm:$0xff]  }
 0xb95   : > { %v15894_v43 = vld [vmem:[%s23263_s12 + $0x80] sm:$0xff]   ;;  %v15898_v17 = vld [vmem:[%s23263_s12 + $0x88] sm:$0xff]  }
 0xb96   : > { %v11212_v7 = vadd.f32 %v11211_v50, %v11148_v6  ;;  %v11151_v28 = vadd.f32 %v14634_v32, %v13989_v54  ;;  %14950 = vmatprep.subr.bf16.mxu1 %v22685_v27  ;;  %14966 = vmatprep.subr.bf16.mxu0 %v22685_v27  ;;  %v15856_v50 = vld [vmem:[%s23262_s11 + $0x54] sm:$0xff]  }
 0xb97   : > { %14951 = vmatpush3.bf16.msra.mxu1 %v22685_v27  ;;  %14967 = vmatpush3.bf16.msra.mxu0 %v22685_v27  ;;  %v15900_v32 = vld [vmem:[%s23263_s12 + $0xd0] sm:$0xff]   ;;  %v15889_v6 = vld [vmem:[%s23263_s12 + $0x58] sm:$0xff]  }
 0xb98   : > { %v14635_v45 = vpop.f32.mrb[64].mxu0  ;;  %v11215_v16 = vadd.f32 %v11214_v31, %v11151_v28  ;;  %v11229_v4 = vmax.f32 %v11212_v7, 0.0  ;;  %v15858_v31 = vld [vmem:[%s23262_s11 + $0x5c] sm:$0xff]   ;;  %v15902_v7 = vld [vmem:[%s23263_s12 + $0x90] sm:$0xff]  }
 0xb99   : > { %v14636_v15 = vpop.f32.mrb[65].mxu0  ;;  %v15890_v28 = vld [vmem:[%s23263_s12 + $0x18] sm:$0xff]  }
 0xb9a   : > { %v14637_v5 = vadd.f32 %v14636_v15, %v14635_v45  ;;  %v11230_v58 = vmax.f32 %v11215_v16, 0.0  ;;  %v14638_v1 = vpop.f32.mrb[66].mxu0  ;;  %v15904_v45 = vld [vmem:[%s23263_s12 + $0xd8] sm:$0xff]   ;;  %v15891_v16 = vld [vmem:[%s23263_s12 + $0x60] sm:$0xff]  }
 0xb9b   : > { %v14639_v42 = vpop.f32.mrb[67].mxu0  ;;  %v15893_v15 = vld [vmem:[%s23263_s12 + $0x20] sm:$0xff]   ;;  %v15901_v1 = vld [vmem:[%s23263_s12 + $0x30] sm:$0xff]  }
 0xb9c   : > { %v11156_v48 = vadd.f32 %v14637_v5, %v13989_v54  ;;  %v22691_v21 = vpack.c.bf16 %v11230_v58, %v11229_v4  ;;  %v15863_v54 = vld [vmem:[%s23262_s11 + $0x70] sm:$0xff]   ;;  %v15895_v5 = vld [vmem:[%s23263_s12 + $0x68] sm:$0xff]   ;;  %v15903_v42 = vld [vmem:[%s23263_s12 + $0x78] sm:$0xff]  }
 0xb9d   : > { %v15897_v4 = vld [vmem:[%s23263_s12 + $0x28] sm:$0xff]   ;;  %v15899_v58 = vld [vmem:[%s23263_s12 + $0x70] sm:$0xff]  }
 0xb9e   : > { %v11220_v51 = vadd.f32 %v22666_v59, %v11156_v48  ;;  %14952 = vmatprep.subr.bf16.mxu1 %v22691_v21  ;;  %14968 = vmatprep.subr.bf16.mxu0 %v22691_v21  ;;  %v15855_v59 = vld [vmem:[%s23262_s11 + $0x38] sm:$0xff]  }
 0xb9f   : > { %14953 = vmatpush3.bf16.msra.mxu1 %v22691_v21  ;;  %14969 = vmatpush3.bf16.msra.mxu0 %v22691_v21  ;;  %v15905_v48 = vld [vmem:[%s23263_s12 + $0x38] sm:$0xff]  }
 0xba0   : > { %v11231_v53 = vmax.f32 %v11220_v51, 0.0 }
 0xba2   : > { %v11235_v3 = vpack.c.bf16 %v11231_v53, %v11231_v53 }
 0xba4   : > { %v22700_v55 = vand.u32 %v11275_v38, %v11235_v3 }
 0xba6   : > { %14954 = vmatprep.subr.bf16.mxu1 %v22700_v55  ;;  %14970 = vmatprep.subr.bf16.mxu0 %v22700_v55 }
 0xba7   : > { %14955 = vmatpush3.bf16.msra.mxu1 %v22700_v55  ;;  %14971 = vmatpush3.bf16.msra.mxu0 %v22700_v55 }
 0xba8   : > { %14980 = vmatprep.subr.bf16.mxu1 %v22679_v19  ;;  %14996 = vmatprep.subr.bf16.mxu0 %v22679_v19 }
 0xbaa   : > { %14957 = vmatmul.mubr.msk.bf16.vlgmr.msra.gmra.mrb[80].mxu1 %vm11261_vm9, %v15849_v44  ;;  %14973 = vmatmul.mubr.msk.bf16.vlgmr.msra.gmra.mrb[68].mxu0 %vm11261_vm9, %v15850_v37 }
 0xbab   : > { %14981 = vmatpush3.bf16.msra.mxu1 %v22679_v19  ;;  %14997 = vmatpush3.bf16.msra.mxu0 %v22679_v19 }
 0xbac   : > { %14982 = vmatprep.subr.bf16.mxu1 %v22685_v27  ;;  %14998 = vmatprep.subr.bf16.mxu0 %v22685_v27 }
 0xbad   : > { %14960 = vmatprep.mubr.msk.bf16.mxu1 %vm11261_vm9, %v15851_v33  ;;  %14976 = vmatprep.mubr.msk.bf16.mxu0 %vm11261_vm9, %v15852_v23 }
 0xbaf   : > { %14983 = vmatpush3.bf16.msra.mxu1 %v22685_v27  ;;  %14999 = vmatpush3.bf16.msra.mxu0 %v22685_v27 }
 0xbb0   : > { %14984 = vmatprep.subr.bf16.mxu1 %v22691_v21  ;;  %15000 = vmatprep.subr.bf16.mxu0 %v22691_v21 }
 0xbb2   : > { %14961 = vmatmul.mubr.msk.bf16.gmra.mrb[84].mxu1 %vm11261_vm9, %v15853_v40  ;;  %14977 = vmatmul.mubr.msk.bf16.gmra.mrb[72].mxu0 %vm11261_vm9, %v15854_v52 }
 0xbb3   : > { %14985 = vmatpush3.bf16.msra.mxu1 %v22691_v21  ;;  %15001 = vmatpush3.bf16.msra.mxu0 %v22691_v21 }
 0xbb4   : > { %14986 = vmatprep.subr.bf16.mxu1 %v22700_v55  ;;  %15002 = vmatprep.subr.bf16.mxu0 %v22700_v55 }
 0xbb5   : > { %14988 = vmatprep.mubr.msk.bf16.mxu1 %vm11261_vm9, %v15855_v59  ;;  %15004 = vmatprep.mubr.msk.bf16.mxu0 %vm11261_vm9, %v15856_v50 }
 0xbb7   : > { %14987 = vmatpush3.bf16.msra.mxu1 %v22700_v55  ;;  %15003 = vmatpush3.bf16.msra.mxu0 %v22700_v55 }
 0xbb8   : > { %15012 = vmatprep.subr.bf16.mxu1 %v22679_v19  ;;  %15028 = vmatprep.subr.bf16.mxu0 %v22679_v19 }
 0xbba   : > { %14989 = vmatmul.mubr.msk.bf16.vlgmr.msra.gmra.mrb[88].mxu1 %vm11261_vm9, %v15857_v56  ;;  %15005 = vmatmul.mubr.msk.bf16.vlgmr.msra.gmra.mrb[76].mxu0 %vm11261_vm9, %v15858_v31  ;;  %v15906_v56 = vld [vmem:[%s23263_s12 + $0x98] sm:$0xff]  }
 0xbbb   : > { %15013 = vmatpush3.bf16.msra.mxu1 %v22679_v19  ;;  %15029 = vmatpush3.bf16.msra.mxu0 %v22679_v19 }
 0xbbc   : > { %15014 = vmatprep.subr.bf16.mxu1 %v22685_v27  ;;  %15030 = vmatprep.subr.bf16.mxu0 %v22685_v27 }
 0xbbd   : > { %14992 = vmatprep.mubr.msk.bf16.mxu1 %vm11261_vm9, %v15859_v60  ;;  %15008 = vmatprep.mubr.msk.bf16.mxu0 %vm11261_vm9, %v15860_v36 }
 0xbbf   : > { %15015 = vmatpush3.bf16.msra.mxu1 %v22685_v27  ;;  %15031 = vmatpush3.bf16.msra.mxu0 %v22685_v27 }
 0xbc0   : > { %15016 = vmatprep.subr.bf16.mxu1 %v22691_v21  ;;  %15032 = vmatprep.subr.bf16.mxu0 %v22691_v21 }
 0xbc2   : > { %14993 = vmatmul.mubr.msk.bf16.gmra.mrb[92].mxu1 %vm11261_vm9, %v15861_v39  ;;  %15009 = vmatmul.mubr.msk.bf16.gmra.mrb[80].mxu0 %vm11261_vm9, %v15862_v26 }
 0xbc3   : > { %15017 = vmatpush3.bf16.msra.mxu1 %v22691_v21  ;;  %15033 = vmatpush3.bf16.msra.mxu0 %v22691_v21 }
 0xbc4   : > { %15018 = vmatprep.subr.bf16.mxu1 %v22700_v55  ;;  %15034 = vmatprep.subr.bf16.mxu0 %v22700_v55 }
 0xbc5   : > { %15020 = vmatprep.mubr.msk.bf16.mxu1 %vm11261_vm9, %v15863_v54  ;;  %15036 = vmatprep.mubr.msk.bf16.mxu0 %vm11261_vm9, %v15864_v57  ;;  %v15907_v57 = vld [vmem:[%s23263_s12 + $0xe0] sm:$0xff]  }
 0xbc7   : > { %15019 = vmatpush3.bf16.msra.mxu1 %v22700_v55  ;;  %15035 = vmatpush3.bf16.msra.mxu0 %v22700_v55 }
 0xbc8   : > { %15044 = vmatprep.subr.bf16.mxu1 %v22679_v19  ;;  %15060 = vmatprep.subr.bf16.mxu0 %v22679_v19 }
 0xbca   : > { %15021 = vmatmul.mubr.msk.bf16.vlgmr.msra.gmra.mrb[96].mxu1 %vm11261_vm9, %v15865_v18  ;;  %15037 = vmatmul.mubr.msk.bf16.vlgmr.msra.gmra.mrb[84].mxu0 %vm11261_vm9, %v15866_v63  ;;  %v15908_v18 = vld [vmem:[%s23263_s12 + $0xa0] sm:$0xff]   ;;  %v15909_v63 = vld [vmem:[%s23263_s12 + $0xe8] sm:$0xff]  }
 0xbcb   : > { %15045 = vmatpush3.bf16.msra.mxu1 %v22679_v19  ;;  %15061 = vmatpush3.bf16.msra.mxu0 %v22679_v19 }
 0xbcc   : > { %15046 = vmatprep.subr.bf16.mxu1 %v22685_v27  ;;  %15062 = vmatprep.subr.bf16.mxu0 %v22685_v27 }
 0xbcd   : > { %15024 = vmatprep.mubr.msk.bf16.mxu1 %vm11261_vm9, %v15867_v13  ;;  %15040 = vmatprep.mubr.msk.bf16.mxu0 %vm11261_vm9, %v15871_v34 }
 0xbcf   : > { %15047 = vmatpush3.bf16.msra.mxu1 %v22685_v27  ;;  %15063 = vmatpush3.bf16.msra.mxu0 %v22685_v27 }
 0xbd0   : > { %15048 = vmatprep.subr.bf16.mxu1 %v22691_v21  ;;  %15064 = vmatprep.subr.bf16.mxu0 %v22691_v21 }
 0xbd2   : > { %15025 = vmatmul.mubr.msk.bf16.gmra.mrb[100].mxu1 %vm11261_vm9, %v15868_v47  ;;  %15041 = vmatmul.mubr.msk.bf16.gmra.mrb[88].mxu0 %vm11261_vm9, %v15872_v20  ;;  %v15910_v47 = vld [vmem:[%s23263_s12 + $0xa8] sm:$0xff]  }
 0xbd3   : > { %15049 = vmatpush3.bf16.msra.mxu1 %v22691_v21  ;;  %15065 = vmatpush3.bf16.msra.mxu0 %v22691_v21 }
 0xbd4   : > { %15050 = vmatprep.subr.bf16.mxu1 %v22700_v55  ;;  %15066 = vmatprep.subr.bf16.mxu0 %v22700_v55 }
 0xbd5   : > { %15052 = vmatprep.mubr.msk.bf16.mxu1 %vm11261_vm9, %v15869_v24  ;;  %15068 = vmatprep.mubr.msk.bf16.mxu0 %vm11261_vm9, %v15873_v11 }
 0xbd7   : > { %15051 = vmatpush3.bf16.msra.mxu1 %v22700_v55  ;;  %15067 = vmatpush3.bf16.msra.mxu0 %v22700_v55 }
 0xbd8   : > { %15076 = vmatprep.subr.bf16.mxu1 %v22679_v19  ;;  %14719 = vmatprep.subr.bf16.mxu0 %v15883_v35 }
 0xbda   : > { %15053 = vmatmul.mubr.msk.bf16.vlgmr.msra.gmra.mrb[104].mxu1 %vm11261_vm9, %v15870_v8  ;;  %15069 = vmatmul.mubr.msk.bf16.vlgmr.msra.gmra.mrb[92].mxu0 %vm11261_vm9, %v15874_v61 }
 0xbdb   : > { %15077 = vmatpush3.bf16.msra.mxu1 %v22679_v19  ;;  %15072 = vmatprep.mubr.msk.bf16.mxu0 %vm11261_vm9, %v15875_v30  ;;  %v15881_v19 = vld [vmem:[%s23262_s11 + $0xf0] sm:$0xff]  }
 0xbdc   : > { %15078 = vmatprep.subr.bf16.mxu1 %v22685_v27  ;;  %15056 = vmatprep.mubr.msk.bf16.mxu1 %vm11261_vm9, %v15877_v0 }
 0xbdd   : > { %14720 = vmatpush3.bf16.msra.mxu0 %v15884_v9 }
 0xbde   : > { %14721 = vmatprep.subr.bf16.mxu0 %v15885_v46 }
 0xbdf   : > { %15079 = vmatpush3.bf16.msra.mxu1 %v22685_v27  ;;  %v15888_v27 = vld [vmem:[%s23263_s12 + $0x10] sm:$0xff]  }
 0xbe0   : > { %15080 = vmatprep.subr.bf16.mxu1 %v22691_v21 }
 0xbe1   : > { %14722 = vmatpush3.bf16.msra.mxu0 %v15886_v62 }
 0xbe2   : > { %15073 = vmatmul.mubr.msk.bf16.gmra.mrb[96].mxu0 %vm11261_vm9, %v15876_v25  ;;  %15057 = vmatmul.mubr.msk.bf16.gmra.mrb[108].mxu1 %vm11261_vm9, %v15878_v41 }
 0xbe3   : > { %15081 = vmatpush3.bf16.msra.mxu1 %v22691_v21  ;;  %15084 = vmatprep.mubr.msk.bf16.mxu1 %vm11261_vm9, %v15879_v49 }
 0xbe4   : > { %15082 = vmatprep.subr.bf16.mxu1 %v22700_v55  ;;  %14723 = vmatprep.subr.bf16.mxu0 %v15887_v22 }
 0xbe5   : > { %14724 = vmatpush3.bf16.msra.mxu0 %v15888_v27 }
 0xbe6   : > { %14725 = vmatprep.subr.bf16.mxu0 %v15889_v6 }
 0xbe7   : > { %15083 = vmatpush3.bf16.msra.mxu1 %v22700_v55 }
 0xbe8   : > { %14759 = vmatprep.subr.bf16.mxu1 %v15892_v2 }
 0xbe9   : > { %14726 = vmatpush3.bf16.msra.mxu0 %v15890_v28 }
 0xbea   : > { %15085 = vmatmul.mubr.msk.bf16.vlgmr.msra.gmra.mrb[112].mxu1 %vm11261_vm9, %v15880_v10  ;;  %14727 = vmatprep.subr.bf16.mxu0 %v15891_v16  ;;  %v15911_v10 = vld [vmem:[%s23263_s12 + $0xf0] sm:$0xff]  }
 0xbeb   : > { %15088 = vmatprep.mubr.msk.bf16.mxu1 %vm11261_vm9, %v15881_v19  ;;  %14760 = vmatpush3.bf16.msra.mxu1 %v15894_v43  ;;  %v15912_v19 = vld [vmem:[%s23263_s12 + $0xb0] sm:$0xff]  }
 0xbec   : > { %14761 = vmatprep.subr.bf16.mxu1 %v15896_v12 }
 0xbed   : > { %14728 = vmatpush3.bf16.msra.mxu0 %v15893_v15 }
 0xbee   : > { %14729 = vmatprep.subr.bf16.mxu0 %v15895_v5 }
 0xbef   : > { %14762 = vmatpush3.bf16.msra.mxu1 %v15898_v17 }
 0xbf0   : > { %14763 = vmatprep.subr.bf16.mxu1 %v15900_v32 }
 0xbf1   : > { %14730 = vmatpush3.bf16.msra.mxu0 %v15897_v4 }
 0xbf2   : > { %15089 = vmatmul.mubr.msk.bf16.gmra.mrb[116].mxu1 %vm11261_vm9, %v15882_v29  ;;  %14731 = vmatprep.subr.bf16.mxu0 %v15899_v58 }
 0xbf3   : > { %14764 = vmatpush3.bf16.msra.mxu1 %v15902_v7 }
 0xbf4   : > { %14765 = vmatprep.subr.bf16.mxu1 %v15904_v45 }
 0xbf5   : > { %14732 = vmatpush3.bf16.msra.mxu0 %v15901_v1 }
 0xbf6   : > { %14733 = vmatprep.subr.bf16.mxu0 %v15903_v42 }
 0xbf7   : > { %14766 = vmatpush3.bf16.msra.mxu1 %v15906_v56 }
 0xbf8   : > { %14767 = vmatprep.subr.bf16.mxu1 %v15907_v57 }
 0xbf9   : > { %14734 = vmatpush3.bf16.msra.mxu0 %v15905_v48 }
 0xbfb   : > { %14768 = vmatpush3.bf16.msra.mxu1 %v15908_v18 }
 0xbfc   : > { %14769 = vmatprep.subr.bf16.mxu1 %v15909_v63  ;;  %v15915_v63 = vld [vmem:[%s23263_s12 + $0x100] sm:$0xff]  }
 0xbfd   : > { %15092 = vmatprep.subr.bf16.mxu0 %v15915_v63 }
 0xbff   : > { %14770 = vmatpush3.bf16.msra.mxu1 %v15910_v47 }
 0xc00   : > { %14771 = vmatprep.subr.bf16.mxu1 %v15911_v10 }
 0xc03   : > { %14772 = vmatpush3.bf16.msra.mxu1 %v15912_v19 }
 0xc7d   : > { %v14974_v21 = vpop.f32.mrb[68].mxu0  ;;  %v22967_v51 = vpop.f32.mrb[80].mxu1 }
 0xc7e   : > { %v11419_v53 = vpop.f32.mrb[69].mxu0  ;;  %v22969_v38 = vpop.f32.mrb[81].mxu1 }
 0xc7f   : > { %v14975_v3 = vpop.f32.mrb[70].mxu0  ;;  %v22971_v55 = vpop.f32.mrb[82].mxu1 }
 0xc80   : > { %v11450_v44 = vpack.c.bf16 %v14975_v3, %v14974_v21  ;;  %v11422_v37 = vpop.f32.mrb[71].mxu0  ;;  %v11344_v33 = vpack.c.bf16 %v22971_v55, %v22967_v51  ;;  %v22975_v23 = vpop.f32.mrb[83].mxu1 }
 0xc81   : > { %v11449_v40 = vpack.c.bf16 %v11422_v37, %v11419_v53  ;;  %v11343_v52 = vpack.c.bf16 %v22975_v23, %v22969_v38  ;;  %v15913_v37 = vld [vmem:[%s23263_s12 + $0xf8] sm:$0xff]  }
 0xc82   : > { %14773 = vmatprep.subr.bf16.mxu1 %v15913_v37  ;;  %v15918_v38 = vld [vmem:[%s23263_s12 + $0x118] sm:$0xff]  }
 0xc83   : > { %12199 = vrot.lane.b32.xlu0 %v11449_v40, %s23339_s22  ;;  %v15914_v40 = vld [vmem:[%s23263_s12 + $0xb8] sm:$0xff]  }
 0xc84   : > { %14774 = vmatpush3.bf16.msra.mxu1 %v15914_v40 }
 0xc85   : > { %v22980_v59 = vpop.f32.mrb[72].mxu0  ;;  %v22982_v50 = vpop.f32.mrb[84].mxu1  ;;  %15108 = vmatprep.subr.bf16.mxu1 %v23467_v14 }
 0xc86   : > { %v11435_v31 = vpop.f32.mrb[73].mxu0  ;;  %v22987_v60 = vpop.f32.mrb[85].mxu1  ;;  %v11452_v53 = vpack.c.bf16 %v22980_v59, %v22980_v59 }
 0xc87   : > { %v14979_v36 = vpop.f32.mrb[74].mxu0  ;;  %12201 = vrot.lane.b32.xlu0 %v11450_v44, %s23339_s22  ;;  %v14963_v39 = vpop.f32.mrb[86].mxu1 }
 0xc88   : > { %v11438_v26 = vpop.f32.mrb[75].mxu0  ;;  %v22990_v54 = vpop.f32.mrb[87].mxu1 }
 0xc89   : > { %v11451_v13 = vpack.c.bf16 %v11438_v26, %v11435_v31  ;;  %v11345_v34 = vpack.c.bf16 %v22990_v54, %v22987_v60 }
 0xc8d   : > { %v15006_v20 = vpop.f32.mrb[76].mxu0  ;;  %v23006_v24 = vpop.f32.mrb[88].mxu1 }
 0xc8e   : > { %v11631_v11 = vpop.f32.mrb[77].mxu0  ;;  %v23008_v8 = vpop.f32.mrb[89].mxu1 }
 0xc8f   : > { %v15007_v61 = vpop.f32.mrb[78].mxu0  ;;  %v23010_v30 = vpop.f32.mrb[90].mxu1 }
 0xc90   : > { %v11662_v0 = vpack.c.bf16 %v15007_v61, %v15006_v20  ;;  %v11634_v25 = vpop.f32.mrb[79].mxu0  ;;  %v11556_v41 = vpack.c.bf16 %v23010_v30, %v23006_v24  ;;  %v23014_v49 = vpop.f32.mrb[91].mxu1 }
 0xc91   : > { %v11661_v29 = vpack.c.bf16 %v11634_v25, %v11631_v11  ;;  %v11555_v35 = vpack.c.bf16 %v23014_v49, %v23008_v8  ;;  %v15917_v49 = vld [vmem:[%s23263_s12 + $0x110] sm:$0xff]  }
 0xc93   : > { %12211 = vrot.lane.b32.xlu1 %v11661_v29, %s23339_s22 }
 0xc95   : > { %v15010_v9 = vpop.f32.mrb[80].mxu0  ;;  %v23025_v46 = vpop.f32.mrb[92].mxu1 }
 0xc96   : > { %v11647_v62 = vpop.f32.mrb[81].mxu0  ;;  %v23027_v2 = vpop.f32.mrb[93].mxu1  ;;  %v11664_v42 = vpack.c.bf16 %v15010_v9, %v15010_v9 }
 0xc97   : > { %v15011_v43 = vpop.f32.mrb[82].mxu0  ;;  %12213 = vrot.lane.b32.xlu1 %v11662_v0, %s23339_s22  ;;  %v14995_v22 = vpop.f32.mrb[94].mxu1 }
 0xc98   : > { %v11650_v12 = vpop.f32.mrb[83].mxu0  ;;  %v23030_v17 = vpop.f32.mrb[95].mxu1 }
 0xc99   : > { %v11663_v27 = vpack.c.bf16 %v11650_v12, %v11647_v62  ;;  %v11557_v32 = vpack.c.bf16 %v23030_v17, %v23027_v2  ;;  %v11346_v2 = vpack.c.bf16 %v22982_v50, %v22982_v50 }
 0xc9b   : > { %12215 = vrot.lane.b32.xlu1 %v11663_v27, %s23339_s22 }
 0xc9d   : > { %v23035_v6 = vpop.f32.mrb[84].mxu0  ;;  %v23037_v7 = vpop.f32.mrb[96].mxu1 }
 0xc9e   : > { %v11843_v28 = vpop.f32.mrb[85].mxu0  ;;  %v23039_v45 = vpop.f32.mrb[97].mxu1 }
 0xc9f   : > { %v15039_v16 = vpop.f32.mrb[86].mxu0  ;;  %12203 = vrot.lane.b32.xlu1 %v11451_v13, %s23339_s22  ;;  %v23042_v15 = vpop.f32.mrb[98].mxu1 }
 0xca0   : > { %v11874_v5 = vpack.c.bf16 %v15039_v16, %v23035_v6  ;;  %v11846_v4 = vpop.f32.mrb[87].mxu0  ;;  %v11768_v58 = vpack.c.bf16 %v23042_v15, %v23037_v7  ;;  %v23047_v1 = vpop.f32.mrb[99].mxu1 }
 0xca1   : > { %v11873_v48 = vpack.c.bf16 %v11846_v4, %v11843_v28  ;;  %v11767_v21 = vpack.c.bf16 %v23047_v1, %v23039_v45 }
 0xca3   : > { %12217 = vrot.lane.b32.xlu1 %v11664_v42, %s23339_s22 }
 0xca5   : > { %v15042_v3 = vpop.f32.mrb[88].mxu0  ;;  %v23054_v44 = vpop.f32.mrb[100].mxu1 }
 0xca6   : > { %v11859_v56 = vpop.f32.mrb[89].mxu0  ;;  %v23062_v31 = vpop.f32.mrb[101].mxu1 }
 0xca7   : > { %v15043_v36 = vpop.f32.mrb[90].mxu0  ;;  %12205 = vrot.lane.b32.xlu1 %v11452_v53, %s23339_s22  ;;  %v15027_v39 = vpop.f32.mrb[102].mxu1 }
 0xca8   : > { %v11862_v59 = vpop.f32.mrb[91].mxu0  ;;  %v23065_v26 = vpop.f32.mrb[103].mxu1 }
 0xca9   : > { %v11875_v57 = vpack.c.bf16 %v11862_v59, %v11859_v56  ;;  %v11769_v18 = vpack.c.bf16 %v23065_v26, %v23062_v31  ;;  %v15919_v31 = vld [vmem:[%s23265_s14] sm:$0xff]   ;;  %v15920_v26 = vld [vmem:[%s23265_s14 + $0x8] sm:$0xff]  }
 0xcad   : > { %v15070_v13 = vpop.f32.mrb[92].mxu0  ;;  %v23073_v47 = vpop.f32.mrb[104].mxu1 }
 0xcae   : > { %v12055_v20 = vpop.f32.mrb[93].mxu0  ;;  %v23075_v11 = vpop.f32.mrb[105].mxu1 }
 0xcaf   : > { %v15071_v61 = vpop.f32.mrb[94].mxu0  ;;  %v23077_v0 = vpop.f32.mrb[106].mxu1 }
 0xcb0   : > { %v12086_v25 = vpack.c.bf16 %v15071_v61, %v15070_v13  ;;  %v12058_v10 = vpop.f32.mrb[95].mxu0  ;;  %v11980_v19 = vpack.c.bf16 %v23077_v0, %v23073_v47  ;;  %v23081_v29 = vpop.f32.mrb[107].mxu1  ;;  %v11876_v13 = vpack.c.bf16 %v15042_v3, %v15042_v3 }
 0xcb1   : > { %v12085_v9 = vpack.c.bf16 %v12058_v10, %v12055_v20  ;;  %v11979_v62 = vpack.c.bf16 %v23081_v29, %v23075_v11 }
 0xcb3   : > { %12235 = vrot.lane.b32.xlu0 %v12085_v9, %s23339_s22 }
 0xcb5   : > { %v15074_v43 = vpop.f32.mrb[96].mxu0  ;;  %v23086_v22 = vpop.f32.mrb[108].mxu1 }
 0xcb6   : > { %v12071_v12 = vpop.f32.mrb[97].mxu0  ;;  %v23088_v27 = vpop.f32.mrb[109].mxu1  ;;  %v12088_v37 = vpack.c.bf16 %v15074_v43, %v15074_v43  ;;  %v11982_v0 = vpack.c.bf16 %v23086_v22, %v23086_v22 }
 0xcb7   : > { %12223 = vrot.lane.b32.xlu0 %v11873_v48, %s23339_s22  ;;  %v15075_v6 = vpop.f32.mrb[98].mxu0  ;;  %v15059_v28 = vpop.f32.mrb[110].mxu1 }
 0xcb8   : > { %v12074_v16 = vpop.f32.mrb[99].mxu0  ;;  %v23091_v4 = vpop.f32.mrb[111].mxu1  ;;  %v15916_v6 = vld [vmem:[%s23263_s12 + $0x108] sm:$0xff]  }
 0xcb9   : > { %v12087_v42 = vpack.c.bf16 %v12074_v16, %v12071_v12  ;;  %v11981_v53 = vpack.c.bf16 %v23091_v4, %v23088_v27 }
 0xcbb   : > { %12237 = vrot.lane.b32.xlu0 %v12086_v25, %s23339_s22  ;;  %12239 = vrot.lane.b32.xlu1 %v12087_v42, %s23339_s22 }
 0xcbd   : > { %v15086_v40 = vpop.f32.mrb[112].mxu1 }
 0xcbe   : > { %v12161_v56 = vpop.f32.mrb[113].mxu1 }
 0xcbf   : > { %12225 = vrot.lane.b32.xlu0 %v11874_v5, %s23339_s22  ;;  %12241 = vrot.lane.b32.xlu1 %v12088_v37, %s23339_s22  ;;  %v15087_v48 = vpop.f32.mrb[114].mxu1 }
 0xcc0   : > { %v12192_v36 = vpack.c.bf16 %v15087_v48, %v15086_v40  ;;  %v12164_v39 = vpop.f32.mrb[115].mxu1 }
 0xcc1   : > { %v12191_v59 = vpack.c.bf16 %v12164_v39, %v12161_v56 }
 0xcc3   : > { %12227 = vrot.lane.b32.xlu0 %v11875_v57, %s23339_s22 }
 0xcc5   : > { %v15090_v20 = vpop.f32.mrb[116].mxu1 }
 0xcc6   : > { %v12177_v61 = vpop.f32.mrb[117].mxu1 }
 0xcc7   : > { %12229 = vrot.lane.b32.xlu0 %v11876_v13, %s23339_s22  ;;  %v15091_v25 = vpop.f32.mrb[118].mxu1  ;;  %s16057_s22 = smov [#allocation2]  }
 0xcc8   : > { %v12180_v10 = vpop.f32.mrb[119].mxu1  ;;  %s15991_s0 = sshll.u32 %s16057_s22, 4  ;;  %s15992_s0 = int_to_ptr.vmem [resolvable:$false] %s15991_s0 }
 0xcc9   : > { %v12193_v9 = vpack.c.bf16 %v12180_v10, %v12177_v61  ;;  %s15993_s19 = scalar_lea.vmem %s15992_s0, 32  ;;  %p15994_p0 = scmp.lt.s32.totalorder %s23211_s23, %s15992_s0 }
 0xcca   : > { %p15995_p1 = scmp.lt.s32.totalorder %s15993_s19, %s15987_s28 }
 0xccc   : > { %p15996_p2 = por %p15995_p1, %p15994_p0 }
 0xcce   : > { %p15997_p3 = pnand %p15996_p2, %p15990_p13 }
 0xcf5   : > { %v12200_v43 = vpop.permute.xlu0 %12199 }
 0xcf6   : > { %v12245_v3 = vsel %vm1513_vm1, %v11343_v52, %v12200_v43 }
 0xd05   : > { %v12212_v12 = vpop.permute.xlu1 %12211 }
 0xd06   : > { %v12261_v5 = vsel %vm1513_vm1, %v11555_v35, %v12212_v12  ;;  %v12202_v35 = vpop.permute.xlu0 %12201 }
 0xd07   : > { %12646 = vmatprep.mubr.bf16.mxu0 %v12261_v5  ;;  %v12249_v23 = vsel %vm1513_vm1, %v11344_v33, %v12202_v35 }
 0xd08   : > { %12647 = vmatmul.mubr.bf16.vlgmr.msra.gmra.mrb[100].mxu0 %v12245_v3 }
 0xd09   : > { %v12214_v57 = vpop.permute.xlu1 %12213  ;;  %15093 = vmatpush3.bf16.msra.mxu0 %v15915_v63 }
 0xd0a   : > { %v12265_v8 = vsel %vm1513_vm1, %v11556_v41, %v12214_v57  ;;  %15094 = vmatprep.subr.bf16.mxu0 %v15916_v6  ;;  %v11558_v41 = vpack.c.bf16 %v23025_v46, %v23025_v46  ;;  %v14140_v57 = vld [vmem:[%s23264_s13] ss:$0 sm:$0xff] }
 0xd0b   : > { %12654 = vmatprep.mubr.bf16.mxu0 %v12265_v8 }
 0xd0d   : > { %v12216_v28 = vpop.permute.xlu1 %12215  ;;  %15095 = vmatpush3.bf16.msra.mxu0 %v15916_v6 }
 0xd0e   : > { %15096 = vmatprep.subr.bf16.mxu0 %v15917_v49  ;;  %v12269_v52 = vsel %vm1513_vm1, %v11557_v32, %v12216_v28 }
 0xd10   : > { %12655 = vmatmul.mubr.bf16.gmra.mrb[104].mxu0 %v12249_v23 }
 0xd11   : > { %v12204_v24 = vpop.permute.xlu1 %12203  ;;  %12662 = vmatprep.mubr.bf16.mxu0 %v12269_v52  ;;  %15097 = vmatpush3.bf16.msra.mxu0 %v15917_v49 }
 0xd12   : > { %15098 = vmatprep.subr.bf16.mxu0 %v15918_v38  ;;  %v12253_v51 = vsel %vm1513_vm1, %v11345_v34, %v12204_v24  ;;  %v12194_v34 = vpack.c.bf16 %v15090_v20, %v15090_v20 }
 0xd15   : > { %v12218_v30 = vpop.permute.xlu1 %12217  ;;  %15099 = vmatpush3.bf16.msra.mxu0 %v15918_v38 }
 0xd16   : > { %v12273_v55 = vsel %vm1513_vm1, %v11558_v41, %v12218_v30 }
 0xd18   : > { %12663 = vmatmul.mubr.bf16.gmra.mrb[108].mxu0 %v12253_v51 }
 0xd19   : > { %12670 = vmatprep.mubr.bf16.mxu0 %v12273_v55  ;;  %v12206_v33 = vpop.permute.xlu1 %12205 }
 0xd1a   : > { %v12257_v17 = vsel %vm1513_vm1, %v11346_v2, %v12206_v33 }
 0xd20   : > { %12671 = vmatmul.mubr.bf16.gmra.mrb[112].mxu0 %v12257_v17 }
 0xd21   : > { %15100 = vmatprep.mubr.msk.bf16.mxu0 %vm1513_vm1, %v12191_v59 }
 0xd25   : > { %v12236_v32 = vpop.permute.xlu0 %12235 }
 0xd26   : > { %v12293_v60 = vsel %vm1513_vm1, %v11979_v62, %v12236_v32 }
 0xd27   : > { %12710 = vmatprep.mubr.bf16.mxu1 %v12293_v60 }
 0xd28   : > { %15101 = vmatmul.mubr.msk.bf16.vlgmr.msra.gmra.mrb[116].mxu0 %vm1513_vm1, %v12192_v36 }
 0xd29   : > { %v12224_v54 = vpop.permute.xlu0 %12223  ;;  %15104 = vmatprep.mubr.msk.bf16.mxu0 %vm1513_vm1, %v12193_v9 }
 0xd2a   : > { %v12277_v50 = vsel %vm1513_vm1, %v11767_v21, %v12224_v54 }
 0xd2b   : > { %12711 = vmatmul.mubr.bf16.vlgmr.msra.gmra.mrb[120].mxu1 %v12277_v50 }
 0xd2c   : > { %15109 = vmatpush3.bf16.msra.mxu1 %v15919_v31 }
 0xd2d   : > { %v12238_v46 = vpop.permute.xlu0 %12237  ;;  %v12240_v11 = vpop.permute.xlu1 %12239  ;;  %15110 = vmatprep.subr.bf16.mxu1 %v23467_v14 }
 0xd2e   : > { %v12297_v63 = vsel %vm1513_vm1, %v11980_v19, %v12238_v46  ;;  %v12301_v1 = vsel %vm1513_vm1, %v11981_v53, %v12240_v11 }
 0xd2f   : > { %12718 = vmatprep.mubr.bf16.mxu1 %v12297_v63 }
 0xd30   : > { %15105 = vmatmul.mubr.msk.bf16.gmra.mrb[120].mxu0 %vm1513_vm1, %v12194_v34  ;;  %15111 = vmatpush3.bf16.msra.mxu1 %v15920_v26 }
 0xd31   : > { %v12226_v29 = vpop.permute.xlu0 %12225  ;;  %v12242_v47 = vpop.permute.xlu1 %12241  ;;  %15112 = vmatprep.subr.bf16.mxu1 %v23467_v14 }
 0xd32   : > { %v12281_v45 = vsel %vm1513_vm1, %v11768_v58, %v12226_v29  ;;  %v12305_v7 = vsel %vm1513_vm1, %v11982_v0, %v12242_v47  ;;  %v11770_v58 = vpack.c.bf16 %v23054_v44, %v23054_v44  ;;  %v15921_v44 = vld [vmem:[%s23265_s14 + $0x10] sm:$0xff]  }
 0xd33   : > { %12719 = vmatmul.mubr.bf16.gmra.mrb[124].mxu1 %v12281_v45 }
 0xd34   : > { %12726 = vmatprep.mubr.bf16.mxu1 %v12301_v1  ;;  %15113 = vmatpush3.bf16.msra.mxu1 %v15921_v44 }
 0xd35   : > { %v12228_v21 = vpop.permute.xlu0 %12227  ;;  %15114 = vmatprep.subr.bf16.mxu1 %v23467_v14 }
 0xd36   : > { %v12285_v19 = vsel %vm1513_vm1, %v11769_v18, %v12228_v21  ;;  %v15922_v18 = vld [vmem:[%s23265_s14 + $0x18] sm:$0xff]  }
 0xd38   : > { %15115 = vmatpush3.bf16.msra.mxu1 %v15922_v18 }
 0xd39   : > { %v12230_v15 = vpop.permute.xlu0 %12229 }
 0xd3a   : > { %v12289_v62 = vsel %vm1513_vm1, %v11770_v58, %v12230_v15 }
 0xd3b   : > { %12727 = vmatmul.mubr.bf16.gmra.mrb[128].mxu1 %v12285_v19 }
 0xd3c   : > { %12734 = vmatprep.mubr.bf16.mxu1 %v12305_v7 }
 0xd43   : > { %12735 = vmatmul.mubr.bf16.gmra.mrb[132].mxu1 %v12289_v62 }
 0xd44   : > { %15116 = vmatprep.mubr.msk.bf16.mxu1 %vm16056_vm5, %v23467_v14 }
 0xddb   : > { %v14735_v22 = vpop.f32.mrb[100].mxu0 }
 0xddc   : > { %v14736_v27 = vpop.f32.mrb[101].mxu0 }
 0xddd   : > { %v14737_v16 = vadd.f32 %v14736_v27, %v14735_v22  ;;  %v14738_v4 = vpop.f32.mrb[102].mxu0 }
 0xdde   : > { %v14739_v42 = vpop.f32.mrb[103].mxu0 }
 0xddf   : > { %v14740_v53 = vadd.f32 %v14739_v42, %v14738_v4  ;;  %v12649_v38 = vadd.f32 %v14737_v16, %v14140_v57 }
 0xde1   : > { %v12652_v30 = vadd.f32 %v14740_v53, %v14140_v57 }
 0xde3   : > { %v14741_v37 = vpop.f32.mrb[104].mxu0 }
 0xde4   : > { %v14742_v40 = vpop.f32.mrb[105].mxu0 }
 0xde5   : > { %v14743_v56 = vadd.f32 %v14742_v40, %v14741_v37  ;;  %v14744_v48 = vpop.f32.mrb[106].mxu0 }
 0xde6   : > { %v14745_v36 = vpop.f32.mrb[107].mxu0 }
 0xde7   : > { %v14746_v39 = vadd.f32 %v14745_v36, %v14744_v48  ;;  %v12657_v63 = vadd.f32 %v14743_v56, %v14140_v57 }
 0xde9   : > { %v12660_v1 = vadd.f32 %v14746_v39, %v14140_v57 }
 0xdeb   : > { %v14747_v59 = vpop.f32.mrb[108].mxu0 }
 0xdec   : > { %v14748_v13 = vpop.f32.mrb[109].mxu0 }
 0xded   : > { %v14749_v20 = vadd.f32 %v14748_v13, %v14747_v59  ;;  %v14750_v61 = vpop.f32.mrb[110].mxu0 }
 0xdee   : > { %v14751_v25 = vpop.f32.mrb[111].mxu0 }
 0xdef   : > { %v14752_v10 = vadd.f32 %v14751_v25, %v14750_v61  ;;  %v12665_v22 = vadd.f32 %v14749_v20, %v14140_v57 }
 0xdf1   : > { %v12668_v40 = vadd.f32 %v14752_v10, %v14140_v57 }
 0xdf3   : > { %v14753_v14 = vpop.f32.mrb[112].mxu0 }
 0xdf4   : > { %v14754_v9 = vpop.f32.mrb[113].mxu0 }
 0xdf5   : > { %v14755_v43 = vadd.f32 %v14754_v9, %v14753_v14  ;;  %v14756_v12 = vpop.f32.mrb[114].mxu0 }
 0xdf6   : > { %v14757_v5 = vpop.f32.mrb[115].mxu0 }
 0xdf7   : > { %v12673_v20 = vadd.f32 %v14755_v43, %v14140_v57 }
 0xdfb   : > { %v15102_v6 = vpop.f32.mrb[116].mxu0 }
 0xdfc   : > { %v12776_v3 = vpop.f32.mrb[117].mxu0 }
 0xdfd   : > { %v15103_v8 = vpop.f32.mrb[118].mxu0 }
 0xdfe   : > { %v14775_v49 = vpop.f32.mrb[120].mxu1  ;;  %v12779_v35 = vpop.f32.mrb[119].mxu0 }
 0xdff   : > { %v14776_v28 = vpop.f32.mrb[121].mxu1 }
 0xe00   : > { %v14777_v23 = vadd.f32 %v14776_v28, %v14775_v49  ;;  %v14778_v52 = vpop.f32.mrb[122].mxu1 }
 0xe01   : > { %v14779_v24 = vpop.f32.mrb[123].mxu1 }
 0xe02   : > { %v14780_v41 = vadd.f32 %v14779_v24, %v14778_v52  ;;  %v12713_v51 = vadd.f32 %v14777_v23, %v12649_v38 }
 0xe03   : > { %v15106_v55 = vpop.f32.mrb[120].mxu0 }
 0xe04   : > { %v12777_v33 = vadd.f32 %v12776_v3, %v12713_v51  ;;  %v12716_v2 = vadd.f32 %v14780_v41, %v12652_v30  ;;  %v12792_v17 = vpop.f32.mrb[121].mxu0 }
 0xe05   : > { %v15107_v32 = vpop.f32.mrb[122].mxu0 }
 0xe06   : > { %v14781_v60 = vpop.f32.mrb[124].mxu1  ;;  %v12806_v54 = vmax.f32 %v12777_v33, 0.0  ;;  %v12780_v50 = vadd.f32 %v12779_v35, %v12716_v2  ;;  %v12795_v34 = vpop.f32.mrb[123].mxu0 }
 0xe07   : > { %v14782_v46 = vpop.f32.mrb[125].mxu1 }
 0xe08   : > { %v14783_v11 = vadd.f32 %v14782_v46, %v14781_v60  ;;  %v14784_v29 = vpop.f32.mrb[126].mxu1  ;;  %v12807_v45 = vmax.f32 %v12780_v50, 0.0  ;;  %v12813_v0 = vsel %vm1513_vm1, %v12806_v54, 0.0 }
 0xe09   : > { %v14785_v21 = vpop.f32.mrb[127].mxu1 }
 0xe0a   : > { %v12721_v47 = vadd.f32 %v14783_v11, %v12657_v63  ;;  %v14786_v19 = vadd.f32 %v14785_v21, %v14784_v29  ;;  %v12814_v7 = vsel %vm1513_vm1, %v12807_v45, 0.0 }
 0xe0b   : > { %v12815_v15 = vadd.f32 %v12814_v7, %v12813_v0 }
 0xe0c   : > { %v12785_v58 = vadd.f32 %v15102_v6, %v12721_v47  ;;  %v12724_v62 = vadd.f32 %v14786_v19, %v12660_v1 }
 0xe0e   : > { %v12808_v31 = vmax.f32 %v12785_v58, 0.0  ;;  %v12788_v26 = vadd.f32 %v15103_v8, %v12724_v62  ;;  %v14787_v44 = vpop.f32.mrb[128].mxu1 }
 0xe0f   : > { %v14788_v18 = vpop.f32.mrb[129].mxu1 }
 0xe10   : > { %v12809_v27 = vmax.f32 %v12788_v26, 0.0  ;;  %v12816_v16 = vsel %vm1513_vm1, %v12808_v31, 0.0  ;;  %v14789_v4 = vadd.f32 %v14788_v18, %v14787_v44  ;;  %v14790_v42 = vpop.f32.mrb[130].mxu1 }
 0xe11   : > { %v12817_v53 = vadd.f32 %v12816_v16, %v12815_v15  ;;  %v14791_v37 = vpop.f32.mrb[131].mxu1 }
 0xe12   : > { %v14792_v56 = vadd.f32 %v14791_v37, %v14790_v42  ;;  %v12729_v48 = vadd.f32 %v14789_v4, %v12665_v22  ;;  %v12818_v36 = vsel %vm1513_vm1, %v12809_v27, 0.0 }
 0xe13   : > { %v12819_v39 = vadd.f32 %v12818_v36, %v12817_v53 }
 0xe14   : > { %v12793_v59 = vadd.f32 %v12792_v17, %v12729_v48  ;;  %v12732_v13 = vadd.f32 %v14792_v56, %v12668_v40 }
 0xe16   : > { %v14793_v61 = vpop.f32.mrb[132].mxu1  ;;  %v12810_v25 = vmax.f32 %v12793_v59, 0.0  ;;  %v12796_v14 = vadd.f32 %v12795_v34, %v12732_v13 }
 0xe17   : > { %v14794_v9 = vpop.f32.mrb[133].mxu1 }
 0xe18   : > { %v14795_v12 = vadd.f32 %v14794_v9, %v14793_v61  ;;  %v12820_v5 = vsel %vm1513_vm1, %v12810_v25, 0.0  ;;  %v12811_v6 = vmax.f32 %v12796_v14, 0.0  ;;  %v14796_v3 = vpop.f32.mrb[134].mxu1 }
 0xe19   : > { %v12821_v8 = vadd.f32 %v12820_v5, %v12819_v39  ;;  %v14797_v49 = vpop.f32.mrb[135].mxu1 }
 0xe1a   : > { %v12737_v10 = vadd.f32 %v14795_v12, %v12673_v20  ;;  %v12822_v35 = vsel %vm1513_vm1, %v12811_v6, 0.0 }
 0xe1b   : > { %v12823_v28 = vadd.f32 %v12822_v35, %v12821_v8 }
 0xe1c   : > { %v12801_v38 = vadd.f32 %v15106_v55, %v12737_v10  ;;  %v12844_v55 = vld [vmem:[%s23266_s15] sm:$0x1] }
 0xe1e   : > { %v12812_v23 = vmax.f32 %v12801_v38, 0.0 }
 0xe20   : > { %v12825_v52 = vsel %vm12824_vm10, %v12812_v23, 0.0 }
 0xe21   : > { %v12826_v24 = vadd.f32 %v12825_v52, %v12823_v28 }
 0xe23   : > { %v12827_v30 = vrot.slane %v12826_v24, 4 }
 0xe25   : > { %v12828_v43 = vadd.f32 %v12827_v30, %v12826_v24 }
 0xe27   : > { %v12829_v57 = vrot.slane %v12828_v43, 2 }
 0xe29   : > { %v12830_v41 = vadd.f32 %v12829_v57, %v12828_v43 }
 0xe2b   : > { %v12831_v51 = vrot.slane %v12830_v41, 1 }
 0xe2d   : > { %v12832_v33 = vadd.f32 %v12831_v51, %v12830_v41 }
 0xe2f   : > { %v12834_v2 = vmul.f32 0.020408163, %v12832_v33 }
 0xe31   : > { %v12835_v17 = vpack.c.bf16 %v12834_v2, %v12834_v2 }
 0xe33   : > { %15117 = vmatmul.mubr.msk.bf16.vlgmr.msra.gmra.mrb[136].mxu1 %vm1513_vm1, %v12835_v17 }
 0xf06   : > { %v12906_v32 = vpop.f32.mrb[136].mxu1 }
 0xf07   : > { %v12907_v60 = vadd.f32 %v12906_v32, %v12844_v55  ;;  %v15118_v54 = vpop.f32.mrb[137].mxu1 }
 0xf08   : > { %v12909_v50 = vpop.f32.mrb[138].mxu1 }
 0xf09   : > { %12912 = vst [vmem:[%s548_s2] sm:$0x1] %v12907_v60  ;;  %v15119_v34 = vpop.f32.mrb[139].mxu1 }
 0xf0a   : > { %16000 = shalt.err (!%p15997_p3)
}
 0xf0b   : > { %s16001_s20 = scalar_lea.hbm %s23209_s24, 16  ;;  %s16005_s2 = scalar_lea.hbm %s23268_s17, 32 }
 0xf0c   : > { %p16002_p4 = scmp.ne.s32.totalorder %s23209_s24, %s16001_s20  ;;  %p16006_p9 = scmp.lt.u32.totalorder %s23209_s24, %s23268_s17 }
 0xf0d   : > { %p16007_p10 = scmp.lt.u32.totalorder %s16005_s2, %s16001_s20  ;;  %p16009_p12 = scmp.lt.u32.totalorder %s16001_s20, %s23209_s24 }
 0xf0e   : > { %p16003_p7 = pnand %p16002_p4, %p16186_p5 }
 0xf0f   : > { %p16008_p11 = por %p16007_p10, %p16006_p9 }
 0xf10   : > { %p16004_p8 = pneg %p16003_p7 }
 0xf11   : > { %p16010_p13 = por %p16009_p12, %p16008_p11 }
 0xf13   : > { %p16011_p0 = pnand %p16010_p13, %p16004_p8 }
 0xf15   : > { %16014 = shalt.err (!%p16011_p0)
}
 0xf16   : > { %15122 = dma.vmem_to_hbm [thread:$0]  (%p16186_p5), %s23211_s23, 16, %s23209_s24, %s12919_s30  }
 0xf17 PF: > { %s23522_s28 = sld [smem:[#allocation5_spill]]  ;;  %p15128_p1 = scmp.ge.s32.totalorder %s16049_s27, 2 }
 0xf19   : > { %p15125_p2 = pnand %p15128_p1, %p16190_p6 }
 0xf1d   : > { %s12954_s0 = sand.u32 1, %s23522_s28  }
 0xf1e   : > { %s12955_s19 = scalar_lea.sflag [#allocation3], %s12954_s0 }
 0xf1f   : > { %16032 = dma.done.wait (!%p15125_p2), %s12955_s19, 16  }
 0xf20   : > { %16034 = vsyncadd (!%p15125_p2), %s12955_s19, 4294967280  ;;  %s23524_s27 = sld [smem:[#allocation7_spill]]  ;;  %s23525_s20 = sld [smem:[#allocation6_spill]] }
 0xf21   : > { %s23526_s26 = sld [smem:[#allocation8_spill]]  ;;  %s23527_s24 = smov %s16041_s25 }
 0xf26   : > { %p28_p3 = scmp.ge.s32.totalorder %s23524_s27, 4   ;;  %s23528_s25 = smov %s23525_s20 }
 0xf28   :  { %30 = sbr.rel (!%p28_p3) target bundleno = 7 (0x7), region = 155 }
 0xf2f   :  { %12959 = vsyncpa [#allocation3], 1 }
 0xf30   :  { %12961 = vsyncpa [#allocation3 + $0x1], 1 }

</bundles_post_ra>
